<compile_context>
chip_gen: v7x
topology: tpu7x:2x2x1
jax: 0.10.0
libtpu: 0.0.40
codegen_flags: <defaults>
</compile_context>

<pallas_src>
import functools

import jax
import jax.numpy as jnp
from jax.experimental import pallas as pl
from jax.experimental.pallas import tpu as pltpu

GROWTH_RATE = 32
BLOCK_CONFIG = (6, 12, 24, 16)          # standard DenseNet-121
NUM_INIT_FEATURES = 64
BN_SIZE = 4
BN_EPS = 1e-5

MXU_TILE = 256          # preferred N/K tile (v6e/v7x MXU is 2x256x256)
M_TILE = 256            # preferred M tile
BN_ROW_TILE = 512       # row tile for the elementwise BN+ReLU kernel
VMEM_LIMIT = 32 * 1024 * 1024   # explicit, safe on v5e/v6e (128 MiB) and v7x (64 MiB)


def _round_up(x, m):
    return (x + m - 1) // m * m


def _divisor_tile(dp, pref, floor):
    """Largest power-of-two tile <= pref that divides dp (dp % floor == 0)."""
    t = pref
    while t > floor and dp % t:
        t //= 2
    return t


# ---------------------------------------------------------------------------
# Pallas kernels
# ---------------------------------------------------------------------------
def _mm_epilogue_kernel(a_ref, b_ref, s_ref, c_ref, o_ref, acc_ref, *, apply_relu):
    """Tiled matmul with f32 accumulator and a fused (scale, bias[, relu])
    epilogue applied on the last K step (folded eval-mode BatchNorm)."""
    @pl.when(pl.program_id(2) == 0)
    def _():
        acc_ref[...] = jnp.zeros_like(acc_ref)

    acc_ref[...] += jnp.dot(a_ref[...], b_ref[...],
                            preferred_element_type=jnp.float32)

    @pl.when(pl.program_id(2) == pl.num_programs(2) - 1)
    def _():
        y = acc_ref[...] * s_ref[...] + c_ref[...]
        if apply_relu:
            y = jnp.maximum(y, 0.0)
        o_ref[...] = y.astype(o_ref.dtype)


def pallas_matmul_fused(a, b_padded, scale_p, bias_p, *, apply_relu,
                        n_valid, out_dtype=jnp.float32):
    """(M, K) @ (Kp, Np) -> (M, n_valid).  a is cast to bf16 for the MXU,
    b_padded is a pre-padded bf16 weight matrix, epilogue = relu(acc*s + b)."""
    M, K = a.shape
    Kp, Np = b_padded.shape
    Mp = _round_up(M, 8)

    a = a.astype(jnp.bfloat16)
    if (Mp, Kp) != (M, K):                      # K pad only for the stem conv
        a = jnp.pad(a, ((0, Mp - M), (0, Kp - K)))

    tm = _divisor_tile(Mp, M_TILE, 8)
    tn = _divisor_tile(Np, MXU_TILE, 128)
    tk = _divisor_tile(Kp, MXU_TILE, 128)

    scale_p = scale_p.reshape(1, Np).astype(jnp.float32)
    bias_p = bias_p.reshape(1, Np).astype(jnp.float32)

    out_isize = jnp.dtype(out_dtype).itemsize
    cost = pl.CostEstimate(
        flops=2 * Mp * Kp * Np,
        transcendentals=0,
        bytes_accessed=Mp * Kp * 2 + Kp * Np * 2 + Mp * Np * out_isize)

    out = pl.pallas_call(
        functools.partial(_mm_epilogue_kernel, apply_relu=apply_relu),
        out_shape=jax.ShapeDtypeStruct((Mp, Np), out_dtype),
        grid_spec=pltpu.PrefetchScalarGridSpec(
            num_scalar_prefetch=0,
            grid=(Mp // tm, Np // tn, Kp // tk),
            in_specs=[pl.BlockSpec((tm, tk), lambda i, j, k: (i, k)),
                      pl.BlockSpec((tk, tn), lambda i, j, k: (k, j)),
                      pl.BlockSpec((1, tn), lambda i, j, k: (0, j)),
                      pl.BlockSpec((1, tn), lambda i, j, k: (0, j))],
            out_specs=pl.BlockSpec((tm, tn), lambda i, j, k: (i, j)),
            scratch_shapes=[pltpu.VMEM((tm, tn), jnp.float32)],
        ),
        compiler_params=pltpu.CompilerParams(
            dimension_semantics=("parallel", "parallel", "arbitrary"),
            vmem_limit_bytes=VMEM_LIMIT),
        cost_estimate=cost,
    )(a, b_padded, scale_p, bias_p)

    if (Mp, Np) != (M, n_valid):
        out = out[:M, :n_valid]
    return out


def _bn_act_kernel(x_ref, s_ref, b_ref, o_ref, *, apply_relu):
    y = x_ref[...] * s_ref[...] + b_ref[...]
    if apply_relu:
        y = jnp.maximum(y, 0.0)
    o_ref[...] = y.astype(o_ref.dtype)


def pallas_bn_act(x2d, scale, bias, *, apply_relu=True, out_dtype=jnp.bfloat16):
    """Eval-mode folded BatchNorm (+ optional ReLU) over the first
    round_up(len(scale), 128) columns of x2d.  The BlockSpec reads that
    lane-aligned channel window directly (no HBM slice copy) and the grid is
    row-tiled so DMA overlaps compute and megacore can split the rows."""
    R, Ctot = x2d.shape
    valid = scale.shape[0]
    Cv = _round_up(valid, 128)
    if Cv > Ctot:                                    # defensive; not hit here
        x2d = jnp.pad(x2d, ((0, 0), (0, Cv - Ctot)))
        Ctot = Cv

    Rp = _round_up(R, 8)
    if Rp != R:
        x2d = jnp.pad(x2d, ((0, Rp - R), (0, 0)))
    tr = _divisor_tile(Rp, BN_ROW_TILE, 8)

    s_p = jnp.pad(scale, (0, Cv - valid)).reshape(1, Cv).astype(jnp.float32)
    b_p = jnp.pad(bias, (0, Cv - valid)).reshape(1, Cv).astype(jnp.float32)

    out = pl.pallas_call(
        functools.partial(_bn_act_kernel, apply_relu=apply_relu),
        out_shape=jax.ShapeDtypeStruct((Rp, Cv), out_dtype),
        grid=(Rp // tr,),
        in_specs=[pl.BlockSpec((tr, Cv), lambda i: (i, 0)),
                  pl.BlockSpec((1, Cv), lambda i: (0, 0)),
                  pl.BlockSpec((1, Cv), lambda i: (0, 0))],
        out_specs=pl.BlockSpec((tr, Cv), lambda i: (i, 0)),
        compiler_params=pltpu.CompilerParams(
            dimension_semantics=("parallel",),
            vmem_limit_bytes=VMEM_LIMIT),
    )(x2d, s_p, b_p)
    return out[:R] if Rp != R else out


def _gap_linear_kernel(x_ref, w_ref, b_ref, o_ref):
    pooled = jnp.mean(x_ref[...].astype(jnp.float32), axis=1)     # (B, C)
    o_ref[...] = (jnp.dot(pooled, w_ref[...],
                          preferred_element_type=jnp.float32) + b_ref[...])


def pallas_gap_linear(x_nhwc, w_padded, b_padded, n_out):
    """adaptive_avg_pool2d((1,1)) + flatten + Linear classifier, fused."""
    B, H, W, C = x_nhwc.shape
    Cp, Op = w_padded.shape
    Bp = _round_up(B, 8)
    x3 = x_nhwc.reshape(B, H * W, C)
    if Bp != B or Cp != C:
        x3 = jnp.pad(x3, ((0, Bp - B), (0, 0), (0, Cp - C)))
    out = pl.pallas_call(
        _gap_linear_kernel,
        out_shape=jax.ShapeDtypeStruct((Bp, Op), jnp.float32),
        grid=(1,),
        in_specs=[pl.BlockSpec((Bp, H * W, Cp), lambda i: (0, 0, 0)),
                  pl.BlockSpec((Cp, Op), lambda i: (0, 0)),
                  pl.BlockSpec((1, Op), lambda i: (0, 0))],
        out_specs=pl.BlockSpec((Bp, Op), lambda i: (0, 0)),
        compiler_params=pltpu.CompilerParams(vmem_limit_bytes=VMEM_LIMIT),
    )(x3, w_padded, b_padded.reshape(1, Op))
    return out[:B, :n_out]


# ---------------------------------------------------------------------------
# Layer wrappers (glue around the Pallas kernels)
# ---------------------------------------------------------------------------
def _im2col_nhwc(x, kh, kw, stride, padding):
    B, H, W, C = x.shape
    xp = jnp.pad(x, ((0, 0), (padding, padding), (padding, padding), (0, 0)))
    OH = (H + 2 * padding - kh) // stride + 1
    OW = (W + 2 * padding - kw) // stride + 1
    cols = []
    for i in range(kh):
        for j in range(kw):
            cols.append(xp[:, i:i + OH * stride:stride,
                           j:j + OW * stride:stride, :])           # (B,OH,OW,C)
    # ordering matches PyTorch weight.reshape(OutC, InC*KH*KW): c*KH*KW + i*KW + j
    patches = jnp.stack(cols, axis=-1)                             # (B,OH,OW,C,KH*KW)
    return patches.reshape(B * OH * OW, C * kh * kw), OH, OW


def conv2d_fused(x_nhwc, w_padded, *, kh, kw, n_out, stride, padding,
                 scale=None, bias=None, apply_relu=False,
                 out_dtype=jnp.float32):
    """Conv (weight pre-packed to a padded (Kp, Np) bf16 matrix) with an
    optional fused folded-BN + ReLU epilogue.  1x1 convs skip im2col."""
    B, H, W, C = x_nhwc.shape
    Kp, Np = w_padded.shape
    if kh == 1 and kw == 1 and stride == 1 and padding == 0:
        cols = x_nhwc.reshape(B * H * W, C)
        OH, OW = H, W
    else:
        cols, OH, OW = _im2col_nhwc(x_nhwc.astype(jnp.bfloat16),
                                    kh, kw, stride, padding)
    if scale is None:
        scale_p = jnp.ones((Np,), jnp.float32)
        bias_p = jnp.zeros((Np,), jnp.float32)
    else:
        scale_p = jnp.pad(scale, (0, Np - n_out))
        bias_p = jnp.pad(bias, (0, Np - n_out))
    out = pallas_matmul_fused(cols, w_padded, scale_p, bias_p,
                              apply_relu=apply_relu, n_valid=n_out,
                              out_dtype=out_dtype)
    return out.reshape(B, OH, OW, n_out)


def maxpool2d_nhwc(x, *, ksize, stride, padding):
    B, H, W, C = x.shape
    xp = jnp.pad(x, ((0, 0), (padding, padding), (padding, padding), (0, 0)),
                 constant_values=-jnp.inf)
    OH = (H + 2 * padding - ksize) // stride + 1
    OW = (W + 2 * padding - ksize) // stride + 1
    out = None
    for i in range(ksize):
        for j in range(ksize):
            sl = xp[:, i:i + OH * stride:stride, j:j + OW * stride:stride, :]
            out = sl if out is None else jnp.maximum(out, sl)
    return out


def avgpool2x2_nhwc(x):
    B, H, W, C = x.shape
    return x.reshape(B, H // 2, 2, W // 2, 2, C).mean(axis=(2, 4))


# ---------------------------------------------------------------------------
# Deterministic parameter initialization (synthetic, no checkpoint load).
# Weights are reshaped / lane-padded / bf16-cast ONCE here.
# ---------------------------------------------------------------------------
def _pack_conv(w):
    """PyTorch (OutC, InC, KH, KW) -> padded (Kp, Np) bf16 matrix."""
    out_c, in_c, kh, kw = w.shape
    K = in_c * kh * kw
    Kp, Np = _round_up(K, 128), _round_up(out_c, 128)
    wmat = w.reshape(out_c, K).T
    return jnp.pad(wmat, ((0, Kp - K), (0, Np - out_c))).astype(jnp.bfloat16)


def init_densenet121_params(key, out_size):
    keys = iter(jax.random.split(key, 4096))

    def nk():
        return next(keys)

    def conv(out_c, in_c, kh, kw):
        fan_in = in_c * kh * kw
        w = (jax.random.normal(nk(), (out_c, in_c, kh, kw), jnp.float32)
             * jnp.sqrt(2.0 / fan_in))
        return _pack_conv(w)

    def bn(c):
        gamma = 1.0 + 0.1 * jax.random.normal(nk(), (c,), jnp.float32)
        beta = 0.05 * jax.random.normal(nk(), (c,), jnp.float32)
        mean = 0.05 * jax.random.normal(nk(), (c,), jnp.float32)
        var = 1.0 + 0.5 * jax.random.uniform(nk(), (c,), jnp.float32)
        scale = gamma * jax.lax.rsqrt(var + BN_EPS)
        return {"scale": scale, "bias": beta - mean * scale}

    params = {"conv0": conv(NUM_INIT_FEATURES, 3, 7, 7),
              "norm0": bn(NUM_INIT_FEATURES)}
    num_features = NUM_INIT_FEATURES
    blocks = []
    for bi, num_layers in enumerate(BLOCK_CONFIG):
        layers = []
        for li in range(num_layers):
            in_f = num_features + li * GROWTH_RATE
            layers.append({
                "norm1": bn(in_f),
                "conv1": conv(BN_SIZE * GROWTH_RATE, in_f, 1, 1),
                "norm2": bn(BN_SIZE * GROWTH_RATE),
                "conv2": conv(GROWTH_RATE, BN_SIZE * GROWTH_RATE, 3, 3),
            })
        num_features += num_layers * GROWTH_RATE
        block = {"layers": layers}
        if bi != len(BLOCK_CONFIG) - 1:
            block["trans_norm"] = bn(num_features)
            block["trans_conv"] = conv(num_features // 2, num_features, 1, 1)
            num_features //= 2
        blocks.append(block)
    params["blocks"] = blocks
    params["norm5"] = bn(num_features)                    # 1024 features

    limit = 1.0 / jnp.sqrt(jnp.float32(num_features))
    w = jax.random.uniform(nk(), (num_features, out_size), jnp.float32,
                           -limit, limit)
    b = jax.random.uniform(nk(), (out_size,), jnp.float32, -limit, limit)
    Op = _round_up(out_size, 128)
    params["classifier_w"] = jnp.pad(w, ((0, 0), (0, Op - out_size)))
    params["classifier_b"] = jnp.pad(b, (0, Op - out_size))
    return params


# ---------------------------------------------------------------------------
# Forward pass (semantics of DenseNet121.forward in the PyTorch module)
# ---------------------------------------------------------------------------
@functools.partial(jax.jit, static_argnames=("out_size",))
def densenet121_forward(params, x_nchw, *, out_size):
    x = jnp.transpose(x_nchw.astype(jnp.float32), (0, 2, 3, 1))   # NCHW -> NHWC

    # stem: conv0 + folded norm0 + relu0 fused in the matmul epilogue, pool0
    x = conv2d_fused(x, params["conv0"], kh=7, kw=7,
                     n_out=NUM_INIT_FEATURES, stride=2, padding=3,
                     scale=params["norm0"]["scale"],
                     bias=params["norm0"]["bias"],
                     apply_relu=True, out_dtype=jnp.float32)
    x = maxpool2d_nhwc(x, ksize=3, stride=2, padding=1)

    # dense blocks + transitions
    num_features = NUM_INIT_FEATURES
    for bi, block in enumerate(params["blocks"]):
        n_layers = len(block["layers"])
        c_final = num_features + n_layers * GROWTH_RATE
        B, H, W, _ = x.shape
        # Pre-allocated dense-block feature buffer replaces per-layer concat.
        # Channels past the currently-valid count remain zero, so lane-padded
        # reads of the first round_up(valid, 128) channels are exact.
        buf = jnp.zeros((B, H, W, c_final), jnp.float32)
        buf = buf.at[..., :num_features].set(x.astype(jnp.float32))

        for li, layer in enumerate(block["layers"]):
            valid = num_features + li * GROWTH_RATE
            buf2 = buf.reshape(B * H * W, c_final)
            # norm1 + relu1 over the live channel window (bf16 for the MXU)
            y = pallas_bn_act(buf2, layer["norm1"]["scale"],
                              layer["norm1"]["bias"],
                              apply_relu=True, out_dtype=jnp.bfloat16)
            y = y.reshape(B, H, W, -1)
            # conv1 (1x1) with norm2 + relu2 fused into the epilogue
            y = conv2d_fused(y, layer["conv1"], kh=1, kw=1,
                             n_out=BN_SIZE * GROWTH_RATE, stride=1, padding=0,
                             scale=layer["norm2"]["scale"],
                             bias=layer["norm2"]["bias"],
                             apply_relu=True, out_dtype=jnp.bfloat16)
            # conv2 (3x3); its 32 new channels go straight into the buffer
            y = conv2d_fused(y, layer["conv2"], kh=3, kw=3,
                             n_out=GROWTH_RATE, stride=1, padding=1,
                             out_dtype=jnp.float32)
            buf = buf.at[..., valid:valid + GROWTH_RATE].set(y)

        num_features = c_final
        x = buf
        if "trans_conv" in block:
            y = pallas_bn_act(x.reshape(B * H * W, c_final),
                              block["trans_norm"]["scale"],
                              block["trans_norm"]["bias"],
                              apply_relu=True, out_dtype=jnp.bfloat16)
            y = y.reshape(B, H, W, -1)
            y = conv2d_fused(y, block["trans_conv"], kh=1, kw=1,
                             n_out=c_final // 2, stride=1, padding=0,
                             out_dtype=jnp.float32)
            x = avgpool2x2_nhwc(y)
            num_features = c_final // 2

    # features end with norm5; the module applies F.relu afterwards -> fused.
    B, H, W, C = x.shape
    y = pallas_bn_act(x.reshape(B * H * W, C), params["norm5"]["scale"],
                      params["norm5"]["bias"],
                      apply_relu=True, out_dtype=jnp.float32)
    y = y.reshape(B, H, W, C)

    # adaptive_avg_pool2d((1,1)) + flatten + Linear classifier (fused kernel)
    return pallas_gap_linear(y, params["classifier_w"],
                             params["classifier_b"], out_size)


if __name__ == "__main__":
    OUT_SIZE = 14
    key = jax.random.PRNGKey(0)
    pkey, xkey = jax.random.split(key)
    params = init_densenet121_params(pkey, OUT_SIZE)
    # small NCHW input consistent with the module (3-channel image)
    x = jax.random.normal(xkey, (2, 3, 32, 32), jnp.float32)

    out = densenet121_forward(params, x, out_size=OUT_SIZE)
    out = jax.block_until_ready(out)
    assert out.shape == (2, OUT_SIZE), out.shape
    assert out.dtype == jnp.float32
    assert bool(jnp.all(jnp.isfinite(out)))
    print("KERNEL_OK")
</pallas_src>

<mosaic_0001>
module attributes {stable_mosaic.version = 11 : i64} {
  func.func @_mm_epilogue_kernel(%arg0: i32, %arg1: i32, %arg2: i32, %arg3: memref<256x256xbf16, #tpu.memory_space<vmem>>, %arg4: memref<256x128xbf16, #tpu.memory_space<vmem>>, %arg5: memref<1x128xf32, #tpu.memory_space<vmem>>, %arg6: memref<1x128xf32, #tpu.memory_space<vmem>>, %arg7: memref<256x128xf32, #tpu.memory_space<vmem>>, %arg8: memref<256x128xf32, #tpu.memory_space<vmem>>) attributes {dimension_semantics = [#tpu.dimension_semantics<parallel>, #tpu.dimension_semantics<parallel>, #tpu.dimension_semantics<arbitrary>], iteration_bounds = array<i64: 2, 1, 1>, scalar_prefetch = 0 : i64, scratch_operands = 1 : i64, tpu.core_type = #tpu.core_type<tc>, window_params = [{transform_indices = @transform_0, window_bounds = array<i64: 256, 256>}, {transform_indices = @transform_1, window_bounds = array<i64: 256, 128>}, {transform_indices = @transform_2, window_bounds = array<i64: 1, 128>}, {transform_indices = @transform_3, window_bounds = array<i64: 1, 128>}, {transform_indices = @transform_4, window_bounds = array<i64: 256, 128>}]} {
    %c0_i32 = arith.constant 0 : i32
    %0 = arith.cmpi eq, %arg2, %c0_i32 : i32
    %1 = arith.extui %0 : i1 to i32
    %c0_i32_0 = arith.constant 0 : i32
    %2 = arith.cmpi ne, %1, %c0_i32_0 : i32
    scf.if %2 {
      %cst_10 = arith.constant 0.000000e+00 : f32
      %12 = vector.broadcast %cst_10 : f32 to vector<256x128xf32>
      %c0_11 = arith.constant 0 : index
      %c0_12 = arith.constant 0 : index
      %13 = vector.load %arg8[%c0_11, %c0_12] : memref<256x128xf32, #tpu.memory_space<vmem>>, vector<256x128xf32>
      tpu.vector_store %arg8[%c0_11, %c0_12], %12 {strides = array<i32>} : memref<256x128xf32, #tpu.memory_space<vmem>>, vector<256x128xf32>,
    } else {
    }
    %c0 = arith.constant 0 : index
    %c0_1 = arith.constant 0 : index
    %3 = vector.load %arg8[%c0, %c0_1] : memref<256x128xf32, #tpu.memory_space<vmem>>, vector<256x128xf32>
    %c0_2 = arith.constant 0 : index
    %c0_3 = arith.constant 0 : index
    %4 = vector.load %arg3[%c0_2, %c0_3] : memref<256x256xbf16, #tpu.memory_space<vmem>>, vector<256x256xbf16>
    %c0_4 = arith.constant 0 : index
    %c0_5 = arith.constant 0 : index
    %5 = vector.load %arg4[%c0_4, %c0_5] : memref<256x128xbf16, #tpu.memory_space<vmem>>, vector<256x128xbf16>
    %cst = arith.constant dense<0.000000e+00> : vector<256x128xf32>
    %6 = tpu.matmul %4, %5, %cst {dimension_numbers = #tpu.dot_dimension_numbers<[1], [0], [0], [1], [0, 0, 1, 1], [], []>} : vector<256x256xbf16>, vector<256x128xbf16>, vector<256x128xf32> -> vector<256x128xf32>
    %7 = arith.addf %3, %6 : vector<256x128xf32>
    %c0_6 = arith.constant 0 : index
    %c0_7 = arith.constant 0 : index
    %8 = vector.load %arg8[%c0_6, %c0_7] : memref<256x128xf32, #tpu.memory_space<vmem>>, vector<256x128xf32>
    tpu.vector_store %arg8[%c0_6, %c0_7], %7 {strides = array<i32>} : memref<256x128xf32, #tpu.memory_space<vmem>>, vector<256x128xf32>,
    %c0_i32_8 = arith.constant 0 : i32
    %9 = arith.cmpi eq, %arg2, %c0_i32_8 : i32
    %10 = arith.extui %9 : i1 to i32
    %c0_i32_9 = arith.constant 0 : i32
    %11 = arith.cmpi ne, %10, %c0_i32_9 : i32
    scf.if %11 {
      %c0_10 = arith.constant 0 : index
      %c0_11 = arith.constant 0 : index
      %12 = vector.load %arg8[%c0_10, %c0_11] : memref<256x128xf32, #tpu.memory_space<vmem>>, vector<256x128xf32>
      %c0_12 = arith.constant 0 : index
      %c0_13 = arith.constant 0 : index
      %13 = vector.load %arg5[%c0_12, %c0_13] : memref<1x128xf32, #tpu.memory_space<vmem>>, vector<1x128xf32>
      %14 = vector.broadcast %13 : vector<1x128xf32> to vector<256x128xf32>
      %15 = arith.mulf %12, %14 : vector<256x128xf32>
      %c0_14 = arith.constant 0 : index
      %c0_15 = arith.constant 0 : index
      %16 = vector.load %arg6[%c0_14, %c0_15] : memref<1x128xf32, #tpu.memory_space<vmem>>, vector<1x128xf32>
      %17 = vector.broadcast %16 : vector<1x128xf32> to vector<256x128xf32>
      %18 = arith.addf %15, %17 : vector<256x128xf32>
      %cst_16 = arith.constant 0.000000e+00 : f32
      %19 = vector.broadcast %cst_16 : f32 to vector<256x128xf32>
      %20 = arith.maximumf %18, %19 : vector<256x128xf32>
      %c0_17 = arith.constant 0 : index
      %c0_18 = arith.constant 0 : index
      %21 = vector.load %arg7[%c0_17, %c0_18] : memref<256x128xf32, #tpu.memory_space<vmem>>, vector<256x128xf32>
      tpu.vector_store %arg7[%c0_17, %c0_18], %20 {strides = array<i32>} : memref<256x128xf32, #tpu.memory_space<vmem>>, vector<256x128xf32>,
    } else {
    }
    return
  }
  func.func @transform_0(%arg0: i32, %arg1: i32, %arg2: i32) -> (i32, i32) {
    %c0_i32 = arith.constant 0 : i32
    return %arg0, %arg2 : i32, i32
  }
  func.func @transform_1(%arg0: i32, %arg1: i32, %arg2: i32) -> (i32, i32) {
    %c0_i32 = arith.constant 0 : i32
    return %arg2, %arg1 : i32, i32
  }
  func.func @transform_2(%arg0: i32, %arg1: i32, %arg2: i32) -> (i32, i32) {
    %c0_i32 = arith.constant 0 : i32
    %c0_i32_0 = arith.constant 0 : i32
    return %c0_i32, %arg1 : i32, i32
  }
  func.func @transform_3(%arg0: i32, %arg1: i32, %arg2: i32) -> (i32, i32) {
    %c0_i32 = arith.constant 0 : i32
    %c0_i32_0 = arith.constant 0 : i32
    return %c0_i32, %arg1 : i32, i32
  }
  func.func @transform_4(%arg0: i32, %arg1: i32, %arg2: i32) -> (i32, i32) {
    %c0_i32 = arith.constant 0 : i32
    return %arg0, %arg1 : i32, i32
  }
}

module attributes {stable_mosaic.version = 11 : i64} {
  func.func @_mm_epilogue_kernel(%arg0: i32, %arg1: i32, %arg2: i32, %arg3: memref<128x128xbf16, #tpu.memory_space<vmem>>, %arg4: memref<128x128xbf16, #tpu.memory_space<vmem>>, %arg5: memref<1x128xf32, #tpu.memory_space<vmem>>, %arg6: memref<1x128xf32, #tpu.memory_space<vmem>>, %arg7: memref<128x128xbf16, #tpu.memory_space<vmem>>, %arg8: memref<128x128xf32, #tpu.memory_space<vmem>>) attributes {dimension_semantics = [#tpu.dimension_semantics<parallel>, #tpu.dimension_semantics<parallel>, #tpu.dimension_semantics<arbitrary>], iteration_bounds = array<i64: 1, 1, 1>, scalar_prefetch = 0 : i64, scratch_operands = 1 : i64, tpu.core_type = #tpu.core_type<tc>, window_params = [{transform_indices = @transform_0, window_bounds = array<i64: 128, 128>}, {transform_indices = @transform_1, window_bounds = array<i64: 128, 128>}, {transform_indices = @transform_2, window_bounds = array<i64: 1, 128>}, {transform_indices = @transform_3, window_bounds = array<i64: 1, 128>}, {transform_indices = @transform_4, window_bounds = array<i64: 128, 128>}]} {
    %c0_i32 = arith.constant 0 : i32
    %0 = arith.cmpi eq, %arg2, %c0_i32 : i32
    %1 = arith.extui %0 : i1 to i32
    %c0_i32_0 = arith.constant 0 : i32
    %2 = arith.cmpi ne, %1, %c0_i32_0 : i32
    scf.if %2 {
      %cst_10 = arith.constant 0.000000e+00 : f32
      %12 = vector.broadcast %cst_10 : f32 to vector<128x128xf32>
      %c0_11 = arith.constant 0 : index
      %c0_12 = arith.constant 0 : index
      %13 = vector.load %arg8[%c0_11, %c0_12] : memref<128x128xf32, #tpu.memory_space<vmem>>, vector<128x128xf32>
      tpu.vector_store %arg8[%c0_11, %c0_12], %12 {strides = array<i32>} : memref<128x128xf32, #tpu.memory_space<vmem>>, vector<128x128xf32>,
    } else {
    }
    %c0 = arith.constant 0 : index
    %c0_1 = arith.constant 0 : index
    %3 = vector.load %arg8[%c0, %c0_1] : memref<128x128xf32, #tpu.memory_space<vmem>>, vector<128x128xf32>
    %c0_2 = arith.constant 0 : index
    %c0_3 = arith.constant 0 : index
    %4 = vector.load %arg3[%c0_2, %c0_3] : memref<128x128xbf16, #tpu.memory_space<vmem>>, vector<128x128xbf16>
    %c0_4 = arith.constant 0 : index
    %c0_5 = arith.constant 0 : index
    %5 = vector.load %arg4[%c0_4, %c0_5] : memref<128x128xbf16, #tpu.memory_space<vmem>>, vector<128x128xbf16>
    %cst = arith.constant dense<0.000000e+00> : vector<128x128xf32>
    %6 = tpu.matmul %4, %5, %cst {dimension_numbers = #tpu.dot_dimension_numbers<[1], [0], [0], [1], [0, 0, 1, 1], [], []>} : vector<128x128xbf16>, vector<128x128xbf16>, vector<128x128xf32> -> vector<128x128xf32>
    %7 = arith.addf %3, %6 : vector<128x128xf32>
    %c0_6 = arith.constant 0 : index
    %c0_7 = arith.constant 0 : index
    %8 = vector.load %arg8[%c0_6, %c0_7] : memref<128x128xf32, #tpu.memory_space<vmem>>, vector<128x128xf32>
    tpu.vector_store %arg8[%c0_6, %c0_7], %7 {strides = array<i32>} : memref<128x128xf32, #tpu.memory_space<vmem>>, vector<128x128xf32>,
    %c0_i32_8 = arith.constant 0 : i32
    %9 = arith.cmpi eq, %arg2, %c0_i32_8 : i32
    %10 = arith.extui %9 : i1 to i32
    %c0_i32_9 = arith.constant 0 : i32
    %11 = arith.cmpi ne, %10, %c0_i32_9 : i32
    scf.if %11 {
      %c0_10 = arith.constant 0 : index
      %c0_11 = arith.constant 0 : index
      %12 = vector.load %arg8[%c0_10, %c0_11] : memref<128x128xf32, #tpu.memory_space<vmem>>, vector<128x128xf32>
      %c0_12 = arith.constant 0 : index
      %c0_13 = arith.constant 0 : index
      %13 = vector.load %arg5[%c0_12, %c0_13] : memref<1x128xf32, #tpu.memory_space<vmem>>, vector<1x128xf32>
      %14 = vector.broadcast %13 : vector<1x128xf32> to vector<128x128xf32>
      %15 = arith.mulf %12, %14 : vector<128x128xf32>
      %c0_14 = arith.constant 0 : index
      %c0_15 = arith.constant 0 : index
      %16 = vector.load %arg6[%c0_14, %c0_15] : memref<1x128xf32, #tpu.memory_space<vmem>>, vector<1x128xf32>
      %17 = vector.broadcast %16 : vector<1x128xf32> to vector<128x128xf32>
      %18 = arith.addf %15, %17 : vector<128x128xf32>
      %cst_16 = arith.constant 0.000000e+00 : f32
      %19 = vector.broadcast %cst_16 : f32 to vector<128x128xf32>
      %20 = arith.maximumf %18, %19 : vector<128x128xf32>
      %21 = arith.truncf %20 : vector<128x128xf32> to vector<128x128xbf16>
      %c0_17 = arith.constant 0 : index
      %c0_18 = arith.constant 0 : index
      %22 = vector.load %arg7[%c0_17, %c0_18] : memref<128x128xbf16, #tpu.memory_space<vmem>>, vector<128x128xbf16>
      tpu.vector_store %arg7[%c0_17, %c0_18], %21 {strides = array<i32>} : memref<128x128xbf16, #tpu.memory_space<vmem>>, vector<128x128xbf16>,
    } else {
    }
    return
  }
  func.func @transform_0(%arg0: i32, %arg1: i32, %arg2: i32) -> (i32, i32) {
    %c0_i32 = arith.constant 0 : i32
    return %arg0, %arg2 : i32, i32
  }
  func.func @transform_1(%arg0: i32, %arg1: i32, %arg2: i32) -> (i32, i32) {
    %c0_i32 = arith.constant 0 : i32
    return %arg2, %arg1 : i32, i32
  }
  func.func @transform_2(%arg0: i32, %arg1: i32, %arg2: i32) -> (i32, i32) {
    %c0_i32 = arith.constant 0 : i32
    %c0_i32_0 = arith.constant 0 : i32
    return %c0_i32, %arg1 : i32, i32
  }
  func.func @transform_3(%arg0: i32, %arg1: i32, %arg2: i32) -> (i32, i32) {
    %c0_i32 = arith.constant 0 : i32
    %c0_i32_0 = arith.constant 0 : i32
    return %c0_i32, %arg1 : i32, i32
  }
  func.func @transform_4(%arg0: i32, %arg1: i32, %arg2: i32) -> (i32, i32) {
    %c0_i32 = arith.constant 0 : i32
    return %arg0, %arg1 : i32, i32
  }
}

module attributes {stable_mosaic.version = 11 : i64} {
  func.func @_bn_act_kernel(%arg0: i32, %arg1: memref<128x128xf32, #tpu.memory_space<vmem>>, %arg2: memref<1x128xf32, #tpu.memory_space<vmem>>, %arg3: memref<1x128xf32, #tpu.memory_space<vmem>>, %arg4: memref<128x128xbf16, #tpu.memory_space<vmem>>) attributes {dimension_semantics = [#tpu.dimension_semantics<parallel>], iteration_bounds = array<i64: 1>, scalar_prefetch = 0 : i64, scratch_operands = 0 : i64, tpu.core_type = #tpu.core_type<tc>, window_params = [{transform_indices = @transform_0, window_bounds = array<i64: 128, 128>}, {pipeline_mode = #tpu.pipeline_mode<synchronous>, transform_indices = @transform_1, window_bounds = array<i64: 1, 128>}, {pipeline_mode = #tpu.pipeline_mode<synchronous>, transform_indices = @transform_2, window_bounds = array<i64: 1, 128>}, {transform_indices = @transform_3, window_bounds = array<i64: 128, 128>}]} {
    %c0 = arith.constant 0 : index
    %c0_0 = arith.constant 0 : index
    %0 = vector.load %arg1[%c0, %c0_0] : memref<128x128xf32, #tpu.memory_space<vmem>>, vector<128x128xf32>
    %c0_1 = arith.constant 0 : index
    %c0_2 = arith.constant 0 : index
    %1 = vector.load %arg2[%c0_1, %c0_2] : memref<1x128xf32, #tpu.memory_space<vmem>>, vector<1x128xf32>
    %2 = vector.broadcast %1 : vector<1x128xf32> to vector<128x128xf32>
    %3 = arith.mulf %0, %2 : vector<128x128xf32>
    %c0_3 = arith.constant 0 : index
    %c0_4 = arith.constant 0 : index
    %4 = vector.load %arg3[%c0_3, %c0_4] : memref<1x128xf32, #tpu.memory_space<vmem>>, vector<1x128xf32>
    %5 = vector.broadcast %4 : vector<1x128xf32> to vector<128x128xf32>
    %6 = arith.addf %3, %5 : vector<128x128xf32>
    %cst = arith.constant 0.000000e+00 : f32
    %7 = vector.broadcast %cst : f32 to vector<128x128xf32>
    %8 = arith.maximumf %6, %7 : vector<128x128xf32>
    %9 = arith.truncf %8 : vector<128x128xf32> to vector<128x128xbf16>
    %c0_5 = arith.constant 0 : index
    %c0_6 = arith.constant 0 : index
    %10 = vector.load %arg4[%c0_5, %c0_6] : memref<128x128xbf16, #tpu.memory_space<vmem>>, vector<128x128xbf16>
    tpu.vector_store %arg4[%c0_5, %c0_6], %9 {strides = array<i32>} : memref<128x128xbf16, #tpu.memory_space<vmem>>, vector<128x128xbf16>,
    return
  }
  func.func @transform_0(%arg0: i32) -> (i32, i32) {
    %c0_i32 = arith.constant 0 : i32
    %c0_i32_0 = arith.constant 0 : i32
    return %arg0, %c0_i32 : i32, i32
  }
  func.func @transform_1(%arg0: i32) -> (i32, i32) {
    %c0_i32 = arith.constant 0 : i32
    %c0_i32_0 = arith.constant 0 : i32
    %c0_i32_1 = arith.constant 0 : i32
    return %c0_i32, %c0_i32_0 : i32, i32
  }
  func.func @transform_2(%arg0: i32) -> (i32, i32) {
    %c0_i32 = arith.constant 0 : i32
    %c0_i32_0 = arith.constant 0 : i32
    %c0_i32_1 = arith.constant 0 : i32
    return %c0_i32, %c0_i32_0 : i32, i32
  }
  func.func @transform_3(%arg0: i32) -> (i32, i32) {
    %c0_i32 = arith.constant 0 : i32
    %c0_i32_0 = arith.constant 0 : i32
    return %arg0, %c0_i32 : i32, i32
  }
}

module attributes {stable_mosaic.version = 11 : i64} {
  func.func @_mm_epilogue_kernel(%arg0: i32, %arg1: i32, %arg2: i32, %arg3: memref<128x128xbf16, #tpu.memory_space<vmem>>, %arg4: memref<128x128xbf16, #tpu.memory_space<vmem>>, %arg5: memref<1x128xf32, #tpu.memory_space<vmem>>, %arg6: memref<1x128xf32, #tpu.memory_space<vmem>>, %arg7: memref<128x128xf32, #tpu.memory_space<vmem>>, %arg8: memref<128x128xf32, #tpu.memory_space<vmem>>) attributes {dimension_semantics = [#tpu.dimension_semantics<parallel>, #tpu.dimension_semantics<parallel>, #tpu.dimension_semantics<arbitrary>], iteration_bounds = array<i64: 1, 1, 9>, scalar_prefetch = 0 : i64, scratch_operands = 1 : i64, tpu.core_type = #tpu.core_type<tc>, window_params = [{transform_indices = @transform_0, window_bounds = array<i64: 128, 128>}, {transform_indices = @transform_1, window_bounds = array<i64: 128, 128>}, {transform_indices = @transform_2, window_bounds = array<i64: 1, 128>}, {transform_indices = @transform_3, window_bounds = array<i64: 1, 128>}, {transform_indices = @transform_4, window_bounds = array<i64: 128, 128>}]} {
    %c0_i32 = arith.constant 0 : i32
    %0 = arith.cmpi eq, %arg2, %c0_i32 : i32
    %1 = arith.extui %0 : i1 to i32
    %c0_i32_0 = arith.constant 0 : i32
    %2 = arith.cmpi ne, %1, %c0_i32_0 : i32
    scf.if %2 {
      %cst_9 = arith.constant 0.000000e+00 : f32
      %12 = vector.broadcast %cst_9 : f32 to vector<128x128xf32>
      %c0_10 = arith.constant 0 : index
      %c0_11 = arith.constant 0 : index
      %13 = vector.load %arg8[%c0_10, %c0_11] : memref<128x128xf32, #tpu.memory_space<vmem>>, vector<128x128xf32>
      tpu.vector_store %arg8[%c0_10, %c0_11], %12 {strides = array<i32>} : memref<128x128xf32, #tpu.memory_space<vmem>>, vector<128x128xf32>,
    } else {
    }
    %c0 = arith.constant 0 : index
    %c0_1 = arith.constant 0 : index
    %3 = vector.load %arg8[%c0, %c0_1] : memref<128x128xf32, #tpu.memory_space<vmem>>, vector<128x128xf32>
    %c0_2 = arith.constant 0 : index
    %c0_3 = arith.constant 0 : index
    %4 = vector.load %arg3[%c0_2, %c0_3] : memref<128x128xbf16, #tpu.memory_space<vmem>>, vector<128x128xbf16>
    %c0_4 = arith.constant 0 : index
    %c0_5 = arith.constant 0 : index
    %5 = vector.load %arg4[%c0_4, %c0_5] : memref<128x128xbf16, #tpu.memory_space<vmem>>, vector<128x128xbf16>
    %cst = arith.constant dense<0.000000e+00> : vector<128x128xf32>
    %6 = tpu.matmul %4, %5, %cst {dimension_numbers = #tpu.dot_dimension_numbers<[1], [0], [0], [1], [0, 0, 1, 1], [], []>} : vector<128x128xbf16>, vector<128x128xbf16>, vector<128x128xf32> -> vector<128x128xf32>
    %7 = arith.addf %3, %6 : vector<128x128xf32>
    %c0_6 = arith.constant 0 : index
    %c0_7 = arith.constant 0 : index
    %8 = vector.load %arg8[%c0_6, %c0_7] : memref<128x128xf32, #tpu.memory_space<vmem>>, vector<128x128xf32>
    tpu.vector_store %arg8[%c0_6, %c0_7], %7 {strides = array<i32>} : memref<128x128xf32, #tpu.memory_space<vmem>>, vector<128x128xf32>,
    %c8_i32 = arith.constant 8 : i32
    %9 = arith.cmpi eq, %arg2, %c8_i32 : i32
    %10 = arith.extui %9 : i1 to i32
    %c0_i32_8 = arith.constant 0 : i32
    %11 = arith.cmpi ne, %10, %c0_i32_8 : i32
    scf.if %11 {
      %c0_9 = arith.constant 0 : index
      %c0_10 = arith.constant 0 : index
      %12 = vector.load %arg8[%c0_9, %c0_10] : memref<128x128xf32, #tpu.memory_space<vmem>>, vector<128x128xf32>
      %c0_11 = arith.constant 0 : index
      %c0_12 = arith.constant 0 : index
      %13 = vector.load %arg5[%c0_11, %c0_12] : memref<1x128xf32, #tpu.memory_space<vmem>>, vector<1x128xf32>
      %14 = vector.broadcast %13 : vector<1x128xf32> to vector<128x128xf32>
      %15 = arith.mulf %12, %14 : vector<128x128xf32>
      %c0_13 = arith.constant 0 : index
      %c0_14 = arith.constant 0 : index
      %16 = vector.load %arg6[%c0_13, %c0_14] : memref<1x128xf32, #tpu.memory_space<vmem>>, vector<1x128xf32>
      %17 = vector.broadcast %16 : vector<1x128xf32> to vector<128x128xf32>
      %18 = arith.addf %15, %17 : vector<128x128xf32>
      %c0_15 = arith.constant 0 : index
      %c0_16 = arith.constant 0 : index
      %19 = vector.load %arg7[%c0_15, %c0_16] : memref<128x128xf32, #tpu.memory_space<vmem>>, vector<128x128xf32>
      tpu.vector_store %arg7[%c0_15, %c0_16], %18 {strides = array<i32>} : memref<128x128xf32, #tpu.memory_space<vmem>>, vector<128x128xf32>,
    } else {
    }
    return
  }
  func.func @transform_0(%arg0: i32, %arg1: i32, %arg2: i32) -> (i32, i32) {
    %c0_i32 = arith.constant 0 : i32
    return %arg0, %arg2 : i32, i32
  }
  func.func @transform_1(%arg0: i32, %arg1: i32, %arg2: i32) -> (i32, i32) {
    %c0_i32 = arith.constant 0 : i32
    return %arg2, %arg1 : i32, i32
  }
  func.func @transform_2(%arg0: i32, %arg1: i32, %arg2: i32) -> (i32, i32) {
    %c0_i32 = arith.constant 0 : i32
    %c0_i32_0 = arith.constant 0 : i32
    return %c0_i32, %arg1 : i32, i32
  }
  func.func @transform_3(%arg0: i32, %arg1: i32, %arg2: i32) -> (i32, i32) {
    %c0_i32 = arith.constant 0 : i32
    %c0_i32_0 = arith.constant 0 : i32
    return %c0_i32, %arg1 : i32, i32
  }
  func.func @transform_4(%arg0: i32, %arg1: i32, %arg2: i32) -> (i32, i32) {
    %c0_i32 = arith.constant 0 : i32
    return %arg0, %arg1 : i32, i32
  }
}

module attributes {stable_mosaic.version = 11 : i64} {
  func.func @_bn_act_kernel(%arg0: i32, %arg1: memref<128x256xf32, #tpu.memory_space<vmem>>, %arg2: memref<1x256xf32, #tpu.memory_space<vmem>>, %arg3: memref<1x256xf32, #tpu.memory_space<vmem>>, %arg4: memref<128x256xbf16, #tpu.memory_space<vmem>>) attributes {dimension_semantics = [#tpu.dimension_semantics<parallel>], iteration_bounds = array<i64: 1>, scalar_prefetch = 0 : i64, scratch_operands = 0 : i64, tpu.core_type = #tpu.core_type<tc>, window_params = [{transform_indices = @transform_0, window_bounds = array<i64: 128, 256>}, {pipeline_mode = #tpu.pipeline_mode<synchronous>, transform_indices = @transform_1, window_bounds = array<i64: 1, 256>}, {pipeline_mode = #tpu.pipeline_mode<synchronous>, transform_indices = @transform_2, window_bounds = array<i64: 1, 256>}, {transform_indices = @transform_3, window_bounds = array<i64: 128, 256>}]} {
    %c0 = arith.constant 0 : index
    %c0_0 = arith.constant 0 : index
    %0 = vector.load %arg1[%c0, %c0_0] : memref<128x256xf32, #tpu.memory_space<vmem>>, vector<128x256xf32>
    %c0_1 = arith.constant 0 : index
    %c0_2 = arith.constant 0 : index
    %1 = vector.load %arg2[%c0_1, %c0_2] : memref<1x256xf32, #tpu.memory_space<vmem>>, vector<1x256xf32>
    %2 = vector.broadcast %1 : vector<1x256xf32> to vector<128x256xf32>
    %3 = arith.mulf %0, %2 : vector<128x256xf32>
    %c0_3 = arith.constant 0 : index
    %c0_4 = arith.constant 0 : index
    %4 = vector.load %arg3[%c0_3, %c0_4] : memref<1x256xf32, #tpu.memory_space<vmem>>, vector<1x256xf32>
    %5 = vector.broadcast %4 : vector<1x256xf32> to vector<128x256xf32>
    %6 = arith.addf %3, %5 : vector<128x256xf32>
    %cst = arith.constant 0.000000e+00 : f32
    %7 = vector.broadcast %cst : f32 to vector<128x256xf32>
    %8 = arith.maximumf %6, %7 : vector<128x256xf32>
    %9 = arith.truncf %8 : vector<128x256xf32> to vector<128x256xbf16>
    %c0_5 = arith.constant 0 : index
    %c0_6 = arith.constant 0 : index
    %10 = vector.load %arg4[%c0_5, %c0_6] : memref<128x256xbf16, #tpu.memory_space<vmem>>, vector<128x256xbf16>
    tpu.vector_store %arg4[%c0_5, %c0_6], %9 {strides = array<i32>} : memref<128x256xbf16, #tpu.memory_space<vmem>>, vector<128x256xbf16>,
    return
  }
  func.func @transform_0(%arg0: i32) -> (i32, i32) {
    %c0_i32 = arith.constant 0 : i32
    %c0_i32_0 = arith.constant 0 : i32
    return %arg0, %c0_i32 : i32, i32
  }
  func.func @transform_1(%arg0: i32) -> (i32, i32) {
    %c0_i32 = arith.constant 0 : i32
    %c0_i32_0 = arith.constant 0 : i32
    %c0_i32_1 = arith.constant 0 : i32
    return %c0_i32, %c0_i32_0 : i32, i32
  }
  func.func @transform_2(%arg0: i32) -> (i32, i32) {
    %c0_i32 = arith.constant 0 : i32
    %c0_i32_0 = arith.constant 0 : i32
    %c0_i32_1 = arith.constant 0 : i32
    return %c0_i32, %c0_i32_0 : i32, i32
  }
  func.func @transform_3(%arg0: i32) -> (i32, i32) {
    %c0_i32 = arith.constant 0 : i32
    %c0_i32_0 = arith.constant 0 : i32
    return %arg0, %c0_i32 : i32, i32
  }
}

module attributes {stable_mosaic.version = 11 : i64} {
  func.func @_mm_epilogue_kernel(%arg0: i32, %arg1: i32, %arg2: i32, %arg3: memref<128x256xbf16, #tpu.memory_space<vmem>>, %arg4: memref<256x128xbf16, #tpu.memory_space<vmem>>, %arg5: memref<1x128xf32, #tpu.memory_space<vmem>>, %arg6: memref<1x128xf32, #tpu.memory_space<vmem>>, %arg7: memref<128x128xbf16, #tpu.memory_space<vmem>>, %arg8: memref<128x128xf32, #tpu.memory_space<vmem>>) attributes {dimension_semantics = [#tpu.dimension_semantics<parallel>, #tpu.dimension_semantics<parallel>, #tpu.dimension_semantics<arbitrary>], iteration_bounds = array<i64: 1, 1, 1>, scalar_prefetch = 0 : i64, scratch_operands = 1 : i64, tpu.core_type = #tpu.core_type<tc>, window_params = [{transform_indices = @transform_0, window_bounds = array<i64: 128, 256>}, {transform_indices = @transform_1, window_bounds = array<i64: 256, 128>}, {transform_indices = @transform_2, window_bounds = array<i64: 1, 128>}, {transform_indices = @transform_3, window_bounds = array<i64: 1, 128>}, {transform_indices = @transform_4, window_bounds = array<i64: 128, 128>}]} {
    %c0_i32 = arith.constant 0 : i32
    %0 = arith.cmpi eq, %arg2, %c0_i32 : i32
    %1 = arith.extui %0 : i1 to i32
    %c0_i32_0 = arith.constant 0 : i32
    %2 = arith.cmpi ne, %1, %c0_i32_0 : i32
    scf.if %2 {
      %cst_10 = arith.constant 0.000000e+00 : f32
      %12 = vector.broadcast %cst_10 : f32 to vector<128x128xf32>
      %c0_11 = arith.constant 0 : index
      %c0_12 = arith.constant 0 : index
      %13 = vector.load %arg8[%c0_11, %c0_12] : memref<128x128xf32, #tpu.memory_space<vmem>>, vector<128x128xf32>
      tpu.vector_store %arg8[%c0_11, %c0_12], %12 {strides = array<i32>} : memref<128x128xf32, #tpu.memory_space<vmem>>, vector<128x128xf32>,
    } else {
    }
    %c0 = arith.constant 0 : index
    %c0_1 = arith.constant 0 : index
    %3 = vector.load %arg8[%c0, %c0_1] : memref<128x128xf32, #tpu.memory_space<vmem>>, vector<128x128xf32>
    %c0_2 = arith.constant 0 : index
    %c0_3 = arith.constant 0 : index
    %4 = vector.load %arg3[%c0_2, %c0_3] : memref<128x256xbf16, #tpu.memory_space<vmem>>, vector<128x256xbf16>
    %c0_4 = arith.constant 0 : index
    %c0_5 = arith.constant 0 : index
    %5 = vector.load %arg4[%c0_4, %c0_5] : memref<256x128xbf16, #tpu.memory_space<vmem>>, vector<256x128xbf16>
    %cst = arith.constant dense<0.000000e+00> : vector<128x128xf32>
    %6 = tpu.matmul %4, %5, %cst {dimension_numbers = #tpu.dot_dimension_numbers<[1], [0], [0], [1], [0, 0, 1, 1], [], []>} : vector<128x256xbf16>, vector<256x128xbf16>, vector<128x128xf32> -> vector<128x128xf32>
    %7 = arith.addf %3, %6 : vector<128x128xf32>
    %c0_6 = arith.constant 0 : index
    %c0_7 = arith.constant 0 : index
    %8 = vector.load %arg8[%c0_6, %c0_7] : memref<128x128xf32, #tpu.memory_space<vmem>>, vector<128x128xf32>
    tpu.vector_store %arg8[%c0_6, %c0_7], %7 {strides = array<i32>} : memref<128x128xf32, #tpu.memory_space<vmem>>, vector<128x128xf32>,
    %c0_i32_8 = arith.constant 0 : i32
    %9 = arith.cmpi eq, %arg2, %c0_i32_8 : i32
    %10 = arith.extui %9 : i1 to i32
    %c0_i32_9 = arith.constant 0 : i32
    %11 = arith.cmpi ne, %10, %c0_i32_9 : i32
    scf.if %11 {
      %c0_10 = arith.constant 0 : index
      %c0_11 = arith.constant 0 : index
      %12 = vector.load %arg8[%c0_10, %c0_11] : memref<128x128xf32, #tpu.memory_space<vmem>>, vector<128x128xf32>
      %c0_12 = arith.constant 0 : index
      %c0_13 = arith.constant 0 : index
      %13 = vector.load %arg5[%c0_12, %c0_13] : memref<1x128xf32, #tpu.memory_space<vmem>>, vector<1x128xf32>
      %14 = vector.broadcast %13 : vector<1x128xf32> to vector<128x128xf32>
      %15 = arith.mulf %12, %14 : vector<128x128xf32>
      %c0_14 = arith.constant 0 : index
      %c0_15 = arith.constant 0 : index
      %16 = vector.load %arg6[%c0_14, %c0_15] : memref<1x128xf32, #tpu.memory_space<vmem>>, vector<1x128xf32>
      %17 = vector.broadcast %16 : vector<1x128xf32> to vector<128x128xf32>
      %18 = arith.addf %15, %17 : vector<128x128xf32>
      %cst_16 = arith.constant 0.000000e+00 : f32
      %19 = vector.broadcast %cst_16 : f32 to vector<128x128xf32>
      %20 = arith.maximumf %18, %19 : vector<128x128xf32>
      %21 = arith.truncf %20 : vector<128x128xf32> to vector<128x128xbf16>
      %c0_17 = arith.constant 0 : index
      %c0_18 = arith.constant 0 : index
      %22 = vector.load %arg7[%c0_17, %c0_18] : memref<128x128xbf16, #tpu.memory_space<vmem>>, vector<128x128xbf16>
      tpu.vector_store %arg7[%c0_17, %c0_18], %21 {strides = array<i32>} : memref<128x128xbf16, #tpu.memory_space<vmem>>, vector<128x128xbf16>,
    } else {
    }
    return
  }
  func.func @transform_0(%arg0: i32, %arg1: i32, %arg2: i32) -> (i32, i32) {
    %c0_i32 = arith.constant 0 : i32
    return %arg0, %arg2 : i32, i32
  }
  func.func @transform_1(%arg0: i32, %arg1: i32, %arg2: i32) -> (i32, i32) {
    %c0_i32 = arith.constant 0 : i32
    return %arg2, %arg1 : i32, i32
  }
  func.func @transform_2(%arg0: i32, %arg1: i32, %arg2: i32) -> (i32, i32) {
    %c0_i32 = arith.constant 0 : i32
    %c0_i32_0 = arith.constant 0 : i32
    return %c0_i32, %arg1 : i32, i32
  }
  func.func @transform_3(%arg0: i32, %arg1: i32, %arg2: i32) -> (i32, i32) {
    %c0_i32 = arith.constant 0 : i32
    %c0_i32_0 = arith.constant 0 : i32
    return %c0_i32, %arg1 : i32, i32
  }
  func.func @transform_4(%arg0: i32, %arg1: i32, %arg2: i32) -> (i32, i32) {
    %c0_i32 = arith.constant 0 : i32
    return %arg0, %arg1 : i32, i32
  }
}

module attributes {stable_mosaic.version = 11 : i64} {
  func.func @_mm_epilogue_kernel(%arg0: i32, %arg1: i32, %arg2: i32, %arg3: memref<128x256xbf16, #tpu.memory_space<vmem>>, %arg4: memref<256x128xbf16, #tpu.memory_space<vmem>>, %arg5: memref<1x128xf32, #tpu.memory_space<vmem>>, %arg6: memref<1x128xf32, #tpu.memory_space<vmem>>, %arg7: memref<128x128xf32, #tpu.memory_space<vmem>>, %arg8: memref<128x128xf32, #tpu.memory_space<vmem>>) attributes {dimension_semantics = [#tpu.dimension_semantics<parallel>, #tpu.dimension_semantics<parallel>, #tpu.dimension_semantics<arbitrary>], iteration_bounds = array<i64: 1, 1, 1>, scalar_prefetch = 0 : i64, scratch_operands = 1 : i64, tpu.core_type = #tpu.core_type<tc>, window_params = [{transform_indices = @transform_0, window_bounds = array<i64: 128, 256>}, {transform_indices = @transform_1, window_bounds = array<i64: 256, 128>}, {transform_indices = @transform_2, window_bounds = array<i64: 1, 128>}, {transform_indices = @transform_3, window_bounds = array<i64: 1, 128>}, {transform_indices = @transform_4, window_bounds = array<i64: 128, 128>}]} {
    %c0_i32 = arith.constant 0 : i32
    %0 = arith.cmpi eq, %arg2, %c0_i32 : i32
    %1 = arith.extui %0 : i1 to i32
    %c0_i32_0 = arith.constant 0 : i32
    %2 = arith.cmpi ne, %1, %c0_i32_0 : i32
    scf.if %2 {
      %cst_10 = arith.constant 0.000000e+00 : f32
      %12 = vector.broadcast %cst_10 : f32 to vector<128x128xf32>
      %c0_11 = arith.constant 0 : index
      %c0_12 = arith.constant 0 : index
      %13 = vector.load %arg8[%c0_11, %c0_12] : memref<128x128xf32, #tpu.memory_space<vmem>>, vector<128x128xf32>
      tpu.vector_store %arg8[%c0_11, %c0_12], %12 {strides = array<i32>} : memref<128x128xf32, #tpu.memory_space<vmem>>, vector<128x128xf32>,
    } else {
    }
    %c0 = arith.constant 0 : index
    %c0_1 = arith.constant 0 : index
    %3 = vector.load %arg8[%c0, %c0_1] : memref<128x128xf32, #tpu.memory_space<vmem>>, vector<128x128xf32>
    %c0_2 = arith.constant 0 : index
    %c0_3 = arith.constant 0 : index
    %4 = vector.load %arg3[%c0_2, %c0_3] : memref<128x256xbf16, #tpu.memory_space<vmem>>, vector<128x256xbf16>
    %c0_4 = arith.constant 0 : index
    %c0_5 = arith.constant 0 : index
    %5 = vector.load %arg4[%c0_4, %c0_5] : memref<256x128xbf16, #tpu.memory_space<vmem>>, vector<256x128xbf16>
    %cst = arith.constant dense<0.000000e+00> : vector<128x128xf32>
    %6 = tpu.matmul %4, %5, %cst {dimension_numbers = #tpu.dot_dimension_numbers<[1], [0], [0], [1], [0, 0, 1, 1], [], []>} : vector<128x256xbf16>, vector<256x128xbf16>, vector<128x128xf32> -> vector<128x128xf32>
    %7 = arith.addf %3, %6 : vector<128x128xf32>
    %c0_6 = arith.constant 0 : index
    %c0_7 = arith.constant 0 : index
    %8 = vector.load %arg8[%c0_6, %c0_7] : memref<128x128xf32, #tpu.memory_space<vmem>>, vector<128x128xf32>
    tpu.vector_store %arg8[%c0_6, %c0_7], %7 {strides = array<i32>} : memref<128x128xf32, #tpu.memory_space<vmem>>, vector<128x128xf32>,
    %c0_i32_8 = arith.constant 0 : i32
    %9 = arith.cmpi eq, %arg2, %c0_i32_8 : i32
    %10 = arith.extui %9 : i1 to i32
    %c0_i32_9 = arith.constant 0 : i32
    %11 = arith.cmpi ne, %10, %c0_i32_9 : i32
    scf.if %11 {
      %c0_10 = arith.constant 0 : index
      %c0_11 = arith.constant 0 : index
      %12 = vector.load %arg8[%c0_10, %c0_11] : memref<128x128xf32, #tpu.memory_space<vmem>>, vector<128x128xf32>
      %c0_12 = arith.constant 0 : index
      %c0_13 = arith.constant 0 : index
      %13 = vector.load %arg5[%c0_12, %c0_13] : memref<1x128xf32, #tpu.memory_space<vmem>>, vector<1x128xf32>
      %14 = vector.broadcast %13 : vector<1x128xf32> to vector<128x128xf32>
      %15 = arith.mulf %12, %14 : vector<128x128xf32>
      %c0_14 = arith.constant 0 : index
      %c0_15 = arith.constant 0 : index
      %16 = vector.load %arg6[%c0_14, %c0_15] : memref<1x128xf32, #tpu.memory_space<vmem>>, vector<1x128xf32>
      %17 = vector.broadcast %16 : vector<1x128xf32> to vector<128x128xf32>
      %18 = arith.addf %15, %17 : vector<128x128xf32>
      %c0_16 = arith.constant 0 : index
      %c0_17 = arith.constant 0 : index
      %19 = vector.load %arg7[%c0_16, %c0_17] : memref<128x128xf32, #tpu.memory_space<vmem>>, vector<128x128xf32>
      tpu.vector_store %arg7[%c0_16, %c0_17], %18 {strides = array<i32>} : memref<128x128xf32, #tpu.memory_space<vmem>>, vector<128x128xf32>,
    } else {
    }
    return
  }
  func.func @transform_0(%arg0: i32, %arg1: i32, %arg2: i32) -> (i32, i32) {
    %c0_i32 = arith.constant 0 : i32
    return %arg0, %arg2 : i32, i32
  }
  func.func @transform_1(%arg0: i32, %arg1: i32, %arg2: i32) -> (i32, i32) {
    %c0_i32 = arith.constant 0 : i32
    return %arg2, %arg1 : i32, i32
  }
  func.func @transform_2(%arg0: i32, %arg1: i32, %arg2: i32) -> (i32, i32) {
    %c0_i32 = arith.constant 0 : i32
    %c0_i32_0 = arith.constant 0 : i32
    return %c0_i32, %arg1 : i32, i32
  }
  func.func @transform_3(%arg0: i32, %arg1: i32, %arg2: i32) -> (i32, i32) {
    %c0_i32 = arith.constant 0 : i32
    %c0_i32_0 = arith.constant 0 : i32
    return %c0_i32, %arg1 : i32, i32
  }
  func.func @transform_4(%arg0: i32, %arg1: i32, %arg2: i32) -> (i32, i32) {
    %c0_i32 = arith.constant 0 : i32
    return %arg0, %arg1 : i32, i32
  }
}

module attributes {stable_mosaic.version = 11 : i64} {
  func.func @_mm_epilogue_kernel(%arg0: i32, %arg1: i32, %arg2: i32, %arg3: memref<32x128xbf16, #tpu.memory_space<vmem>>, %arg4: memref<128x128xbf16, #tpu.memory_space<vmem>>, %arg5: memref<1x128xf32, #tpu.memory_space<vmem>>, %arg6: memref<1x128xf32, #tpu.memory_space<vmem>>, %arg7: memref<32x128xbf16, #tpu.memory_space<vmem>>, %arg8: memref<32x128xf32, #tpu.memory_space<vmem>>) attributes {dimension_semantics = [#tpu.dimension_semantics<parallel>, #tpu.dimension_semantics<parallel>, #tpu.dimension_semantics<arbitrary>], iteration_bounds = array<i64: 1, 1, 1>, scalar_prefetch = 0 : i64, scratch_operands = 1 : i64, tpu.core_type = #tpu.core_type<tc>, window_params = [{transform_indices = @transform_0, window_bounds = array<i64: 32, 128>}, {transform_indices = @transform_1, window_bounds = array<i64: 128, 128>}, {transform_indices = @transform_2, window_bounds = array<i64: 1, 128>}, {transform_indices = @transform_3, window_bounds = array<i64: 1, 128>}, {transform_indices = @transform_4, window_bounds = array<i64: 32, 128>}]} {
    %c0_i32 = arith.constant 0 : i32
    %0 = arith.cmpi eq, %arg2, %c0_i32 : i32
    %1 = arith.extui %0 : i1 to i32
    %c0_i32_0 = arith.constant 0 : i32
    %2 = arith.cmpi ne, %1, %c0_i32_0 : i32
    scf.if %2 {
      %cst_10 = arith.constant 0.000000e+00 : f32
      %12 = vector.broadcast %cst_10 : f32 to vector<32x128xf32>
      %c0_11 = arith.constant 0 : index
      %c0_12 = arith.constant 0 : index
      %13 = vector.load %arg8[%c0_11, %c0_12] : memref<32x128xf32, #tpu.memory_space<vmem>>, vector<32x128xf32>
      tpu.vector_store %arg8[%c0_11, %c0_12], %12 {strides = array<i32>} : memref<32x128xf32, #tpu.memory_space<vmem>>, vector<32x128xf32>,
    } else {
    }
    %c0 = arith.constant 0 : index
    %c0_1 = arith.constant 0 : index
    %3 = vector.load %arg8[%c0, %c0_1] : memref<32x128xf32, #tpu.memory_space<vmem>>, vector<32x128xf32>
    %c0_2 = arith.constant 0 : index
    %c0_3 = arith.constant 0 : index
    %4 = vector.load %arg3[%c0_2, %c0_3] : memref<32x128xbf16, #tpu.memory_space<vmem>>, vector<32x128xbf16>
    %c0_4 = arith.constant 0 : index
    %c0_5 = arith.constant 0 : index
    %5 = vector.load %arg4[%c0_4, %c0_5] : memref<128x128xbf16, #tpu.memory_space<vmem>>, vector<128x128xbf16>
    %cst = arith.constant dense<0.000000e+00> : vector<32x128xf32>
    %6 = tpu.matmul %4, %5, %cst {dimension_numbers = #tpu.dot_dimension_numbers<[1], [0], [0], [1], [0, 0, 1, 1], [], []>} : vector<32x128xbf16>, vector<128x128xbf16>, vector<32x128xf32> -> vector<32x128xf32>
    %7 = arith.addf %3, %6 : vector<32x128xf32>
    %c0_6 = arith.constant 0 : index
    %c0_7 = arith.constant 0 : index
    %8 = vector.load %arg8[%c0_6, %c0_7] : memref<32x128xf32, #tpu.memory_space<vmem>>, vector<32x128xf32>
    tpu.vector_store %arg8[%c0_6, %c0_7], %7 {strides = array<i32>} : memref<32x128xf32, #tpu.memory_space<vmem>>, vector<32x128xf32>,
    %c0_i32_8 = arith.constant 0 : i32
    %9 = arith.cmpi eq, %arg2, %c0_i32_8 : i32
    %10 = arith.extui %9 : i1 to i32
    %c0_i32_9 = arith.constant 0 : i32
    %11 = arith.cmpi ne, %10, %c0_i32_9 : i32
    scf.if %11 {
      %c0_10 = arith.constant 0 : index
      %c0_11 = arith.constant 0 : index
      %12 = vector.load %arg8[%c0_10, %c0_11] : memref<32x128xf32, #tpu.memory_space<vmem>>, vector<32x128xf32>
      %c0_12 = arith.constant 0 : index
      %c0_13 = arith.constant 0 : index
      %13 = vector.load %arg5[%c0_12, %c0_13] : memref<1x128xf32, #tpu.memory_space<vmem>>, vector<1x128xf32>
      %14 = vector.broadcast %13 : vector<1x128xf32> to vector<32x128xf32>
      %15 = arith.mulf %12, %14 : vector<32x128xf32>
      %c0_14 = arith.constant 0 : index
      %c0_15 = arith.constant 0 : index
      %16 = vector.load %arg6[%c0_14, %c0_15] : memref<1x128xf32, #tpu.memory_space<vmem>>, vector<1x128xf32>
      %17 = vector.broadcast %16 : vector<1x128xf32> to vector<32x128xf32>
      %18 = arith.addf %15, %17 : vector<32x128xf32>
      %cst_16 = arith.constant 0.000000e+00 : f32
      %19 = vector.broadcast %cst_16 : f32 to vector<32x128xf32>
      %20 = arith.maximumf %18, %19 : vector<32x128xf32>
      %21 = arith.truncf %20 : vector<32x128xf32> to vector<32x128xbf16>
      %c0_17 = arith.constant 0 : index
      %c0_18 = arith.constant 0 : index
      %22 = vector.load %arg7[%c0_17, %c0_18] : memref<32x128xbf16, #tpu.memory_space<vmem>>, vector<32x128xbf16>
      tpu.vector_store %arg7[%c0_17, %c0_18], %21 {strides = array<i32>} : memref<32x128xbf16, #tpu.memory_space<vmem>>, vector<32x128xbf16>,
    } else {
    }
    return
  }
  func.func @transform_0(%arg0: i32, %arg1: i32, %arg2: i32) -> (i32, i32) {
    %c0_i32 = arith.constant 0 : i32
    return %arg0, %arg2 : i32, i32
  }
  func.func @transform_1(%arg0: i32, %arg1: i32, %arg2: i32) -> (i32, i32) {
    %c0_i32 = arith.constant 0 : i32
    return %arg2, %arg1 : i32, i32
  }
  func.func @transform_2(%arg0: i32, %arg1: i32, %arg2: i32) -> (i32, i32) {
    %c0_i32 = arith.constant 0 : i32
    %c0_i32_0 = arith.constant 0 : i32
    return %c0_i32, %arg1 : i32, i32
  }
  func.func @transform_3(%arg0: i32, %arg1: i32, %arg2: i32) -> (i32, i32) {
    %c0_i32 = arith.constant 0 : i32
    %c0_i32_0 = arith.constant 0 : i32
    return %c0_i32, %arg1 : i32, i32
  }
  func.func @transform_4(%arg0: i32, %arg1: i32, %arg2: i32) -> (i32, i32) {
    %c0_i32 = arith.constant 0 : i32
    return %arg0, %arg1 : i32, i32
  }
}

module attributes {stable_mosaic.version = 11 : i64} {
  func.func @_bn_act_kernel(%arg0: i32, %arg1: memref<32x128xf32, #tpu.memory_space<vmem>>, %arg2: memref<1x128xf32, #tpu.memory_space<vmem>>, %arg3: memref<1x128xf32, #tpu.memory_space<vmem>>, %arg4: memref<32x128xbf16, #tpu.memory_space<vmem>>) attributes {dimension_semantics = [#tpu.dimension_semantics<parallel>], iteration_bounds = array<i64: 1>, scalar_prefetch = 0 : i64, scratch_operands = 0 : i64, tpu.core_type = #tpu.core_type<tc>, window_params = [{transform_indices = @transform_0, window_bounds = array<i64: 32, 128>}, {pipeline_mode = #tpu.pipeline_mode<synchronous>, transform_indices = @transform_1, window_bounds = array<i64: 1, 128>}, {pipeline_mode = #tpu.pipeline_mode<synchronous>, transform_indices = @transform_2, window_bounds = array<i64: 1, 128>}, {transform_indices = @transform_3, window_bounds = array<i64: 32, 128>}]} {
    %c0 = arith.constant 0 : index
    %c0_0 = arith.constant 0 : index
    %0 = vector.load %arg1[%c0, %c0_0] : memref<32x128xf32, #tpu.memory_space<vmem>>, vector<32x128xf32>
    %c0_1 = arith.constant 0 : index
    %c0_2 = arith.constant 0 : index
    %1 = vector.load %arg2[%c0_1, %c0_2] : memref<1x128xf32, #tpu.memory_space<vmem>>, vector<1x128xf32>
    %2 = vector.broadcast %1 : vector<1x128xf32> to vector<32x128xf32>
    %3 = arith.mulf %0, %2 : vector<32x128xf32>
    %c0_3 = arith.constant 0 : index
    %c0_4 = arith.constant 0 : index
    %4 = vector.load %arg3[%c0_3, %c0_4] : memref<1x128xf32, #tpu.memory_space<vmem>>, vector<1x128xf32>
    %5 = vector.broadcast %4 : vector<1x128xf32> to vector<32x128xf32>
    %6 = arith.addf %3, %5 : vector<32x128xf32>
    %cst = arith.constant 0.000000e+00 : f32
    %7 = vector.broadcast %cst : f32 to vector<32x128xf32>
    %8 = arith.maximumf %6, %7 : vector<32x128xf32>
    %9 = arith.truncf %8 : vector<32x128xf32> to vector<32x128xbf16>
    %c0_5 = arith.constant 0 : index
    %c0_6 = arith.constant 0 : index
    %10 = vector.load %arg4[%c0_5, %c0_6] : memref<32x128xbf16, #tpu.memory_space<vmem>>, vector<32x128xbf16>
    tpu.vector_store %arg4[%c0_5, %c0_6], %9 {strides = array<i32>} : memref<32x128xbf16, #tpu.memory_space<vmem>>, vector<32x128xbf16>,
    return
  }
  func.func @transform_0(%arg0: i32) -> (i32, i32) {
    %c0_i32 = arith.constant 0 : i32
    %c0_i32_0 = arith.constant 0 : i32
    return %arg0, %c0_i32 : i32, i32
  }
  func.func @transform_1(%arg0: i32) -> (i32, i32) {
    %c0_i32 = arith.constant 0 : i32
    %c0_i32_0 = arith.constant 0 : i32
    %c0_i32_1 = arith.constant 0 : i32
    return %c0_i32, %c0_i32_0 : i32, i32
  }
  func.func @transform_2(%arg0: i32) -> (i32, i32) {
    %c0_i32 = arith.constant 0 : i32
    %c0_i32_0 = arith.constant 0 : i32
    %c0_i32_1 = arith.constant 0 : i32
    return %c0_i32, %c0_i32_0 : i32, i32
  }
  func.func @transform_3(%arg0: i32) -> (i32, i32) {
    %c0_i32 = arith.constant 0 : i32
    %c0_i32_0 = arith.constant 0 : i32
    return %arg0, %c0_i32 : i32, i32
  }
}

module attributes {stable_mosaic.version = 11 : i64} {
  func.func @_mm_epilogue_kernel(%arg0: i32, %arg1: i32, %arg2: i32, %arg3: memref<32x128xbf16, #tpu.memory_space<vmem>>, %arg4: memref<128x128xbf16, #tpu.memory_space<vmem>>, %arg5: memref<1x128xf32, #tpu.memory_space<vmem>>, %arg6: memref<1x128xf32, #tpu.memory_space<vmem>>, %arg7: memref<32x128xf32, #tpu.memory_space<vmem>>, %arg8: memref<32x128xf32, #tpu.memory_space<vmem>>) attributes {dimension_semantics = [#tpu.dimension_semantics<parallel>, #tpu.dimension_semantics<parallel>, #tpu.dimension_semantics<arbitrary>], iteration_bounds = array<i64: 1, 1, 9>, scalar_prefetch = 0 : i64, scratch_operands = 1 : i64, tpu.core_type = #tpu.core_type<tc>, window_params = [{transform_indices = @transform_0, window_bounds = array<i64: 32, 128>}, {transform_indices = @transform_1, window_bounds = array<i64: 128, 128>}, {transform_indices = @transform_2, window_bounds = array<i64: 1, 128>}, {transform_indices = @transform_3, window_bounds = array<i64: 1, 128>}, {transform_indices = @transform_4, window_bounds = array<i64: 32, 128>}]} {
    %c0_i32 = arith.constant 0 : i32
    %0 = arith.cmpi eq, %arg2, %c0_i32 : i32
    %1 = arith.extui %0 : i1 to i32
    %c0_i32_0 = arith.constant 0 : i32
    %2 = arith.cmpi ne, %1, %c0_i32_0 : i32
    scf.if %2 {
      %cst_9 = arith.constant 0.000000e+00 : f32
      %12 = vector.broadcast %cst_9 : f32 to vector<32x128xf32>
      %c0_10 = arith.constant 0 : index
      %c0_11 = arith.constant 0 : index
      %13 = vector.load %arg8[%c0_10, %c0_11] : memref<32x128xf32, #tpu.memory_space<vmem>>, vector<32x128xf32>
      tpu.vector_store %arg8[%c0_10, %c0_11], %12 {strides = array<i32>} : memref<32x128xf32, #tpu.memory_space<vmem>>, vector<32x128xf32>,
    } else {
    }
    %c0 = arith.constant 0 : index
    %c0_1 = arith.constant 0 : index
    %3 = vector.load %arg8[%c0, %c0_1] : memref<32x128xf32, #tpu.memory_space<vmem>>, vector<32x128xf32>
    %c0_2 = arith.constant 0 : index
    %c0_3 = arith.constant 0 : index
    %4 = vector.load %arg3[%c0_2, %c0_3] : memref<32x128xbf16, #tpu.memory_space<vmem>>, vector<32x128xbf16>
    %c0_4 = arith.constant 0 : index
    %c0_5 = arith.constant 0 : index
    %5 = vector.load %arg4[%c0_4, %c0_5] : memref<128x128xbf16, #tpu.memory_space<vmem>>, vector<128x128xbf16>
    %cst = arith.constant dense<0.000000e+00> : vector<32x128xf32>
    %6 = tpu.matmul %4, %5, %cst {dimension_numbers = #tpu.dot_dimension_numbers<[1], [0], [0], [1], [0, 0, 1, 1], [], []>} : vector<32x128xbf16>, vector<128x128xbf16>, vector<32x128xf32> -> vector<32x128xf32>
    %7 = arith.addf %3, %6 : vector<32x128xf32>
    %c0_6 = arith.constant 0 : index
    %c0_7 = arith.constant 0 : index
    %8 = vector.load %arg8[%c0_6, %c0_7] : memref<32x128xf32, #tpu.memory_space<vmem>>, vector<32x128xf32>
    tpu.vector_store %arg8[%c0_6, %c0_7], %7 {strides = array<i32>} : memref<32x128xf32, #tpu.memory_space<vmem>>, vector<32x128xf32>,
    %c8_i32 = arith.constant 8 : i32
    %9 = arith.cmpi eq, %arg2, %c8_i32 : i32
    %10 = arith.extui %9 : i1 to i32
    %c0_i32_8 = arith.constant 0 : i32
    %11 = arith.cmpi ne, %10, %c0_i32_8 : i32
    scf.if %11 {
      %c0_9 = arith.constant 0 : index
      %c0_10 = arith.constant 0 : index
      %12 = vector.load %arg8[%c0_9, %c0_10] : memref<32x128xf32, #tpu.memory_space<vmem>>, vector<32x128xf32>
      %c0_11 = arith.constant 0 : index
      %c0_12 = arith.constant 0 : index
      %13 = vector.load %arg5[%c0_11, %c0_12] : memref<1x128xf32, #tpu.memory_space<vmem>>, vector<1x128xf32>
      %14 = vector.broadcast %13 : vector<1x128xf32> to vector<32x128xf32>
      %15 = arith.mulf %12, %14 : vector<32x128xf32>
      %c0_13 = arith.constant 0 : index
      %c0_14 = arith.constant 0 : index
      %16 = vector.load %arg6[%c0_13, %c0_14] : memref<1x128xf32, #tpu.memory_space<vmem>>, vector<1x128xf32>
      %17 = vector.broadcast %16 : vector<1x128xf32> to vector<32x128xf32>
      %18 = arith.addf %15, %17 : vector<32x128xf32>
      %c0_15 = arith.constant 0 : index
      %c0_16 = arith.constant 0 : index
      %19 = vector.load %arg7[%c0_15, %c0_16] : memref<32x128xf32, #tpu.memory_space<vmem>>, vector<32x128xf32>
      tpu.vector_store %arg7[%c0_15, %c0_16], %18 {strides = array<i32>} : memref<32x128xf32, #tpu.memory_space<vmem>>, vector<32x128xf32>,
    } else {
    }
    return
  }
  func.func @transform_0(%arg0: i32, %arg1: i32, %arg2: i32) -> (i32, i32) {
    %c0_i32 = arith.constant 0 : i32
    return %arg0, %arg2 : i32, i32
  }
  func.func @transform_1(%arg0: i32, %arg1: i32, %arg2: i32) -> (i32, i32) {
    %c0_i32 = arith.constant 0 : i32
    return %arg2, %arg1 : i32, i32
  }
  func.func @transform_2(%arg0: i32, %arg1: i32, %arg2: i32) -> (i32, i32) {
    %c0_i32 = arith.constant 0 : i32
    %c0_i32_0 = arith.constant 0 : i32
    return %c0_i32, %arg1 : i32, i32
  }
  func.func @transform_3(%arg0: i32, %arg1: i32, %arg2: i32) -> (i32, i32) {
    %c0_i32 = arith.constant 0 : i32
    %c0_i32_0 = arith.constant 0 : i32
    return %c0_i32, %arg1 : i32, i32
  }
  func.func @transform_4(%arg0: i32, %arg1: i32, %arg2: i32) -> (i32, i32) {
    %c0_i32 = arith.constant 0 : i32
    return %arg0, %arg1 : i32, i32
  }
}

module attributes {stable_mosaic.version = 11 : i64} {
  func.func @_bn_act_kernel(%arg0: i32, %arg1: memref<32x256xf32, #tpu.memory_space<vmem>>, %arg2: memref<1x256xf32, #tpu.memory_space<vmem>>, %arg3: memref<1x256xf32, #tpu.memory_space<vmem>>, %arg4: memref<32x256xbf16, #tpu.memory_space<vmem>>) attributes {dimension_semantics = [#tpu.dimension_semantics<parallel>], iteration_bounds = array<i64: 1>, scalar_prefetch = 0 : i64, scratch_operands = 0 : i64, tpu.core_type = #tpu.core_type<tc>, window_params = [{transform_indices = @transform_0, window_bounds = array<i64: 32, 256>}, {pipeline_mode = #tpu.pipeline_mode<synchronous>, transform_indices = @transform_1, window_bounds = array<i64: 1, 256>}, {pipeline_mode = #tpu.pipeline_mode<synchronous>, transform_indices = @transform_2, window_bounds = array<i64: 1, 256>}, {transform_indices = @transform_3, window_bounds = array<i64: 32, 256>}]} {
    %c0 = arith.constant 0 : index
    %c0_0 = arith.constant 0 : index
    %0 = vector.load %arg1[%c0, %c0_0] : memref<32x256xf32, #tpu.memory_space<vmem>>, vector<32x256xf32>
    %c0_1 = arith.constant 0 : index
    %c0_2 = arith.constant 0 : index
    %1 = vector.load %arg2[%c0_1, %c0_2] : memref<1x256xf32, #tpu.memory_space<vmem>>, vector<1x256xf32>
    %2 = vector.broadcast %1 : vector<1x256xf32> to vector<32x256xf32>
    %3 = arith.mulf %0, %2 : vector<32x256xf32>
    %c0_3 = arith.constant 0 : index
    %c0_4 = arith.constant 0 : index
    %4 = vector.load %arg3[%c0_3, %c0_4] : memref<1x256xf32, #tpu.memory_space<vmem>>, vector<1x256xf32>
    %5 = vector.broadcast %4 : vector<1x256xf32> to vector<32x256xf32>
    %6 = arith.addf %3, %5 : vector<32x256xf32>
    %cst = arith.constant 0.000000e+00 : f32
    %7 = vector.broadcast %cst : f32 to vector<32x256xf32>
    %8 = arith.maximumf %6, %7 : vector<32x256xf32>
    %9 = arith.truncf %8 : vector<32x256xf32> to vector<32x256xbf16>
    %c0_5 = arith.constant 0 : index
    %c0_6 = arith.constant 0 : index
    %10 = vector.load %arg4[%c0_5, %c0_6] : memref<32x256xbf16, #tpu.memory_space<vmem>>, vector<32x256xbf16>
    tpu.vector_store %arg4[%c0_5, %c0_6], %9 {strides = array<i32>} : memref<32x256xbf16, #tpu.memory_space<vmem>>, vector<32x256xbf16>,
    return
  }
  func.func @transform_0(%arg0: i32) -> (i32, i32) {
    %c0_i32 = arith.constant 0 : i32
    %c0_i32_0 = arith.constant 0 : i32
    return %arg0, %c0_i32 : i32, i32
  }
  func.func @transform_1(%arg0: i32) -> (i32, i32) {
    %c0_i32 = arith.constant 0 : i32
    %c0_i32_0 = arith.constant 0 : i32
    %c0_i32_1 = arith.constant 0 : i32
    return %c0_i32, %c0_i32_0 : i32, i32
  }
  func.func @transform_2(%arg0: i32) -> (i32, i32) {
    %c0_i32 = arith.constant 0 : i32
    %c0_i32_0 = arith.constant 0 : i32
    %c0_i32_1 = arith.constant 0 : i32
    return %c0_i32, %c0_i32_0 : i32, i32
  }
  func.func @transform_3(%arg0: i32) -> (i32, i32) {
    %c0_i32 = arith.constant 0 : i32
    %c0_i32_0 = arith.constant 0 : i32
    return %arg0, %c0_i32 : i32, i32
  }
}

module attributes {stable_mosaic.version = 11 : i64} {
  func.func @_mm_epilogue_kernel(%arg0: i32, %arg1: i32, %arg2: i32, %arg3: memref<32x256xbf16, #tpu.memory_space<vmem>>, %arg4: memref<256x128xbf16, #tpu.memory_space<vmem>>, %arg5: memref<1x128xf32, #tpu.memory_space<vmem>>, %arg6: memref<1x128xf32, #tpu.memory_space<vmem>>, %arg7: memref<32x128xbf16, #tpu.memory_space<vmem>>, %arg8: memref<32x128xf32, #tpu.memory_space<vmem>>) attributes {dimension_semantics = [#tpu.dimension_semantics<parallel>, #tpu.dimension_semantics<parallel>, #tpu.dimension_semantics<arbitrary>], iteration_bounds = array<i64: 1, 1, 1>, scalar_prefetch = 0 : i64, scratch_operands = 1 : i64, tpu.core_type = #tpu.core_type<tc>, window_params = [{transform_indices = @transform_0, window_bounds = array<i64: 32, 256>}, {transform_indices = @transform_1, window_bounds = array<i64: 256, 128>}, {transform_indices = @transform_2, window_bounds = array<i64: 1, 128>}, {transform_indices = @transform_3, window_bounds = array<i64: 1, 128>}, {transform_indices = @transform_4, window_bounds = array<i64: 32, 128>}]} {
    %c0_i32 = arith.constant 0 : i32
    %0 = arith.cmpi eq, %arg2, %c0_i32 : i32
    %1 = arith.extui %0 : i1 to i32
    %c0_i32_0 = arith.constant 0 : i32
    %2 = arith.cmpi ne, %1, %c0_i32_0 : i32
    scf.if %2 {
      %cst_10 = arith.constant 0.000000e+00 : f32
      %12 = vector.broadcast %cst_10 : f32 to vector<32x128xf32>
      %c0_11 = arith.constant 0 : index
      %c0_12 = arith.constant 0 : index
      %13 = vector.load %arg8[%c0_11, %c0_12] : memref<32x128xf32, #tpu.memory_space<vmem>>, vector<32x128xf32>
      tpu.vector_store %arg8[%c0_11, %c0_12], %12 {strides = array<i32>} : memref<32x128xf32, #tpu.memory_space<vmem>>, vector<32x128xf32>,
    } else {
    }
    %c0 = arith.constant 0 : index
    %c0_1 = arith.constant 0 : index
    %3 = vector.load %arg8[%c0, %c0_1] : memref<32x128xf32, #tpu.memory_space<vmem>>, vector<32x128xf32>
    %c0_2 = arith.constant 0 : index
    %c0_3 = arith.constant 0 : index
    %4 = vector.load %arg3[%c0_2, %c0_3] : memref<32x256xbf16, #tpu.memory_space<vmem>>, vector<32x256xbf16>
    %c0_4 = arith.constant 0 : index
    %c0_5 = arith.constant 0 : index
    %5 = vector.load %arg4[%c0_4, %c0_5] : memref<256x128xbf16, #tpu.memory_space<vmem>>, vector<256x128xbf16>
    %cst = arith.constant dense<0.000000e+00> : vector<32x128xf32>
    %6 = tpu.matmul %4, %5, %cst {dimension_numbers = #tpu.dot_dimension_numbers<[1], [0], [0], [1], [0, 0, 1, 1], [], []>} : vector<32x256xbf16>, vector<256x128xbf16>, vector<32x128xf32> -> vector<32x128xf32>
    %7 = arith.addf %3, %6 : vector<32x128xf32>
    %c0_6 = arith.constant 0 : index
    %c0_7 = arith.constant 0 : index
    %8 = vector.load %arg8[%c0_6, %c0_7] : memref<32x128xf32, #tpu.memory_space<vmem>>, vector<32x128xf32>
    tpu.vector_store %arg8[%c0_6, %c0_7], %7 {strides = array<i32>} : memref<32x128xf32, #tpu.memory_space<vmem>>, vector<32x128xf32>,
    %c0_i32_8 = arith.constant 0 : i32
    %9 = arith.cmpi eq, %arg2, %c0_i32_8 : i32
    %10 = arith.extui %9 : i1 to i32
    %c0_i32_9 = arith.constant 0 : i32
    %11 = arith.cmpi ne, %10, %c0_i32_9 : i32
    scf.if %11 {
      %c0_10 = arith.constant 0 : index
      %c0_11 = arith.constant 0 : index
      %12 = vector.load %arg8[%c0_10, %c0_11] : memref<32x128xf32, #tpu.memory_space<vmem>>, vector<32x128xf32>
      %c0_12 = arith.constant 0 : index
      %c0_13 = arith.constant 0 : index
      %13 = vector.load %arg5[%c0_12, %c0_13] : memref<1x128xf32, #tpu.memory_space<vmem>>, vector<1x128xf32>
      %14 = vector.broadcast %13 : vector<1x128xf32> to vector<32x128xf32>
      %15 = arith.mulf %12, %14 : vector<32x128xf32>
      %c0_14 = arith.constant 0 : index
      %c0_15 = arith.constant 0 : index
      %16 = vector.load %arg6[%c0_14, %c0_15] : memref<1x128xf32, #tpu.memory_space<vmem>>, vector<1x128xf32>
      %17 = vector.broadcast %16 : vector<1x128xf32> to vector<32x128xf32>
      %18 = arith.addf %15, %17 : vector<32x128xf32>
      %cst_16 = arith.constant 0.000000e+00 : f32
      %19 = vector.broadcast %cst_16 : f32 to vector<32x128xf32>
      %20 = arith.maximumf %18, %19 : vector<32x128xf32>
      %21 = arith.truncf %20 : vector<32x128xf32> to vector<32x128xbf16>
      %c0_17 = arith.constant 0 : index
      %c0_18 = arith.constant 0 : index
      %22 = vector.load %arg7[%c0_17, %c0_18] : memref<32x128xbf16, #tpu.memory_space<vmem>>, vector<32x128xbf16>
      tpu.vector_store %arg7[%c0_17, %c0_18], %21 {strides = array<i32>} : memref<32x128xbf16, #tpu.memory_space<vmem>>, vector<32x128xbf16>,
    } else {
    }
    return
  }
  func.func @transform_0(%arg0: i32, %arg1: i32, %arg2: i32) -> (i32, i32) {
    %c0_i32 = arith.constant 0 : i32
    return %arg0, %arg2 : i32, i32
  }
  func.func @transform_1(%arg0: i32, %arg1: i32, %arg2: i32) -> (i32, i32) {
    %c0_i32 = arith.constant 0 : i32
    return %arg2, %arg1 : i32, i32
  }
  func.func @transform_2(%arg0: i32, %arg1: i32, %arg2: i32) -> (i32, i32) {
    %c0_i32 = arith.constant 0 : i32
    %c0_i32_0 = arith.constant 0 : i32
    return %c0_i32, %arg1 : i32, i32
  }
  func.func @transform_3(%arg0: i32, %arg1: i32, %arg2: i32) -> (i32, i32) {
    %c0_i32 = arith.constant 0 : i32
    %c0_i32_0 = arith.constant 0 : i32
    return %c0_i32, %arg1 : i32, i32
  }
  func.func @transform_4(%arg0: i32, %arg1: i32, %arg2: i32) -> (i32, i32) {
    %c0_i32 = arith.constant 0 : i32
    return %arg0, %arg1 : i32, i32
  }
}

module attributes {stable_mosaic.version = 11 : i64} {
  func.func @_bn_act_kernel(%arg0: i32, %arg1: memref<32x384xf32, #tpu.memory_space<vmem>>, %arg2: memref<1x384xf32, #tpu.memory_space<vmem>>, %arg3: memref<1x384xf32, #tpu.memory_space<vmem>>, %arg4: memref<32x384xbf16, #tpu.memory_space<vmem>>) attributes {dimension_semantics = [#tpu.dimension_semantics<parallel>], iteration_bounds = array<i64: 1>, scalar_prefetch = 0 : i64, scratch_operands = 0 : i64, tpu.core_type = #tpu.core_type<tc>, window_params = [{transform_indices = @transform_0, window_bounds = array<i64: 32, 384>}, {pipeline_mode = #tpu.pipeline_mode<synchronous>, transform_indices = @transform_1, window_bounds = array<i64: 1, 384>}, {pipeline_mode = #tpu.pipeline_mode<synchronous>, transform_indices = @transform_2, window_bounds = array<i64: 1, 384>}, {transform_indices = @transform_3, window_bounds = array<i64: 32, 384>}]} {
    %c0 = arith.constant 0 : index
    %c0_0 = arith.constant 0 : index
    %0 = vector.load %arg1[%c0, %c0_0] : memref<32x384xf32, #tpu.memory_space<vmem>>, vector<32x384xf32>
    %c0_1 = arith.constant 0 : index
    %c0_2 = arith.constant 0 : index
    %1 = vector.load %arg2[%c0_1, %c0_2] : memref<1x384xf32, #tpu.memory_space<vmem>>, vector<1x384xf32>
    %2 = vector.broadcast %1 : vector<1x384xf32> to vector<32x384xf32>
    %3 = arith.mulf %0, %2 : vector<32x384xf32>
    %c0_3 = arith.constant 0 : index
    %c0_4 = arith.constant 0 : index
    %4 = vector.load %arg3[%c0_3, %c0_4] : memref<1x384xf32, #tpu.memory_space<vmem>>, vector<1x384xf32>
    %5 = vector.broadcast %4 : vector<1x384xf32> to vector<32x384xf32>
    %6 = arith.addf %3, %5 : vector<32x384xf32>
    %cst = arith.constant 0.000000e+00 : f32
    %7 = vector.broadcast %cst : f32 to vector<32x384xf32>
    %8 = arith.maximumf %6, %7 : vector<32x384xf32>
    %9 = arith.truncf %8 : vector<32x384xf32> to vector<32x384xbf16>
    %c0_5 = arith.constant 0 : index
    %c0_6 = arith.constant 0 : index
    %10 = vector.load %arg4[%c0_5, %c0_6] : memref<32x384xbf16, #tpu.memory_space<vmem>>, vector<32x384xbf16>
    tpu.vector_store %arg4[%c0_5, %c0_6], %9 {strides = array<i32>} : memref<32x384xbf16, #tpu.memory_space<vmem>>, vector<32x384xbf16>,
    return
  }
  func.func @transform_0(%arg0: i32) -> (i32, i32) {
    %c0_i32 = arith.constant 0 : i32
    %c0_i32_0 = arith.constant 0 : i32
    return %arg0, %c0_i32 : i32, i32
  }
  func.func @transform_1(%arg0: i32) -> (i32, i32) {
    %c0_i32 = arith.constant 0 : i32
    %c0_i32_0 = arith.constant 0 : i32
    %c0_i32_1 = arith.constant 0 : i32
    return %c0_i32, %c0_i32_0 : i32, i32
  }
  func.func @transform_2(%arg0: i32) -> (i32, i32) {
    %c0_i32 = arith.constant 0 : i32
    %c0_i32_0 = arith.constant 0 : i32
    %c0_i32_1 = arith.constant 0 : i32
    return %c0_i32, %c0_i32_0 : i32, i32
  }
  func.func @transform_3(%arg0: i32) -> (i32, i32) {
    %c0_i32 = arith.constant 0 : i32
    %c0_i32_0 = arith.constant 0 : i32
    return %arg0, %c0_i32 : i32, i32
  }
}

module attributes {stable_mosaic.version = 11 : i64} {
  func.func @_mm_epilogue_kernel(%arg0: i32, %arg1: i32, %arg2: i32, %arg3: memref<32x128xbf16, #tpu.memory_space<vmem>>, %arg4: memref<128x128xbf16, #tpu.memory_space<vmem>>, %arg5: memref<1x128xf32, #tpu.memory_space<vmem>>, %arg6: memref<1x128xf32, #tpu.memory_space<vmem>>, %arg7: memref<32x128xbf16, #tpu.memory_space<vmem>>, %arg8: memref<32x128xf32, #tpu.memory_space<vmem>>) attributes {dimension_semantics = [#tpu.dimension_semantics<parallel>, #tpu.dimension_semantics<parallel>, #tpu.dimension_semantics<arbitrary>], iteration_bounds = array<i64: 1, 1, 3>, scalar_prefetch = 0 : i64, scratch_operands = 1 : i64, tpu.core_type = #tpu.core_type<tc>, window_params = [{transform_indices = @transform_0, window_bounds = array<i64: 32, 128>}, {transform_indices = @transform_1, window_bounds = array<i64: 128, 128>}, {transform_indices = @transform_2, window_bounds = array<i64: 1, 128>}, {transform_indices = @transform_3, window_bounds = array<i64: 1, 128>}, {transform_indices = @transform_4, window_bounds = array<i64: 32, 128>}]} {
    %c0_i32 = arith.constant 0 : i32
    %0 = arith.cmpi eq, %arg2, %c0_i32 : i32
    %1 = arith.extui %0 : i1 to i32
    %c0_i32_0 = arith.constant 0 : i32
    %2 = arith.cmpi ne, %1, %c0_i32_0 : i32
    scf.if %2 {
      %cst_9 = arith.constant 0.000000e+00 : f32
      %12 = vector.broadcast %cst_9 : f32 to vector<32x128xf32>
      %c0_10 = arith.constant 0 : index
      %c0_11 = arith.constant 0 : index
      %13 = vector.load %arg8[%c0_10, %c0_11] : memref<32x128xf32, #tpu.memory_space<vmem>>, vector<32x128xf32>
      tpu.vector_store %arg8[%c0_10, %c0_11], %12 {strides = array<i32>} : memref<32x128xf32, #tpu.memory_space<vmem>>, vector<32x128xf32>,
    } else {
    }
    %c0 = arith.constant 0 : index
    %c0_1 = arith.constant 0 : index
    %3 = vector.load %arg8[%c0, %c0_1] : memref<32x128xf32, #tpu.memory_space<vmem>>, vector<32x128xf32>
    %c0_2 = arith.constant 0 : index
    %c0_3 = arith.constant 0 : index
    %4 = vector.load %arg3[%c0_2, %c0_3] : memref<32x128xbf16, #tpu.memory_space<vmem>>, vector<32x128xbf16>
    %c0_4 = arith.constant 0 : index
    %c0_5 = arith.constant 0 : index
    %5 = vector.load %arg4[%c0_4, %c0_5] : memref<128x128xbf16, #tpu.memory_space<vmem>>, vector<128x128xbf16>
    %cst = arith.constant dense<0.000000e+00> : vector<32x128xf32>
    %6 = tpu.matmul %4, %5, %cst {dimension_numbers = #tpu.dot_dimension_numbers<[1], [0], [0], [1], [0, 0, 1, 1], [], []>} : vector<32x128xbf16>, vector<128x128xbf16>, vector<32x128xf32> -> vector<32x128xf32>
    %7 = arith.addf %3, %6 : vector<32x128xf32>
    %c0_6 = arith.constant 0 : index
    %c0_7 = arith.constant 0 : index
    %8 = vector.load %arg8[%c0_6, %c0_7] : memref<32x128xf32, #tpu.memory_space<vmem>>, vector<32x128xf32>
    tpu.vector_store %arg8[%c0_6, %c0_7], %7 {strides = array<i32>} : memref<32x128xf32, #tpu.memory_space<vmem>>, vector<32x128xf32>,
    %c2_i32 = arith.constant 2 : i32
    %9 = arith.cmpi eq, %arg2, %c2_i32 : i32
    %10 = arith.extui %9 : i1 to i32
    %c0_i32_8 = arith.constant 0 : i32
    %11 = arith.cmpi ne, %10, %c0_i32_8 : i32
    scf.if %11 {
      %c0_9 = arith.constant 0 : index
      %c0_10 = arith.constant 0 : index
      %12 = vector.load %arg8[%c0_9, %c0_10] : memref<32x128xf32, #tpu.memory_space<vmem>>, vector<32x128xf32>
      %c0_11 = arith.constant 0 : index
      %c0_12 = arith.constant 0 : index
      %13 = vector.load %arg5[%c0_11, %c0_12] : memref<1x128xf32, #tpu.memory_space<vmem>>, vector<1x128xf32>
      %14 = vector.broadcast %13 : vector<1x128xf32> to vector<32x128xf32>
      %15 = arith.mulf %12, %14 : vector<32x128xf32>
      %c0_13 = arith.constant 0 : index
      %c0_14 = arith.constant 0 : index
      %16 = vector.load %arg6[%c0_13, %c0_14] : memref<1x128xf32, #tpu.memory_space<vmem>>, vector<1x128xf32>
      %17 = vector.broadcast %16 : vector<1x128xf32> to vector<32x128xf32>
      %18 = arith.addf %15, %17 : vector<32x128xf32>
      %cst_15 = arith.constant 0.000000e+00 : f32
      %19 = vector.broadcast %cst_15 : f32 to vector<32x128xf32>
      %20 = arith.maximumf %18, %19 : vector<32x128xf32>
      %21 = arith.truncf %20 : vector<32x128xf32> to vector<32x128xbf16>
      %c0_16 = arith.constant 0 : index
      %c0_17 = arith.constant 0 : index
      %22 = vector.load %arg7[%c0_16, %c0_17] : memref<32x128xbf16, #tpu.memory_space<vmem>>, vector<32x128xbf16>
      tpu.vector_store %arg7[%c0_16, %c0_17], %21 {strides = array<i32>} : memref<32x128xbf16, #tpu.memory_space<vmem>>, vector<32x128xbf16>,
    } else {
    }
    return
  }
  func.func @transform_0(%arg0: i32, %arg1: i32, %arg2: i32) -> (i32, i32) {
    %c0_i32 = arith.constant 0 : i32
    return %arg0, %arg2 : i32, i32
  }
  func.func @transform_1(%arg0: i32, %arg1: i32, %arg2: i32) -> (i32, i32) {
    %c0_i32 = arith.constant 0 : i32
    return %arg2, %arg1 : i32, i32
  }
  func.func @transform_2(%arg0: i32, %arg1: i32, %arg2: i32) -> (i32, i32) {
    %c0_i32 = arith.constant 0 : i32
    %c0_i32_0 = arith.constant 0 : i32
    return %c0_i32, %arg1 : i32, i32
  }
  func.func @transform_3(%arg0: i32, %arg1: i32, %arg2: i32) -> (i32, i32) {
    %c0_i32 = arith.constant 0 : i32
    %c0_i32_0 = arith.constant 0 : i32
    return %c0_i32, %arg1 : i32, i32
  }
  func.func @transform_4(%arg0: i32, %arg1: i32, %arg2: i32) -> (i32, i32) {
    %c0_i32 = arith.constant 0 : i32
    return %arg0, %arg1 : i32, i32
  }
}

module attributes {stable_mosaic.version = 11 : i64} {
  func.func @_bn_act_kernel(%arg0: i32, %arg1: memref<32x512xf32, #tpu.memory_space<vmem>>, %arg2: memref<1x512xf32, #tpu.memory_space<vmem>>, %arg3: memref<1x512xf32, #tpu.memory_space<vmem>>, %arg4: memref<32x512xbf16, #tpu.memory_space<vmem>>) attributes {dimension_semantics = [#tpu.dimension_semantics<parallel>], iteration_bounds = array<i64: 1>, scalar_prefetch = 0 : i64, scratch_operands = 0 : i64, tpu.core_type = #tpu.core_type<tc>, window_params = [{transform_indices = @transform_0, window_bounds = array<i64: 32, 512>}, {pipeline_mode = #tpu.pipeline_mode<synchronous>, transform_indices = @transform_1, window_bounds = array<i64: 1, 512>}, {pipeline_mode = #tpu.pipeline_mode<synchronous>, transform_indices = @transform_2, window_bounds = array<i64: 1, 512>}, {transform_indices = @transform_3, window_bounds = array<i64: 32, 512>}]} {
    %c0 = arith.constant 0 : index
    %c0_0 = arith.constant 0 : index
    %0 = vector.load %arg1[%c0, %c0_0] : memref<32x512xf32, #tpu.memory_space<vmem>>, vector<32x512xf32>
    %c0_1 = arith.constant 0 : index
    %c0_2 = arith.constant 0 : index
    %1 = vector.load %arg2[%c0_1, %c0_2] : memref<1x512xf32, #tpu.memory_space<vmem>>, vector<1x512xf32>
    %2 = vector.broadcast %1 : vector<1x512xf32> to vector<32x512xf32>
    %3 = arith.mulf %0, %2 : vector<32x512xf32>
    %c0_3 = arith.constant 0 : index
    %c0_4 = arith.constant 0 : index
    %4 = vector.load %arg3[%c0_3, %c0_4] : memref<1x512xf32, #tpu.memory_space<vmem>>, vector<1x512xf32>
    %5 = vector.broadcast %4 : vector<1x512xf32> to vector<32x512xf32>
    %6 = arith.addf %3, %5 : vector<32x512xf32>
    %cst = arith.constant 0.000000e+00 : f32
    %7 = vector.broadcast %cst : f32 to vector<32x512xf32>
    %8 = arith.maximumf %6, %7 : vector<32x512xf32>
    %9 = arith.truncf %8 : vector<32x512xf32> to vector<32x512xbf16>
    %c0_5 = arith.constant 0 : index
    %c0_6 = arith.constant 0 : index
    %10 = vector.load %arg4[%c0_5, %c0_6] : memref<32x512xbf16, #tpu.memory_space<vmem>>, vector<32x512xbf16>
    tpu.vector_store %arg4[%c0_5, %c0_6], %9 {strides = array<i32>} : memref<32x512xbf16, #tpu.memory_space<vmem>>, vector<32x512xbf16>,
    return
  }
  func.func @transform_0(%arg0: i32) -> (i32, i32) {
    %c0_i32 = arith.constant 0 : i32
    %c0_i32_0 = arith.constant 0 : i32
    return %arg0, %c0_i32 : i32, i32
  }
  func.func @transform_1(%arg0: i32) -> (i32, i32) {
    %c0_i32 = arith.constant 0 : i32
    %c0_i32_0 = arith.constant 0 : i32
    %c0_i32_1 = arith.constant 0 : i32
    return %c0_i32, %c0_i32_0 : i32, i32
  }
  func.func @transform_2(%arg0: i32) -> (i32, i32) {
    %c0_i32 = arith.constant 0 : i32
    %c0_i32_0 = arith.constant 0 : i32
    %c0_i32_1 = arith.constant 0 : i32
    return %c0_i32, %c0_i32_0 : i32, i32
  }
  func.func @transform_3(%arg0: i32) -> (i32, i32) {
    %c0_i32 = arith.constant 0 : i32
    %c0_i32_0 = arith.constant 0 : i32
    return %arg0, %c0_i32 : i32, i32
  }
}

module attributes {stable_mosaic.version = 11 : i64} {
  func.func @_mm_epilogue_kernel(%arg0: i32, %arg1: i32, %arg2: i32, %arg3: memref<32x256xbf16, #tpu.memory_space<vmem>>, %arg4: memref<256x128xbf16, #tpu.memory_space<vmem>>, %arg5: memref<1x128xf32, #tpu.memory_space<vmem>>, %arg6: memref<1x128xf32, #tpu.memory_space<vmem>>, %arg7: memref<32x128xbf16, #tpu.memory_space<vmem>>, %arg8: memref<32x128xf32, #tpu.memory_space<vmem>>) attributes {dimension_semantics = [#tpu.dimension_semantics<parallel>, #tpu.dimension_semantics<parallel>, #tpu.dimension_semantics<arbitrary>], iteration_bounds = array<i64: 1, 1, 2>, scalar_prefetch = 0 : i64, scratch_operands = 1 : i64, tpu.core_type = #tpu.core_type<tc>, window_params = [{transform_indices = @transform_0, window_bounds = array<i64: 32, 256>}, {transform_indices = @transform_1, window_bounds = array<i64: 256, 128>}, {transform_indices = @transform_2, window_bounds = array<i64: 1, 128>}, {transform_indices = @transform_3, window_bounds = array<i64: 1, 128>}, {transform_indices = @transform_4, window_bounds = array<i64: 32, 128>}]} {
    %c0_i32 = arith.constant 0 : i32
    %0 = arith.cmpi eq, %arg2, %c0_i32 : i32
    %1 = arith.extui %0 : i1 to i32
    %c0_i32_0 = arith.constant 0 : i32
    %2 = arith.cmpi ne, %1, %c0_i32_0 : i32
    scf.if %2 {
      %cst_9 = arith.constant 0.000000e+00 : f32
      %12 = vector.broadcast %cst_9 : f32 to vector<32x128xf32>
      %c0_10 = arith.constant 0 : index
      %c0_11 = arith.constant 0 : index
      %13 = vector.load %arg8[%c0_10, %c0_11] : memref<32x128xf32, #tpu.memory_space<vmem>>, vector<32x128xf32>
      tpu.vector_store %arg8[%c0_10, %c0_11], %12 {strides = array<i32>} : memref<32x128xf32, #tpu.memory_space<vmem>>, vector<32x128xf32>,
    } else {
    }
    %c0 = arith.constant 0 : index
    %c0_1 = arith.constant 0 : index
    %3 = vector.load %arg8[%c0, %c0_1] : memref<32x128xf32, #tpu.memory_space<vmem>>, vector<32x128xf32>
    %c0_2 = arith.constant 0 : index
    %c0_3 = arith.constant 0 : index
    %4 = vector.load %arg3[%c0_2, %c0_3] : memref<32x256xbf16, #tpu.memory_space<vmem>>, vector<32x256xbf16>
    %c0_4 = arith.constant 0 : index
    %c0_5 = arith.constant 0 : index
    %5 = vector.load %arg4[%c0_4, %c0_5] : memref<256x128xbf16, #tpu.memory_space<vmem>>, vector<256x128xbf16>
    %cst = arith.constant dense<0.000000e+00> : vector<32x128xf32>
    %6 = tpu.matmul %4, %5, %cst {dimension_numbers = #tpu.dot_dimension_numbers<[1], [0], [0], [1], [0, 0, 1, 1], [], []>} : vector<32x256xbf16>, vector<256x128xbf16>, vector<32x128xf32> -> vector<32x128xf32>
    %7 = arith.addf %3, %6 : vector<32x128xf32>
    %c0_6 = arith.constant 0 : index
    %c0_7 = arith.constant 0 : index
    %8 = vector.load %arg8[%c0_6, %c0_7] : memref<32x128xf32, #tpu.memory_space<vmem>>, vector<32x128xf32>
    tpu.vector_store %arg8[%c0_6, %c0_7], %7 {strides = array<i32>} : memref<32x128xf32, #tpu.memory_space<vmem>>, vector<32x128xf32>,
    %c1_i32 = arith.constant 1 : i32
    %9 = arith.cmpi eq, %arg2, %c1_i32 : i32
    %10 = arith.extui %9 : i1 to i32
    %c0_i32_8 = arith.constant 0 : i32
    %11 = arith.cmpi ne, %10, %c0_i32_8 : i32
    scf.if %11 {
      %c0_9 = arith.constant 0 : index
      %c0_10 = arith.constant 0 : index
      %12 = vector.load %arg8[%c0_9, %c0_10] : memref<32x128xf32, #tpu.memory_space<vmem>>, vector<32x128xf32>
      %c0_11 = arith.constant 0 : index
      %c0_12 = arith.constant 0 : index
      %13 = vector.load %arg5[%c0_11, %c0_12] : memref<1x128xf32, #tpu.memory_space<vmem>>, vector<1x128xf32>
      %14 = vector.broadcast %13 : vector<1x128xf32> to vector<32x128xf32>
      %15 = arith.mulf %12, %14 : vector<32x128xf32>
      %c0_13 = arith.constant 0 : index
      %c0_14 = arith.constant 0 : index
      %16 = vector.load %arg6[%c0_13, %c0_14] : memref<1x128xf32, #tpu.memory_space<vmem>>, vector<1x128xf32>
      %17 = vector.broadcast %16 : vector<1x128xf32> to vector<32x128xf32>
      %18 = arith.addf %15, %17 : vector<32x128xf32>
      %cst_15 = arith.constant 0.000000e+00 : f32
      %19 = vector.broadcast %cst_15 : f32 to vector<32x128xf32>
      %20 = arith.maximumf %18, %19 : vector<32x128xf32>
      %21 = arith.truncf %20 : vector<32x128xf32> to vector<32x128xbf16>
      %c0_16 = arith.constant 0 : index
      %c0_17 = arith.constant 0 : index
      %22 = vector.load %arg7[%c0_16, %c0_17] : memref<32x128xbf16, #tpu.memory_space<vmem>>, vector<32x128xbf16>
      tpu.vector_store %arg7[%c0_16, %c0_17], %21 {strides = array<i32>} : memref<32x128xbf16, #tpu.memory_space<vmem>>, vector<32x128xbf16>,
    } else {
    }
    return
  }
  func.func @transform_0(%arg0: i32, %arg1: i32, %arg2: i32) -> (i32, i32) {
    %c0_i32 = arith.constant 0 : i32
    return %arg0, %arg2 : i32, i32
  }
  func.func @transform_1(%arg0: i32, %arg1: i32, %arg2: i32) -> (i32, i32) {
    %c0_i32 = arith.constant 0 : i32
    return %arg2, %arg1 : i32, i32
  }
  func.func @transform_2(%arg0: i32, %arg1: i32, %arg2: i32) -> (i32, i32) {
    %c0_i32 = arith.constant 0 : i32
    %c0_i32_0 = arith.constant 0 : i32
    return %c0_i32, %arg1 : i32, i32
  }
  func.func @transform_3(%arg0: i32, %arg1: i32, %arg2: i32) -> (i32, i32) {
    %c0_i32 = arith.constant 0 : i32
    %c0_i32_0 = arith.constant 0 : i32
    return %c0_i32, %arg1 : i32, i32
  }
  func.func @transform_4(%arg0: i32, %arg1: i32, %arg2: i32) -> (i32, i32) {
    %c0_i32 = arith.constant 0 : i32
    return %arg0, %arg1 : i32, i32
  }
}

module attributes {stable_mosaic.version = 11 : i64} {
  func.func @_mm_epilogue_kernel(%arg0: i32, %arg1: i32, %arg2: i32, %arg3: memref<32x256xbf16, #tpu.memory_space<vmem>>, %arg4: memref<256x256xbf16, #tpu.memory_space<vmem>>, %arg5: memref<1x256xf32, #tpu.memory_space<vmem>>, %arg6: memref<1x256xf32, #tpu.memory_space<vmem>>, %arg7: memref<32x256xf32, #tpu.memory_space<vmem>>, %arg8: memref<32x256xf32, #tpu.memory_space<vmem>>) attributes {dimension_semantics = [#tpu.dimension_semantics<parallel>, #tpu.dimension_semantics<parallel>, #tpu.dimension_semantics<arbitrary>], iteration_bounds = array<i64: 1, 1, 2>, scalar_prefetch = 0 : i64, scratch_operands = 1 : i64, tpu.core_type = #tpu.core_type<tc>, window_params = [{transform_indices = @transform_0, window_bounds = array<i64: 32, 256>}, {transform_indices = @transform_1, window_bounds = array<i64: 256, 256>}, {transform_indices = @transform_2, window_bounds = array<i64: 1, 256>}, {transform_indices = @transform_3, window_bounds = array<i64: 1, 256>}, {transform_indices = @transform_4, window_bounds = array<i64: 32, 256>}]} {
    %c0_i32 = arith.constant 0 : i32
    %0 = arith.cmpi eq, %arg2, %c0_i32 : i32
    %1 = arith.extui %0 : i1 to i32
    %c0_i32_0 = arith.constant 0 : i32
    %2 = arith.cmpi ne, %1, %c0_i32_0 : i32
    scf.if %2 {
      %cst_9 = arith.constant 0.000000e+00 : f32
      %12 = vector.broadcast %cst_9 : f32 to vector<32x256xf32>
      %c0_10 = arith.constant 0 : index
      %c0_11 = arith.constant 0 : index
      %13 = vector.load %arg8[%c0_10, %c0_11] : memref<32x256xf32, #tpu.memory_space<vmem>>, vector<32x256xf32>
      tpu.vector_store %arg8[%c0_10, %c0_11], %12 {strides = array<i32>} : memref<32x256xf32, #tpu.memory_space<vmem>>, vector<32x256xf32>,
    } else {
    }
    %c0 = arith.constant 0 : index
    %c0_1 = arith.constant 0 : index
    %3 = vector.load %arg8[%c0, %c0_1] : memref<32x256xf32, #tpu.memory_space<vmem>>, vector<32x256xf32>
    %c0_2 = arith.constant 0 : index
    %c0_3 = arith.constant 0 : index
    %4 = vector.load %arg3[%c0_2, %c0_3] : memref<32x256xbf16, #tpu.memory_space<vmem>>, vector<32x256xbf16>
    %c0_4 = arith.constant 0 : index
    %c0_5 = arith.constant 0 : index
    %5 = vector.load %arg4[%c0_4, %c0_5] : memref<256x256xbf16, #tpu.memory_space<vmem>>, vector<256x256xbf16>
    %cst = arith.constant dense<0.000000e+00> : vector<32x256xf32>
    %6 = tpu.matmul %4, %5, %cst {dimension_numbers = #tpu.dot_dimension_numbers<[1], [0], [0], [1], [0, 0, 1, 1], [], []>} : vector<32x256xbf16>, vector<256x256xbf16>, vector<32x256xf32> -> vector<32x256xf32>
    %7 = arith.addf %3, %6 : vector<32x256xf32>
    %c0_6 = arith.constant 0 : index
    %c0_7 = arith.constant 0 : index
    %8 = vector.load %arg8[%c0_6, %c0_7] : memref<32x256xf32, #tpu.memory_space<vmem>>, vector<32x256xf32>
    tpu.vector_store %arg8[%c0_6, %c0_7], %7 {strides = array<i32>} : memref<32x256xf32, #tpu.memory_space<vmem>>, vector<32x256xf32>,
    %c1_i32 = arith.constant 1 : i32
    %9 = arith.cmpi eq, %arg2, %c1_i32 : i32
    %10 = arith.extui %9 : i1 to i32
    %c0_i32_8 = arith.constant 0 : i32
    %11 = arith.cmpi ne, %10, %c0_i32_8 : i32
    scf.if %11 {
      %c0_9 = arith.constant 0 : index
      %c0_10 = arith.constant 0 : index
      %12 = vector.load %arg8[%c0_9, %c0_10] : memref<32x256xf32, #tpu.memory_space<vmem>>, vector<32x256xf32>
      %c0_11 = arith.constant 0 : index
      %c0_12 = arith.constant 0 : index
      %13 = vector.load %arg5[%c0_11, %c0_12] : memref<1x256xf32, #tpu.memory_space<vmem>>, vector<1x256xf32>
      %14 = vector.broadcast %13 : vector<1x256xf32> to vector<32x256xf32>
      %15 = arith.mulf %12, %14 : vector<32x256xf32>
      %c0_13 = arith.constant 0 : index
      %c0_14 = arith.constant 0 : index
      %16 = vector.load %arg6[%c0_13, %c0_14] : memref<1x256xf32, #tpu.memory_space<vmem>>, vector<1x256xf32>
      %17 = vector.broadcast %16 : vector<1x256xf32> to vector<32x256xf32>
      %18 = arith.addf %15, %17 : vector<32x256xf32>
      %c0_15 = arith.constant 0 : index
      %c0_16 = arith.constant 0 : index
      %19 = vector.load %arg7[%c0_15, %c0_16] : memref<32x256xf32, #tpu.memory_space<vmem>>, vector<32x256xf32>
      tpu.vector_store %arg7[%c0_15, %c0_16], %18 {strides = array<i32>} : memref<32x256xf32, #tpu.memory_space<vmem>>, vector<32x256xf32>,
    } else {
    }
    return
  }
  func.func @transform_0(%arg0: i32, %arg1: i32, %arg2: i32) -> (i32, i32) {
    %c0_i32 = arith.constant 0 : i32
    return %arg0, %arg2 : i32, i32
  }
  func.func @transform_1(%arg0: i32, %arg1: i32, %arg2: i32) -> (i32, i32) {
    %c0_i32 = arith.constant 0 : i32
    return %arg2, %arg1 : i32, i32
  }
  func.func @transform_2(%arg0: i32, %arg1: i32, %arg2: i32) -> (i32, i32) {
    %c0_i32 = arith.constant 0 : i32
    %c0_i32_0 = arith.constant 0 : i32
    return %c0_i32, %arg1 : i32, i32
  }
  func.func @transform_3(%arg0: i32, %arg1: i32, %arg2: i32) -> (i32, i32) {
    %c0_i32 = arith.constant 0 : i32
    %c0_i32_0 = arith.constant 0 : i32
    return %c0_i32, %arg1 : i32, i32
  }
  func.func @transform_4(%arg0: i32, %arg1: i32, %arg2: i32) -> (i32, i32) {
    %c0_i32 = arith.constant 0 : i32
    return %arg0, %arg1 : i32, i32
  }
}

module attributes {stable_mosaic.version = 11 : i64} {
  func.func @_bn_act_kernel(%arg0: i32, %arg1: memref<8x256xf32, #tpu.memory_space<vmem>>, %arg2: memref<1x256xf32, #tpu.memory_space<vmem>>, %arg3: memref<1x256xf32, #tpu.memory_space<vmem>>, %arg4: memref<8x256xbf16, #tpu.memory_space<vmem>>) attributes {dimension_semantics = [#tpu.dimension_semantics<parallel>], iteration_bounds = array<i64: 1>, scalar_prefetch = 0 : i64, scratch_operands = 0 : i64, tpu.core_type = #tpu.core_type<tc>, window_params = [{transform_indices = @transform_0, window_bounds = array<i64: 8, 256>}, {pipeline_mode = #tpu.pipeline_mode<synchronous>, transform_indices = @transform_1, window_bounds = array<i64: 1, 256>}, {pipeline_mode = #tpu.pipeline_mode<synchronous>, transform_indices = @transform_2, window_bounds = array<i64: 1, 256>}, {transform_indices = @transform_3, window_bounds = array<i64: 8, 256>}]} {
    %c0 = arith.constant 0 : index
    %c0_0 = arith.constant 0 : index
    %0 = vector.load %arg1[%c0, %c0_0] : memref<8x256xf32, #tpu.memory_space<vmem>>, vector<8x256xf32>
    %c0_1 = arith.constant 0 : index
    %c0_2 = arith.constant 0 : index
    %1 = vector.load %arg2[%c0_1, %c0_2] : memref<1x256xf32, #tpu.memory_space<vmem>>, vector<1x256xf32>
    %2 = vector.broadcast %1 : vector<1x256xf32> to vector<8x256xf32>
    %3 = arith.mulf %0, %2 : vector<8x256xf32>
    %c0_3 = arith.constant 0 : index
    %c0_4 = arith.constant 0 : index
    %4 = vector.load %arg3[%c0_3, %c0_4] : memref<1x256xf32, #tpu.memory_space<vmem>>, vector<1x256xf32>
    %5 = vector.broadcast %4 : vector<1x256xf32> to vector<8x256xf32>
    %6 = arith.addf %3, %5 : vector<8x256xf32>
    %cst = arith.constant 0.000000e+00 : f32
    %7 = vector.broadcast %cst : f32 to vector<8x256xf32>
    %8 = arith.maximumf %6, %7 : vector<8x256xf32>
    %9 = arith.truncf %8 : vector<8x256xf32> to vector<8x256xbf16>
    %c0_5 = arith.constant 0 : index
    %c0_6 = arith.constant 0 : index
    %10 = vector.load %arg4[%c0_5, %c0_6] : memref<8x256xbf16, #tpu.memory_space<vmem>>, vector<8x256xbf16>
    tpu.vector_store %arg4[%c0_5, %c0_6], %9 {strides = array<i32>} : memref<8x256xbf16, #tpu.memory_space<vmem>>, vector<8x256xbf16>,
    return
  }
  func.func @transform_0(%arg0: i32) -> (i32, i32) {
    %c0_i32 = arith.constant 0 : i32
    %c0_i32_0 = arith.constant 0 : i32
    return %arg0, %c0_i32 : i32, i32
  }
  func.func @transform_1(%arg0: i32) -> (i32, i32) {
    %c0_i32 = arith.constant 0 : i32
    %c0_i32_0 = arith.constant 0 : i32
    %c0_i32_1 = arith.constant 0 : i32
    return %c0_i32, %c0_i32_0 : i32, i32
  }
  func.func @transform_2(%arg0: i32) -> (i32, i32) {
    %c0_i32 = arith.constant 0 : i32
    %c0_i32_0 = arith.constant 0 : i32
    %c0_i32_1 = arith.constant 0 : i32
    return %c0_i32, %c0_i32_0 : i32, i32
  }
  func.func @transform_3(%arg0: i32) -> (i32, i32) {
    %c0_i32 = arith.constant 0 : i32
    %c0_i32_0 = arith.constant 0 : i32
    return %arg0, %c0_i32 : i32, i32
  }
}

module attributes {stable_mosaic.version = 11 : i64} {
  func.func @_mm_epilogue_kernel(%arg0: i32, %arg1: i32, %arg2: i32, %arg3: memref<8x256xbf16, #tpu.memory_space<vmem>>, %arg4: memref<256x128xbf16, #tpu.memory_space<vmem>>, %arg5: memref<1x128xf32, #tpu.memory_space<vmem>>, %arg6: memref<1x128xf32, #tpu.memory_space<vmem>>, %arg7: memref<8x128xbf16, #tpu.memory_space<vmem>>, %arg8: memref<8x128xf32, #tpu.memory_space<vmem>>) attributes {dimension_semantics = [#tpu.dimension_semantics<parallel>, #tpu.dimension_semantics<parallel>, #tpu.dimension_semantics<arbitrary>], iteration_bounds = array<i64: 1, 1, 1>, scalar_prefetch = 0 : i64, scratch_operands = 1 : i64, tpu.core_type = #tpu.core_type<tc>, window_params = [{transform_indices = @transform_0, window_bounds = array<i64: 8, 256>}, {transform_indices = @transform_1, window_bounds = array<i64: 256, 128>}, {transform_indices = @transform_2, window_bounds = array<i64: 1, 128>}, {transform_indices = @transform_3, window_bounds = array<i64: 1, 128>}, {transform_indices = @transform_4, window_bounds = array<i64: 8, 128>}]} {
    %c0_i32 = arith.constant 0 : i32
    %0 = arith.cmpi eq, %arg2, %c0_i32 : i32
    %1 = arith.extui %0 : i1 to i32
    %c0_i32_0 = arith.constant 0 : i32
    %2 = arith.cmpi ne, %1, %c0_i32_0 : i32
    scf.if %2 {
      %cst_10 = arith.constant 0.000000e+00 : f32
      %12 = vector.broadcast %cst_10 : f32 to vector<8x128xf32>
      %c0_11 = arith.constant 0 : index
      %c0_12 = arith.constant 0 : index
      %13 = vector.load %arg8[%c0_11, %c0_12] : memref<8x128xf32, #tpu.memory_space<vmem>>, vector<8x128xf32>
      tpu.vector_store %arg8[%c0_11, %c0_12], %12 {strides = array<i32>} : memref<8x128xf32, #tpu.memory_space<vmem>>, vector<8x128xf32>,
    } else {
    }
    %c0 = arith.constant 0 : index
    %c0_1 = arith.constant 0 : index
    %3 = vector.load %arg8[%c0, %c0_1] : memref<8x128xf32, #tpu.memory_space<vmem>>, vector<8x128xf32>
    %c0_2 = arith.constant 0 : index
    %c0_3 = arith.constant 0 : index
    %4 = vector.load %arg3[%c0_2, %c0_3] : memref<8x256xbf16, #tpu.memory_space<vmem>>, vector<8x256xbf16>
    %c0_4 = arith.constant 0 : index
    %c0_5 = arith.constant 0 : index
    %5 = vector.load %arg4[%c0_4, %c0_5] : memref<256x128xbf16, #tpu.memory_space<vmem>>, vector<256x128xbf16>
    %cst = arith.constant dense<0.000000e+00> : vector<8x128xf32>
    %6 = tpu.matmul %4, %5, %cst {dimension_numbers = #tpu.dot_dimension_numbers<[1], [0], [0], [1], [0, 0, 1, 1], [], []>} : vector<8x256xbf16>, vector<256x128xbf16>, vector<8x128xf32> -> vector<8x128xf32>
    %7 = arith.addf %3, %6 : vector<8x128xf32>
    %c0_6 = arith.constant 0 : index
    %c0_7 = arith.constant 0 : index
    %8 = vector.load %arg8[%c0_6, %c0_7] : memref<8x128xf32, #tpu.memory_space<vmem>>, vector<8x128xf32>
    tpu.vector_store %arg8[%c0_6, %c0_7], %7 {strides = array<i32>} : memref<8x128xf32, #tpu.memory_space<vmem>>, vector<8x128xf32>,
    %c0_i32_8 = arith.constant 0 : i32
    %9 = arith.cmpi eq, %arg2, %c0_i32_8 : i32
    %10 = arith.extui %9 : i1 to i32
    %c0_i32_9 = arith.constant 0 : i32
    %11 = arith.cmpi ne, %10, %c0_i32_9 : i32
    scf.if %11 {
      %c0_10 = arith.constant 0 : index
      %c0_11 = arith.constant 0 : index
      %12 = vector.load %arg8[%c0_10, %c0_11] : memref<8x128xf32, #tpu.memory_space<vmem>>, vector<8x128xf32>
      %c0_12 = arith.constant 0 : index
      %c0_13 = arith.constant 0 : index
      %13 = vector.load %arg5[%c0_12, %c0_13] : memref<1x128xf32, #tpu.memory_space<vmem>>, vector<1x128xf32>
      %14 = vector.broadcast %13 : vector<1x128xf32> to vector<8x128xf32>
      %15 = arith.mulf %12, %14 : vector<8x128xf32>
      %c0_14 = arith.constant 0 : index
      %c0_15 = arith.constant 0 : index
      %16 = vector.load %arg6[%c0_14, %c0_15] : memref<1x128xf32, #tpu.memory_space<vmem>>, vector<1x128xf32>
      %17 = vector.broadcast %16 : vector<1x128xf32> to vector<8x128xf32>
      %18 = arith.addf %15, %17 : vector<8x128xf32>
      %cst_16 = arith.constant 0.000000e+00 : f32
      %19 = vector.broadcast %cst_16 : f32 to vector<8x128xf32>
      %20 = arith.maximumf %18, %19 : vector<8x128xf32>
      %21 = arith.truncf %20 : vector<8x128xf32> to vector<8x128xbf16>
      %c0_17 = arith.constant 0 : index
      %c0_18 = arith.constant 0 : index
      %22 = vector.load %arg7[%c0_17, %c0_18] : memref<8x128xbf16, #tpu.memory_space<vmem>>, vector<8x128xbf16>
      tpu.vector_store %arg7[%c0_17, %c0_18], %21 {strides = array<i32>} : memref<8x128xbf16, #tpu.memory_space<vmem>>, vector<8x128xbf16>,
    } else {
    }
    return
  }
  func.func @transform_0(%arg0: i32, %arg1: i32, %arg2: i32) -> (i32, i32) {
    %c0_i32 = arith.constant 0 : i32
    return %arg0, %arg2 : i32, i32
  }
  func.func @transform_1(%arg0: i32, %arg1: i32, %arg2: i32) -> (i32, i32) {
    %c0_i32 = arith.constant 0 : i32
    return %arg2, %arg1 : i32, i32
  }
  func.func @transform_2(%arg0: i32, %arg1: i32, %arg2: i32) -> (i32, i32) {
    %c0_i32 = arith.constant 0 : i32
    %c0_i32_0 = arith.constant 0 : i32
    return %c0_i32, %arg1 : i32, i32
  }
  func.func @transform_3(%arg0: i32, %arg1: i32, %arg2: i32) -> (i32, i32) {
    %c0_i32 = arith.constant 0 : i32
    %c0_i32_0 = arith.constant 0 : i32
    return %c0_i32, %arg1 : i32, i32
  }
  func.func @transform_4(%arg0: i32, %arg1: i32, %arg2: i32) -> (i32, i32) {
    %c0_i32 = arith.constant 0 : i32
    return %arg0, %arg1 : i32, i32
  }
}

module attributes {stable_mosaic.version = 11 : i64} {
  func.func @_mm_epilogue_kernel(%arg0: i32, %arg1: i32, %arg2: i32, %arg3: memref<8x128xbf16, #tpu.memory_space<vmem>>, %arg4: memref<128x128xbf16, #tpu.memory_space<vmem>>, %arg5: memref<1x128xf32, #tpu.memory_space<vmem>>, %arg6: memref<1x128xf32, #tpu.memory_space<vmem>>, %arg7: memref<8x128xf32, #tpu.memory_space<vmem>>, %arg8: memref<8x128xf32, #tpu.memory_space<vmem>>) attributes {dimension_semantics = [#tpu.dimension_semantics<parallel>, #tpu.dimension_semantics<parallel>, #tpu.dimension_semantics<arbitrary>], iteration_bounds = array<i64: 1, 1, 9>, scalar_prefetch = 0 : i64, scratch_operands = 1 : i64, tpu.core_type = #tpu.core_type<tc>, window_params = [{transform_indices = @transform_0, window_bounds = array<i64: 8, 128>}, {transform_indices = @transform_1, window_bounds = array<i64: 128, 128>}, {transform_indices = @transform_2, window_bounds = array<i64: 1, 128>}, {transform_indices = @transform_3, window_bounds = array<i64: 1, 128>}, {transform_indices = @transform_4, window_bounds = array<i64: 8, 128>}]} {
    %c0_i32 = arith.constant 0 : i32
    %0 = arith.cmpi eq, %arg2, %c0_i32 : i32
    %1 = arith.extui %0 : i1 to i32
    %c0_i32_0 = arith.constant 0 : i32
    %2 = arith.cmpi ne, %1, %c0_i32_0 : i32
    scf.if %2 {
      %cst_9 = arith.constant 0.000000e+00 : f32
      %12 = vector.broadcast %cst_9 : f32 to vector<8x128xf32>
      %c0_10 = arith.constant 0 : index
      %c0_11 = arith.constant 0 : index
      %13 = vector.load %arg8[%c0_10, %c0_11] : memref<8x128xf32, #tpu.memory_space<vmem>>, vector<8x128xf32>
      tpu.vector_store %arg8[%c0_10, %c0_11], %12 {strides = array<i32>} : memref<8x128xf32, #tpu.memory_space<vmem>>, vector<8x128xf32>,
    } else {
    }
    %c0 = arith.constant 0 : index
    %c0_1 = arith.constant 0 : index
    %3 = vector.load %arg8[%c0, %c0_1] : memref<8x128xf32, #tpu.memory_space<vmem>>, vector<8x128xf32>
    %c0_2 = arith.constant 0 : index
    %c0_3 = arith.constant 0 : index
    %4 = vector.load %arg3[%c0_2, %c0_3] : memref<8x128xbf16, #tpu.memory_space<vmem>>, vector<8x128xbf16>
    %c0_4 = arith.constant 0 : index
    %c0_5 = arith.constant 0 : index
    %5 = vector.load %arg4[%c0_4, %c0_5] : memref<128x128xbf16, #tpu.memory_space<vmem>>, vector<128x128xbf16>
    %cst = arith.constant dense<0.000000e+00> : vector<8x128xf32>
    %6 = tpu.matmul %4, %5, %cst {dimension_numbers = #tpu.dot_dimension_numbers<[1], [0], [0], [1], [0, 0, 1, 1], [], []>} : vector<8x128xbf16>, vector<128x128xbf16>, vector<8x128xf32> -> vector<8x128xf32>
    %7 = arith.addf %3, %6 : vector<8x128xf32>
    %c0_6 = arith.constant 0 : index
    %c0_7 = arith.constant 0 : index
    %8 = vector.load %arg8[%c0_6, %c0_7] : memref<8x128xf32, #tpu.memory_space<vmem>>, vector<8x128xf32>
    tpu.vector_store %arg8[%c0_6, %c0_7], %7 {strides = array<i32>} : memref<8x128xf32, #tpu.memory_space<vmem>>, vector<8x128xf32>,
    %c8_i32 = arith.constant 8 : i32
    %9 = arith.cmpi eq, %arg2, %c8_i32 : i32
    %10 = arith.extui %9 : i1 to i32
    %c0_i32_8 = arith.constant 0 : i32
    %11 = arith.cmpi ne, %10, %c0_i32_8 : i32
    scf.if %11 {
      %c0_9 = arith.constant 0 : index
      %c0_10 = arith.constant 0 : index
      %12 = vector.load %arg8[%c0_9, %c0_10] : memref<8x128xf32, #tpu.memory_space<vmem>>, vector<8x128xf32>
      %c0_11 = arith.constant 0 : index
      %c0_12 = arith.constant 0 : index
      %13 = vector.load %arg5[%c0_11, %c0_12] : memref<1x128xf32, #tpu.memory_space<vmem>>, vector<1x128xf32>
      %14 = vector.broadcast %13 : vector<1x128xf32> to vector<8x128xf32>
      %15 = arith.mulf %12, %14 : vector<8x128xf32>
      %c0_13 = arith.constant 0 : index
      %c0_14 = arith.constant 0 : index
      %16 = vector.load %arg6[%c0_13, %c0_14] : memref<1x128xf32, #tpu.memory_space<vmem>>, vector<1x128xf32>
      %17 = vector.broadcast %16 : vector<1x128xf32> to vector<8x128xf32>
      %18 = arith.addf %15, %17 : vector<8x128xf32>
      %c0_15 = arith.constant 0 : index
      %c0_16 = arith.constant 0 : index
      %19 = vector.load %arg7[%c0_15, %c0_16] : memref<8x128xf32, #tpu.memory_space<vmem>>, vector<8x128xf32>
      tpu.vector_store %arg7[%c0_15, %c0_16], %18 {strides = array<i32>} : memref<8x128xf32, #tpu.memory_space<vmem>>, vector<8x128xf32>,
    } else {
    }
    return
  }
  func.func @transform_0(%arg0: i32, %arg1: i32, %arg2: i32) -> (i32, i32) {
    %c0_i32 = arith.constant 0 : i32
    return %arg0, %arg2 : i32, i32
  }
  func.func @transform_1(%arg0: i32, %arg1: i32, %arg2: i32) -> (i32, i32) {
    %c0_i32 = arith.constant 0 : i32
    return %arg2, %arg1 : i32, i32
  }
  func.func @transform_2(%arg0: i32, %arg1: i32, %arg2: i32) -> (i32, i32) {
    %c0_i32 = arith.constant 0 : i32
    %c0_i32_0 = arith.constant 0 : i32
    return %c0_i32, %arg1 : i32, i32
  }
  func.func @transform_3(%arg0: i32, %arg1: i32, %arg2: i32) -> (i32, i32) {
    %c0_i32 = arith.constant 0 : i32
    %c0_i32_0 = arith.constant 0 : i32
    return %c0_i32, %arg1 : i32, i32
  }
  func.func @transform_4(%arg0: i32, %arg1: i32, %arg2: i32) -> (i32, i32) {
    %c0_i32 = arith.constant 0 : i32
    return %arg0, %arg1 : i32, i32
  }
}

module attributes {stable_mosaic.version = 11 : i64} {
  func.func @_bn_act_kernel(%arg0: i32, %arg1: memref<8x384xf32, #tpu.memory_space<vmem>>, %arg2: memref<1x384xf32, #tpu.memory_space<vmem>>, %arg3: memref<1x384xf32, #tpu.memory_space<vmem>>, %arg4: memref<8x384xbf16, #tpu.memory_space<vmem>>) attributes {dimension_semantics = [#tpu.dimension_semantics<parallel>], iteration_bounds = array<i64: 1>, scalar_prefetch = 0 : i64, scratch_operands = 0 : i64, tpu.core_type = #tpu.core_type<tc>, window_params = [{transform_indices = @transform_0, window_bounds = array<i64: 8, 384>}, {pipeline_mode = #tpu.pipeline_mode<synchronous>, transform_indices = @transform_1, window_bounds = array<i64: 1, 384>}, {pipeline_mode = #tpu.pipeline_mode<synchronous>, transform_indices = @transform_2, window_bounds = array<i64: 1, 384>}, {transform_indices = @transform_3, window_bounds = array<i64: 8, 384>}]} {
    %c0 = arith.constant 0 : index
    %c0_0 = arith.constant 0 : index
    %0 = vector.load %arg1[%c0, %c0_0] : memref<8x384xf32, #tpu.memory_space<vmem>>, vector<8x384xf32>
    %c0_1 = arith.constant 0 : index
    %c0_2 = arith.constant 0 : index
    %1 = vector.load %arg2[%c0_1, %c0_2] : memref<1x384xf32, #tpu.memory_space<vmem>>, vector<1x384xf32>
    %2 = vector.broadcast %1 : vector<1x384xf32> to vector<8x384xf32>
    %3 = arith.mulf %0, %2 : vector<8x384xf32>
    %c0_3 = arith.constant 0 : index
    %c0_4 = arith.constant 0 : index
    %4 = vector.load %arg3[%c0_3, %c0_4] : memref<1x384xf32, #tpu.memory_space<vmem>>, vector<1x384xf32>
    %5 = vector.broadcast %4 : vector<1x384xf32> to vector<8x384xf32>
    %6 = arith.addf %3, %5 : vector<8x384xf32>
    %cst = arith.constant 0.000000e+00 : f32
    %7 = vector.broadcast %cst : f32 to vector<8x384xf32>
    %8 = arith.maximumf %6, %7 : vector<8x384xf32>
    %9 = arith.truncf %8 : vector<8x384xf32> to vector<8x384xbf16>
    %c0_5 = arith.constant 0 : index
    %c0_6 = arith.constant 0 : index
    %10 = vector.load %arg4[%c0_5, %c0_6] : memref<8x384xbf16, #tpu.memory_space<vmem>>, vector<8x384xbf16>
    tpu.vector_store %arg4[%c0_5, %c0_6], %9 {strides = array<i32>} : memref<8x384xbf16, #tpu.memory_space<vmem>>, vector<8x384xbf16>,
    return
  }
  func.func @transform_0(%arg0: i32) -> (i32, i32) {
    %c0_i32 = arith.constant 0 : i32
    %c0_i32_0 = arith.constant 0 : i32
    return %arg0, %c0_i32 : i32, i32
  }
  func.func @transform_1(%arg0: i32) -> (i32, i32) {
    %c0_i32 = arith.constant 0 : i32
    %c0_i32_0 = arith.constant 0 : i32
    %c0_i32_1 = arith.constant 0 : i32
    return %c0_i32, %c0_i32_0 : i32, i32
  }
  func.func @transform_2(%arg0: i32) -> (i32, i32) {
    %c0_i32 = arith.constant 0 : i32
    %c0_i32_0 = arith.constant 0 : i32
    %c0_i32_1 = arith.constant 0 : i32
    return %c0_i32, %c0_i32_0 : i32, i32
  }
  func.func @transform_3(%arg0: i32) -> (i32, i32) {
    %c0_i32 = arith.constant 0 : i32
    %c0_i32_0 = arith.constant 0 : i32
    return %arg0, %c0_i32 : i32, i32
  }
}

module attributes {stable_mosaic.version = 11 : i64} {
  func.func @_mm_epilogue_kernel(%arg0: i32, %arg1: i32, %arg2: i32, %arg3: memref<8x128xbf16, #tpu.memory_space<vmem>>, %arg4: memref<128x128xbf16, #tpu.memory_space<vmem>>, %arg5: memref<1x128xf32, #tpu.memory_space<vmem>>, %arg6: memref<1x128xf32, #tpu.memory_space<vmem>>, %arg7: memref<8x128xbf16, #tpu.memory_space<vmem>>, %arg8: memref<8x128xf32, #tpu.memory_space<vmem>>) attributes {dimension_semantics = [#tpu.dimension_semantics<parallel>, #tpu.dimension_semantics<parallel>, #tpu.dimension_semantics<arbitrary>], iteration_bounds = array<i64: 1, 1, 3>, scalar_prefetch = 0 : i64, scratch_operands = 1 : i64, tpu.core_type = #tpu.core_type<tc>, window_params = [{transform_indices = @transform_0, window_bounds = array<i64: 8, 128>}, {transform_indices = @transform_1, window_bounds = array<i64: 128, 128>}, {transform_indices = @transform_2, window_bounds = array<i64: 1, 128>}, {transform_indices = @transform_3, window_bounds = array<i64: 1, 128>}, {transform_indices = @transform_4, window_bounds = array<i64: 8, 128>}]} {
    %c0_i32 = arith.constant 0 : i32
    %0 = arith.cmpi eq, %arg2, %c0_i32 : i32
    %1 = arith.extui %0 : i1 to i32
    %c0_i32_0 = arith.constant 0 : i32
    %2 = arith.cmpi ne, %1, %c0_i32_0 : i32
    scf.if %2 {
      %cst_9 = arith.constant 0.000000e+00 : f32
      %12 = vector.broadcast %cst_9 : f32 to vector<8x128xf32>
      %c0_10 = arith.constant 0 : index
      %c0_11 = arith.constant 0 : index
      %13 = vector.load %arg8[%c0_10, %c0_11] : memref<8x128xf32, #tpu.memory_space<vmem>>, vector<8x128xf32>
      tpu.vector_store %arg8[%c0_10, %c0_11], %12 {strides = array<i32>} : memref<8x128xf32, #tpu.memory_space<vmem>>, vector<8x128xf32>,
    } else {
    }
    %c0 = arith.constant 0 : index
    %c0_1 = arith.constant 0 : index
    %3 = vector.load %arg8[%c0, %c0_1] : memref<8x128xf32, #tpu.memory_space<vmem>>, vector<8x128xf32>
    %c0_2 = arith.constant 0 : index
    %c0_3 = arith.constant 0 : index
    %4 = vector.load %arg3[%c0_2, %c0_3] : memref<8x128xbf16, #tpu.memory_space<vmem>>, vector<8x128xbf16>
    %c0_4 = arith.constant 0 : index
    %c0_5 = arith.constant 0 : index
    %5 = vector.load %arg4[%c0_4, %c0_5] : memref<128x128xbf16, #tpu.memory_space<vmem>>, vector<128x128xbf16>
    %cst = arith.constant dense<0.000000e+00> : vector<8x128xf32>
    %6 = tpu.matmul %4, %5, %cst {dimension_numbers = #tpu.dot_dimension_numbers<[1], [0], [0], [1], [0, 0, 1, 1], [], []>} : vector<8x128xbf16>, vector<128x128xbf16>, vector<8x128xf32> -> vector<8x128xf32>
    %7 = arith.addf %3, %6 : vector<8x128xf32>
    %c0_6 = arith.constant 0 : index
    %c0_7 = arith.constant 0 : index
    %8 = vector.load %arg8[%c0_6, %c0_7] : memref<8x128xf32, #tpu.memory_space<vmem>>, vector<8x128xf32>
    tpu.vector_store %arg8[%c0_6, %c0_7], %7 {strides = array<i32>} : memref<8x128xf32, #tpu.memory_space<vmem>>, vector<8x128xf32>,
    %c2_i32 = arith.constant 2 : i32
    %9 = arith.cmpi eq, %arg2, %c2_i32 : i32
    %10 = arith.extui %9 : i1 to i32
    %c0_i32_8 = arith.constant 0 : i32
    %11 = arith.cmpi ne, %10, %c0_i32_8 : i32
    scf.if %11 {
      %c0_9 = arith.constant 0 : index
      %c0_10 = arith.constant 0 : index
      %12 = vector.load %arg8[%c0_9, %c0_10] : memref<8x128xf32, #tpu.memory_space<vmem>>, vector<8x128xf32>
      %c0_11 = arith.constant 0 : index
      %c0_12 = arith.constant 0 : index
      %13 = vector.load %arg5[%c0_11, %c0_12] : memref<1x128xf32, #tpu.memory_space<vmem>>, vector<1x128xf32>
      %14 = vector.broadcast %13 : vector<1x128xf32> to vector<8x128xf32>
      %15 = arith.mulf %12, %14 : vector<8x128xf32>
      %c0_13 = arith.constant 0 : index
      %c0_14 = arith.constant 0 : index
      %16 = vector.load %arg6[%c0_13, %c0_14] : memref<1x128xf32, #tpu.memory_space<vmem>>, vector<1x128xf32>
      %17 = vector.broadcast %16 : vector<1x128xf32> to vector<8x128xf32>
      %18 = arith.addf %15, %17 : vector<8x128xf32>
      %cst_15 = arith.constant 0.000000e+00 : f32
      %19 = vector.broadcast %cst_15 : f32 to vector<8x128xf32>
      %20 = arith.maximumf %18, %19 : vector<8x128xf32>
      %21 = arith.truncf %20 : vector<8x128xf32> to vector<8x128xbf16>
      %c0_16 = arith.constant 0 : index
      %c0_17 = arith.constant 0 : index
      %22 = vector.load %arg7[%c0_16, %c0_17] : memref<8x128xbf16, #tpu.memory_space<vmem>>, vector<8x128xbf16>
      tpu.vector_store %arg7[%c0_16, %c0_17], %21 {strides = array<i32>} : memref<8x128xbf16, #tpu.memory_space<vmem>>, vector<8x128xbf16>,
    } else {
    }
    return
  }
  func.func @transform_0(%arg0: i32, %arg1: i32, %arg2: i32) -> (i32, i32) {
    %c0_i32 = arith.constant 0 : i32
    return %arg0, %arg2 : i32, i32
  }
  func.func @transform_1(%arg0: i32, %arg1: i32, %arg2: i32) -> (i32, i32) {
    %c0_i32 = arith.constant 0 : i32
    return %arg2, %arg1 : i32, i32
  }
  func.func @transform_2(%arg0: i32, %arg1: i32, %arg2: i32) -> (i32, i32) {
    %c0_i32 = arith.constant 0 : i32
    %c0_i32_0 = arith.constant 0 : i32
    return %c0_i32, %arg1 : i32, i32
  }
  func.func @transform_3(%arg0: i32, %arg1: i32, %arg2: i32) -> (i32, i32) {
    %c0_i32 = arith.constant 0 : i32
    %c0_i32_0 = arith.constant 0 : i32
    return %c0_i32, %arg1 : i32, i32
  }
  func.func @transform_4(%arg0: i32, %arg1: i32, %arg2: i32) -> (i32, i32) {
    %c0_i32 = arith.constant 0 : i32
    return %arg0, %arg1 : i32, i32
  }
}

module attributes {stable_mosaic.version = 11 : i64} {
  func.func @_mm_epilogue_kernel(%arg0: i32, %arg1: i32, %arg2: i32, %arg3: memref<8x256xbf16, #tpu.memory_space<vmem>>, %arg4: memref<256x128xbf16, #tpu.memory_space<vmem>>, %arg5: memref<1x128xf32, #tpu.memory_space<vmem>>, %arg6: memref<1x128xf32, #tpu.memory_space<vmem>>, %arg7: memref<8x128xbf16, #tpu.memory_space<vmem>>, %arg8: memref<8x128xf32, #tpu.memory_space<vmem>>) attributes {dimension_semantics = [#tpu.dimension_semantics<parallel>, #tpu.dimension_semantics<parallel>, #tpu.dimension_semantics<arbitrary>], iteration_bounds = array<i64: 1, 1, 2>, scalar_prefetch = 0 : i64, scratch_operands = 1 : i64, tpu.core_type = #tpu.core_type<tc>, window_params = [{transform_indices = @transform_0, window_bounds = array<i64: 8, 256>}, {transform_indices = @transform_1, window_bounds = array<i64: 256, 128>}, {transform_indices = @transform_2, window_bounds = array<i64: 1, 128>}, {transform_indices = @transform_3, window_bounds = array<i64: 1, 128>}, {transform_indices = @transform_4, window_bounds = array<i64: 8, 128>}]} {
    %c0_i32 = arith.constant 0 : i32
    %0 = arith.cmpi eq, %arg2, %c0_i32 : i32
    %1 = arith.extui %0 : i1 to i32
    %c0_i32_0 = arith.constant 0 : i32
    %2 = arith.cmpi ne, %1, %c0_i32_0 : i32
    scf.if %2 {
      %cst_9 = arith.constant 0.000000e+00 : f32
      %12 = vector.broadcast %cst_9 : f32 to vector<8x128xf32>
      %c0_10 = arith.constant 0 : index
      %c0_11 = arith.constant 0 : index
      %13 = vector.load %arg8[%c0_10, %c0_11] : memref<8x128xf32, #tpu.memory_space<vmem>>, vector<8x128xf32>
      tpu.vector_store %arg8[%c0_10, %c0_11], %12 {strides = array<i32>} : memref<8x128xf32, #tpu.memory_space<vmem>>, vector<8x128xf32>,
    } else {
    }
    %c0 = arith.constant 0 : index
    %c0_1 = arith.constant 0 : index
    %3 = vector.load %arg8[%c0, %c0_1] : memref<8x128xf32, #tpu.memory_space<vmem>>, vector<8x128xf32>
    %c0_2 = arith.constant 0 : index
    %c0_3 = arith.constant 0 : index
    %4 = vector.load %arg3[%c0_2, %c0_3] : memref<8x256xbf16, #tpu.memory_space<vmem>>, vector<8x256xbf16>
    %c0_4 = arith.constant 0 : index
    %c0_5 = arith.constant 0 : index
    %5 = vector.load %arg4[%c0_4, %c0_5] : memref<256x128xbf16, #tpu.memory_space<vmem>>, vector<256x128xbf16>
    %cst = arith.constant dense<0.000000e+00> : vector<8x128xf32>
    %6 = tpu.matmul %4, %5, %cst {dimension_numbers = #tpu.dot_dimension_numbers<[1], [0], [0], [1], [0, 0, 1, 1], [], []>} : vector<8x256xbf16>, vector<256x128xbf16>, vector<8x128xf32> -> vector<8x128xf32>
    %7 = arith.addf %3, %6 : vector<8x128xf32>
    %c0_6 = arith.constant 0 : index
    %c0_7 = arith.constant 0 : index
    %8 = vector.load %arg8[%c0_6, %c0_7] : memref<8x128xf32, #tpu.memory_space<vmem>>, vector<8x128xf32>
    tpu.vector_store %arg8[%c0_6, %c0_7], %7 {strides = array<i32>} : memref<8x128xf32, #tpu.memory_space<vmem>>, vector<8x128xf32>,
    %c1_i32 = arith.constant 1 : i32
    %9 = arith.cmpi eq, %arg2, %c1_i32 : i32
    %10 = arith.extui %9 : i1 to i32
    %c0_i32_8 = arith.constant 0 : i32
    %11 = arith.cmpi ne, %10, %c0_i32_8 : i32
    scf.if %11 {
      %c0_9 = arith.constant 0 : index
      %c0_10 = arith.constant 0 : index
      %12 = vector.load %arg8[%c0_9, %c0_10] : memref<8x128xf32, #tpu.memory_space<vmem>>, vector<8x128xf32>
      %c0_11 = arith.constant 0 : index
      %c0_12 = arith.constant 0 : index
      %13 = vector.load %arg5[%c0_11, %c0_12] : memref<1x128xf32, #tpu.memory_space<vmem>>, vector<1x128xf32>
      %14 = vector.broadcast %13 : vector<1x128xf32> to vector<8x128xf32>
      %15 = arith.mulf %12, %14 : vector<8x128xf32>
      %c0_13 = arith.constant 0 : index
      %c0_14 = arith.constant 0 : index
      %16 = vector.load %arg6[%c0_13, %c0_14] : memref<1x128xf32, #tpu.memory_space<vmem>>, vector<1x128xf32>
      %17 = vector.broadcast %16 : vector<1x128xf32> to vector<8x128xf32>
      %18 = arith.addf %15, %17 : vector<8x128xf32>
      %cst_15 = arith.constant 0.000000e+00 : f32
      %19 = vector.broadcast %cst_15 : f32 to vector<8x128xf32>
      %20 = arith.maximumf %18, %19 : vector<8x128xf32>
      %21 = arith.truncf %20 : vector<8x128xf32> to vector<8x128xbf16>
      %c0_16 = arith.constant 0 : index
      %c0_17 = arith.constant 0 : index
      %22 = vector.load %arg7[%c0_16, %c0_17] : memref<8x128xbf16, #tpu.memory_space<vmem>>, vector<8x128xbf16>
      tpu.vector_store %arg7[%c0_16, %c0_17], %21 {strides = array<i32>} : memref<8x128xbf16, #tpu.memory_space<vmem>>, vector<8x128xbf16>,
    } else {
    }
    return
  }
  func.func @transform_0(%arg0: i32, %arg1: i32, %arg2: i32) -> (i32, i32) {
    %c0_i32 = arith.constant 0 : i32
    return %arg0, %arg2 : i32, i32
  }
  func.func @transform_1(%arg0: i32, %arg1: i32, %arg2: i32) -> (i32, i32) {
    %c0_i32 = arith.constant 0 : i32
    return %arg2, %arg1 : i32, i32
  }
  func.func @transform_2(%arg0: i32, %arg1: i32, %arg2: i32) -> (i32, i32) {
    %c0_i32 = arith.constant 0 : i32
    %c0_i32_0 = arith.constant 0 : i32
    return %c0_i32, %arg1 : i32, i32
  }
  func.func @transform_3(%arg0: i32, %arg1: i32, %arg2: i32) -> (i32, i32) {
    %c0_i32 = arith.constant 0 : i32
    %c0_i32_0 = arith.constant 0 : i32
    return %c0_i32, %arg1 : i32, i32
  }
  func.func @transform_4(%arg0: i32, %arg1: i32, %arg2: i32) -> (i32, i32) {
    %c0_i32 = arith.constant 0 : i32
    return %arg0, %arg1 : i32, i32
  }
}

module attributes {stable_mosaic.version = 11 : i64} {
  func.func @_bn_act_kernel(%arg0: i32, %arg1: memref<8x512xf32, #tpu.memory_space<vmem>>, %arg2: memref<1x512xf32, #tpu.memory_space<vmem>>, %arg3: memref<1x512xf32, #tpu.memory_space<vmem>>, %arg4: memref<8x512xbf16, #tpu.memory_space<vmem>>) attributes {dimension_semantics = [#tpu.dimension_semantics<parallel>], iteration_bounds = array<i64: 1>, scalar_prefetch = 0 : i64, scratch_operands = 0 : i64, tpu.core_type = #tpu.core_type<tc>, window_params = [{transform_indices = @transform_0, window_bounds = array<i64: 8, 512>}, {pipeline_mode = #tpu.pipeline_mode<synchronous>, transform_indices = @transform_1, window_bounds = array<i64: 1, 512>}, {pipeline_mode = #tpu.pipeline_mode<synchronous>, transform_indices = @transform_2, window_bounds = array<i64: 1, 512>}, {transform_indices = @transform_3, window_bounds = array<i64: 8, 512>}]} {
    %c0 = arith.constant 0 : index
    %c0_0 = arith.constant 0 : index
    %0 = vector.load %arg1[%c0, %c0_0] : memref<8x512xf32, #tpu.memory_space<vmem>>, vector<8x512xf32>
    %c0_1 = arith.constant 0 : index
    %c0_2 = arith.constant 0 : index
    %1 = vector.load %arg2[%c0_1, %c0_2] : memref<1x512xf32, #tpu.memory_space<vmem>>, vector<1x512xf32>
    %2 = vector.broadcast %1 : vector<1x512xf32> to vector<8x512xf32>
    %3 = arith.mulf %0, %2 : vector<8x512xf32>
    %c0_3 = arith.constant 0 : index
    %c0_4 = arith.constant 0 : index
    %4 = vector.load %arg3[%c0_3, %c0_4] : memref<1x512xf32, #tpu.memory_space<vmem>>, vector<1x512xf32>
    %5 = vector.broadcast %4 : vector<1x512xf32> to vector<8x512xf32>
    %6 = arith.addf %3, %5 : vector<8x512xf32>
    %cst = arith.constant 0.000000e+00 : f32
    %7 = vector.broadcast %cst : f32 to vector<8x512xf32>
    %8 = arith.maximumf %6, %7 : vector<8x512xf32>
    %9 = arith.truncf %8 : vector<8x512xf32> to vector<8x512xbf16>
    %c0_5 = arith.constant 0 : index
    %c0_6 = arith.constant 0 : index
    %10 = vector.load %arg4[%c0_5, %c0_6] : memref<8x512xbf16, #tpu.memory_space<vmem>>, vector<8x512xbf16>
    tpu.vector_store %arg4[%c0_5, %c0_6], %9 {strides = array<i32>} : memref<8x512xbf16, #tpu.memory_space<vmem>>, vector<8x512xbf16>,
    return
  }
  func.func @transform_0(%arg0: i32) -> (i32, i32) {
    %c0_i32 = arith.constant 0 : i32
    %c0_i32_0 = arith.constant 0 : i32
    return %arg0, %c0_i32 : i32, i32
  }
  func.func @transform_1(%arg0: i32) -> (i32, i32) {
    %c0_i32 = arith.constant 0 : i32
    %c0_i32_0 = arith.constant 0 : i32
    %c0_i32_1 = arith.constant 0 : i32
    return %c0_i32, %c0_i32_0 : i32, i32
  }
  func.func @transform_2(%arg0: i32) -> (i32, i32) {
    %c0_i32 = arith.constant 0 : i32
    %c0_i32_0 = arith.constant 0 : i32
    %c0_i32_1 = arith.constant 0 : i32
    return %c0_i32, %c0_i32_0 : i32, i32
  }
  func.func @transform_3(%arg0: i32) -> (i32, i32) {
    %c0_i32 = arith.constant 0 : i32
    %c0_i32_0 = arith.constant 0 : i32
    return %arg0, %c0_i32 : i32, i32
  }
}

module attributes {stable_mosaic.version = 11 : i64} {
  func.func @_mm_epilogue_kernel(%arg0: i32, %arg1: i32, %arg2: i32, %arg3: memref<8x128xbf16, #tpu.memory_space<vmem>>, %arg4: memref<128x128xbf16, #tpu.memory_space<vmem>>, %arg5: memref<1x128xf32, #tpu.memory_space<vmem>>, %arg6: memref<1x128xf32, #tpu.memory_space<vmem>>, %arg7: memref<8x128xbf16, #tpu.memory_space<vmem>>, %arg8: memref<8x128xf32, #tpu.memory_space<vmem>>) attributes {dimension_semantics = [#tpu.dimension_semantics<parallel>, #tpu.dimension_semantics<parallel>, #tpu.dimension_semantics<arbitrary>], iteration_bounds = array<i64: 1, 1, 5>, scalar_prefetch = 0 : i64, scratch_operands = 1 : i64, tpu.core_type = #tpu.core_type<tc>, window_params = [{transform_indices = @transform_0, window_bounds = array<i64: 8, 128>}, {transform_indices = @transform_1, window_bounds = array<i64: 128, 128>}, {transform_indices = @transform_2, window_bounds = array<i64: 1, 128>}, {transform_indices = @transform_3, window_bounds = array<i64: 1, 128>}, {transform_indices = @transform_4, window_bounds = array<i64: 8, 128>}]} {
    %c0_i32 = arith.constant 0 : i32
    %0 = arith.cmpi eq, %arg2, %c0_i32 : i32
    %1 = arith.extui %0 : i1 to i32
    %c0_i32_0 = arith.constant 0 : i32
    %2 = arith.cmpi ne, %1, %c0_i32_0 : i32
    scf.if %2 {
      %cst_9 = arith.constant 0.000000e+00 : f32
      %12 = vector.broadcast %cst_9 : f32 to vector<8x128xf32>
      %c0_10 = arith.constant 0 : index
      %c0_11 = arith.constant 0 : index
      %13 = vector.load %arg8[%c0_10, %c0_11] : memref<8x128xf32, #tpu.memory_space<vmem>>, vector<8x128xf32>
      tpu.vector_store %arg8[%c0_10, %c0_11], %12 {strides = array<i32>} : memref<8x128xf32, #tpu.memory_space<vmem>>, vector<8x128xf32>,
    } else {
    }
    %c0 = arith.constant 0 : index
    %c0_1 = arith.constant 0 : index
    %3 = vector.load %arg8[%c0, %c0_1] : memref<8x128xf32, #tpu.memory_space<vmem>>, vector<8x128xf32>
    %c0_2 = arith.constant 0 : index
    %c0_3 = arith.constant 0 : index
    %4 = vector.load %arg3[%c0_2, %c0_3] : memref<8x128xbf16, #tpu.memory_space<vmem>>, vector<8x128xbf16>
    %c0_4 = arith.constant 0 : index
    %c0_5 = arith.constant 0 : index
    %5 = vector.load %arg4[%c0_4, %c0_5] : memref<128x128xbf16, #tpu.memory_space<vmem>>, vector<128x128xbf16>
    %cst = arith.constant dense<0.000000e+00> : vector<8x128xf32>
    %6 = tpu.matmul %4, %5, %cst {dimension_numbers = #tpu.dot_dimension_numbers<[1], [0], [0], [1], [0, 0, 1, 1], [], []>} : vector<8x128xbf16>, vector<128x128xbf16>, vector<8x128xf32> -> vector<8x128xf32>
    %7 = arith.addf %3, %6 : vector<8x128xf32>
    %c0_6 = arith.constant 0 : index
    %c0_7 = arith.constant 0 : index
    %8 = vector.load %arg8[%c0_6, %c0_7] : memref<8x128xf32, #tpu.memory_space<vmem>>, vector<8x128xf32>
    tpu.vector_store %arg8[%c0_6, %c0_7], %7 {strides = array<i32>} : memref<8x128xf32, #tpu.memory_space<vmem>>, vector<8x128xf32>,
    %c4_i32 = arith.constant 4 : i32
    %9 = arith.cmpi eq, %arg2, %c4_i32 : i32
    %10 = arith.extui %9 : i1 to i32
    %c0_i32_8 = arith.constant 0 : i32
    %11 = arith.cmpi ne, %10, %c0_i32_8 : i32
    scf.if %11 {
      %c0_9 = arith.constant 0 : index
      %c0_10 = arith.constant 0 : index
      %12 = vector.load %arg8[%c0_9, %c0_10] : memref<8x128xf32, #tpu.memory_space<vmem>>, vector<8x128xf32>
      %c0_11 = arith.constant 0 : index
      %c0_12 = arith.constant 0 : index
      %13 = vector.load %arg5[%c0_11, %c0_12] : memref<1x128xf32, #tpu.memory_space<vmem>>, vector<1x128xf32>
      %14 = vector.broadcast %13 : vector<1x128xf32> to vector<8x128xf32>
      %15 = arith.mulf %12, %14 : vector<8x128xf32>
      %c0_13 = arith.constant 0 : index
      %c0_14 = arith.constant 0 : index
      %16 = vector.load %arg6[%c0_13, %c0_14] : memref<1x128xf32, #tpu.memory_space<vmem>>, vector<1x128xf32>
      %17 = vector.broadcast %16 : vector<1x128xf32> to vector<8x128xf32>
      %18 = arith.addf %15, %17 : vector<8x128xf32>
      %cst_15 = arith.constant 0.000000e+00 : f32
      %19 = vector.broadcast %cst_15 : f32 to vector<8x128xf32>
      %20 = arith.maximumf %18, %19 : vector<8x128xf32>
      %21 = arith.truncf %20 : vector<8x128xf32> to vector<8x128xbf16>
      %c0_16 = arith.constant 0 : index
      %c0_17 = arith.constant 0 : index
      %22 = vector.load %arg7[%c0_16, %c0_17] : memref<8x128xbf16, #tpu.memory_space<vmem>>, vector<8x128xbf16>
      tpu.vector_store %arg7[%c0_16, %c0_17], %21 {strides = array<i32>} : memref<8x128xbf16, #tpu.memory_space<vmem>>, vector<8x128xbf16>,
    } else {
    }
    return
  }
  func.func @transform_0(%arg0: i32, %arg1: i32, %arg2: i32) -> (i32, i32) {
    %c0_i32 = arith.constant 0 : i32
    return %arg0, %arg2 : i32, i32
  }
  func.func @transform_1(%arg0: i32, %arg1: i32, %arg2: i32) -> (i32, i32) {
    %c0_i32 = arith.constant 0 : i32
    return %arg2, %arg1 : i32, i32
  }
  func.func @transform_2(%arg0: i32, %arg1: i32, %arg2: i32) -> (i32, i32) {
    %c0_i32 = arith.constant 0 : i32
    %c0_i32_0 = arith.constant 0 : i32
    return %c0_i32, %arg1 : i32, i32
  }
  func.func @transform_3(%arg0: i32, %arg1: i32, %arg2: i32) -> (i32, i32) {
    %c0_i32 = arith.constant 0 : i32
    %c0_i32_0 = arith.constant 0 : i32
    return %c0_i32, %arg1 : i32, i32
  }
  func.func @transform_4(%arg0: i32, %arg1: i32, %arg2: i32) -> (i32, i32) {
    %c0_i32 = arith.constant 0 : i32
    return %arg0, %arg1 : i32, i32
  }
}

module attributes {stable_mosaic.version = 11 : i64} {
  func.func @_bn_act_kernel(%arg0: i32, %arg1: memref<8x640xf32, #tpu.memory_space<vmem>>, %arg2: memref<1x640xf32, #tpu.memory_space<vmem>>, %arg3: memref<1x640xf32, #tpu.memory_space<vmem>>, %arg4: memref<8x640xbf16, #tpu.memory_space<vmem>>) attributes {dimension_semantics = [#tpu.dimension_semantics<parallel>], iteration_bounds = array<i64: 1>, scalar_prefetch = 0 : i64, scratch_operands = 0 : i64, tpu.core_type = #tpu.core_type<tc>, window_params = [{transform_indices = @transform_0, window_bounds = array<i64: 8, 640>}, {pipeline_mode = #tpu.pipeline_mode<synchronous>, transform_indices = @transform_1, window_bounds = array<i64: 1, 640>}, {pipeline_mode = #tpu.pipeline_mode<synchronous>, transform_indices = @transform_2, window_bounds = array<i64: 1, 640>}, {transform_indices = @transform_3, window_bounds = array<i64: 8, 640>}]} {
    %c0 = arith.constant 0 : index
    %c0_0 = arith.constant 0 : index
    %0 = vector.load %arg1[%c0, %c0_0] : memref<8x640xf32, #tpu.memory_space<vmem>>, vector<8x640xf32>
    %c0_1 = arith.constant 0 : index
    %c0_2 = arith.constant 0 : index
    %1 = vector.load %arg2[%c0_1, %c0_2] : memref<1x640xf32, #tpu.memory_space<vmem>>, vector<1x640xf32>
    %2 = vector.broadcast %1 : vector<1x640xf32> to vector<8x640xf32>
    %3 = arith.mulf %0, %2 : vector<8x640xf32>
    %c0_3 = arith.constant 0 : index
    %c0_4 = arith.constant 0 : index
    %4 = vector.load %arg3[%c0_3, %c0_4] : memref<1x640xf32, #tpu.memory_space<vmem>>, vector<1x640xf32>
    %5 = vector.broadcast %4 : vector<1x640xf32> to vector<8x640xf32>
    %6 = arith.addf %3, %5 : vector<8x640xf32>
    %cst = arith.constant 0.000000e+00 : f32
    %7 = vector.broadcast %cst : f32 to vector<8x640xf32>
    %8 = arith.maximumf %6, %7 : vector<8x640xf32>
    %9 = arith.truncf %8 : vector<8x640xf32> to vector<8x640xbf16>
    %c0_5 = arith.constant 0 : index
    %c0_6 = arith.constant 0 : index
    %10 = vector.load %arg4[%c0_5, %c0_6] : memref<8x640xbf16, #tpu.memory_space<vmem>>, vector<8x640xbf16>
    tpu.vector_store %arg4[%c0_5, %c0_6], %9 {strides = array<i32>} : memref<8x640xbf16, #tpu.memory_space<vmem>>, vector<8x640xbf16>,
    return
  }
  func.func @transform_0(%arg0: i32) -> (i32, i32) {
    %c0_i32 = arith.constant 0 : i32
    %c0_i32_0 = arith.constant 0 : i32
    return %arg0, %c0_i32 : i32, i32
  }
  func.func @transform_1(%arg0: i32) -> (i32, i32) {
    %c0_i32 = arith.constant 0 : i32
    %c0_i32_0 = arith.constant 0 : i32
    %c0_i32_1 = arith.constant 0 : i32
    return %c0_i32, %c0_i32_0 : i32, i32
  }
  func.func @transform_2(%arg0: i32) -> (i32, i32) {
    %c0_i32 = arith.constant 0 : i32
    %c0_i32_0 = arith.constant 0 : i32
    %c0_i32_1 = arith.constant 0 : i32
    return %c0_i32, %c0_i32_0 : i32, i32
  }
  func.func @transform_3(%arg0: i32) -> (i32, i32) {
    %c0_i32 = arith.constant 0 : i32
    %c0_i32_0 = arith.constant 0 : i32
    return %arg0, %c0_i32 : i32, i32
  }
}

module attributes {stable_mosaic.version = 11 : i64} {
  func.func @_mm_epilogue_kernel(%arg0: i32, %arg1: i32, %arg2: i32, %arg3: memref<8x256xbf16, #tpu.memory_space<vmem>>, %arg4: memref<256x128xbf16, #tpu.memory_space<vmem>>, %arg5: memref<1x128xf32, #tpu.memory_space<vmem>>, %arg6: memref<1x128xf32, #tpu.memory_space<vmem>>, %arg7: memref<8x128xbf16, #tpu.memory_space<vmem>>, %arg8: memref<8x128xf32, #tpu.memory_space<vmem>>) attributes {dimension_semantics = [#tpu.dimension_semantics<parallel>, #tpu.dimension_semantics<parallel>, #tpu.dimension_semantics<arbitrary>], iteration_bounds = array<i64: 1, 1, 3>, scalar_prefetch = 0 : i64, scratch_operands = 1 : i64, tpu.core_type = #tpu.core_type<tc>, window_params = [{transform_indices = @transform_0, window_bounds = array<i64: 8, 256>}, {transform_indices = @transform_1, window_bounds = array<i64: 256, 128>}, {transform_indices = @transform_2, window_bounds = array<i64: 1, 128>}, {transform_indices = @transform_3, window_bounds = array<i64: 1, 128>}, {transform_indices = @transform_4, window_bounds = array<i64: 8, 128>}]} {
    %c0_i32 = arith.constant 0 : i32
    %0 = arith.cmpi eq, %arg2, %c0_i32 : i32
    %1 = arith.extui %0 : i1 to i32
    %c0_i32_0 = arith.constant 0 : i32
    %2 = arith.cmpi ne, %1, %c0_i32_0 : i32
    scf.if %2 {
      %cst_9 = arith.constant 0.000000e+00 : f32
      %12 = vector.broadcast %cst_9 : f32 to vector<8x128xf32>
      %c0_10 = arith.constant 0 : index
      %c0_11 = arith.constant 0 : index
      %13 = vector.load %arg8[%c0_10, %c0_11] : memref<8x128xf32, #tpu.memory_space<vmem>>, vector<8x128xf32>
      tpu.vector_store %arg8[%c0_10, %c0_11], %12 {strides = array<i32>} : memref<8x128xf32, #tpu.memory_space<vmem>>, vector<8x128xf32>,
    } else {
    }
    %c0 = arith.constant 0 : index
    %c0_1 = arith.constant 0 : index
    %3 = vector.load %arg8[%c0, %c0_1] : memref<8x128xf32, #tpu.memory_space<vmem>>, vector<8x128xf32>
    %c0_2 = arith.constant 0 : index
    %c0_3 = arith.constant 0 : index
    %4 = vector.load %arg3[%c0_2, %c0_3] : memref<8x256xbf16, #tpu.memory_space<vmem>>, vector<8x256xbf16>
    %c0_4 = arith.constant 0 : index
    %c0_5 = arith.constant 0 : index
    %5 = vector.load %arg4[%c0_4, %c0_5] : memref<256x128xbf16, #tpu.memory_space<vmem>>, vector<256x128xbf16>
    %cst = arith.constant dense<0.000000e+00> : vector<8x128xf32>
    %6 = tpu.matmul %4, %5, %cst {dimension_numbers = #tpu.dot_dimension_numbers<[1], [0], [0], [1], [0, 0, 1, 1], [], []>} : vector<8x256xbf16>, vector<256x128xbf16>, vector<8x128xf32> -> vector<8x128xf32>
    %7 = arith.addf %3, %6 : vector<8x128xf32>
    %c0_6 = arith.constant 0 : index
    %c0_7 = arith.constant 0 : index
    %8 = vector.load %arg8[%c0_6, %c0_7] : memref<8x128xf32, #tpu.memory_space<vmem>>, vector<8x128xf32>
    tpu.vector_store %arg8[%c0_6, %c0_7], %7 {strides = array<i32>} : memref<8x128xf32, #tpu.memory_space<vmem>>, vector<8x128xf32>,
    %c2_i32 = arith.constant 2 : i32
    %9 = arith.cmpi eq, %arg2, %c2_i32 : i32
    %10 = arith.extui %9 : i1 to i32
    %c0_i32_8 = arith.constant 0 : i32
    %11 = arith.cmpi ne, %10, %c0_i32_8 : i32
    scf.if %11 {
      %c0_9 = arith.constant 0 : index
      %c0_10 = arith.constant 0 : index
      %12 = vector.load %arg8[%c0_9, %c0_10] : memref<8x128xf32, #tpu.memory_space<vmem>>, vector<8x128xf32>
      %c0_11 = arith.constant 0 : index
      %c0_12 = arith.constant 0 : index
      %13 = vector.load %arg5[%c0_11, %c0_12] : memref<1x128xf32, #tpu.memory_space<vmem>>, vector<1x128xf32>
      %14 = vector.broadcast %13 : vector<1x128xf32> to vector<8x128xf32>
      %15 = arith.mulf %12, %14 : vector<8x128xf32>
      %c0_13 = arith.constant 0 : index
      %c0_14 = arith.constant 0 : index
      %16 = vector.load %arg6[%c0_13, %c0_14] : memref<1x128xf32, #tpu.memory_space<vmem>>, vector<1x128xf32>
      %17 = vector.broadcast %16 : vector<1x128xf32> to vector<8x128xf32>
      %18 = arith.addf %15, %17 : vector<8x128xf32>
      %cst_15 = arith.constant 0.000000e+00 : f32
      %19 = vector.broadcast %cst_15 : f32 to vector<8x128xf32>
      %20 = arith.maximumf %18, %19 : vector<8x128xf32>
      %21 = arith.truncf %20 : vector<8x128xf32> to vector<8x128xbf16>
      %c0_16 = arith.constant 0 : index
      %c0_17 = arith.constant 0 : index
      %22 = vector.load %arg7[%c0_16, %c0_17] : memref<8x128xbf16, #tpu.memory_space<vmem>>, vector<8x128xbf16>
      tpu.vector_store %arg7[%c0_16, %c0_17], %21 {strides = array<i32>} : memref<8x128xbf16, #tpu.memory_space<vmem>>, vector<8x128xbf16>,
    } else {
    }
    return
  }
  func.func @transform_0(%arg0: i32, %arg1: i32, %arg2: i32) -> (i32, i32) {
    %c0_i32 = arith.constant 0 : i32
    return %arg0, %arg2 : i32, i32
  }
  func.func @transform_1(%arg0: i32, %arg1: i32, %arg2: i32) -> (i32, i32) {
    %c0_i32 = arith.constant 0 : i32
    return %arg2, %arg1 : i32, i32
  }
  func.func @transform_2(%arg0: i32, %arg1: i32, %arg2: i32) -> (i32, i32) {
    %c0_i32 = arith.constant 0 : i32
    %c0_i32_0 = arith.constant 0 : i32
    return %c0_i32, %arg1 : i32, i32
  }
  func.func @transform_3(%arg0: i32, %arg1: i32, %arg2: i32) -> (i32, i32) {
    %c0_i32 = arith.constant 0 : i32
    %c0_i32_0 = arith.constant 0 : i32
    return %c0_i32, %arg1 : i32, i32
  }
  func.func @transform_4(%arg0: i32, %arg1: i32, %arg2: i32) -> (i32, i32) {
    %c0_i32 = arith.constant 0 : i32
    return %arg0, %arg1 : i32, i32
  }
}

module attributes {stable_mosaic.version = 11 : i64} {
  func.func @_bn_act_kernel(%arg0: i32, %arg1: memref<8x768xf32, #tpu.memory_space<vmem>>, %arg2: memref<1x768xf32, #tpu.memory_space<vmem>>, %arg3: memref<1x768xf32, #tpu.memory_space<vmem>>, %arg4: memref<8x768xbf16, #tpu.memory_space<vmem>>) attributes {dimension_semantics = [#tpu.dimension_semantics<parallel>], iteration_bounds = array<i64: 1>, scalar_prefetch = 0 : i64, scratch_operands = 0 : i64, tpu.core_type = #tpu.core_type<tc>, window_params = [{transform_indices = @transform_0, window_bounds = array<i64: 8, 768>}, {pipeline_mode = #tpu.pipeline_mode<synchronous>, transform_indices = @transform_1, window_bounds = array<i64: 1, 768>}, {pipeline_mode = #tpu.pipeline_mode<synchronous>, transform_indices = @transform_2, window_bounds = array<i64: 1, 768>}, {transform_indices = @transform_3, window_bounds = array<i64: 8, 768>}]} {
    %c0 = arith.constant 0 : index
    %c0_0 = arith.constant 0 : index
    %0 = vector.load %arg1[%c0, %c0_0] : memref<8x768xf32, #tpu.memory_space<vmem>>, vector<8x768xf32>
    %c0_1 = arith.constant 0 : index
    %c0_2 = arith.constant 0 : index
    %1 = vector.load %arg2[%c0_1, %c0_2] : memref<1x768xf32, #tpu.memory_space<vmem>>, vector<1x768xf32>
    %2 = vector.broadcast %1 : vector<1x768xf32> to vector<8x768xf32>
    %3 = arith.mulf %0, %2 : vector<8x768xf32>
    %c0_3 = arith.constant 0 : index
    %c0_4 = arith.constant 0 : index
    %4 = vector.load %arg3[%c0_3, %c0_4] : memref<1x768xf32, #tpu.memory_space<vmem>>, vector<1x768xf32>
    %5 = vector.broadcast %4 : vector<1x768xf32> to vector<8x768xf32>
    %6 = arith.addf %3, %5 : vector<8x768xf32>
    %cst = arith.constant 0.000000e+00 : f32
    %7 = vector.broadcast %cst : f32 to vector<8x768xf32>
    %8 = arith.maximumf %6, %7 : vector<8x768xf32>
    %9 = arith.truncf %8 : vector<8x768xf32> to vector<8x768xbf16>
    %c0_5 = arith.constant 0 : index
    %c0_6 = arith.constant 0 : index
    %10 = vector.load %arg4[%c0_5, %c0_6] : memref<8x768xbf16, #tpu.memory_space<vmem>>, vector<8x768xbf16>
    tpu.vector_store %arg4[%c0_5, %c0_6], %9 {strides = array<i32>} : memref<8x768xbf16, #tpu.memory_space<vmem>>, vector<8x768xbf16>,
    return
  }
  func.func @transform_0(%arg0: i32) -> (i32, i32) {
    %c0_i32 = arith.constant 0 : i32
    %c0_i32_0 = arith.constant 0 : i32
    return %arg0, %c0_i32 : i32, i32
  }
  func.func @transform_1(%arg0: i32) -> (i32, i32) {
    %c0_i32 = arith.constant 0 : i32
    %c0_i32_0 = arith.constant 0 : i32
    %c0_i32_1 = arith.constant 0 : i32
    return %c0_i32, %c0_i32_0 : i32, i32
  }
  func.func @transform_2(%arg0: i32) -> (i32, i32) {
    %c0_i32 = arith.constant 0 : i32
    %c0_i32_0 = arith.constant 0 : i32
    %c0_i32_1 = arith.constant 0 : i32
    return %c0_i32, %c0_i32_0 : i32, i32
  }
  func.func @transform_3(%arg0: i32) -> (i32, i32) {
    %c0_i32 = arith.constant 0 : i32
    %c0_i32_0 = arith.constant 0 : i32
    return %arg0, %c0_i32 : i32, i32
  }
}

module attributes {stable_mosaic.version = 11 : i64} {
  func.func @_mm_epilogue_kernel(%arg0: i32, %arg1: i32, %arg2: i32, %arg3: memref<8x128xbf16, #tpu.memory_space<vmem>>, %arg4: memref<128x128xbf16, #tpu.memory_space<vmem>>, %arg5: memref<1x128xf32, #tpu.memory_space<vmem>>, %arg6: memref<1x128xf32, #tpu.memory_space<vmem>>, %arg7: memref<8x128xbf16, #tpu.memory_space<vmem>>, %arg8: memref<8x128xf32, #tpu.memory_space<vmem>>) attributes {dimension_semantics = [#tpu.dimension_semantics<parallel>, #tpu.dimension_semantics<parallel>, #tpu.dimension_semantics<arbitrary>], iteration_bounds = array<i64: 1, 1, 7>, scalar_prefetch = 0 : i64, scratch_operands = 1 : i64, tpu.core_type = #tpu.core_type<tc>, window_params = [{transform_indices = @transform_0, window_bounds = array<i64: 8, 128>}, {transform_indices = @transform_1, window_bounds = array<i64: 128, 128>}, {transform_indices = @transform_2, window_bounds = array<i64: 1, 128>}, {transform_indices = @transform_3, window_bounds = array<i64: 1, 128>}, {transform_indices = @transform_4, window_bounds = array<i64: 8, 128>}]} {
    %c0_i32 = arith.constant 0 : i32
    %0 = arith.cmpi eq, %arg2, %c0_i32 : i32
    %1 = arith.extui %0 : i1 to i32
    %c0_i32_0 = arith.constant 0 : i32
    %2 = arith.cmpi ne, %1, %c0_i32_0 : i32
    scf.if %2 {
      %cst_9 = arith.constant 0.000000e+00 : f32
      %12 = vector.broadcast %cst_9 : f32 to vector<8x128xf32>
      %c0_10 = arith.constant 0 : index
      %c0_11 = arith.constant 0 : index
      %13 = vector.load %arg8[%c0_10, %c0_11] : memref<8x128xf32, #tpu.memory_space<vmem>>, vector<8x128xf32>
      tpu.vector_store %arg8[%c0_10, %c0_11], %12 {strides = array<i32>} : memref<8x128xf32, #tpu.memory_space<vmem>>, vector<8x128xf32>,
    } else {
    }
    %c0 = arith.constant 0 : index
    %c0_1 = arith.constant 0 : index
    %3 = vector.load %arg8[%c0, %c0_1] : memref<8x128xf32, #tpu.memory_space<vmem>>, vector<8x128xf32>
    %c0_2 = arith.constant 0 : index
    %c0_3 = arith.constant 0 : index
    %4 = vector.load %arg3[%c0_2, %c0_3] : memref<8x128xbf16, #tpu.memory_space<vmem>>, vector<8x128xbf16>
    %c0_4 = arith.constant 0 : index
    %c0_5 = arith.constant 0 : index
    %5 = vector.load %arg4[%c0_4, %c0_5] : memref<128x128xbf16, #tpu.memory_space<vmem>>, vector<128x128xbf16>
    %cst = arith.constant dense<0.000000e+00> : vector<8x128xf32>
    %6 = tpu.matmul %4, %5, %cst {dimension_numbers = #tpu.dot_dimension_numbers<[1], [0], [0], [1], [0, 0, 1, 1], [], []>} : vector<8x128xbf16>, vector<128x128xbf16>, vector<8x128xf32> -> vector<8x128xf32>
    %7 = arith.addf %3, %6 : vector<8x128xf32>
    %c0_6 = arith.constant 0 : index
    %c0_7 = arith.constant 0 : index
    %8 = vector.load %arg8[%c0_6, %c0_7] : memref<8x128xf32, #tpu.memory_space<vmem>>, vector<8x128xf32>
    tpu.vector_store %arg8[%c0_6, %c0_7], %7 {strides = array<i32>} : memref<8x128xf32, #tpu.memory_space<vmem>>, vector<8x128xf32>,
    %c6_i32 = arith.constant 6 : i32
    %9 = arith.cmpi eq, %arg2, %c6_i32 : i32
    %10 = arith.extui %9 : i1 to i32
    %c0_i32_8 = arith.constant 0 : i32
    %11 = arith.cmpi ne, %10, %c0_i32_8 : i32
    scf.if %11 {
      %c0_9 = arith.constant 0 : index
      %c0_10 = arith.constant 0 : index
      %12 = vector.load %arg8[%c0_9, %c0_10] : memref<8x128xf32, #tpu.memory_space<vmem>>, vector<8x128xf32>
      %c0_11 = arith.constant 0 : index
      %c0_12 = arith.constant 0 : index
      %13 = vector.load %arg5[%c0_11, %c0_12] : memref<1x128xf32, #tpu.memory_space<vmem>>, vector<1x128xf32>
      %14 = vector.broadcast %13 : vector<1x128xf32> to vector<8x128xf32>
      %15 = arith.mulf %12, %14 : vector<8x128xf32>
      %c0_13 = arith.constant 0 : index
      %c0_14 = arith.constant 0 : index
      %16 = vector.load %arg6[%c0_13, %c0_14] : memref<1x128xf32, #tpu.memory_space<vmem>>, vector<1x128xf32>
      %17 = vector.broadcast %16 : vector<1x128xf32> to vector<8x128xf32>
      %18 = arith.addf %15, %17 : vector<8x128xf32>
      %cst_15 = arith.constant 0.000000e+00 : f32
      %19 = vector.broadcast %cst_15 : f32 to vector<8x128xf32>
      %20 = arith.maximumf %18, %19 : vector<8x128xf32>
      %21 = arith.truncf %20 : vector<8x128xf32> to vector<8x128xbf16>
      %c0_16 = arith.constant 0 : index
      %c0_17 = arith.constant 0 : index
      %22 = vector.load %arg7[%c0_16, %c0_17] : memref<8x128xbf16, #tpu.memory_space<vmem>>, vector<8x128xbf16>
      tpu.vector_store %arg7[%c0_16, %c0_17], %21 {strides = array<i32>} : memref<8x128xbf16, #tpu.memory_space<vmem>>, vector<8x128xbf16>,
    } else {
    }
    return
  }
  func.func @transform_0(%arg0: i32, %arg1: i32, %arg2: i32) -> (i32, i32) {
    %c0_i32 = arith.constant 0 : i32
    return %arg0, %arg2 : i32, i32
  }
  func.func @transform_1(%arg0: i32, %arg1: i32, %arg2: i32) -> (i32, i32) {
    %c0_i32 = arith.constant 0 : i32
    return %arg2, %arg1 : i32, i32
  }
  func.func @transform_2(%arg0: i32, %arg1: i32, %arg2: i32) -> (i32, i32) {
    %c0_i32 = arith.constant 0 : i32
    %c0_i32_0 = arith.constant 0 : i32
    return %c0_i32, %arg1 : i32, i32
  }
  func.func @transform_3(%arg0: i32, %arg1: i32, %arg2: i32) -> (i32, i32) {
    %c0_i32 = arith.constant 0 : i32
    %c0_i32_0 = arith.constant 0 : i32
    return %c0_i32, %arg1 : i32, i32
  }
  func.func @transform_4(%arg0: i32, %arg1: i32, %arg2: i32) -> (i32, i32) {
    %c0_i32 = arith.constant 0 : i32
    return %arg0, %arg1 : i32, i32
  }
}

module attributes {stable_mosaic.version = 11 : i64} {
  func.func @_bn_act_kernel(%arg0: i32, %arg1: memref<8x896xf32, #tpu.memory_space<vmem>>, %arg2: memref<1x896xf32, #tpu.memory_space<vmem>>, %arg3: memref<1x896xf32, #tpu.memory_space<vmem>>, %arg4: memref<8x896xbf16, #tpu.memory_space<vmem>>) attributes {dimension_semantics = [#tpu.dimension_semantics<parallel>], iteration_bounds = array<i64: 1>, scalar_prefetch = 0 : i64, scratch_operands = 0 : i64, tpu.core_type = #tpu.core_type<tc>, window_params = [{transform_indices = @transform_0, window_bounds = array<i64: 8, 896>}, {pipeline_mode = #tpu.pipeline_mode<synchronous>, transform_indices = @transform_1, window_bounds = array<i64: 1, 896>}, {pipeline_mode = #tpu.pipeline_mode<synchronous>, transform_indices = @transform_2, window_bounds = array<i64: 1, 896>}, {transform_indices = @transform_3, window_bounds = array<i64: 8, 896>}]} {
    %c0 = arith.constant 0 : index
    %c0_0 = arith.constant 0 : index
    %0 = vector.load %arg1[%c0, %c0_0] : memref<8x896xf32, #tpu.memory_space<vmem>>, vector<8x896xf32>
    %c0_1 = arith.constant 0 : index
    %c0_2 = arith.constant 0 : index
    %1 = vector.load %arg2[%c0_1, %c0_2] : memref<1x896xf32, #tpu.memory_space<vmem>>, vector<1x896xf32>
    %2 = vector.broadcast %1 : vector<1x896xf32> to vector<8x896xf32>
    %3 = arith.mulf %0, %2 : vector<8x896xf32>
    %c0_3 = arith.constant 0 : index
    %c0_4 = arith.constant 0 : index
    %4 = vector.load %arg3[%c0_3, %c0_4] : memref<1x896xf32, #tpu.memory_space<vmem>>, vector<1x896xf32>
    %5 = vector.broadcast %4 : vector<1x896xf32> to vector<8x896xf32>
    %6 = arith.addf %3, %5 : vector<8x896xf32>
    %cst = arith.constant 0.000000e+00 : f32
    %7 = vector.broadcast %cst : f32 to vector<8x896xf32>
    %8 = arith.maximumf %6, %7 : vector<8x896xf32>
    %9 = arith.truncf %8 : vector<8x896xf32> to vector<8x896xbf16>
    %c0_5 = arith.constant 0 : index
    %c0_6 = arith.constant 0 : index
    %10 = vector.load %arg4[%c0_5, %c0_6] : memref<8x896xbf16, #tpu.memory_space<vmem>>, vector<8x896xbf16>
    tpu.vector_store %arg4[%c0_5, %c0_6], %9 {strides = array<i32>} : memref<8x896xbf16, #tpu.memory_space<vmem>>, vector<8x896xbf16>,
    return
  }
  func.func @transform_0(%arg0: i32) -> (i32, i32) {
    %c0_i32 = arith.constant 0 : i32
    %c0_i32_0 = arith.constant 0 : i32
    return %arg0, %c0_i32 : i32, i32
  }
  func.func @transform_1(%arg0: i32) -> (i32, i32) {
    %c0_i32 = arith.constant 0 : i32
    %c0_i32_0 = arith.constant 0 : i32
    %c0_i32_1 = arith.constant 0 : i32
    return %c0_i32, %c0_i32_0 : i32, i32
  }
  func.func @transform_2(%arg0: i32) -> (i32, i32) {
    %c0_i32 = arith.constant 0 : i32
    %c0_i32_0 = arith.constant 0 : i32
    %c0_i32_1 = arith.constant 0 : i32
    return %c0_i32, %c0_i32_0 : i32, i32
  }
  func.func @transform_3(%arg0: i32) -> (i32, i32) {
    %c0_i32 = arith.constant 0 : i32
    %c0_i32_0 = arith.constant 0 : i32
    return %arg0, %c0_i32 : i32, i32
  }
}

module attributes {stable_mosaic.version = 11 : i64} {
  func.func @_bn_act_kernel(%arg0: i32, %arg1: memref<8x1024xf32, #tpu.memory_space<vmem>>, %arg2: memref<1x1024xf32, #tpu.memory_space<vmem>>, %arg3: memref<1x1024xf32, #tpu.memory_space<vmem>>, %arg4: memref<8x1024xbf16, #tpu.memory_space<vmem>>) attributes {dimension_semantics = [#tpu.dimension_semantics<parallel>], iteration_bounds = array<i64: 1>, scalar_prefetch = 0 : i64, scratch_operands = 0 : i64, tpu.core_type = #tpu.core_type<tc>, window_params = [{transform_indices = @transform_0, window_bounds = array<i64: 8, 1024>}, {pipeline_mode = #tpu.pipeline_mode<synchronous>, transform_indices = @transform_1, window_bounds = array<i64: 1, 1024>}, {pipeline_mode = #tpu.pipeline_mode<synchronous>, transform_indices = @transform_2, window_bounds = array<i64: 1, 1024>}, {transform_indices = @transform_3, window_bounds = array<i64: 8, 1024>}]} {
    %c0 = arith.constant 0 : index
    %c0_0 = arith.constant 0 : index
    %0 = vector.load %arg1[%c0, %c0_0] : memref<8x1024xf32, #tpu.memory_space<vmem>>, vector<8x1024xf32>
    %c0_1 = arith.constant 0 : index
    %c0_2 = arith.constant 0 : index
    %1 = vector.load %arg2[%c0_1, %c0_2] : memref<1x1024xf32, #tpu.memory_space<vmem>>, vector<1x1024xf32>
    %2 = vector.broadcast %1 : vector<1x1024xf32> to vector<8x1024xf32>
    %3 = arith.mulf %0, %2 : vector<8x1024xf32>
    %c0_3 = arith.constant 0 : index
    %c0_4 = arith.constant 0 : index
    %4 = vector.load %arg3[%c0_3, %c0_4] : memref<1x1024xf32, #tpu.memory_space<vmem>>, vector<1x1024xf32>
    %5 = vector.broadcast %4 : vector<1x1024xf32> to vector<8x1024xf32>
    %6 = arith.addf %3, %5 : vector<8x1024xf32>
    %cst = arith.constant 0.000000e+00 : f32
    %7 = vector.broadcast %cst : f32 to vector<8x1024xf32>
    %8 = arith.maximumf %6, %7 : vector<8x1024xf32>
    %9 = arith.truncf %8 : vector<8x1024xf32> to vector<8x1024xbf16>
    %c0_5 = arith.constant 0 : index
    %c0_6 = arith.constant 0 : index
    %10 = vector.load %arg4[%c0_5, %c0_6] : memref<8x1024xbf16, #tpu.memory_space<vmem>>, vector<8x1024xbf16>
    tpu.vector_store %arg4[%c0_5, %c0_6], %9 {strides = array<i32>} : memref<8x1024xbf16, #tpu.memory_space<vmem>>, vector<8x1024xbf16>,
    return
  }
  func.func @transform_0(%arg0: i32) -> (i32, i32) {
    %c0_i32 = arith.constant 0 : i32
    %c0_i32_0 = arith.constant 0 : i32
    return %arg0, %c0_i32 : i32, i32
  }
  func.func @transform_1(%arg0: i32) -> (i32, i32) {
    %c0_i32 = arith.constant 0 : i32
    %c0_i32_0 = arith.constant 0 : i32
    %c0_i32_1 = arith.constant 0 : i32
    return %c0_i32, %c0_i32_0 : i32, i32
  }
  func.func @transform_2(%arg0: i32) -> (i32, i32) {
    %c0_i32 = arith.constant 0 : i32
    %c0_i32_0 = arith.constant 0 : i32
    %c0_i32_1 = arith.constant 0 : i32
    return %c0_i32, %c0_i32_0 : i32, i32
  }
  func.func @transform_3(%arg0: i32) -> (i32, i32) {
    %c0_i32 = arith.constant 0 : i32
    %c0_i32_0 = arith.constant 0 : i32
    return %arg0, %c0_i32 : i32, i32
  }
}

module attributes {stable_mosaic.version = 11 : i64} {
  func.func @_mm_epilogue_kernel(%arg0: i32, %arg1: i32, %arg2: i32, %arg3: memref<8x256xbf16, #tpu.memory_space<vmem>>, %arg4: memref<256x128xbf16, #tpu.memory_space<vmem>>, %arg5: memref<1x128xf32, #tpu.memory_space<vmem>>, %arg6: memref<1x128xf32, #tpu.memory_space<vmem>>, %arg7: memref<8x128xbf16, #tpu.memory_space<vmem>>, %arg8: memref<8x128xf32, #tpu.memory_space<vmem>>) attributes {dimension_semantics = [#tpu.dimension_semantics<parallel>, #tpu.dimension_semantics<parallel>, #tpu.dimension_semantics<arbitrary>], iteration_bounds = array<i64: 1, 1, 4>, scalar_prefetch = 0 : i64, scratch_operands = 1 : i64, tpu.core_type = #tpu.core_type<tc>, window_params = [{transform_indices = @transform_0, window_bounds = array<i64: 8, 256>}, {transform_indices = @transform_1, window_bounds = array<i64: 256, 128>}, {transform_indices = @transform_2, window_bounds = array<i64: 1, 128>}, {transform_indices = @transform_3, window_bounds = array<i64: 1, 128>}, {transform_indices = @transform_4, window_bounds = array<i64: 8, 128>}]} {
    %c0_i32 = arith.constant 0 : i32
    %0 = arith.cmpi eq, %arg2, %c0_i32 : i32
    %1 = arith.extui %0 : i1 to i32
    %c0_i32_0 = arith.constant 0 : i32
    %2 = arith.cmpi ne, %1, %c0_i32_0 : i32
    scf.if %2 {
      %cst_9 = arith.constant 0.000000e+00 : f32
      %12 = vector.broadcast %cst_9 : f32 to vector<8x128xf32>
      %c0_10 = arith.constant 0 : index
      %c0_11 = arith.constant 0 : index
      %13 = vector.load %arg8[%c0_10, %c0_11] : memref<8x128xf32, #tpu.memory_space<vmem>>, vector<8x128xf32>
      tpu.vector_store %arg8[%c0_10, %c0_11], %12 {strides = array<i32>} : memref<8x128xf32, #tpu.memory_space<vmem>>, vector<8x128xf32>,
    } else {
    }
    %c0 = arith.constant 0 : index
    %c0_1 = arith.constant 0 : index
    %3 = vector.load %arg8[%c0, %c0_1] : memref<8x128xf32, #tpu.memory_space<vmem>>, vector<8x128xf32>
    %c0_2 = arith.constant 0 : index
    %c0_3 = arith.constant 0 : index
    %4 = vector.load %arg3[%c0_2, %c0_3] : memref<8x256xbf16, #tpu.memory_space<vmem>>, vector<8x256xbf16>
    %c0_4 = arith.constant 0 : index
    %c0_5 = arith.constant 0 : index
    %5 = vector.load %arg4[%c0_4, %c0_5] : memref<256x128xbf16, #tpu.memory_space<vmem>>, vector<256x128xbf16>
    %cst = arith.constant dense<0.000000e+00> : vector<8x128xf32>
    %6 = tpu.matmul %4, %5, %cst {dimension_numbers = #tpu.dot_dimension_numbers<[1], [0], [0], [1], [0, 0, 1, 1], [], []>} : vector<8x256xbf16>, vector<256x128xbf16>, vector<8x128xf32> -> vector<8x128xf32>
    %7 = arith.addf %3, %6 : vector<8x128xf32>
    %c0_6 = arith.constant 0 : index
    %c0_7 = arith.constant 0 : index
    %8 = vector.load %arg8[%c0_6, %c0_7] : memref<8x128xf32, #tpu.memory_space<vmem>>, vector<8x128xf32>
    tpu.vector_store %arg8[%c0_6, %c0_7], %7 {strides = array<i32>} : memref<8x128xf32, #tpu.memory_space<vmem>>, vector<8x128xf32>,
    %c3_i32 = arith.constant 3 : i32
    %9 = arith.cmpi eq, %arg2, %c3_i32 : i32
    %10 = arith.extui %9 : i1 to i32
    %c0_i32_8 = arith.constant 0 : i32
    %11 = arith.cmpi ne, %10, %c0_i32_8 : i32
    scf.if %11 {
      %c0_9 = arith.constant 0 : index
      %c0_10 = arith.constant 0 : index
      %12 = vector.load %arg8[%c0_9, %c0_10] : memref<8x128xf32, #tpu.memory_space<vmem>>, vector<8x128xf32>
      %c0_11 = arith.constant 0 : index
      %c0_12 = arith.constant 0 : index
      %13 = vector.load %arg5[%c0_11, %c0_12] : memref<1x128xf32, #tpu.memory_space<vmem>>, vector<1x128xf32>
      %14 = vector.broadcast %13 : vector<1x128xf32> to vector<8x128xf32>
      %15 = arith.mulf %12, %14 : vector<8x128xf32>
      %c0_13 = arith.constant 0 : index
      %c0_14 = arith.constant 0 : index
      %16 = vector.load %arg6[%c0_13, %c0_14] : memref<1x128xf32, #tpu.memory_space<vmem>>, vector<1x128xf32>
      %17 = vector.broadcast %16 : vector<1x128xf32> to vector<8x128xf32>
      %18 = arith.addf %15, %17 : vector<8x128xf32>
      %cst_15 = arith.constant 0.000000e+00 : f32
      %19 = vector.broadcast %cst_15 : f32 to vector<8x128xf32>
      %20 = arith.maximumf %18, %19 : vector<8x128xf32>
      %21 = arith.truncf %20 : vector<8x128xf32> to vector<8x128xbf16>
      %c0_16 = arith.constant 0 : index
      %c0_17 = arith.constant 0 : index
      %22 = vector.load %arg7[%c0_16, %c0_17] : memref<8x128xbf16, #tpu.memory_space<vmem>>, vector<8x128xbf16>
      tpu.vector_store %arg7[%c0_16, %c0_17], %21 {strides = array<i32>} : memref<8x128xbf16, #tpu.memory_space<vmem>>, vector<8x128xbf16>,
    } else {
    }
    return
  }
  func.func @transform_0(%arg0: i32, %arg1: i32, %arg2: i32) -> (i32, i32) {
    %c0_i32 = arith.constant 0 : i32
    return %arg0, %arg2 : i32, i32
  }
  func.func @transform_1(%arg0: i32, %arg1: i32, %arg2: i32) -> (i32, i32) {
    %c0_i32 = arith.constant 0 : i32
    return %arg2, %arg1 : i32, i32
  }
  func.func @transform_2(%arg0: i32, %arg1: i32, %arg2: i32) -> (i32, i32) {
    %c0_i32 = arith.constant 0 : i32
    %c0_i32_0 = arith.constant 0 : i32
    return %c0_i32, %arg1 : i32, i32
  }
  func.func @transform_3(%arg0: i32, %arg1: i32, %arg2: i32) -> (i32, i32) {
    %c0_i32 = arith.constant 0 : i32
    %c0_i32_0 = arith.constant 0 : i32
    return %c0_i32, %arg1 : i32, i32
  }
  func.func @transform_4(%arg0: i32, %arg1: i32, %arg2: i32) -> (i32, i32) {
    %c0_i32 = arith.constant 0 : i32
    return %arg0, %arg1 : i32, i32
  }
}

module attributes {stable_mosaic.version = 11 : i64} {
  func.func @_mm_epilogue_kernel(%arg0: i32, %arg1: i32, %arg2: i32, %arg3: memref<8x256xbf16, #tpu.memory_space<vmem>>, %arg4: memref<256x256xbf16, #tpu.memory_space<vmem>>, %arg5: memref<1x256xf32, #tpu.memory_space<vmem>>, %arg6: memref<1x256xf32, #tpu.memory_space<vmem>>, %arg7: memref<8x256xf32, #tpu.memory_space<vmem>>, %arg8: memref<8x256xf32, #tpu.memory_space<vmem>>) attributes {dimension_semantics = [#tpu.dimension_semantics<parallel>, #tpu.dimension_semantics<parallel>, #tpu.dimension_semantics<arbitrary>], iteration_bounds = array<i64: 1, 2, 4>, scalar_prefetch = 0 : i64, scratch_operands = 1 : i64, tpu.core_type = #tpu.core_type<tc>, window_params = [{transform_indices = @transform_0, window_bounds = array<i64: 8, 256>}, {transform_indices = @transform_1, window_bounds = array<i64: 256, 256>}, {transform_indices = @transform_2, window_bounds = array<i64: 1, 256>}, {transform_indices = @transform_3, window_bounds = array<i64: 1, 256>}, {transform_indices = @transform_4, window_bounds = array<i64: 8, 256>}]} {
    %c0_i32 = arith.constant 0 : i32
    %0 = arith.cmpi eq, %arg2, %c0_i32 : i32
    %1 = arith.extui %0 : i1 to i32
    %c0_i32_0 = arith.constant 0 : i32
    %2 = arith.cmpi ne, %1, %c0_i32_0 : i32
    scf.if %2 {
      %cst_9 = arith.constant 0.000000e+00 : f32
      %12 = vector.broadcast %cst_9 : f32 to vector<8x256xf32>
      %c0_10 = arith.constant 0 : index
      %c0_11 = arith.constant 0 : index
      %13 = vector.load %arg8[%c0_10, %c0_11] : memref<8x256xf32, #tpu.memory_space<vmem>>, vector<8x256xf32>
      tpu.vector_store %arg8[%c0_10, %c0_11], %12 {strides = array<i32>} : memref<8x256xf32, #tpu.memory_space<vmem>>, vector<8x256xf32>,
    } else {
    }
    %c0 = arith.constant 0 : index
    %c0_1 = arith.constant 0 : index
    %3 = vector.load %arg8[%c0, %c0_1] : memref<8x256xf32, #tpu.memory_space<vmem>>, vector<8x256xf32>
    %c0_2 = arith.constant 0 : index
    %c0_3 = arith.constant 0 : index
    %4 = vector.load %arg3[%c0_2, %c0_3] : memref<8x256xbf16, #tpu.memory_space<vmem>>, vector<8x256xbf16>
    %c0_4 = arith.constant 0 : index
    %c0_5 = arith.constant 0 : index
    %5 = vector.load %arg4[%c0_4, %c0_5] : memref<256x256xbf16, #tpu.memory_space<vmem>>, vector<256x256xbf16>
    %cst = arith.constant dense<0.000000e+00> : vector<8x256xf32>
    %6 = tpu.matmul %4, %5, %cst {dimension_numbers = #tpu.dot_dimension_numbers<[1], [0], [0], [1], [0, 0, 1, 1], [], []>} : vector<8x256xbf16>, vector<256x256xbf16>, vector<8x256xf32> -> vector<8x256xf32>
    %7 = arith.addf %3, %6 : vector<8x256xf32>
    %c0_6 = arith.constant 0 : index
    %c0_7 = arith.constant 0 : index
    %8 = vector.load %arg8[%c0_6, %c0_7] : memref<8x256xf32, #tpu.memory_space<vmem>>, vector<8x256xf32>
    tpu.vector_store %arg8[%c0_6, %c0_7], %7 {strides = array<i32>} : memref<8x256xf32, #tpu.memory_space<vmem>>, vector<8x256xf32>,
    %c3_i32 = arith.constant 3 : i32
    %9 = arith.cmpi eq, %arg2, %c3_i32 : i32
    %10 = arith.extui %9 : i1 to i32
    %c0_i32_8 = arith.constant 0 : i32
    %11 = arith.cmpi ne, %10, %c0_i32_8 : i32
    scf.if %11 {
      %c0_9 = arith.constant 0 : index
      %c0_10 = arith.constant 0 : index
      %12 = vector.load %arg8[%c0_9, %c0_10] : memref<8x256xf32, #tpu.memory_space<vmem>>, vector<8x256xf32>
      %c0_11 = arith.constant 0 : index
      %c0_12 = arith.constant 0 : index
      %13 = vector.load %arg5[%c0_11, %c0_12] : memref<1x256xf32, #tpu.memory_space<vmem>>, vector<1x256xf32>
      %14 = vector.broadcast %13 : vector<1x256xf32> to vector<8x256xf32>
      %15 = arith.mulf %12, %14 : vector<8x256xf32>
      %c0_13 = arith.constant 0 : index
      %c0_14 = arith.constant 0 : index
      %16 = vector.load %arg6[%c0_13, %c0_14] : memref<1x256xf32, #tpu.memory_space<vmem>>, vector<1x256xf32>
      %17 = vector.broadcast %16 : vector<1x256xf32> to vector<8x256xf32>
      %18 = arith.addf %15, %17 : vector<8x256xf32>
      %c0_15 = arith.constant 0 : index
      %c0_16 = arith.constant 0 : index
      %19 = vector.load %arg7[%c0_15, %c0_16] : memref<8x256xf32, #tpu.memory_space<vmem>>, vector<8x256xf32>
      tpu.vector_store %arg7[%c0_15, %c0_16], %18 {strides = array<i32>} : memref<8x256xf32, #tpu.memory_space<vmem>>, vector<8x256xf32>,
    } else {
    }
    return
  }
  func.func @transform_0(%arg0: i32, %arg1: i32, %arg2: i32) -> (i32, i32) {
    %c0_i32 = arith.constant 0 : i32
    return %arg0, %arg2 : i32, i32
  }
  func.func @transform_1(%arg0: i32, %arg1: i32, %arg2: i32) -> (i32, i32) {
    %c0_i32 = arith.constant 0 : i32
    return %arg2, %arg1 : i32, i32
  }
  func.func @transform_2(%arg0: i32, %arg1: i32, %arg2: i32) -> (i32, i32) {
    %c0_i32 = arith.constant 0 : i32
    %c0_i32_0 = arith.constant 0 : i32
    return %c0_i32, %arg1 : i32, i32
  }
  func.func @transform_3(%arg0: i32, %arg1: i32, %arg2: i32) -> (i32, i32) {
    %c0_i32 = arith.constant 0 : i32
    %c0_i32_0 = arith.constant 0 : i32
    return %c0_i32, %arg1 : i32, i32
  }
  func.func @transform_4(%arg0: i32, %arg1: i32, %arg2: i32) -> (i32, i32) {
    %c0_i32 = arith.constant 0 : i32
    return %arg0, %arg1 : i32, i32
  }
}

module attributes {stable_mosaic.version = 11 : i64} {
  func.func @_bn_act_kernel(%arg0: i32, %arg1: memref<8x1024xf32, #tpu.memory_space<vmem>>, %arg2: memref<1x1024xf32, #tpu.memory_space<vmem>>, %arg3: memref<1x1024xf32, #tpu.memory_space<vmem>>, %arg4: memref<8x1024xf32, #tpu.memory_space<vmem>>) attributes {dimension_semantics = [#tpu.dimension_semantics<parallel>], iteration_bounds = array<i64: 1>, scalar_prefetch = 0 : i64, scratch_operands = 0 : i64, tpu.core_type = #tpu.core_type<tc>, window_params = [{transform_indices = @transform_0, window_bounds = array<i64: 8, 1024>}, {pipeline_mode = #tpu.pipeline_mode<synchronous>, transform_indices = @transform_1, window_bounds = array<i64: 1, 1024>}, {pipeline_mode = #tpu.pipeline_mode<synchronous>, transform_indices = @transform_2, window_bounds = array<i64: 1, 1024>}, {transform_indices = @transform_3, window_bounds = array<i64: 8, 1024>}]} {
    %c0 = arith.constant 0 : index
    %c0_0 = arith.constant 0 : index
    %0 = vector.load %arg1[%c0, %c0_0] : memref<8x1024xf32, #tpu.memory_space<vmem>>, vector<8x1024xf32>
    %c0_1 = arith.constant 0 : index
    %c0_2 = arith.constant 0 : index
    %1 = vector.load %arg2[%c0_1, %c0_2] : memref<1x1024xf32, #tpu.memory_space<vmem>>, vector<1x1024xf32>
    %2 = vector.broadcast %1 : vector<1x1024xf32> to vector<8x1024xf32>
    %3 = arith.mulf %0, %2 : vector<8x1024xf32>
    %c0_3 = arith.constant 0 : index
    %c0_4 = arith.constant 0 : index
    %4 = vector.load %arg3[%c0_3, %c0_4] : memref<1x1024xf32, #tpu.memory_space<vmem>>, vector<1x1024xf32>
    %5 = vector.broadcast %4 : vector<1x1024xf32> to vector<8x1024xf32>
    %6 = arith.addf %3, %5 : vector<8x1024xf32>
    %cst = arith.constant 0.000000e+00 : f32
    %7 = vector.broadcast %cst : f32 to vector<8x1024xf32>
    %8 = arith.maximumf %6, %7 : vector<8x1024xf32>
    %c0_5 = arith.constant 0 : index
    %c0_6 = arith.constant 0 : index
    %9 = vector.load %arg4[%c0_5, %c0_6] : memref<8x1024xf32, #tpu.memory_space<vmem>>, vector<8x1024xf32>
    tpu.vector_store %arg4[%c0_5, %c0_6], %8 {strides = array<i32>} : memref<8x1024xf32, #tpu.memory_space<vmem>>, vector<8x1024xf32>,
    return
  }
  func.func @transform_0(%arg0: i32) -> (i32, i32) {
    %c0_i32 = arith.constant 0 : i32
    %c0_i32_0 = arith.constant 0 : i32
    return %arg0, %c0_i32 : i32, i32
  }
  func.func @transform_1(%arg0: i32) -> (i32, i32) {
    %c0_i32 = arith.constant 0 : i32
    %c0_i32_0 = arith.constant 0 : i32
    %c0_i32_1 = arith.constant 0 : i32
    return %c0_i32, %c0_i32_0 : i32, i32
  }
  func.func @transform_2(%arg0: i32) -> (i32, i32) {
    %c0_i32 = arith.constant 0 : i32
    %c0_i32_0 = arith.constant 0 : i32
    %c0_i32_1 = arith.constant 0 : i32
    return %c0_i32, %c0_i32_0 : i32, i32
  }
  func.func @transform_3(%arg0: i32) -> (i32, i32) {
    %c0_i32 = arith.constant 0 : i32
    %c0_i32_0 = arith.constant 0 : i32
    return %arg0, %c0_i32 : i32, i32
  }
}

module attributes {stable_mosaic.version = 11 : i64} {
  func.func @_gap_linear_kernel(%arg0: i32, %arg1: memref<8x1x1024xf32, #tpu.memory_space<vmem>>, %arg2: memref<1024x128xf32, #tpu.memory_space<vmem>>, %arg3: memref<1x128xf32, #tpu.memory_space<vmem>>, %arg4: memref<8x128xf32, #tpu.memory_space<vmem>>) attributes {dimension_semantics = [#tpu.dimension_semantics<arbitrary>], iteration_bounds = array<i64: 1>, scalar_prefetch = 0 : i64, scratch_operands = 0 : i64, tpu.core_type = #tpu.core_type<tc>, window_params = [{pipeline_mode = #tpu.pipeline_mode<synchronous>, transform_indices = @transform_0, window_bounds = array<i64: 8, 1, 1024>}, {pipeline_mode = #tpu.pipeline_mode<synchronous>, transform_indices = @transform_1, window_bounds = array<i64: 1024, 128>}, {pipeline_mode = #tpu.pipeline_mode<synchronous>, transform_indices = @transform_2, window_bounds = array<i64: 1, 128>}, {pipeline_mode = #tpu.pipeline_mode<synchronous>, transform_indices = @transform_3, window_bounds = array<i64: 8, 128>}]} {
    %c0 = arith.constant 0 : index
    %c0_0 = arith.constant 0 : index
    %c0_1 = arith.constant 0 : index
    %0 = vector.load %arg1[%c0, %c0_0, %c0_1] : memref<8x1x1024xf32, #tpu.memory_space<vmem>>, vector<8x1x1024xf32>
    %cst = arith.constant dense<0.000000e+00> : vector<8x1024xf32>
    %1 = vector.multi_reduction <add>, %0, %cst [1] : vector<8x1x1024xf32> to vector<8x1024xf32>
    %cst_2 = arith.constant 1.000000e+00 : f32
    %2 = vector.broadcast %cst_2 : f32 to vector<8x1024xf32>
    %3 = arith.divf %1, %2 : vector<8x1024xf32>
    %c0_3 = arith.constant 0 : index
    %c0_4 = arith.constant 0 : index
    %4 = vector.load %arg2[%c0_3, %c0_4] : memref<1024x128xf32, #tpu.memory_space<vmem>>, vector<1024x128xf32>
    %cst_5 = arith.constant dense<0.000000e+00> : vector<8x128xf32>
    %5 = tpu.matmul %3, %4, %cst_5 {dimension_numbers = #tpu.dot_dimension_numbers<[1], [0], [0], [1], [0, 0, 1, 1], [], []>} : vector<8x1024xf32>, vector<1024x128xf32>, vector<8x128xf32> -> vector<8x128xf32>
    %c0_6 = arith.constant 0 : index
    %c0_7 = arith.constant 0 : index
    %6 = vector.load %arg3[%c0_6, %c0_7] : memref<1x128xf32, #tpu.memory_space<vmem>>, vector<1x128xf32>
    %7 = vector.broadcast %6 : vector<1x128xf32> to vector<8x128xf32>
    %8 = arith.addf %5, %7 : vector<8x128xf32>
    %c0_8 = arith.constant 0 : index
    %c0_9 = arith.constant 0 : index
    %9 = vector.load %arg4[%c0_8, %c0_9] : memref<8x128xf32, #tpu.memory_space<vmem>>, vector<8x128xf32>
    tpu.vector_store %arg4[%c0_8, %c0_9], %8 {strides = array<i32>} : memref<8x128xf32, #tpu.memory_space<vmem>>, vector<8x128xf32>,
    return
  }
  func.func @transform_0(%arg0: i32) -> (i32, i32, i32) {
    %c0_i32 = arith.constant 0 : i32
    %c0_i32_0 = arith.constant 0 : i32
    %c0_i32_1 = arith.constant 0 : i32
    %c0_i32_2 = arith.constant 0 : i32
    return %c0_i32, %c0_i32_0, %c0_i32_1 : i32, i32, i32
  }
  func.func @transform_1(%arg0: i32) -> (i32, i32) {
    %c0_i32 = arith.constant 0 : i32
    %c0_i32_0 = arith.constant 0 : i32
    %c0_i32_1 = arith.constant 0 : i32
    return %c0_i32, %c0_i32_0 : i32, i32
  }
  func.func @transform_2(%arg0: i32) -> (i32, i32) {
    %c0_i32 = arith.constant 0 : i32
    %c0_i32_0 = arith.constant 0 : i32
    %c0_i32_1 = arith.constant 0 : i32
    return %c0_i32, %c0_i32_0 : i32, i32
  }
  func.func @transform_3(%arg0: i32) -> (i32, i32) {
    %c0_i32 = arith.constant 0 : i32
    %c0_i32_0 = arith.constant 0 : i32
    %c0_i32_1 = arith.constant 0 : i32
    return %c0_i32, %c0_i32_0 : i32, i32
  }
}

</mosaic_0001>

<bundles_post_ra>
// kernel: densenet121_forward.183
= control target key start
LH: loop header
LB: loop body
LE: loop exit
PB: predicated region body
PF: predicated region fallthrough
CT: control target
= control target key end

     0   :  { %s1556_s15 = smov 0   ;;  %s1558_s16 = smov 0   ;;  %s1786_s0 = inlined_call_operand.vmem [shape: bf16[512,256], index: 0, kind: input, shape index: {}]   ;;  %s1787_s1 = inlined_call_operand.vmem [shape: bf16[256,128], index: 1, kind: input, shape index: {}]   ;;  %s1788_s2 = inlined_call_operand.vmem [shape: f32[1,128], index: 2, kind: input, shape index: {}]   ;;  %s1789_s3 = inlined_call_operand.vmem [shape: f32[1,128], index: 3, kind: input, shape index: {}]   ;;  %s1790_s4 = inlined_call_operand.vmem [shape: f32[512,128], index: 4, kind: output, shape index: {}]  }
   0x1   :  { %s1560_s17 = smov 0  }
   0x2 LB: > { %s33_s18 = sadd.s32 1, %s1525_s16  ;;  %p1232_p0 = scmp.ge.s32.totalorder %s1529_s17, 1  ;;  %s1529_s17 = sphi %s1560_s17, %s14_s17   ;;  %s1525_s16 = sphi %s1558_s16, %s1792_s16   ;;  %s1521_s15 = sphi %s1556_s15, %s1791_s15  }
   0x3   : > { %p35_p1 = scmp.ge.s32.totalorder %s33_s18, 2  ;;  %p224_p2 = scmp.lt.s32.totalorder %s1529_s17, 3 }
   0x5   : > { %s1794_s18 = smov (%p35_p1, %s33_s18), 0  ;;  %p225_p3 = pnand %p1232_p0, %p224_p2 }
   0x6   : > { %v1443_v0 = vld [vmem:[%s1787_s1 + $0x40] sm:$0xff] (!%p225_p3)   ;;  %s1233_s21 = sshll.u32 (!%p225_p3), %s1521_s15, 5  ;;  %v1445_v2 = vld [vmem:[%s1787_s1 + $0x48] sm:$0xff] (!%p225_p3)   ;;  %v1447_v4 = vld [vmem:[%s1787_s1 + $0x50] sm:$0xff] (!%p225_p3)  }
   0x7   : > { %228 = sbr.rel (%p225_p3) target bundleno = 320 (0x140), region = 36  ;;  %v1444_v1 = vld [vmem:[%s1787_s1] sm:$0xff] (!%p225_p3)   ;;  %1291 = vmatprep.subr.bf16.mxu0 (!%p225_p3), %v1443_v0  ;;  %1403 = vmatprep.subr.bf16.mxu1 (!%p225_p3), %v1443_v0  ;;  %v1446_v3 = vld [vmem:[%s1787_s1 + $0x8] sm:$0xff] (!%p225_p3)   ;;  %p274_p4 = scmp.lt.s32.totalorder (!%p225_p3), %s1233_s21, 63  ;;  %v1448_v5 = vld [vmem:[%s1787_s1 + $0x10] sm:$0xff] (!%p225_p3)  }
   0x8   : > { %1292 = vmatpush3.bf16.msra.mxu0 (!%p225_p3), %v1444_v1  ;;  %1411 = vmatpush3.bf16.msra.mxu1 (!%p225_p3), %v1444_v1  ;;  %v1449_v6 = vld [vmem:[%s1787_s1 + $0x58] sm:$0xff] (!%p225_p3)   ;;  %v1451_v8 = vld [vmem:[%s1787_s1 + $0x60] sm:$0xff] (!%p225_p3)   ;;  %v1453_v10 = vld [vmem:[%s1787_s1 + $0x68] sm:$0xff] (!%p225_p3)  }
   0x9   : > { %1293 = vmatprep.subr.bf16.mxu0 (!%p225_p3), %v1445_v2  ;;  %1404 = vmatprep.subr.bf16.mxu1 (!%p225_p3), %v1445_v2  ;;  %v1450_v7 = vld [vmem:[%s1787_s1 + $0x18] sm:$0xff] (!%p225_p3)   ;;  %v1452_v9 = vld [vmem:[%s1787_s1 + $0x20] sm:$0xff] (!%p225_p3)   ;;  %v1454_v13 = vld [vmem:[%s1787_s1 + $0x28] sm:$0xff] (!%p225_p3)  }
   0xa   : > { %v1455_v14 = vld [vmem:[%s1787_s1 + $0x70] sm:$0xff] (!%p225_p3)   ;;  %v1457_v16 = vld [vmem:[%s1787_s1 + $0x78] sm:$0xff] (!%p225_p3)   ;;  %v1667_v51 = vld [vmem:[%s1788_s2] ss:$0 sm:$0xff] (!%p225_p3) }
   0xb   : > { %v1456_v15 = vld [vmem:[%s1787_s1 + $0x30] sm:$0xff] (!%p225_p3)   ;;  %v1458_v17 = vld [vmem:[%s1787_s1 + $0x38] sm:$0xff] (!%p225_p3)   ;;  %v1672_v57 = vld [vmem:[%s1789_s3] ss:$0 sm:$0xff] (!%p225_p3) }
   0xc   : > { %1294 = vmatpush3.bf16.msra.mxu0 (!%p225_p3), %v1446_v3  ;;  %1412 = vmatpush3.bf16.msra.mxu1 (!%p225_p3), %v1446_v3 }
   0xd   : > { %1295 = vmatprep.subr.bf16.mxu0 (!%p225_p3), %v1447_v4  ;;  %1405 = vmatprep.subr.bf16.mxu1 (!%p225_p3), %v1447_v4 }
   0xe   : > { %s1796_s21 = smov (!%p274_p4, %s1233_s21), 63 }
   0xf   : > { %s1290_s10 = sshll.u32 %s1796_s21, 3 }
  0x10   : > { %1296 = vmatpush3.bf16.msra.mxu0 %v1448_v5  ;;  %1413 = vmatpush3.bf16.msra.mxu1 %v1448_v5  ;;  %s1609_s15 = scalar_lea.vmem %s1786_s0, %s1290_s10 }
  0x11   : > { %1297 = vmatprep.subr.bf16.mxu0 %v1449_v6  ;;  %1406 = vmatprep.subr.bf16.mxu1 %v1449_v6  ;;  %v1461_v11 = vld [vmem:[%s1609_s15 + $0x4] ss:$8 sps:$4 sm:$0xff]   ;;  %v1459_v18 = vld [vmem:[%s1609_s15] ss:$8 sps:$4 sm:$0xff]   ;;  %v1465_v20 = vld [vmem:[%s1609_s15 + $0x14] ss:$8 sps:$4 sm:$0xff]  }
  0x12   : > { %v1464_v12 = vld [vmem:[%s1609_s15 + $0x84] ss:$8 sps:$4 sm:$0xff]   ;;  %729 = vmatprep.mubr.bf16.mxu0 %v1461_v11  ;;  %v1462_v19 = vld [vmem:[%s1609_s15 + $0x80] ss:$8 sps:$4 sm:$0xff]   ;;  %v1467_v21 = vld [vmem:[%s1609_s15 + $0x94] ss:$8 sps:$4 sm:$0xff]  }
  0x13   : > { %793 = vmatprep.mubr.bf16.mxu1 %v1464_v12  ;;  %v1469_v22 = vld [vmem:[%s1609_s15 + $0x10] ss:$8 sps:$4 sm:$0xff]   ;;  %v1471_v24 = vld [vmem:[%s1609_s15 + $0x24] ss:$8 sps:$4 sm:$0xff]   ;;  %v1475_v26 = vld [vmem:[%s1609_s15 + $0x20] ss:$8 sps:$4 sm:$0xff]  }
  0x14   : > { %1298 = vmatpush3.bf16.msra.mxu0 %v1450_v7  ;;  %1414 = vmatpush3.bf16.msra.mxu1 %v1450_v7  ;;  %v1470_v23 = vld [vmem:[%s1609_s15 + $0x90] ss:$8 sps:$4 sm:$0xff]   ;;  %v1473_v25 = vld [vmem:[%s1609_s15 + $0xa4] ss:$8 sps:$4 sm:$0xff]   ;;  %v1476_v27 = vld [vmem:[%s1609_s15 + $0xa0] ss:$8 sps:$4 sm:$0xff]  }
  0x15   : > { %1299 = vmatprep.subr.bf16.mxu0 %v1451_v8  ;;  %1407 = vmatprep.subr.bf16.mxu1 %v1451_v8  ;;  %v1477_v28 = vld [vmem:[%s1609_s15 + $0x34] ss:$8 sps:$4 sm:$0xff]   ;;  %v1481_v30 = vld [vmem:[%s1609_s15 + $0x30] ss:$8 sps:$4 sm:$0xff]   ;;  %v1483_v32 = vld [vmem:[%s1609_s15 + $0x44] ss:$8 sps:$4 sm:$0xff]  }
  0x16   : > { %v1479_v29 = vld [vmem:[%s1609_s15 + $0xb4] ss:$8 sps:$4 sm:$0xff]   ;;  %v1482_v31 = vld [vmem:[%s1609_s15 + $0xb0] ss:$8 sps:$4 sm:$0xff]   ;;  %v1485_v33 = vld [vmem:[%s1609_s15 + $0xc4] ss:$8 sps:$4 sm:$0xff]  }
  0x17   : > { %v1487_v34 = vld [vmem:[%s1609_s15 + $0x40] ss:$8 sps:$4 sm:$0xff]   ;;  %v1489_v36 = vld [vmem:[%s1609_s15 + $0x54] ss:$8 sps:$4 sm:$0xff]   ;;  %v1493_v38 = vld [vmem:[%s1609_s15 + $0x50] ss:$8 sps:$4 sm:$0xff]  }
  0x18   : > { %1300 = vmatpush3.bf16.msra.mxu0 %v1452_v9  ;;  %1415 = vmatpush3.bf16.msra.mxu1 %v1452_v9  ;;  %v1488_v35 = vld [vmem:[%s1609_s15 + $0xc0] ss:$8 sps:$4 sm:$0xff]   ;;  %v1491_v37 = vld [vmem:[%s1609_s15 + $0xd4] ss:$8 sps:$4 sm:$0xff]   ;;  %v1494_v39 = vld [vmem:[%s1609_s15 + $0xd0] ss:$8 sps:$4 sm:$0xff]  }
  0x19   : > { %1301 = vmatprep.subr.bf16.mxu0 %v1453_v10  ;;  %1408 = vmatprep.subr.bf16.mxu1 %v1453_v10  ;;  %v1495_v40 = vld [vmem:[%s1609_s15 + $0x64] ss:$8 sps:$4 sm:$0xff]   ;;  %v1499_v42 = vld [vmem:[%s1609_s15 + $0x60] ss:$8 sps:$4 sm:$0xff]   ;;  %v1501_v44 = vld [vmem:[%s1609_s15 + $0x74] ss:$8 sps:$4 sm:$0xff]  }
  0x1a   : > { %v1497_v41 = vld [vmem:[%s1609_s15 + $0xe4] ss:$8 sps:$4 sm:$0xff]   ;;  %v1500_v43 = vld [vmem:[%s1609_s15 + $0xe0] ss:$8 sps:$4 sm:$0xff]   ;;  %v1503_v45 = vld [vmem:[%s1609_s15 + $0xf4] ss:$8 sps:$4 sm:$0xff]  }
  0x1b   : > { %v1505_v46 = vld [vmem:[%s1609_s15 + $0x70] ss:$8 sps:$4 sm:$0xff]  }
  0x1c   : > { %1302 = vmatpush3.bf16.msra.mxu0 %v1454_v13  ;;  %1416 = vmatpush3.bf16.msra.mxu1 %v1454_v13  ;;  %v1506_v47 = vld [vmem:[%s1609_s15 + $0xf0] ss:$8 sps:$4 sm:$0xff]   ;;  %s1685_s15 = scalar_lea.vmem %s1790_s4, %s1290_s10 }
  0x1d   : > { %1303 = vmatprep.subr.bf16.mxu0 %v1455_v14  ;;  %1409 = vmatprep.subr.bf16.mxu1 %v1455_v14 }
  0x20   : > { %1304 = vmatpush3.bf16.msra.mxu0 %v1456_v15  ;;  %1417 = vmatpush3.bf16.msra.mxu1 %v1456_v15 }
  0x21   : > { %1305 = vmatprep.subr.bf16.mxu0 %v1457_v16  ;;  %1410 = vmatprep.subr.bf16.mxu1 %v1457_v16 }
  0x24   : > { %1306 = vmatpush3.bf16.msra.mxu0 %v1458_v17  ;;  %1418 = vmatpush3.bf16.msra.mxu1 %v1458_v17 }
  0x27   : > { %730 = vmatmul.mubr.bf16.vlgmr.msra.gmra.mrb[0].mxu0 %v1459_v18  ;;  %794 = vmatmul.mubr.bf16.vlgmr.msra.gmra.mrb[0].mxu1 %v1462_v19 }
  0x28   : > { %737 = vmatprep.mubr.bf16.mxu0 %v1465_v20  ;;  %801 = vmatprep.mubr.bf16.mxu1 %v1467_v21 }
  0x2f   : > { %738 = vmatmul.mubr.bf16.gmra.mrb[4].mxu0 %v1469_v22  ;;  %802 = vmatmul.mubr.bf16.gmra.mrb[4].mxu1 %v1470_v23 }
  0x30   : > { %745 = vmatprep.mubr.bf16.mxu0 %v1471_v24  ;;  %809 = vmatprep.mubr.bf16.mxu1 %v1473_v25 }
  0x37   : > { %746 = vmatmul.mubr.bf16.gmra.mrb[8].mxu0 %v1475_v26  ;;  %810 = vmatmul.mubr.bf16.gmra.mrb[8].mxu1 %v1476_v27 }
  0x38   : > { %753 = vmatprep.mubr.bf16.mxu0 %v1477_v28  ;;  %817 = vmatprep.mubr.bf16.mxu1 %v1479_v29 }
  0x3f   : > { %754 = vmatmul.mubr.bf16.gmra.mrb[12].mxu0 %v1481_v30  ;;  %818 = vmatmul.mubr.bf16.gmra.mrb[12].mxu1 %v1482_v31 }
  0x40   : > { %761 = vmatprep.mubr.bf16.mxu0 %v1483_v32  ;;  %825 = vmatprep.mubr.bf16.mxu1 %v1485_v33 }
  0x47   : > { %762 = vmatmul.mubr.bf16.gmra.mrb[16].mxu0 %v1487_v34  ;;  %826 = vmatmul.mubr.bf16.gmra.mrb[16].mxu1 %v1488_v35 }
  0x48   : > { %769 = vmatprep.mubr.bf16.mxu0 %v1489_v36  ;;  %833 = vmatprep.mubr.bf16.mxu1 %v1491_v37 }
  0x4f   : > { %770 = vmatmul.mubr.bf16.gmra.mrb[20].mxu0 %v1493_v38  ;;  %834 = vmatmul.mubr.bf16.gmra.mrb[20].mxu1 %v1494_v39 }
  0x50   : > { %777 = vmatprep.mubr.bf16.mxu0 %v1495_v40  ;;  %841 = vmatprep.mubr.bf16.mxu1 %v1497_v41 }
  0x57   : > { %778 = vmatmul.mubr.bf16.gmra.mrb[24].mxu0 %v1499_v42  ;;  %842 = vmatmul.mubr.bf16.gmra.mrb[24].mxu1 %v1500_v43 }
  0x58   : > { %785 = vmatprep.mubr.bf16.mxu0 %v1501_v44  ;;  %849 = vmatprep.mubr.bf16.mxu1 %v1503_v45 }
  0x5f   : > { %786 = vmatmul.mubr.bf16.gmra.mrb[28].mxu0 %v1505_v46  ;;  %850 = vmatmul.mubr.bf16.gmra.mrb[28].mxu1 %v1506_v47 }
  0xfa   : > { %v1307_v48 = vpop.f32.mrb[0].mxu0  ;;  %v1355_v49 = vpop.f32.mrb[0].mxu1 }
  0xfb   : > { %v1308_v50 = vpop.f32.mrb[1].mxu0  ;;  %v1356_v52 = vpop.f32.mrb[1].mxu1 }
  0xfc   : > { %v1309_v53 = vadd.f32 %v1308_v50, %v1307_v48  ;;  %v1357_v54 = vadd.f32 %v1356_v52, %v1355_v49  ;;  %v1310_v55 = vpop.f32.mrb[2].mxu0  ;;  %v1358_v56 = vpop.f32.mrb[2].mxu1 }
  0xfd   : > { %v1311_v58 = vpop.f32.mrb[3].mxu0  ;;  %v1359_v59 = vpop.f32.mrb[3].mxu1 }
  0xfe   : > { %v964_v60 = vmul.f32 %v1309_v53, %v1667_v51  ;;  %v980_v61 = vmul.f32 %v1357_v54, %v1667_v51  ;;  %v1312_v62 = vadd.f32 %v1311_v58, %v1310_v55  ;;  %v1360_v63 = vadd.f32 %v1359_v59, %v1358_v56 }
 0x100   : > { %v1003_v0 = vadd.f32 %v1672_v57, %v964_v60  ;;  %v1019_v1 = vadd.f32 %v1672_v57, %v980_v61  ;;  %v965_v2 = vmul.f32 %v1312_v62, %v1667_v51  ;;  %v981_v3 = vmul.f32 %v1360_v63, %v1667_v51 }
 0x102   : > { %v1035_v4 = vmax.f32 %v1003_v0, 0.0  ;;  %v1051_v5 = vmax.f32 %v1019_v1, 0.0  ;;  %v1004_v6 = vadd.f32 %v1672_v57, %v965_v2  ;;  %v1020_v7 = vadd.f32 %v1672_v57, %v981_v3  ;;  %v1313_v8 = vpop.f32.mrb[4].mxu0  ;;  %v1361_v9 = vpop.f32.mrb[4].mxu1 }
 0x103   : > { %v1314_v10 = vpop.f32.mrb[5].mxu0  ;;  %v1362_v11 = vpop.f32.mrb[5].mxu1 }
 0x104   : > { %1067 = vst [vmem:[%s1685_s15] sm:$0xff] %v1035_v4  ;;  %1083 = vst [vmem:[%s1685_s15 + $0x80] sm:$0xff] %v1051_v5  ;;  %v1036_v12 = vmax.f32 %v1004_v6, 0.0  ;;  %v1052_v13 = vmax.f32 %v1020_v7, 0.0  ;;  %v1315_v14 = vadd.f32 %v1314_v10, %v1313_v8  ;;  %v1363_v15 = vadd.f32 %v1362_v11, %v1361_v9  ;;  %v1316_v16 = vpop.f32.mrb[6].mxu0  ;;  %v1364_v17 = vpop.f32.mrb[6].mxu1 }
 0x105   : > { %v1317_v18 = vpop.f32.mrb[7].mxu0  ;;  %v1365_v19 = vpop.f32.mrb[7].mxu1 }
 0x106   : > { %1068 = vst [vmem:[%s1685_s15 + $0x8] sm:$0xff] %v1036_v12  ;;  %1084 = vst [vmem:[%s1685_s15 + $0x88] sm:$0xff] %v1052_v13  ;;  %v966_v20 = vmul.f32 %v1315_v14, %v1667_v51  ;;  %v982_v21 = vmul.f32 %v1363_v15, %v1667_v51  ;;  %v1318_v22 = vadd.f32 %v1317_v18, %v1316_v16 }
 0x107   : > { %v1366_v23 = vadd.f32 %v1365_v19, %v1364_v17 }
 0x108   : > { %v1005_v24 = vadd.f32 %v1672_v57, %v966_v20  ;;  %v1021_v25 = vadd.f32 %v1672_v57, %v982_v21  ;;  %v967_v26 = vmul.f32 %v1318_v22, %v1667_v51 }
 0x109   : > { %v983_v27 = vmul.f32 %v1366_v23, %v1667_v51 }
 0x10a   : > { %v1037_v28 = vmax.f32 %v1005_v24, 0.0  ;;  %v1053_v29 = vmax.f32 %v1021_v25, 0.0  ;;  %v1006_v30 = vadd.f32 %v1672_v57, %v967_v26  ;;  %v1319_v32 = vpop.f32.mrb[8].mxu0  ;;  %v1367_v33 = vpop.f32.mrb[8].mxu1 }
 0x10b   : > { %v1022_v31 = vadd.f32 %v1672_v57, %v983_v27  ;;  %v1320_v34 = vpop.f32.mrb[9].mxu0  ;;  %v1368_v35 = vpop.f32.mrb[9].mxu1 }
 0x10c   : > { %1069 = vst [vmem:[%s1685_s15 + $0x10] sm:$0xff] %v1037_v28  ;;  %1085 = vst [vmem:[%s1685_s15 + $0x90] sm:$0xff] %v1053_v29  ;;  %v1038_v36 = vmax.f32 %v1006_v30, 0.0  ;;  %v1321_v38 = vadd.f32 %v1320_v34, %v1319_v32  ;;  %v1369_v39 = vadd.f32 %v1368_v35, %v1367_v33  ;;  %v1322_v40 = vpop.f32.mrb[10].mxu0  ;;  %v1370_v41 = vpop.f32.mrb[10].mxu1 }
 0x10d   : > { %v1054_v37 = vmax.f32 %v1022_v31, 0.0  ;;  %v1323_v42 = vpop.f32.mrb[11].mxu0  ;;  %v1371_v43 = vpop.f32.mrb[11].mxu1 }
 0x10e   : > { %1070 = vst [vmem:[%s1685_s15 + $0x18] sm:$0xff] %v1038_v36  ;;  %v968_v44 = vmul.f32 %v1321_v38, %v1667_v51  ;;  %v984_v45 = vmul.f32 %v1369_v39, %v1667_v51  ;;  %v1324_v46 = vadd.f32 %v1323_v42, %v1322_v40  ;;  %v1372_v47 = vadd.f32 %v1371_v43, %v1370_v41 }
 0x10f   : > { %1086 = vst [vmem:[%s1685_s15 + $0x98] sm:$0xff] %v1054_v37 }
 0x110   : > { %v1007_v48 = vadd.f32 %v1672_v57, %v968_v44  ;;  %v1023_v49 = vadd.f32 %v1672_v57, %v984_v45  ;;  %v969_v50 = vmul.f32 %v1324_v46, %v1667_v51  ;;  %v985_v52 = vmul.f32 %v1372_v47, %v1667_v51 }
 0x112   : > { %v1039_v53 = vmax.f32 %v1007_v48, 0.0  ;;  %v1055_v54 = vmax.f32 %v1023_v49, 0.0  ;;  %v1008_v55 = vadd.f32 %v1672_v57, %v969_v50  ;;  %v1024_v56 = vadd.f32 %v1672_v57, %v985_v52  ;;  %v1325_v58 = vpop.f32.mrb[12].mxu0  ;;  %v1373_v59 = vpop.f32.mrb[12].mxu1 }
 0x113   : > { %v1326_v60 = vpop.f32.mrb[13].mxu0  ;;  %v1374_v61 = vpop.f32.mrb[13].mxu1 }
 0x114   : > { %1071 = vst [vmem:[%s1685_s15 + $0x20] sm:$0xff] %v1039_v53  ;;  %1087 = vst [vmem:[%s1685_s15 + $0xa0] sm:$0xff] %v1055_v54  ;;  %v1040_v62 = vmax.f32 %v1008_v55, 0.0  ;;  %v1056_v63 = vmax.f32 %v1024_v56, 0.0  ;;  %v1327_v0 = vadd.f32 %v1326_v60, %v1325_v58  ;;  %v1375_v1 = vadd.f32 %v1374_v61, %v1373_v59  ;;  %v1328_v2 = vpop.f32.mrb[14].mxu0  ;;  %v1376_v3 = vpop.f32.mrb[14].mxu1 }
 0x115   : > { %v1329_v4 = vpop.f32.mrb[15].mxu0  ;;  %v1377_v5 = vpop.f32.mrb[15].mxu1 }
 0x116   : > { %1072 = vst [vmem:[%s1685_s15 + $0x28] sm:$0xff] %v1040_v62  ;;  %1088 = vst [vmem:[%s1685_s15 + $0xa8] sm:$0xff] %v1056_v63  ;;  %v970_v6 = vmul.f32 %v1327_v0, %v1667_v51  ;;  %v986_v7 = vmul.f32 %v1375_v1, %v1667_v51  ;;  %v1330_v8 = vadd.f32 %v1329_v4, %v1328_v2 }
 0x117   : > { %v1378_v9 = vadd.f32 %v1377_v5, %v1376_v3 }
 0x118   : > { %v1009_v10 = vadd.f32 %v1672_v57, %v970_v6  ;;  %v1025_v11 = vadd.f32 %v1672_v57, %v986_v7  ;;  %v971_v12 = vmul.f32 %v1330_v8, %v1667_v51 }
 0x119   : > { %v987_v13 = vmul.f32 %v1378_v9, %v1667_v51 }
 0x11a   : > { %v1041_v14 = vmax.f32 %v1009_v10, 0.0  ;;  %v1057_v15 = vmax.f32 %v1025_v11, 0.0  ;;  %v1010_v16 = vadd.f32 %v1672_v57, %v971_v12  ;;  %v1331_v18 = vpop.f32.mrb[16].mxu0  ;;  %v1379_v19 = vpop.f32.mrb[16].mxu1 }
 0x11b   : > { %v1026_v17 = vadd.f32 %v1672_v57, %v987_v13  ;;  %v1332_v20 = vpop.f32.mrb[17].mxu0  ;;  %v1380_v21 = vpop.f32.mrb[17].mxu1 }
 0x11c   : > { %1073 = vst [vmem:[%s1685_s15 + $0x30] sm:$0xff] %v1041_v14  ;;  %1089 = vst [vmem:[%s1685_s15 + $0xb0] sm:$0xff] %v1057_v15  ;;  %v1042_v22 = vmax.f32 %v1010_v16, 0.0  ;;  %v1333_v24 = vadd.f32 %v1332_v20, %v1331_v18  ;;  %v1381_v25 = vadd.f32 %v1380_v21, %v1379_v19  ;;  %v1334_v26 = vpop.f32.mrb[18].mxu0  ;;  %v1382_v27 = vpop.f32.mrb[18].mxu1 }
 0x11d   : > { %v1058_v23 = vmax.f32 %v1026_v17, 0.0  ;;  %v1335_v28 = vpop.f32.mrb[19].mxu0  ;;  %v1383_v29 = vpop.f32.mrb[19].mxu1 }
 0x11e   : > { %1074 = vst [vmem:[%s1685_s15 + $0x38] sm:$0xff] %v1042_v22  ;;  %v972_v30 = vmul.f32 %v1333_v24, %v1667_v51  ;;  %v988_v31 = vmul.f32 %v1381_v25, %v1667_v51  ;;  %v1336_v32 = vadd.f32 %v1335_v28, %v1334_v26  ;;  %v1384_v33 = vadd.f32 %v1383_v29, %v1382_v27 }
 0x11f   : > { %1090 = vst [vmem:[%s1685_s15 + $0xb8] sm:$0xff] %v1058_v23 }
 0x120   : > { %v1011_v34 = vadd.f32 %v1672_v57, %v972_v30  ;;  %v1027_v35 = vadd.f32 %v1672_v57, %v988_v31  ;;  %v973_v36 = vmul.f32 %v1336_v32, %v1667_v51  ;;  %v989_v37 = vmul.f32 %v1384_v33, %v1667_v51 }
 0x122   : > { %v1043_v38 = vmax.f32 %v1011_v34, 0.0  ;;  %v1059_v39 = vmax.f32 %v1027_v35, 0.0  ;;  %v1012_v40 = vadd.f32 %v1672_v57, %v973_v36  ;;  %v1028_v41 = vadd.f32 %v1672_v57, %v989_v37  ;;  %v1337_v42 = vpop.f32.mrb[20].mxu0  ;;  %v1385_v43 = vpop.f32.mrb[20].mxu1 }
 0x123   : > { %v1338_v44 = vpop.f32.mrb[21].mxu0  ;;  %v1386_v45 = vpop.f32.mrb[21].mxu1 }
 0x124   : > { %1075 = vst [vmem:[%s1685_s15 + $0x40] sm:$0xff] %v1043_v38  ;;  %1091 = vst [vmem:[%s1685_s15 + $0xc0] sm:$0xff] %v1059_v39  ;;  %v1044_v46 = vmax.f32 %v1012_v40, 0.0  ;;  %v1060_v47 = vmax.f32 %v1028_v41, 0.0  ;;  %v1339_v48 = vadd.f32 %v1338_v44, %v1337_v42  ;;  %v1387_v49 = vadd.f32 %v1386_v45, %v1385_v43  ;;  %v1340_v50 = vpop.f32.mrb[22].mxu0  ;;  %v1388_v52 = vpop.f32.mrb[22].mxu1 }
 0x125   : > { %v1341_v53 = vpop.f32.mrb[23].mxu0  ;;  %v1389_v54 = vpop.f32.mrb[23].mxu1 }
 0x126   : > { %1076 = vst [vmem:[%s1685_s15 + $0x48] sm:$0xff] %v1044_v46  ;;  %1092 = vst [vmem:[%s1685_s15 + $0xc8] sm:$0xff] %v1060_v47  ;;  %v974_v55 = vmul.f32 %v1339_v48, %v1667_v51  ;;  %v990_v56 = vmul.f32 %v1387_v49, %v1667_v51  ;;  %v1342_v58 = vadd.f32 %v1341_v53, %v1340_v50 }
 0x127   : > { %v1390_v59 = vadd.f32 %v1389_v54, %v1388_v52 }
 0x128   : > { %v1013_v60 = vadd.f32 %v1672_v57, %v974_v55  ;;  %v1029_v61 = vadd.f32 %v1672_v57, %v990_v56  ;;  %v975_v62 = vmul.f32 %v1342_v58, %v1667_v51 }
 0x129   : > { %v991_v63 = vmul.f32 %v1390_v59, %v1667_v51 }
 0x12a   : > { %v1045_v0 = vmax.f32 %v1013_v60, 0.0  ;;  %v1061_v1 = vmax.f32 %v1029_v61, 0.0  ;;  %v1014_v2 = vadd.f32 %v1672_v57, %v975_v62  ;;  %v1343_v4 = vpop.f32.mrb[24].mxu0  ;;  %v1391_v5 = vpop.f32.mrb[24].mxu1 }
 0x12b   : > { %v1030_v3 = vadd.f32 %v1672_v57, %v991_v63  ;;  %v1344_v6 = vpop.f32.mrb[25].mxu0  ;;  %v1392_v7 = vpop.f32.mrb[25].mxu1 }
 0x12c   : > { %1077 = vst [vmem:[%s1685_s15 + $0x50] sm:$0xff] %v1045_v0  ;;  %1093 = vst [vmem:[%s1685_s15 + $0xd0] sm:$0xff] %v1061_v1  ;;  %v1046_v8 = vmax.f32 %v1014_v2, 0.0  ;;  %v1345_v10 = vadd.f32 %v1344_v6, %v1343_v4  ;;  %v1393_v11 = vadd.f32 %v1392_v7, %v1391_v5  ;;  %v1346_v12 = vpop.f32.mrb[26].mxu0  ;;  %v1394_v13 = vpop.f32.mrb[26].mxu1 }
 0x12d   : > { %v1062_v9 = vmax.f32 %v1030_v3, 0.0  ;;  %v1347_v14 = vpop.f32.mrb[27].mxu0  ;;  %v1395_v15 = vpop.f32.mrb[27].mxu1 }
 0x12e   : > { %1078 = vst [vmem:[%s1685_s15 + $0x58] sm:$0xff] %v1046_v8  ;;  %v976_v16 = vmul.f32 %v1345_v10, %v1667_v51  ;;  %v992_v17 = vmul.f32 %v1393_v11, %v1667_v51  ;;  %v1348_v18 = vadd.f32 %v1347_v14, %v1346_v12  ;;  %v1396_v19 = vadd.f32 %v1395_v15, %v1394_v13 }
 0x12f   : > { %1094 = vst [vmem:[%s1685_s15 + $0xd8] sm:$0xff] %v1062_v9 }
 0x130   : > { %v1015_v20 = vadd.f32 %v1672_v57, %v976_v16  ;;  %v1031_v21 = vadd.f32 %v1672_v57, %v992_v17  ;;  %v977_v22 = vmul.f32 %v1348_v18, %v1667_v51  ;;  %v993_v23 = vmul.f32 %v1396_v19, %v1667_v51 }
 0x132   : > { %v1047_v24 = vmax.f32 %v1015_v20, 0.0  ;;  %v1063_v25 = vmax.f32 %v1031_v21, 0.0  ;;  %v1016_v26 = vadd.f32 %v1672_v57, %v977_v22  ;;  %v1032_v27 = vadd.f32 %v1672_v57, %v993_v23  ;;  %v1349_v28 = vpop.f32.mrb[28].mxu0  ;;  %v1397_v29 = vpop.f32.mrb[28].mxu1 }
 0x133   : > { %v1350_v30 = vpop.f32.mrb[29].mxu0  ;;  %v1398_v31 = vpop.f32.mrb[29].mxu1 }
 0x134   : > { %1079 = vst [vmem:[%s1685_s15 + $0x60] sm:$0xff] %v1047_v24  ;;  %1095 = vst [vmem:[%s1685_s15 + $0xe0] sm:$0xff] %v1063_v25  ;;  %v1048_v32 = vmax.f32 %v1016_v26, 0.0  ;;  %v1064_v33 = vmax.f32 %v1032_v27, 0.0  ;;  %v1351_v34 = vadd.f32 %v1350_v30, %v1349_v28  ;;  %v1399_v35 = vadd.f32 %v1398_v31, %v1397_v29  ;;  %v1352_v36 = vpop.f32.mrb[30].mxu0  ;;  %v1400_v37 = vpop.f32.mrb[30].mxu1 }
 0x135   : > { %v1353_v38 = vpop.f32.mrb[31].mxu0  ;;  %v1401_v39 = vpop.f32.mrb[31].mxu1 }
 0x136   : > { %1080 = vst [vmem:[%s1685_s15 + $0x68] sm:$0xff] %v1048_v32  ;;  %1096 = vst [vmem:[%s1685_s15 + $0xe8] sm:$0xff] %v1064_v33  ;;  %v978_v40 = vmul.f32 %v1351_v34, %v1667_v51  ;;  %v994_v41 = vmul.f32 %v1399_v35, %v1667_v51  ;;  %v1354_v42 = vadd.f32 %v1353_v38, %v1352_v36 }
 0x137   : > { %v1402_v43 = vadd.f32 %v1401_v39, %v1400_v37 }
 0x138   : > { %v1017_v44 = vadd.f32 %v1672_v57, %v978_v40  ;;  %v1033_v45 = vadd.f32 %v1672_v57, %v994_v41  ;;  %v979_v46 = vmul.f32 %v1354_v42, %v1667_v51 }
 0x139   : > { %v995_v47 = vmul.f32 %v1402_v43, %v1667_v51 }
 0x13a   : > { %v1049_v48 = vmax.f32 %v1017_v44, 0.0  ;;  %v1065_v49 = vmax.f32 %v1033_v45, 0.0  ;;  %v1018_v50 = vadd.f32 %v1672_v57, %v979_v46 }
 0x13b   : > { %v1034_v52 = vadd.f32 %v1672_v57, %v995_v47 }
 0x13c   : > { %1081 = vst [vmem:[%s1685_s15 + $0x70] sm:$0xff] %v1049_v48  ;;  %1097 = vst [vmem:[%s1685_s15 + $0xf0] sm:$0xff] %v1065_v49  ;;  %v1050_v53 = vmax.f32 %v1018_v50, 0.0 }
 0x13d   : > { %v1066_v54 = vmax.f32 %v1034_v52, 0.0 }
 0x13e   : > { %1082 = vst [vmem:[%s1685_s15 + $0x78] sm:$0xff] %v1050_v53 }
 0x13f   : > { %1098 = vst [vmem:[%s1685_s15 + $0xf8] sm:$0xff] %v1066_v54 }
 0x140 PF: > { %s14_s17 = sadd.s32 1, %s1529_s17   ;;  %s1791_s15 = smov %s1525_s16 }
 0x141   : > { %p11_p5 = scmp.ge.s32.totalorder %s14_s17, 4   ;;  %s1792_s16 = smov %s1794_s18 }
 0x143   :  { %13 = sbr.rel (!%p11_p5) target bundleno = 2 (0x2), region = 83 }

// kernel: densenet121_forward.185
= control target key start
LH: loop header
LB: loop body
LE: loop exit
PB: predicated region body
PF: predicated region fallthrough
CT: control target
= control target key end

     0   :  { %s774_s1 = inlined_call_operand.vmem [shape: bf16[128,128], index: 1, kind: input, shape index: {}]   ;;  %s775_s0 = inlined_call_operand.vmem [shape: bf16[128,128], index: 0, kind: input, shape index: {}]   ;;  %s776_s2 = inlined_call_operand.vmem [shape: f32[1,128], index: 2, kind: input, shape index: {}]   ;;  %s777_s3 = inlined_call_operand.vmem [shape: f32[1,128], index: 3, kind: input, shape index: {}]   ;;  %s778_s4 = inlined_call_operand.vmem [shape: bf16[128,128], index: 4, kind: output, shape index: {}]  }
   0x1   :  { %v637_v0 = vld [vmem:[%s774_s1] sm:$0xff]   ;;  %v638_v1 = vld [vmem:[%s774_s1 + $0x8] sm:$0xff]   ;;  %v639_v2 = vld [vmem:[%s774_s1 + $0x10] sm:$0xff]  }
   0x2   :  { %589 = vmatprep.subr.bf16.mxu0 %v637_v0  ;;  %621 = vmatprep.subr.bf16.mxu1 %v637_v0  ;;  %v640_v3 = vld [vmem:[%s774_s1 + $0x18] sm:$0xff]   ;;  %v645_v4 = vld [vmem:[%s775_s0] sm:$0xff]   ;;  %v642_v7 = vld [vmem:[%s774_s1 + $0x28] sm:$0xff]  }
   0x3   :  { %590 = vmatpush3.bf16.msra.mxu0 %v637_v0  ;;  %629 = vmatpush3.bf16.msra.mxu1 %v637_v0  ;;  %v646_v5 = vld [vmem:[%s775_s0 + $0x20] sm:$0xff]   ;;  %v643_v8 = vld [vmem:[%s774_s1 + $0x30] sm:$0xff]   ;;  %v644_v9 = vld [vmem:[%s774_s1 + $0x38] sm:$0xff]  }
   0x4   :  { %591 = vmatprep.subr.bf16.mxu0 %v638_v1  ;;  %622 = vmatprep.subr.bf16.mxu1 %v638_v1  ;;  %v641_v6 = vld [vmem:[%s774_s1 + $0x20] sm:$0xff]   ;;  %v647_v10 = vld [vmem:[%s775_s0 + $0x8] sm:$0xff]   ;;  %v649_v12 = vld [vmem:[%s775_s0 + $0x10] sm:$0xff]  }
   0x5   :  { %605 = vmatprep.mubr.bf16.mxu0 %v645_v4  ;;  %613 = vmatprep.mubr.bf16.mxu1 %v646_v5  ;;  %v648_v11 = vld [vmem:[%s775_s0 + $0x28] sm:$0xff]   ;;  %v650_v13 = vld [vmem:[%s775_s0 + $0x30] sm:$0xff]   ;;  %v651_v14 = vld [vmem:[%s775_s0 + $0x18] sm:$0xff]  }
   0x6   :  { %v652_v15 = vld [vmem:[%s775_s0 + $0x38] sm:$0xff]   ;;  %v492_v16 = vld [vmem:[%s776_s2] ss:$0 sm:$0xff] }
   0x7   :  { %592 = vmatpush3.bf16.msra.mxu0 %v638_v1  ;;  %630 = vmatpush3.bf16.msra.mxu1 %v638_v1  ;;  %v732_v18 = vld [vmem:[%s777_s3] ss:$0 sm:$0xff] }
   0x8   :  { %593 = vmatprep.subr.bf16.mxu0 %v639_v2  ;;  %623 = vmatprep.subr.bf16.mxu1 %v639_v2 }
   0xb   :  { %594 = vmatpush3.bf16.msra.mxu0 %v639_v2  ;;  %631 = vmatpush3.bf16.msra.mxu1 %v639_v2 }
   0xc   :  { %595 = vmatprep.subr.bf16.mxu0 %v640_v3  ;;  %624 = vmatprep.subr.bf16.mxu1 %v640_v3 }
   0xf   :  { %596 = vmatpush3.bf16.msra.mxu0 %v640_v3  ;;  %632 = vmatpush3.bf16.msra.mxu1 %v640_v3 }
  0x10   :  { %597 = vmatprep.subr.bf16.mxu0 %v641_v6  ;;  %625 = vmatprep.subr.bf16.mxu1 %v641_v6 }
  0x13   :  { %598 = vmatpush3.bf16.msra.mxu0 %v641_v6  ;;  %633 = vmatpush3.bf16.msra.mxu1 %v641_v6 }
  0x14   :  { %599 = vmatprep.subr.bf16.mxu0 %v642_v7  ;;  %626 = vmatprep.subr.bf16.mxu1 %v642_v7 }
  0x17   :  { %600 = vmatpush3.bf16.msra.mxu0 %v642_v7  ;;  %634 = vmatpush3.bf16.msra.mxu1 %v642_v7 }
  0x18   :  { %601 = vmatprep.subr.bf16.mxu0 %v643_v8  ;;  %627 = vmatprep.subr.bf16.mxu1 %v643_v8 }
  0x1b   :  { %602 = vmatpush3.bf16.msra.mxu0 %v643_v8  ;;  %635 = vmatpush3.bf16.msra.mxu1 %v643_v8 }
  0x1c   :  { %603 = vmatprep.subr.bf16.mxu0 %v644_v9  ;;  %628 = vmatprep.subr.bf16.mxu1 %v644_v9 }
  0x1f   :  { %604 = vmatpush3.bf16.msra.mxu0 %v644_v9  ;;  %636 = vmatpush3.bf16.msra.mxu1 %v644_v9 }
  0x22   :  { %606 = vmatmul.mubr.bf16.vlgmr.msra.gmra.mrb[0].mxu0 %v647_v10  ;;  %614 = vmatmul.mubr.bf16.vlgmr.msra.gmra.mrb[0].mxu1 %v648_v11 }
  0x23   :  { %609 = vmatprep.mubr.bf16.mxu0 %v649_v12  ;;  %617 = vmatprep.mubr.bf16.mxu1 %v650_v13 }
  0x2a   :  { %610 = vmatmul.mubr.bf16.gmra.mrb[4].mxu0 %v651_v14  ;;  %618 = vmatmul.mubr.bf16.gmra.mrb[4].mxu1 %v652_v15 }
  0xf5   :  { %v607_v17 = vpop.f32.mrb[0].mxu0  ;;  %v615_v19 = vpop.f32.mrb[0].mxu1 }
  0xf6   :  { %v339_v20 = vmul.f32 %v607_v17, %v492_v16  ;;  %v347_v21 = vmul.f32 %v615_v19, %v492_v16  ;;  %v216_v22 = vpop.f32.mrb[1].mxu0  ;;  %v248_v23 = vpop.f32.mrb[1].mxu1 }
  0xf7   :  { %v337_v24 = vmul.f32 %v492_v16, %v216_v22  ;;  %v345_v25 = vmul.f32 %v492_v16, %v248_v23  ;;  %v608_v26 = vpop.f32.mrb[2].mxu0  ;;  %v616_v27 = vpop.f32.mrb[2].mxu1 }
  0xf8   :  { %v362_v28 = vadd.f32 %v732_v18, %v339_v20  ;;  %v370_v29 = vadd.f32 %v732_v18, %v347_v21  ;;  %v340_v30 = vmul.f32 %v608_v26, %v492_v16  ;;  %v348_v31 = vmul.f32 %v616_v27, %v492_v16  ;;  %v219_v32 = vpop.f32.mrb[3].mxu0  ;;  %v251_v33 = vpop.f32.mrb[3].mxu1 }
  0xf9   :  { %v360_v34 = vadd.f32 %v732_v18, %v337_v24  ;;  %v368_v35 = vadd.f32 %v732_v18, %v345_v25  ;;  %v338_v36 = vmul.f32 %v492_v16, %v219_v32  ;;  %v346_v37 = vmul.f32 %v492_v16, %v251_v33 }
  0xfa   :  { %v363_v38 = vadd.f32 %v732_v18, %v340_v30  ;;  %v371_v39 = vadd.f32 %v732_v18, %v348_v31  ;;  %v378_v42 = vmax.f32 %v362_v28, 0.0  ;;  %v386_v43 = vmax.f32 %v370_v29, 0.0 }
  0xfb   :  { %v361_v40 = vadd.f32 %v732_v18, %v338_v36  ;;  %v369_v41 = vadd.f32 %v732_v18, %v346_v37  ;;  %v376_v46 = vmax.f32 %v360_v34, 0.0  ;;  %v384_v47 = vmax.f32 %v368_v35, 0.0 }
  0xfc   :  { %v379_v44 = vmax.f32 %v363_v38, 0.0  ;;  %v387_v45 = vmax.f32 %v371_v39, 0.0 }
  0xfd   :  { %v377_v48 = vmax.f32 %v361_v40, 0.0  ;;  %v385_v49 = vmax.f32 %v369_v41, 0.0  ;;  %v611_v50 = vpop.f32.mrb[4].mxu0  ;;  %v619_v51 = vpop.f32.mrb[4].mxu1 }
  0xfe   :  { %v534_v52 = vpack.c.bf16 %v379_v44, %v378_v42  ;;  %v554_v53 = vpack.c.bf16 %v387_v45, %v386_v43  ;;  %v343_v54 = vmul.f32 %v611_v50, %v492_v16  ;;  %v351_v55 = vmul.f32 %v619_v51, %v492_v16  ;;  %v232_v56 = vpop.f32.mrb[5].mxu0  ;;  %v264_v57 = vpop.f32.mrb[5].mxu1 }
  0xff   :  { %v529_v58 = vpack.c.bf16 %v377_v48, %v376_v46  ;;  %v549_v59 = vpack.c.bf16 %v385_v49, %v384_v47  ;;  %v341_v60 = vmul.f32 %v492_v16, %v232_v56  ;;  %v349_v61 = vmul.f32 %v492_v16, %v264_v57  ;;  %v612_v62 = vpop.f32.mrb[6].mxu0  ;;  %v620_v63 = vpop.f32.mrb[6].mxu1 }
 0x100   :  { %566 = vst [vmem:[%s778_s4 + $0x8] sm:$0xff] %v534_v52   ;;  %570 = vst [vmem:[%s778_s4 + $0x28] sm:$0xff] %v554_v53   ;;  %v366_v0 = vadd.f32 %v732_v18, %v343_v54  ;;  %v374_v1 = vadd.f32 %v732_v18, %v351_v55  ;;  %v344_v2 = vmul.f32 %v612_v62, %v492_v16  ;;  %v235_v4 = vpop.f32.mrb[7].mxu0  ;;  %v267_v5 = vpop.f32.mrb[7].mxu1 }
 0x101   :  { %v352_v3 = vmul.f32 %v620_v63, %v492_v16  ;;  %530 = vst [vmem:[%s778_s4] sm:$0xff] %v529_v58   ;;  %569 = vst [vmem:[%s778_s4 + $0x20] sm:$0xff] %v549_v59   ;;  %v364_v6 = vadd.f32 %v732_v18, %v341_v60  ;;  %v372_v7 = vadd.f32 %v732_v18, %v349_v61 }
 0x102   :  { %v342_v8 = vmul.f32 %v492_v16, %v235_v4  ;;  %v350_v9 = vmul.f32 %v492_v16, %v267_v5  ;;  %v367_v10 = vadd.f32 %v732_v18, %v344_v2  ;;  %v382_v14 = vmax.f32 %v366_v0, 0.0 }
 0x103   :  { %v375_v11 = vadd.f32 %v732_v18, %v352_v3  ;;  %v390_v15 = vmax.f32 %v374_v1, 0.0  ;;  %v380_v20 = vmax.f32 %v364_v6, 0.0  ;;  %v388_v21 = vmax.f32 %v372_v7, 0.0 }
 0x104   :  { %v365_v12 = vadd.f32 %v732_v18, %v342_v8  ;;  %v373_v13 = vadd.f32 %v732_v18, %v350_v9  ;;  %v383_v17 = vmax.f32 %v367_v10, 0.0 }
 0x105   :  { %v391_v19 = vmax.f32 %v375_v11, 0.0 }
 0x106   :  { %v381_v22 = vmax.f32 %v365_v12, 0.0  ;;  %v389_v23 = vmax.f32 %v373_v13, 0.0  ;;  %v544_v24 = vpack.c.bf16 %v383_v17, %v382_v14 }
 0x107   :  { %v564_v25 = vpack.c.bf16 %v391_v19, %v390_v15 }
 0x108   :  { %v539_v26 = vpack.c.bf16 %v381_v22, %v380_v20  ;;  %v559_v16 = vpack.c.bf16 %v389_v23, %v388_v21  ;;  %568 = vst [vmem:[%s778_s4 + $0x18] sm:$0xff] %v544_v24  }
 0x109   :  { %572 = vst [vmem:[%s778_s4 + $0x38] sm:$0xff] %v564_v25  }
 0x10a   :  { %567 = vst [vmem:[%s778_s4 + $0x10] sm:$0xff] %v539_v26   ;;  %571 = vst [vmem:[%s778_s4 + $0x30] sm:$0xff] %v559_v16  }

// kernel: densenet121_forward.184
= control target key start
LH: loop header
LB: loop body
LE: loop exit
PB: predicated region body
PF: predicated region fallthrough
CT: control target
= control target key end

     0   :  { %s489_s0 = inlined_call_operand.vmem [shape: f32[128,256], index: 0, kind: input, shape index: {}]   ;;  %s490_s1 = inlined_call_operand.vmem [shape: f32[1,128], index: 1, kind: input, shape index: {}]   ;;  %s491_s2 = inlined_call_operand.vmem [shape: f32[1,128], index: 2, kind: input, shape index: {}]   ;;  %s492_s3 = inlined_call_operand.vmem [shape: bf16[128,128], index: 3, kind: output, shape index: {}]  }
   0x1   :  { %v67_v0 = vld [vmem:[%s489_s0] sm:$0xff]  ;;  %v69_v1 = vld [vmem:[%s489_s0 + $0x10] sm:$0xff] }
   0x2   :  { %v384_v2 = vld [vmem:[%s490_s1] ss:$0 sm:$0xff]  ;;  %v73_v7 = vld [vmem:[%s489_s0 + $0x30] sm:$0xff] }
   0x3   :  { %v131_v3 = vmul.f32 %v384_v2, %v67_v0  ;;  %v132_v4 = vmul.f32 %v384_v2, %v69_v1  ;;  %v391_v5 = vld [vmem:[%s491_s2] ss:$0 sm:$0xff]  ;;  %v134_v9 = vmul.f32 %v384_v2, %v73_v7  ;;  %v77_v11 = vld [vmem:[%s489_s0 + $0x50] sm:$0xff] }
   0x4   :  { %v71_v6 = vld [vmem:[%s489_s0 + $0x20] sm:$0xff]  ;;  %v136_v16 = vmul.f32 %v384_v2, %v77_v11  ;;  %v81_v17 = vld [vmem:[%s489_s0 + $0x70] sm:$0xff] }
   0x5   :  { %v133_v8 = vmul.f32 %v384_v2, %v71_v6  ;;  %v75_v10 = vld [vmem:[%s489_s0 + $0x40] sm:$0xff]  ;;  %v154_v13 = vadd.f32 %v391_v5, %v131_v3  ;;  %v155_v14 = vadd.f32 %v391_v5, %v132_v4  ;;  %v157_v19 = vadd.f32 %v391_v5, %v134_v9  ;;  %v85_v27 = vld [vmem:[%s489_s0 + $0x90] sm:$0xff] }
   0x6   :  { %v79_v12 = vld [vmem:[%s489_s0 + $0x60] sm:$0xff]  ;;  %v135_v15 = vmul.f32 %v384_v2, %v75_v10  ;;  %v138_v21 = vmul.f32 %v384_v2, %v81_v17  ;;  %v159_v26 = vadd.f32 %v391_v5, %v136_v16  ;;  %v89_v33 = vld [vmem:[%s489_s0 + $0xb0] sm:$0xff]  ;;  %v140_v43 = vmul.f32 %v384_v2, %v85_v27 }
   0x7   :  { %v156_v18 = vadd.f32 %v391_v5, %v133_v8  ;;  %v137_v20 = vmul.f32 %v384_v2, %v79_v12  ;;  %v83_v22 = vld [vmem:[%s489_s0 + $0x80] sm:$0xff]  ;;  %v170_v23 = vmax.f32 %v154_v13, 0.0  ;;  %v171_v24 = vmax.f32 %v155_v14, 0.0  ;;  %v93_v39 = vld [vmem:[%s489_s0 + $0xd0] sm:$0xff] }
   0x8   :  { %v158_v25 = vadd.f32 %v391_v5, %v135_v15  ;;  %v173_v29 = vmax.f32 %v157_v19, 0.0  ;;  %v161_v31 = vadd.f32 %v391_v5, %v138_v21  ;;  %v87_v32 = vld [vmem:[%s489_s0 + $0xa0] sm:$0xff]  ;;  %v175_v36 = vmax.f32 %v159_v26, 0.0  ;;  %v97_v49 = vld [vmem:[%s489_s0 + $0xf0] sm:$0xff] }
   0x9   :  { %v172_v28 = vmax.f32 %v156_v18, 0.0  ;;  %v160_v30 = vadd.f32 %v391_v5, %v137_v20  ;;  %v311_v34 = vpack.c.bf16 %v171_v24, %v170_v23  ;;  %v139_v37 = vmul.f32 %v384_v2, %v83_v22  ;;  %v91_v38 = vld [vmem:[%s489_s0 + $0xc0] sm:$0xff] }
   0xa   :  { %v174_v35 = vmax.f32 %v158_v25, 0.0  ;;  %v177_v42 = vmax.f32 %v161_v31, 0.0  ;;  %v95_v44 = vld [vmem:[%s489_s0 + $0xe0] sm:$0xff]  ;;  %v141_v47 = vmul.f32 %v384_v2, %v87_v32  ;;  %v142_v48 = vmul.f32 %v384_v2, %v89_v33 }
   0xb   :  { %v316_v40 = vpack.c.bf16 %v173_v29, %v172_v28  ;;  %v176_v41 = vmax.f32 %v160_v30, 0.0  ;;  %312 = vst [vmem:[%s492_s3] sm:$0xff] %v311_v34   ;;  %v162_v46 = vadd.f32 %v391_v5, %v139_v37  ;;  %v163_v51 = vadd.f32 %v391_v5, %v140_v43 }
   0xc   :  { %v321_v45 = vpack.c.bf16 %v175_v36, %v174_v35  ;;  %v143_v52 = vmul.f32 %v384_v2, %v91_v38  ;;  %v144_v53 = vmul.f32 %v384_v2, %v93_v39  ;;  %v164_v55 = vadd.f32 %v391_v5, %v141_v47 }
   0xd   :  { %348 = vst [vmem:[%s492_s3 + $0x8] sm:$0xff] %v316_v40   ;;  %v326_v50 = vpack.c.bf16 %v177_v42, %v176_v41  ;;  %v178_v54 = vmax.f32 %v162_v46, 0.0  ;;  %v165_v56 = vadd.f32 %v391_v5, %v142_v48  ;;  %v145_v57 = vmul.f32 %v384_v2, %v95_v44 }
   0xe   :  { %349 = vst [vmem:[%s492_s3 + $0x10] sm:$0xff] %v321_v45   ;;  %v179_v58 = vmax.f32 %v163_v51, 0.0  ;;  %v166_v59 = vadd.f32 %v391_v5, %v143_v52  ;;  %v167_v60 = vadd.f32 %v391_v5, %v144_v53  ;;  %v146_v61 = vmul.f32 %v384_v2, %v97_v49 }
   0xf   :  { %350 = vst [vmem:[%s492_s3 + $0x18] sm:$0xff] %v326_v50   ;;  %v180_v62 = vmax.f32 %v164_v55, 0.0  ;;  %v181_v63 = vmax.f32 %v165_v56, 0.0  ;;  %v168_v0 = vadd.f32 %v391_v5, %v145_v57 }
  0x10   :  { %v331_v1 = vpack.c.bf16 %v179_v58, %v178_v54  ;;  %v182_v3 = vmax.f32 %v166_v59, 0.0  ;;  %v183_v4 = vmax.f32 %v167_v60, 0.0  ;;  %v169_v6 = vadd.f32 %v391_v5, %v146_v61 }
  0x11   :  { %v336_v7 = vpack.c.bf16 %v181_v63, %v180_v62  ;;  %v184_v8 = vmax.f32 %v168_v0, 0.0 }
  0x12   :  { %351 = vst [vmem:[%s492_s3 + $0x20] sm:$0xff] %v331_v1   ;;  %v341_v9 = vpack.c.bf16 %v183_v4, %v182_v3  ;;  %v185_v10 = vmax.f32 %v169_v6, 0.0 }
  0x13   :  { %352 = vst [vmem:[%s492_s3 + $0x28] sm:$0xff] %v336_v7  }
  0x14   :  { %353 = vst [vmem:[%s492_s3 + $0x30] sm:$0xff] %v341_v9   ;;  %v346_v2 = vpack.c.bf16 %v185_v10, %v184_v8 }
  0x16   :  { %354 = vst [vmem:[%s492_s3 + $0x38] sm:$0xff] %v346_v2  }

// kernel: densenet121_forward.186
= control target key start
LH: loop header
LB: loop body
LE: loop exit
PB: predicated region body
PF: predicated region fallthrough
CT: control target
= control target key end

     0   :  { %s1114_s15 = smov 0   ;;  %s1116_s16 = smov 0   ;;  %s1273_s0 = inlined_call_operand.vmem [shape: bf16[128,1152], index: 0, kind: input, shape index: {}]   ;;  %s1274_s1 = inlined_call_operand.vmem [shape: bf16[1152,128], index: 1, kind: input, shape index: {}]   ;;  %s1275_s2 = inlined_call_operand.vmem [shape: f32[1,128], index: 2, kind: input, shape index: {}]   ;;  %s1276_s3 = inlined_call_operand.vmem [shape: f32[1,128], index: 3, kind: input, shape index: {}]   ;;  %s1277_s4 = inlined_call_operand.vmem [shape: f32[128,128], index: 4, kind: output, shape index: {}]  }
   0x1   :  { %s1118_s17 = smov 0   ;;  %s1120_s18 = smov 0  }
   0x2   :  { %s1122_s19 = smov 0  }
   0x3 LB: > { %s26_s20 = sadd.s32 1, %s1082_s18  ;;  %p49_p1 = scmp.ne.s32.totalorder %s1074_s16, %s1070_s15  ;;  %s1086_s19 = sphi %s1122_s19, %s14_s19   ;;  %s1082_s18 = sphi %s1120_s18, %s1281_s18   ;;  %s1078_s17 = sphi %s1118_s17, %s1280_s17   ;;  %s1074_s16 = sphi %s1116_s16, %s1279_s16   ;;  %s1070_s15 = sphi %s1114_s15, %s1278_s15  }
   0x4   : > { %p27_p0 = scmp.ge.s32.totalorder %s26_s20, 9  ;;  %p50_p2 = scmp.eq.s32.totalorder %s1086_s19, 0 }
   0x5   : > { %s42_s22 = sadd.s32 1, %s1074_s16  ;;  %p896_p5 = scmp.ge.s32.totalorder %s1086_s19, 9 }
   0x6   : > { %s1283_s20 = smov (%p27_p0, %s26_s20), 0  ;;  %p51_p3 = por %p50_p2, %p49_p1 }
   0x7   : > { %s38_s21 = ssub.s32 %s1082_s18, %s1283_s20  ;;  %195 = sbr.rel (%p896_p5) target bundleno = 28 (0x1c), region = 24 }
   0x8   : > { %p40_p4 = scmp.eq.s32.totalorder %s38_s21, 0 }
   0xa   : > { %s1149_s23 = scalar_select %p40_p4, %s1074_s16, %s42_s22  }
   0xe   : > { %198 = sbr.rel (!%p51_p3) target bundleno = 28 (0x1c), region = 28  ;;  %s200_s24 = sand.u32 (%p51_p3), 1, %s1074_s16  }
   0xf   : > { %s898_s25 = sshll.u32 (%p51_p3), %s1082_s18, 2  ;;  %s897_s26 = sshll.u32 (%p51_p3), %s200_s24, 6 }
  0x10   : > { %s1157_s29 = scalar_lea.vmem (%p51_p3), %s1273_s0, %s898_s25  ;;  %s202_s30 = scalar_lea.vmem (%p51_p3), [#allocation3], %s897_s26 }
  0x11   : > { %v223_v0 = vld [vmem:[%s1157_s29] sm:$0xf] (%p51_p3)  ;;  %v225_v1 = vld [vmem:[%s1157_s29 + $0x24] sm:$0xf] (%p51_p3)  ;;  %v227_v2 = vld [vmem:[%s1157_s29 + $0x48] sm:$0xf] (%p51_p3) }
  0x12   : > { %224 = vst [vmem:[%s202_s30] sm:$0xf] (%p51_p3), %v223_v0  ;;  %226 = vst [vmem:[%s202_s30 + $0x4] sm:$0xf] (%p51_p3), %v225_v1  ;;  %v229_v3 = vld [vmem:[%s1157_s29 + $0x6c] sm:$0xf] (%p51_p3) }
  0x13   : > { %v231_v4 = vld [vmem:[%s1157_s29 + $0x90] sm:$0xf] (%p51_p3)  ;;  %228 = vst [vmem:[%s202_s30 + $0x8] sm:$0xf] (%p51_p3), %v227_v2  ;;  %230 = vst [vmem:[%s202_s30 + $0xc] sm:$0xf] (%p51_p3), %v229_v3 }
  0x14   : > { %232 = vst [vmem:[%s202_s30 + $0x10] sm:$0xf] (%p51_p3), %v231_v4  ;;  %v233_v5 = vld [vmem:[%s1157_s29 + $0xb4] sm:$0xf] (%p51_p3)  ;;  %v235_v6 = vld [vmem:[%s1157_s29 + $0xd8] sm:$0xf] (%p51_p3) }
  0x15   : > { %v237_v7 = vld [vmem:[%s1157_s29 + $0xfc] sm:$0xf]  ;;  %234 = vst [vmem:[%s202_s30 + $0x14] sm:$0xf] %v233_v5  ;;  %236 = vst [vmem:[%s202_s30 + $0x18] sm:$0xf] %v235_v6 }
  0x16   : > { %238 = vst [vmem:[%s202_s30 + $0x1c] sm:$0xf] %v237_v7  ;;  %v239_v8 = vld [vmem:[%s1157_s29 + $0x120] sm:$0xf]  ;;  %v241_v9 = vld [vmem:[%s1157_s29 + $0x144] sm:$0xf] }
  0x17   : > { %v243_v10 = vld [vmem:[%s1157_s29 + $0x168] sm:$0xf]  ;;  %240 = vst [vmem:[%s202_s30 + $0x20] sm:$0xf] %v239_v8  ;;  %242 = vst [vmem:[%s202_s30 + $0x24] sm:$0xf] %v241_v9 }
  0x18   : > { %244 = vst [vmem:[%s202_s30 + $0x28] sm:$0xf] %v243_v10  ;;  %v245_v11 = vld [vmem:[%s1157_s29 + $0x18c] sm:$0xf]  ;;  %v247_v12 = vld [vmem:[%s1157_s29 + $0x1b0] sm:$0xf] }
  0x19   : > { %v249_v13 = vld [vmem:[%s1157_s29 + $0x1d4] sm:$0xf]  ;;  %246 = vst [vmem:[%s202_s30 + $0x2c] sm:$0xf] %v245_v11  ;;  %248 = vst [vmem:[%s202_s30 + $0x30] sm:$0xf] %v247_v12 }
  0x1a   : > { %250 = vst [vmem:[%s202_s30 + $0x34] sm:$0xf] %v249_v13  ;;  %v251_v14 = vld [vmem:[%s1157_s29 + $0x1f8] sm:$0xf]  ;;  %v253_v15 = vld [vmem:[%s1157_s29 + $0x21c] sm:$0xf] }
  0x1b   : > { %252 = vst [vmem:[%s202_s30 + $0x38] sm:$0xf] %v251_v14  ;;  %254 = vst [vmem:[%s202_s30 + $0x3c] sm:$0xf] %v253_v15 }
  0x1c PF: > { %p899_p6 = scmp.ge.s32.totalorder %s1086_s19, 1  ;;  %p320_p7 = scmp.lt.s32.totalorder %s1086_s19, 10 }
  0x1e   : > { %p321_p8 = pnand %p899_p6, %p320_p7 }
  0x1f   : > { %s327_s5 = sand.u32 (!%p321_p8), 1, %s1070_s15   ;;  %s901_s6 = sshll.u32 (!%p321_p8), %s1078_s17, 4 }
  0x20   : > { %324 = sbr.rel (%p321_p8) target bundleno = 321 (0x141), region = 73  ;;  %s900_s7 = sshll.u32 (!%p321_p8), %s327_s5, 6 }
  0x21   : > { %p371_p9 = scmp.lt.s32.totalorder (!%p321_p8), %s901_s6, 143  ;;  %s1184_s12 = scalar_lea.vmem (!%p321_p8), [#allocation3], %s900_s7 }
  0x22   : > { %p903_p10 = scmp.ne.s32.totalorder (!%p321_p8), %s1078_s17, 0 }
  0x27   : > { %s1285_s6 = smov (!%p371_p9, %s901_s6), 143  ;;  %398 = sbr.rel (%p903_p10) target bundleno = 49 (0x31), region = 81 }
  0x28   : > { %s902_s8 = sshll.u32 %s1285_s6, 2  ;;  %v1088_v16 = vmov (!%p903_p10), 0.0  }
  0x29   : > { %s1182_s11 = scalar_lea.vmem %s1274_s1, %s902_s8  ;;  %399 = vst [vmem:[#allocation2] sm:$0xff] (!%p903_p10), %v1088_v16  ;;  %400 = vst [vmem:[#allocation2 + $0x8] sm:$0xff] (!%p903_p10), %v1088_v16 }
  0x2a   : > { %401 = vst [vmem:[#allocation2 + $0x10] sm:$0xff] (!%p903_p10), %v1088_v16  ;;  %402 = vst [vmem:[#allocation2 + $0x18] sm:$0xff] (!%p903_p10), %v1088_v16 }
  0x2b   : > { %403 = vst [vmem:[#allocation2 + $0x20] sm:$0xff] (!%p903_p10), %v1088_v16  ;;  %404 = vst [vmem:[#allocation2 + $0x28] sm:$0xff] (!%p903_p10), %v1088_v16 }
  0x2c   : > { %405 = vst [vmem:[#allocation2 + $0x30] sm:$0xff] (!%p903_p10), %v1088_v16  ;;  %406 = vst [vmem:[#allocation2 + $0x38] sm:$0xff] (!%p903_p10), %v1088_v16 }
  0x2d   : > { %407 = vst [vmem:[#allocation2 + $0x40] sm:$0xff] (!%p903_p10), %v1088_v16  ;;  %408 = vst [vmem:[#allocation2 + $0x48] sm:$0xff] (!%p903_p10), %v1088_v16 }
  0x2e   : > { %409 = vst [vmem:[#allocation2 + $0x50] sm:$0xff] %v1088_v16  ;;  %410 = vst [vmem:[#allocation2 + $0x58] sm:$0xff] %v1088_v16 }
  0x2f   : > { %411 = vst [vmem:[#allocation2 + $0x60] sm:$0xff] %v1088_v16  ;;  %412 = vst [vmem:[#allocation2 + $0x68] sm:$0xff] %v1088_v16 }
  0x30   : > { %413 = vst [vmem:[#allocation2 + $0x70] sm:$0xff] %v1088_v16  ;;  %414 = vst [vmem:[#allocation2 + $0x78] sm:$0xff] %v1088_v16 }
  0x31 PF: > { %v1032_v17 = vld [vmem:[%s1182_s11] sm:$0xff]   ;;  %v1033_v18 = vld [vmem:[%s1182_s11 + $0x8] sm:$0xff]   ;;  %v1034_v19 = vld [vmem:[%s1182_s11 + $0x10] sm:$0xff]   ;;  %p920_p11 = scmp.ne.s32.totalorder %s1078_s17, 8 }
  0x32   : > { %943 = vmatprep.subr.bf16.mxu0 %v1032_v17  ;;  %975 = vmatprep.subr.bf16.mxu1 %v1032_v17  ;;  %v1035_v20 = vld [vmem:[%s1182_s11 + $0x18] sm:$0xff]   ;;  %v1040_v21 = vld [vmem:[%s1184_s12] sm:$0xff]   ;;  %v1037_v24 = vld [vmem:[%s1182_s11 + $0x28] sm:$0xff]  }
  0x33   : > { %944 = vmatpush3.bf16.msra.mxu0 %v1032_v17  ;;  %983 = vmatpush3.bf16.msra.mxu1 %v1032_v17  ;;  %v1041_v22 = vld [vmem:[%s1184_s12 + $0x20] sm:$0xff]   ;;  %v1038_v25 = vld [vmem:[%s1182_s11 + $0x30] sm:$0xff]   ;;  %v1039_v26 = vld [vmem:[%s1182_s11 + $0x38] sm:$0xff]  }
  0x34   : > { %945 = vmatprep.subr.bf16.mxu0 %v1033_v18  ;;  %976 = vmatprep.subr.bf16.mxu1 %v1033_v18  ;;  %v1036_v23 = vld [vmem:[%s1182_s11 + $0x20] sm:$0xff]   ;;  %v1042_v27 = vld [vmem:[%s1184_s12 + $0x8] sm:$0xff]   ;;  %v1044_v29 = vld [vmem:[%s1184_s12 + $0x10] sm:$0xff]  }
  0x35   : > { %959 = vmatprep.mubr.bf16.mxu0 %v1040_v21  ;;  %967 = vmatprep.mubr.bf16.mxu1 %v1041_v22  ;;  %v1043_v28 = vld [vmem:[%s1184_s12 + $0x28] sm:$0xff]   ;;  %v1045_v30 = vld [vmem:[%s1184_s12 + $0x30] sm:$0xff]   ;;  %v1046_v31 = vld [vmem:[%s1184_s12 + $0x18] sm:$0xff]  }
  0x36   : > { %v1047_v32 = vld [vmem:[%s1184_s12 + $0x38] sm:$0xff]   ;;  %v417_v33 = vld [vmem:[#allocation2 + $0x10] sm:$0xff]  ;;  %v415_v35 = vld [vmem:[#allocation2] sm:$0xff] }
  0x37   : > { %946 = vmatpush3.bf16.msra.mxu0 %v1033_v18  ;;  %984 = vmatpush3.bf16.msra.mxu1 %v1033_v18  ;;  %v425_v34 = vld [vmem:[#allocation2 + $0x50] sm:$0xff]  ;;  %v423_v36 = vld [vmem:[#allocation2 + $0x40] sm:$0xff]  ;;  %v418_v39 = vld [vmem:[#allocation2 + $0x18] sm:$0xff] }
  0x38   : > { %947 = vmatprep.subr.bf16.mxu0 %v1034_v19  ;;  %977 = vmatprep.subr.bf16.mxu1 %v1034_v19  ;;  %v426_v40 = vld [vmem:[#allocation2 + $0x58] sm:$0xff]  ;;  %v416_v45 = vld [vmem:[#allocation2 + $0x8] sm:$0xff]  ;;  %v421_v57 = vld [vmem:[#allocation2 + $0x30] sm:$0xff] }
  0x39   : > { %v424_v46 = vld [vmem:[#allocation2 + $0x48] sm:$0xff]  ;;  %v429_v58 = vld [vmem:[#allocation2 + $0x70] sm:$0xff]  ;;  %v419_v59 = vld [vmem:[#allocation2 + $0x20] sm:$0xff] }
  0x3a   : > { %v427_v60 = vld [vmem:[#allocation2 + $0x60] sm:$0xff]  ;;  %v422_v63 = vld [vmem:[#allocation2 + $0x38] sm:$0xff]  ;;  %v420_v5 = vld [vmem:[#allocation2 + $0x28] sm:$0xff] }
  0x3b   : > { %948 = vmatpush3.bf16.msra.mxu0 %v1034_v19  ;;  %985 = vmatpush3.bf16.msra.mxu1 %v1034_v19  ;;  %v430_v0 = vld [vmem:[#allocation2 + $0x78] sm:$0xff]  ;;  %v428_v6 = vld [vmem:[#allocation2 + $0x68] sm:$0xff]  ;;  %v921_v18 = vld [vmem:[%s1275_s2] ss:$0 sm:$0xff] (!%p920_p11) }
  0x3c   : > { %949 = vmatprep.subr.bf16.mxu0 %v1035_v20  ;;  %978 = vmatprep.subr.bf16.mxu1 %v1035_v20  ;;  %v922_v19 = vld [vmem:[%s1276_s3] ss:$0 sm:$0xff] (!%p920_p11) }
  0x3f   : > { %950 = vmatpush3.bf16.msra.mxu0 %v1035_v20  ;;  %986 = vmatpush3.bf16.msra.mxu1 %v1035_v20 }
  0x40   : > { %951 = vmatprep.subr.bf16.mxu0 %v1036_v23  ;;  %979 = vmatprep.subr.bf16.mxu1 %v1036_v23 }
  0x43   : > { %952 = vmatpush3.bf16.msra.mxu0 %v1036_v23  ;;  %987 = vmatpush3.bf16.msra.mxu1 %v1036_v23 }
  0x44   : > { %953 = vmatprep.subr.bf16.mxu0 %v1037_v24  ;;  %980 = vmatprep.subr.bf16.mxu1 %v1037_v24 }
  0x47   : > { %954 = vmatpush3.bf16.msra.mxu0 %v1037_v24  ;;  %988 = vmatpush3.bf16.msra.mxu1 %v1037_v24 }
  0x48   : > { %955 = vmatprep.subr.bf16.mxu0 %v1038_v25  ;;  %981 = vmatprep.subr.bf16.mxu1 %v1038_v25 }
  0x4b   : > { %956 = vmatpush3.bf16.msra.mxu0 %v1038_v25  ;;  %989 = vmatpush3.bf16.msra.mxu1 %v1038_v25 }
  0x4c   : > { %957 = vmatprep.subr.bf16.mxu0 %v1039_v26  ;;  %982 = vmatprep.subr.bf16.mxu1 %v1039_v26 }
  0x4f   : > { %958 = vmatpush3.bf16.msra.mxu0 %v1039_v26  ;;  %990 = vmatpush3.bf16.msra.mxu1 %v1039_v26 }
  0x52   : > { %960 = vmatmul.mubr.bf16.vlgmr.msra.gmra.mrb[0].mxu0 %v1042_v27  ;;  %968 = vmatmul.mubr.bf16.vlgmr.msra.gmra.mrb[0].mxu1 %v1043_v28 }
  0x53   : > { %963 = vmatprep.mubr.bf16.mxu0 %v1044_v29  ;;  %971 = vmatprep.mubr.bf16.mxu1 %v1045_v30 }
  0x5a   : > { %964 = vmatmul.mubr.bf16.gmra.mrb[4].mxu0 %v1046_v31  ;;  %972 = vmatmul.mubr.bf16.gmra.mrb[4].mxu1 %v1047_v32 }
 0x125   : > { %v961_v37 = vpop.f32.mrb[0].mxu0  ;;  %v969_v38 = vpop.f32.mrb[0].mxu1 }
 0x126   : > { %v658_v41 = vadd.f32 %v961_v37, %v417_v33  ;;  %v666_v42 = vadd.f32 %v969_v38, %v425_v34  ;;  %v593_v43 = vpop.f32.mrb[1].mxu0  ;;  %v625_v44 = vpop.f32.mrb[1].mxu1 }
 0x127   : > { %v656_v47 = vadd.f32 %v593_v43, %v415_v35  ;;  %v664_v48 = vadd.f32 %v625_v44, %v423_v36  ;;  %v962_v49 = vpop.f32.mrb[2].mxu0  ;;  %v970_v50 = vpop.f32.mrb[2].mxu1 }
 0x128   : > { %674 = vst [vmem:[#allocation2 + $0x10] sm:$0xff] %v658_v41  ;;  %682 = vst [vmem:[#allocation2 + $0x50] sm:$0xff] %v666_v42  ;;  %v659_v51 = vadd.f32 %v962_v49, %v418_v39  ;;  %v667_v52 = vadd.f32 %v970_v50, %v426_v40  ;;  %v596_v53 = vpop.f32.mrb[3].mxu0  ;;  %v628_v54 = vpop.f32.mrb[3].mxu1 }
 0x129   : > { %672 = vst [vmem:[#allocation2] sm:$0xff] %v656_v47  ;;  %680 = vst [vmem:[#allocation2 + $0x40] sm:$0xff] %v664_v48  ;;  %v657_v55 = vadd.f32 %v596_v53, %v416_v45  ;;  %v665_v56 = vadd.f32 %v628_v54, %v424_v46 }
 0x12a   : > { %675 = vst [vmem:[#allocation2 + $0x18] sm:$0xff] %v659_v51  ;;  %683 = vst [vmem:[#allocation2 + $0x58] sm:$0xff] %v667_v52 }
 0x12b   : > { %673 = vst [vmem:[#allocation2 + $0x8] sm:$0xff] %v657_v55  ;;  %681 = vst [vmem:[#allocation2 + $0x48] sm:$0xff] %v665_v56 }
 0x12d   : > { %v965_v61 = vpop.f32.mrb[4].mxu0  ;;  %v973_v62 = vpop.f32.mrb[4].mxu1  ;;  %691 = sbr.rel (%p920_p11) target bundleno = 321 (0x141), region = 85 }
 0x12e   : > { %v662_v1 = vadd.f32 %v965_v61, %v421_v57  ;;  %v670_v2 = vadd.f32 %v973_v62, %v429_v58  ;;  %v609_v3 = vpop.f32.mrb[5].mxu0  ;;  %v641_v4 = vpop.f32.mrb[5].mxu1 }
 0x12f   : > { %v660_v7 = vadd.f32 %v609_v3, %v419_v59  ;;  %v668_v8 = vadd.f32 %v641_v4, %v427_v60  ;;  %v966_v9 = vpop.f32.mrb[6].mxu0  ;;  %v974_v10 = vpop.f32.mrb[6].mxu1  ;;  %v694_v22 = vld [vmem:[#allocation2 + $0x10] sm:$0xff] (!%p920_p11) }
 0x130   : > { %678 = vst [vmem:[#allocation2 + $0x30] sm:$0xff] %v662_v1  ;;  %686 = vst [vmem:[#allocation2 + $0x70] sm:$0xff] %v670_v2  ;;  %v663_v11 = vadd.f32 %v966_v9, %v422_v63  ;;  %v671_v12 = vadd.f32 %v974_v10, %v430_v0  ;;  %v612_v13 = vpop.f32.mrb[7].mxu0  ;;  %v644_v14 = vpop.f32.mrb[7].mxu1  ;;  %v692_v17 = vld [vmem:[#allocation2] sm:$0xff] (!%p920_p11)  ;;  %v717_v25 = vmul.f32 (!%p920_p11), %v921_v18, %v694_v22  ;;  %v702_v41 = vld [vmem:[#allocation2 + $0x50] sm:$0xff] (!%p920_p11) }
 0x131   : > { %676 = vst [vmem:[#allocation2 + $0x20] sm:$0xff] %v660_v7  ;;  %684 = vst [vmem:[#allocation2 + $0x60] sm:$0xff] %v668_v8  ;;  %v661_v15 = vadd.f32 %v612_v13, %v420_v5  ;;  %v669_v16 = vadd.f32 %v644_v14, %v428_v6  ;;  %v715_v20 = vmul.f32 (!%p920_p11), %v921_v18, %v692_v17  ;;  %v695_v23 = vld [vmem:[#allocation2 + $0x18] sm:$0xff] (!%p920_p11)  ;;  %v700_v35 = vld [vmem:[#allocation2 + $0x40] sm:$0xff] (!%p920_p11) }
 0x132   : > { %679 = vst [vmem:[#allocation2 + $0x38] sm:$0xff] %v663_v11  ;;  %687 = vst [vmem:[#allocation2 + $0x78] sm:$0xff] %v671_v12  ;;  %v693_v21 = vld [vmem:[#allocation2 + $0x8] sm:$0xff] (!%p920_p11)  ;;  %v718_v26 = vmul.f32 (!%p920_p11), %v921_v18, %v695_v23  ;;  %v740_v38 = vadd.f32 (!%p920_p11), %v922_v19, %v717_v25  ;;  %v703_v42 = vld [vmem:[#allocation2 + $0x58] sm:$0xff] (!%p920_p11)  ;;  %v723_v47 = vmul.f32 (!%p920_p11), %v921_v18, %v700_v35 }
 0x133   : > { %677 = vst [vmem:[#allocation2 + $0x28] sm:$0xff] %v661_v15  ;;  %685 = vst [vmem:[#allocation2 + $0x68] sm:$0xff] %v669_v16  ;;  %v716_v24 = vmul.f32 (!%p920_p11), %v921_v18, %v693_v21  ;;  %v738_v30 = vadd.f32 (!%p920_p11), %v922_v19, %v715_v20  ;;  %v701_v36 = vld [vmem:[#allocation2 + $0x48] sm:$0xff] (!%p920_p11)  ;;  %v725_v53 = vmul.f32 (!%p920_p11), %v921_v18, %v702_v41 }
 0x134   : > { %v741_v39 = vadd.f32 %v922_v19, %v718_v26  ;;  %756 = vst [vmem:[%s1277_s4 + $0x10] sm:$0xff] %v740_v38  ;;  %v724_v52 = vmul.f32 %v921_v18, %v701_v36  ;;  %v726_v54 = vmul.f32 %v921_v18, %v703_v42  ;;  %v746_v55 = vadd.f32 %v922_v19, %v723_v47 }
 0x135   : > { %v739_v37 = vadd.f32 %v922_v19, %v716_v24  ;;  %754 = vst [vmem:[%s1277_s4] sm:$0xff] %v738_v30  ;;  %v748_v60 = vadd.f32 %v922_v19, %v725_v53 }
 0x136   : > { %757 = vst [vmem:[%s1277_s4 + $0x18] sm:$0xff] %v741_v39  ;;  %v747_v59 = vadd.f32 %v922_v19, %v724_v52  ;;  %v749_v61 = vadd.f32 %v922_v19, %v726_v54  ;;  %762 = vst [vmem:[%s1277_s4 + $0x40] sm:$0xff] %v746_v55 }
 0x137   : > { %v698_v29 = vld [vmem:[#allocation2 + $0x30] sm:$0xff]  ;;  %755 = vst [vmem:[%s1277_s4 + $0x8] sm:$0xff] %v739_v37  ;;  %764 = vst [vmem:[%s1277_s4 + $0x50] sm:$0xff] %v748_v60 }
 0x138   : > { %v696_v27 = vld [vmem:[#allocation2 + $0x20] sm:$0xff]  ;;  %v721_v33 = vmul.f32 %v921_v18, %v698_v29  ;;  %v706_v49 = vld [vmem:[#allocation2 + $0x70] sm:$0xff]  ;;  %763 = vst [vmem:[%s1277_s4 + $0x48] sm:$0xff] %v747_v59  ;;  %765 = vst [vmem:[%s1277_s4 + $0x58] sm:$0xff] %v749_v61 }
 0x139   : > { %v719_v31 = vmul.f32 %v921_v18, %v696_v27  ;;  %v699_v34 = vld [vmem:[#allocation2 + $0x38] sm:$0xff]  ;;  %v704_v43 = vld [vmem:[#allocation2 + $0x60] sm:$0xff]  ;;  %v729_v58 = vmul.f32 %v921_v18, %v706_v49 }
 0x13a   : > { %v697_v28 = vld [vmem:[#allocation2 + $0x28] sm:$0xff]  ;;  %v722_v40 = vmul.f32 %v921_v18, %v699_v34  ;;  %v744_v46 = vadd.f32 %v922_v19, %v721_v33  ;;  %v707_v50 = vld [vmem:[#allocation2 + $0x78] sm:$0xff]  ;;  %v727_v56 = vmul.f32 %v921_v18, %v704_v43 }
 0x13b   : > { %v720_v32 = vmul.f32 %v921_v18, %v697_v28  ;;  %v742_v44 = vadd.f32 %v922_v19, %v719_v31  ;;  %v705_v48 = vld [vmem:[#allocation2 + $0x68] sm:$0xff]  ;;  %v730_v62 = vmul.f32 %v921_v18, %v707_v50  ;;  %v752_v1 = vadd.f32 %v922_v19, %v729_v58 }
 0x13c   : > { %v745_v51 = vadd.f32 %v922_v19, %v722_v40  ;;  %760 = vst [vmem:[%s1277_s4 + $0x30] sm:$0xff] %v744_v46  ;;  %v728_v57 = vmul.f32 %v921_v18, %v705_v48  ;;  %v750_v63 = vadd.f32 %v922_v19, %v727_v56 }
 0x13d   : > { %v743_v45 = vadd.f32 %v922_v19, %v720_v32  ;;  %758 = vst [vmem:[%s1277_s4 + $0x20] sm:$0xff] %v742_v44  ;;  %v753_v2 = vadd.f32 %v922_v19, %v730_v62  ;;  %768 = vst [vmem:[%s1277_s4 + $0x70] sm:$0xff] %v752_v1 }
 0x13e   : > { %761 = vst [vmem:[%s1277_s4 + $0x38] sm:$0xff] %v745_v51  ;;  %v751_v0 = vadd.f32 %v922_v19, %v728_v57  ;;  %766 = vst [vmem:[%s1277_s4 + $0x60] sm:$0xff] %v750_v63 }
 0x13f   : > { %759 = vst [vmem:[%s1277_s4 + $0x28] sm:$0xff] %v743_v45  ;;  %769 = vst [vmem:[%s1277_s4 + $0x78] sm:$0xff] %v753_v2 }
 0x140   : > { %767 = vst [vmem:[%s1277_s4 + $0x68] sm:$0xff] %v751_v0 }
 0x141 PF: > { %s14_s19 = sadd.s32 1, %s1086_s19   ;;  %s1278_s15 = smov %s1074_s16 }
 0x142   : > { %p11_p12 = scmp.ge.s32.totalorder %s14_s19, 11   ;;  %s1279_s16 = smov %s1149_s23 }
 0x143   : > { %s1280_s17 = smov %s1082_s18  ;;  %s1281_s18 = smov %s1283_s20 }
 0x144   :  { %13 = sbr.rel (!%p11_p12) target bundleno = 3 (0x3), region = 129 }

// kernel: densenet121_forward.193
= control target key start
LH: loop header
LB: loop body
LE: loop exit
PB: predicated region body
PF: predicated region fallthrough
CT: control target
= control target key end

     0   :  { %v48_v0 = vlaneseq  ;;  %s556_s1 = inlined_call_operand.vmem [shape: f32[1,256], index: 1, kind: input, shape index: {}]   ;;  %s557_s2 = inlined_call_operand.vmem [shape: f32[1,256], index: 2, kind: input, shape index: {}]   ;;  %s558_s0 = inlined_call_operand.vmem [shape: f32[128,256], index: 0, kind: input, shape index: {}]   ;;  %s559_s3 = inlined_call_operand.vmem [shape: bf16[128,256], index: 3, kind: output, shape index: {}]  }
   0x1   :  { %v46_v2 = vld [vmem:[%s556_s1] sm:$0x3]  ;;  %v15_v5 = vld [vmem:[%s558_s0 + $0x8] sm:$0xff]  ;;  %v16_v8 = vld [vmem:[%s558_s0 + $0x10] sm:$0xff] }
   0x2   :  { %v49_v1 = vshrl.u32 %v48_v0, 7  ;;  %v90_v3 = vld [vmem:[%s557_s2] sm:$0x3]  ;;  %v17_v9 = vld [vmem:[%s558_s0 + $0x18] sm:$0xff]  ;;  %v19_v15 = vld [vmem:[%s558_s0 + $0x28] sm:$0xff] }
   0x3   :  { %v14_v4 = vld [vmem:[%s558_s0] sm:$0xff]  ;;  %v20_v16 = vld [vmem:[%s558_s0 + $0x30] sm:$0xff]  ;;  %v21_v17 = vld [vmem:[%s558_s0 + $0x38] sm:$0xff] }
   0x4   :  { %v50_v6 = vsub.s32 0, %v49_v1  ;;  %v54_v7 = vsub.s32 1, %v49_v1  ;;  %v18_v10 = vld [vmem:[%s558_s0 + $0x20] sm:$0xff]  ;;  %v23_v35 = vld [vmem:[%s558_s0 + $0x48] sm:$0xff]  ;;  %v24_v40 = vld [vmem:[%s558_s0 + $0x50] sm:$0xff] }
   0x5   :  { %v22_v34 = vld [vmem:[%s558_s0 + $0x40] sm:$0xff]  ;;  %v25_v41 = vld [vmem:[%s558_s0 + $0x58] sm:$0xff]  ;;  %v27_v47 = vld [vmem:[%s558_s0 + $0x68] sm:$0xff] }
   0x6   :  { %v355_v11 = vrot.slane %v46_v2, %v50_v6  ;;  %v357_v12 = vrot.slane %v46_v2, %v54_v7  ;;  %v359_v13 = vrot.slane %v90_v3, %v50_v6  ;;  %v361_v14 = vrot.slane %v90_v3, %v54_v7  ;;  %v26_v46 = vld [vmem:[%s558_s0 + $0x60] sm:$0xff]  ;;  %v28_v52 = vld [vmem:[%s558_s0 + $0x70] sm:$0xff]  ;;  %v29_v53 = vld [vmem:[%s558_s0 + $0x78] sm:$0xff] }
   0x7   :  { %v30_v2 = vld [vmem:[%s558_s0 + $0x80] sm:$0xff]  ;;  %v31_v7 = vld [vmem:[%s558_s0 + $0x88] sm:$0xff] }
   0x8   :  { %v58_v18 = vmul.f32 %v355_v11, %v14_v4  ;;  %v59_v19 = vmul.f32 %v357_v12, %v15_v5  ;;  %v60_v20 = vmul.f32 %v355_v11, %v16_v8  ;;  %v61_v21 = vmul.f32 %v357_v12, %v17_v9 }
   0x9   :  { %v62_v22 = vmul.f32 %v355_v11, %v18_v10  ;;  %v63_v23 = vmul.f32 %v357_v12, %v19_v15  ;;  %v64_v24 = vmul.f32 %v355_v11, %v20_v16  ;;  %v65_v25 = vmul.f32 %v357_v12, %v21_v17  ;;  %v32_v16 = vld [vmem:[%s558_s0 + $0x90] sm:$0xff]  ;;  %v33_v17 = vld [vmem:[%s558_s0 + $0x98] sm:$0xff] }
   0xa   :  { %v102_v26 = vadd.f32 %v359_v13, %v58_v18  ;;  %v103_v27 = vadd.f32 %v361_v14, %v59_v19  ;;  %v104_v28 = vadd.f32 %v359_v13, %v60_v20  ;;  %v105_v29 = vadd.f32 %v361_v14, %v61_v21 }
   0xb   :  { %v106_v30 = vadd.f32 %v359_v13, %v62_v22  ;;  %v107_v31 = vadd.f32 %v361_v14, %v63_v23  ;;  %v108_v32 = vadd.f32 %v359_v13, %v64_v24  ;;  %v109_v33 = vadd.f32 %v361_v14, %v65_v25  ;;  %v34_v22 = vld [vmem:[%s558_s0 + $0xa0] sm:$0xff]  ;;  %v35_v23 = vld [vmem:[%s558_s0 + $0xa8] sm:$0xff] }
   0xc   :  { %v134_v36 = vmax.f32 %v102_v26, 0.0  ;;  %v135_v37 = vmax.f32 %v103_v27, 0.0  ;;  %v136_v38 = vmax.f32 %v104_v28, 0.0  ;;  %v137_v39 = vmax.f32 %v105_v29, 0.0  ;;  %v36_v28 = vld [vmem:[%s558_s0 + $0xb0] sm:$0xff] }
   0xd   :  { %v138_v42 = vmax.f32 %v106_v30, 0.0  ;;  %v139_v43 = vmax.f32 %v107_v31, 0.0  ;;  %v140_v44 = vmax.f32 %v108_v32, 0.0  ;;  %v141_v45 = vmax.f32 %v109_v33, 0.0  ;;  %v37_v33 = vld [vmem:[%s558_s0 + $0xb8] sm:$0xff] }
   0xe   :  { %v298_v48 = vpack.c.bf16 %v135_v37, %v134_v36  ;;  %v299_v49 = vpack.c.bf16 %v137_v39, %v136_v38  ;;  %v66_v50 = vmul.f32 %v355_v11, %v22_v34  ;;  %v67_v51 = vmul.f32 %v357_v12, %v23_v35  ;;  %v38_v38 = vld [vmem:[%s558_s0 + $0xc0] sm:$0xff] }
   0xf   :  { %v300_v54 = vpack.c.bf16 %v139_v43, %v138_v42  ;;  %v301_v55 = vpack.c.bf16 %v141_v45, %v140_v44  ;;  %v68_v56 = vmul.f32 %v355_v11, %v24_v40  ;;  %v69_v57 = vmul.f32 %v357_v12, %v25_v41 }
  0x10   :  { %262 = vst [vmem:[%s559_s3] sm:$0xff] %v298_v48  ;;  %263 = vst [vmem:[%s559_s3 + $0x8] sm:$0xff] %v299_v49  ;;  %v110_v58 = vadd.f32 %v359_v13, %v66_v50  ;;  %v111_v59 = vadd.f32 %v361_v14, %v67_v51  ;;  %v70_v60 = vmul.f32 %v355_v11, %v26_v46 }
  0x11   :  { %v71_v61 = vmul.f32 %v357_v12, %v27_v47  ;;  %264 = vst [vmem:[%s559_s3 + $0x10] sm:$0xff] %v300_v54  ;;  %265 = vst [vmem:[%s559_s3 + $0x18] sm:$0xff] %v301_v55  ;;  %v112_v62 = vadd.f32 %v359_v13, %v68_v56  ;;  %v113_v63 = vadd.f32 %v361_v14, %v69_v57  ;;  %v39_v47 = vld [vmem:[%s558_s0 + $0xc8] sm:$0xff] }
  0x12   :  { %v72_v0 = vmul.f32 %v355_v11, %v28_v52  ;;  %v73_v1 = vmul.f32 %v357_v12, %v29_v53  ;;  %v142_v3 = vmax.f32 %v110_v58, 0.0  ;;  %v143_v4 = vmax.f32 %v111_v59, 0.0  ;;  %v40_v52 = vld [vmem:[%s558_s0 + $0xd0] sm:$0xff]  ;;  %v41_v53 = vld [vmem:[%s558_s0 + $0xd8] sm:$0xff]  ;;  %v42_v58 = vld [vmem:[%s558_s0 + $0xe0] sm:$0xff] }
  0x13   :  { %v114_v5 = vadd.f32 %v359_v13, %v70_v60  ;;  %v115_v6 = vadd.f32 %v361_v14, %v71_v61  ;;  %v144_v8 = vmax.f32 %v112_v62, 0.0  ;;  %v145_v9 = vmax.f32 %v113_v63, 0.0  ;;  %v43_v59 = vld [vmem:[%s558_s0 + $0xe8] sm:$0xff] }
  0x14   :  { %v116_v10 = vadd.f32 %v359_v13, %v72_v0  ;;  %v117_v15 = vadd.f32 %v361_v14, %v73_v1  ;;  %v302_v18 = vpack.c.bf16 %v143_v4, %v142_v3  ;;  %v74_v21 = vmul.f32 %v355_v11, %v30_v2  ;;  %v44_v0 = vld [vmem:[%s558_s0 + $0xf0] sm:$0xff] }
  0x15   :  { %v146_v19 = vmax.f32 %v114_v5, 0.0  ;;  %v147_v20 = vmax.f32 %v115_v6, 0.0  ;;  %v303_v24 = vpack.c.bf16 %v145_v9, %v144_v8  ;;  %v75_v27 = vmul.f32 %v357_v12, %v31_v7  ;;  %v45_v5 = vld [vmem:[%s558_s0 + $0xf8] sm:$0xff] }
  0x16   :  { %v148_v25 = vmax.f32 %v116_v10, 0.0  ;;  %v149_v26 = vmax.f32 %v117_v15, 0.0  ;;  %266 = vst [vmem:[%s559_s3 + $0x20] sm:$0xff] %v302_v18  ;;  %v118_v30 = vadd.f32 %v359_v13, %v74_v21  ;;  %v76_v31 = vmul.f32 %v355_v11, %v32_v16 }
  0x17   :  { %v304_v29 = vpack.c.bf16 %v147_v20, %v146_v19  ;;  %v77_v32 = vmul.f32 %v357_v12, %v33_v17  ;;  %267 = vst [vmem:[%s559_s3 + $0x28] sm:$0xff] %v303_v24  ;;  %v119_v35 = vadd.f32 %v361_v14, %v75_v27  ;;  %v78_v36 = vmul.f32 %v355_v11, %v34_v22 }
  0x18   :  { %v305_v34 = vpack.c.bf16 %v149_v26, %v148_v25  ;;  %v79_v37 = vmul.f32 %v357_v12, %v35_v23  ;;  %v150_v39 = vmax.f32 %v118_v30, 0.0  ;;  %v120_v40 = vadd.f32 %v359_v13, %v76_v31 }
  0x19   :  { %268 = vst [vmem:[%s559_s3 + $0x30] sm:$0xff] %v304_v29  ;;  %v121_v41 = vadd.f32 %v361_v14, %v77_v32  ;;  %v80_v42 = vmul.f32 %v355_v11, %v36_v28  ;;  %v151_v43 = vmax.f32 %v119_v35, 0.0  ;;  %v122_v44 = vadd.f32 %v359_v13, %v78_v36 }
  0x1a   :  { %269 = vst [vmem:[%s559_s3 + $0x38] sm:$0xff] %v305_v34  ;;  %v123_v45 = vadd.f32 %v361_v14, %v79_v37  ;;  %v81_v46 = vmul.f32 %v357_v12, %v37_v33  ;;  %v152_v48 = vmax.f32 %v120_v40, 0.0  ;;  %v82_v51 = vmul.f32 %v355_v11, %v38_v38 }
  0x1b   :  { %v153_v49 = vmax.f32 %v121_v41, 0.0  ;;  %v124_v50 = vadd.f32 %v359_v13, %v80_v42  ;;  %v306_v54 = vpack.c.bf16 %v151_v43, %v150_v39  ;;  %v154_v55 = vmax.f32 %v122_v44, 0.0 }
  0x1c   :  { %v155_v56 = vmax.f32 %v123_v45, 0.0  ;;  %v125_v57 = vadd.f32 %v361_v14, %v81_v46  ;;  %v83_v62 = vmul.f32 %v357_v12, %v39_v47  ;;  %v126_v63 = vadd.f32 %v359_v13, %v82_v51 }
  0x1d   :  { %v307_v60 = vpack.c.bf16 %v153_v49, %v152_v48  ;;  %v156_v61 = vmax.f32 %v124_v50, 0.0  ;;  %270 = vst [vmem:[%s559_s3 + $0x40] sm:$0xff] %v306_v54  ;;  %v84_v3 = vmul.f32 %v355_v11, %v40_v52  ;;  %v85_v4 = vmul.f32 %v357_v12, %v41_v53 }
  0x1e   :  { %v308_v1 = vpack.c.bf16 %v155_v56, %v154_v55  ;;  %v157_v2 = vmax.f32 %v125_v57, 0.0  ;;  %v127_v6 = vadd.f32 %v361_v14, %v83_v62  ;;  %v158_v7 = vmax.f32 %v126_v63, 0.0 }
  0x1f   :  { %271 = vst [vmem:[%s559_s3 + $0x48] sm:$0xff] %v307_v60  ;;  %v86_v8 = vmul.f32 %v355_v11, %v42_v58  ;;  %v87_v9 = vmul.f32 %v357_v12, %v43_v59  ;;  %v128_v15 = vadd.f32 %v359_v13, %v84_v3  ;;  %v129_v16 = vadd.f32 %v361_v14, %v85_v4 }
  0x20   :  { %272 = vst [vmem:[%s559_s3 + $0x50] sm:$0xff] %v308_v1  ;;  %v309_v10 = vpack.c.bf16 %v157_v2, %v156_v61  ;;  %v88_v17 = vmul.f32 %v355_v11, %v44_v0  ;;  %v159_v18 = vmax.f32 %v127_v6, 0.0  ;;  %v89_v21 = vmul.f32 %v357_v12, %v45_v5 }
  0x21   :  { %v130_v19 = vadd.f32 %v359_v13, %v86_v8  ;;  %v131_v20 = vadd.f32 %v361_v14, %v87_v9  ;;  %v160_v22 = vmax.f32 %v128_v15, 0.0  ;;  %v161_v23 = vmax.f32 %v129_v16, 0.0 }
  0x22   :  { %273 = vst [vmem:[%s559_s3 + $0x58] sm:$0xff] %v309_v10  ;;  %v132_v24 = vadd.f32 %v359_v13, %v88_v17  ;;  %v310_v25 = vpack.c.bf16 %v159_v18, %v158_v7  ;;  %v133_v11 = vadd.f32 %v361_v14, %v89_v21 }
  0x23   :  { %v162_v26 = vmax.f32 %v130_v19, 0.0  ;;  %v163_v27 = vmax.f32 %v131_v20, 0.0  ;;  %v311_v28 = vpack.c.bf16 %v161_v23, %v160_v22 }
  0x24   :  { %v164_v29 = vmax.f32 %v132_v24, 0.0  ;;  %274 = vst [vmem:[%s559_s3 + $0x60] sm:$0xff] %v310_v25  ;;  %v165_v30 = vmax.f32 %v133_v11, 0.0 }
  0x25   :  { %v312_v12 = vpack.c.bf16 %v163_v27, %v162_v26  ;;  %275 = vst [vmem:[%s559_s3 + $0x68] sm:$0xff] %v311_v28 }
  0x26   :  { %v313_v13 = vpack.c.bf16 %v165_v30, %v164_v29 }
  0x27   :  { %276 = vst [vmem:[%s559_s3 + $0x70] sm:$0xff] %v312_v12 }
  0x28   :  { %277 = vst [vmem:[%s559_s3 + $0x78] sm:$0xff] %v313_v13 }

// kernel: densenet121_forward.194
= control target key start
LH: loop header
LB: loop body
LE: loop exit
PB: predicated region body
PF: predicated region fallthrough
CT: control target
= control target key end

     0   :  { %s992_s1 = inlined_call_operand.vmem [shape: bf16[256,128], index: 1, kind: input, shape index: {}]   ;;  %s993_s0 = inlined_call_operand.vmem [shape: bf16[128,256], index: 0, kind: input, shape index: {}]   ;;  %s994_s2 = inlined_call_operand.vmem [shape: f32[1,128], index: 2, kind: input, shape index: {}]   ;;  %s995_s3 = inlined_call_operand.vmem [shape: f32[1,128], index: 3, kind: input, shape index: {}]   ;;  %s996_s4 = inlined_call_operand.vmem [shape: bf16[128,128], index: 4, kind: output, shape index: {}]  }
   0x1   :  { %v765_v0 = vld [vmem:[%s992_s1 + $0x40] sm:$0xff]   ;;  %v767_v2 = vld [vmem:[%s992_s1 + $0x48] sm:$0xff]   ;;  %v769_v4 = vld [vmem:[%s992_s1 + $0x50] sm:$0xff]  }
   0x2   :  { %v766_v1 = vld [vmem:[%s992_s1] sm:$0xff]   ;;  %685 = vmatprep.subr.bf16.mxu0 %v765_v0  ;;  %749 = vmatprep.subr.bf16.mxu1 %v765_v0  ;;  %v768_v3 = vld [vmem:[%s992_s1 + $0x8] sm:$0xff]   ;;  %v770_v5 = vld [vmem:[%s992_s1 + $0x10] sm:$0xff]  }
   0x3   :  { %686 = vmatpush3.bf16.msra.mxu0 %v766_v1  ;;  %757 = vmatpush3.bf16.msra.mxu1 %v766_v1  ;;  %v771_v6 = vld [vmem:[%s992_s1 + $0x58] sm:$0xff]   ;;  %v773_v8 = vld [vmem:[%s992_s1 + $0x60] sm:$0xff]   ;;  %v775_v10 = vld [vmem:[%s992_s1 + $0x68] sm:$0xff]  }
   0x4   :  { %687 = vmatprep.subr.bf16.mxu0 %v767_v2  ;;  %750 = vmatprep.subr.bf16.mxu1 %v767_v2  ;;  %v772_v7 = vld [vmem:[%s992_s1 + $0x18] sm:$0xff]   ;;  %v774_v9 = vld [vmem:[%s992_s1 + $0x20] sm:$0xff]   ;;  %v776_v13 = vld [vmem:[%s992_s1 + $0x28] sm:$0xff]  }
   0x5   :  { %v783_v11 = vld [vmem:[%s993_s0 + $0x4] ss:$8 sps:$4 sm:$0xff]   ;;  %v777_v14 = vld [vmem:[%s992_s1 + $0x70] sm:$0xff]   ;;  %v779_v16 = vld [vmem:[%s992_s1 + $0x78] sm:$0xff]  }
   0x6   :  { %v786_v12 = vld [vmem:[%s993_s0 + $0x44] ss:$8 sps:$4 sm:$0xff]   ;;  %310 = vmatprep.mubr.bf16.mxu0 %v783_v11  ;;  %v778_v15 = vld [vmem:[%s992_s1 + $0x30] sm:$0xff]   ;;  %v780_v17 = vld [vmem:[%s992_s1 + $0x38] sm:$0xff]  }
   0x7   :  { %688 = vmatpush3.bf16.msra.mxu0 %v768_v3  ;;  %758 = vmatpush3.bf16.msra.mxu1 %v768_v3  ;;  %v781_v18 = vld [vmem:[%s993_s0] ss:$8 sps:$4 sm:$0xff]   ;;  %v787_v20 = vld [vmem:[%s993_s0 + $0x14] ss:$8 sps:$4 sm:$0xff]   ;;  %v791_v22 = vld [vmem:[%s993_s0 + $0x10] ss:$8 sps:$4 sm:$0xff]  }
   0x8   :  { %689 = vmatprep.subr.bf16.mxu0 %v769_v4  ;;  %751 = vmatprep.subr.bf16.mxu1 %v769_v4  ;;  %v784_v19 = vld [vmem:[%s993_s0 + $0x40] ss:$8 sps:$4 sm:$0xff]   ;;  %v789_v21 = vld [vmem:[%s993_s0 + $0x54] ss:$8 sps:$4 sm:$0xff]   ;;  %v792_v23 = vld [vmem:[%s993_s0 + $0x50] ss:$8 sps:$4 sm:$0xff]  }
   0x9   :  { %342 = vmatprep.mubr.bf16.mxu1 %v786_v12  ;;  %v793_v24 = vld [vmem:[%s993_s0 + $0x24] ss:$8 sps:$4 sm:$0xff]   ;;  %v797_v26 = vld [vmem:[%s993_s0 + $0x20] ss:$8 sps:$4 sm:$0xff]   ;;  %v799_v28 = vld [vmem:[%s993_s0 + $0x34] ss:$8 sps:$4 sm:$0xff]  }
   0xa   :  { %v795_v25 = vld [vmem:[%s993_s0 + $0x64] ss:$8 sps:$4 sm:$0xff]   ;;  %v798_v27 = vld [vmem:[%s993_s0 + $0x60] ss:$8 sps:$4 sm:$0xff]   ;;  %v801_v29 = vld [vmem:[%s993_s0 + $0x74] ss:$8 sps:$4 sm:$0xff]  }
   0xb   :  { %690 = vmatpush3.bf16.msra.mxu0 %v770_v5  ;;  %759 = vmatpush3.bf16.msra.mxu1 %v770_v5  ;;  %v803_v30 = vld [vmem:[%s993_s0 + $0x30] ss:$8 sps:$4 sm:$0xff]   ;;  %v929_v35 = vld [vmem:[%s994_s2] ss:$0 sm:$0xff] }
   0xc   :  { %691 = vmatprep.subr.bf16.mxu0 %v771_v6  ;;  %752 = vmatprep.subr.bf16.mxu1 %v771_v6  ;;  %v804_v31 = vld [vmem:[%s993_s0 + $0x70] ss:$8 sps:$4 sm:$0xff]   ;;  %v934_v41 = vld [vmem:[%s995_s3] ss:$0 sm:$0xff] }
   0xf   :  { %692 = vmatpush3.bf16.msra.mxu0 %v772_v7  ;;  %760 = vmatpush3.bf16.msra.mxu1 %v772_v7 }
  0x10   :  { %693 = vmatprep.subr.bf16.mxu0 %v773_v8  ;;  %753 = vmatprep.subr.bf16.mxu1 %v773_v8 }
  0x13   :  { %694 = vmatpush3.bf16.msra.mxu0 %v774_v9  ;;  %761 = vmatpush3.bf16.msra.mxu1 %v774_v9 }
  0x14   :  { %695 = vmatprep.subr.bf16.mxu0 %v775_v10  ;;  %754 = vmatprep.subr.bf16.mxu1 %v775_v10 }
  0x17   :  { %696 = vmatpush3.bf16.msra.mxu0 %v776_v13  ;;  %762 = vmatpush3.bf16.msra.mxu1 %v776_v13 }
  0x18   :  { %697 = vmatprep.subr.bf16.mxu0 %v777_v14  ;;  %755 = vmatprep.subr.bf16.mxu1 %v777_v14 }
  0x1b   :  { %698 = vmatpush3.bf16.msra.mxu0 %v778_v15  ;;  %763 = vmatpush3.bf16.msra.mxu1 %v778_v15 }
  0x1c   :  { %699 = vmatprep.subr.bf16.mxu0 %v779_v16  ;;  %756 = vmatprep.subr.bf16.mxu1 %v779_v16 }
  0x1f   :  { %700 = vmatpush3.bf16.msra.mxu0 %v780_v17  ;;  %764 = vmatpush3.bf16.msra.mxu1 %v780_v17 }
  0x22   :  { %311 = vmatmul.mubr.bf16.vlgmr.msra.gmra.mrb[0].mxu0 %v781_v18  ;;  %343 = vmatmul.mubr.bf16.vlgmr.msra.gmra.mrb[0].mxu1 %v784_v19 }
  0x23   :  { %318 = vmatprep.mubr.bf16.mxu0 %v787_v20  ;;  %350 = vmatprep.mubr.bf16.mxu1 %v789_v21 }
  0x2a   :  { %319 = vmatmul.mubr.bf16.gmra.mrb[4].mxu0 %v791_v22  ;;  %351 = vmatmul.mubr.bf16.gmra.mrb[4].mxu1 %v792_v23 }
  0x2b   :  { %326 = vmatprep.mubr.bf16.mxu0 %v793_v24  ;;  %358 = vmatprep.mubr.bf16.mxu1 %v795_v25 }
  0x32   :  { %327 = vmatmul.mubr.bf16.gmra.mrb[8].mxu0 %v797_v26  ;;  %359 = vmatmul.mubr.bf16.gmra.mrb[8].mxu1 %v798_v27 }
  0x33   :  { %334 = vmatprep.mubr.bf16.mxu0 %v799_v28  ;;  %366 = vmatprep.mubr.bf16.mxu1 %v801_v29 }
  0x3a   :  { %335 = vmatmul.mubr.bf16.gmra.mrb[12].mxu0 %v803_v30  ;;  %367 = vmatmul.mubr.bf16.gmra.mrb[12].mxu1 %v804_v31 }
  0xf5   :  { %v701_v32 = vpop.f32.mrb[0].mxu0  ;;  %v725_v33 = vpop.f32.mrb[0].mxu1 }
  0xf6   :  { %v702_v34 = vpop.f32.mrb[1].mxu0  ;;  %v726_v36 = vpop.f32.mrb[1].mxu1 }
  0xf7   :  { %v703_v37 = vadd.f32 %v702_v34, %v701_v32  ;;  %v727_v38 = vadd.f32 %v726_v36, %v725_v33  ;;  %v704_v39 = vpop.f32.mrb[2].mxu0  ;;  %v728_v40 = vpop.f32.mrb[2].mxu1 }
  0xf8   :  { %v705_v42 = vpop.f32.mrb[3].mxu0  ;;  %v729_v43 = vpop.f32.mrb[3].mxu1 }
  0xf9   :  { %v433_v44 = vmul.f32 %v703_v37, %v929_v35  ;;  %v441_v45 = vmul.f32 %v727_v38, %v929_v35  ;;  %v706_v46 = vadd.f32 %v705_v42, %v704_v39  ;;  %v730_v47 = vadd.f32 %v729_v43, %v728_v40 }
  0xfb   :  { %v456_v48 = vadd.f32 %v934_v41, %v433_v44  ;;  %v464_v49 = vadd.f32 %v934_v41, %v441_v45  ;;  %v434_v50 = vmul.f32 %v706_v46, %v929_v35  ;;  %v442_v51 = vmul.f32 %v730_v47, %v929_v35 }
  0xfd   :  { %v457_v52 = vadd.f32 %v934_v41, %v434_v50  ;;  %v465_v53 = vadd.f32 %v934_v41, %v442_v51  ;;  %v707_v54 = vpop.f32.mrb[4].mxu0  ;;  %v731_v55 = vpop.f32.mrb[4].mxu1  ;;  %v472_v56 = vmax.f32 %v456_v48, 0.0  ;;  %v480_v57 = vmax.f32 %v464_v49, 0.0 }
  0xfe   :  { %v708_v58 = vpop.f32.mrb[5].mxu0  ;;  %v732_v59 = vpop.f32.mrb[5].mxu1 }
  0xff   :  { %v473_v60 = vmax.f32 %v457_v52, 0.0  ;;  %v481_v61 = vmax.f32 %v465_v53, 0.0  ;;  %v709_v62 = vadd.f32 %v708_v58, %v707_v54  ;;  %v733_v63 = vadd.f32 %v732_v59, %v731_v55  ;;  %v710_v0 = vpop.f32.mrb[6].mxu0  ;;  %v734_v1 = vpop.f32.mrb[6].mxu1 }
 0x100   :  { %v711_v2 = vpop.f32.mrb[7].mxu0  ;;  %v735_v3 = vpop.f32.mrb[7].mxu1 }
 0x101   :  { %v641_v4 = vpack.c.bf16 %v473_v60, %v472_v56  ;;  %v661_v5 = vpack.c.bf16 %v481_v61, %v480_v57  ;;  %v435_v6 = vmul.f32 %v709_v62, %v929_v35  ;;  %v443_v7 = vmul.f32 %v733_v63, %v929_v35 }
 0x102   :  { %v712_v8 = vadd.f32 %v711_v2, %v710_v0  ;;  %v736_v9 = vadd.f32 %v735_v3, %v734_v1 }
 0x103   :  { %642 = vst [vmem:[%s996_s4] sm:$0xff] %v641_v4   ;;  %681 = vst [vmem:[%s996_s4 + $0x20] sm:$0xff] %v661_v5   ;;  %v458_v10 = vadd.f32 %v934_v41, %v435_v6  ;;  %v466_v11 = vadd.f32 %v934_v41, %v443_v7 }
 0x104   :  { %v436_v12 = vmul.f32 %v712_v8, %v929_v35  ;;  %v444_v13 = vmul.f32 %v736_v9, %v929_v35 }
 0x105   :  { %v713_v14 = vpop.f32.mrb[8].mxu0  ;;  %v737_v15 = vpop.f32.mrb[8].mxu1  ;;  %v474_v24 = vmax.f32 %v458_v10, 0.0  ;;  %v482_v25 = vmax.f32 %v466_v11, 0.0 }
 0x106   :  { %v459_v16 = vadd.f32 %v934_v41, %v436_v12  ;;  %v467_v17 = vadd.f32 %v934_v41, %v444_v13  ;;  %v714_v18 = vpop.f32.mrb[9].mxu0  ;;  %v738_v19 = vpop.f32.mrb[9].mxu1 }
 0x107   :  { %v715_v20 = vadd.f32 %v714_v18, %v713_v14  ;;  %v739_v21 = vadd.f32 %v738_v19, %v737_v15  ;;  %v716_v22 = vpop.f32.mrb[10].mxu0  ;;  %v740_v23 = vpop.f32.mrb[10].mxu1 }
 0x108   :  { %v475_v26 = vmax.f32 %v459_v16, 0.0  ;;  %v483_v27 = vmax.f32 %v467_v17, 0.0  ;;  %v717_v28 = vpop.f32.mrb[11].mxu0  ;;  %v741_v29 = vpop.f32.mrb[11].mxu1 }
 0x109   :  { %v437_v30 = vmul.f32 %v715_v20, %v929_v35  ;;  %v445_v31 = vmul.f32 %v739_v21, %v929_v35  ;;  %v718_v32 = vadd.f32 %v717_v28, %v716_v22  ;;  %v742_v33 = vadd.f32 %v741_v29, %v740_v23 }
 0x10a   :  { %v646_v34 = vpack.c.bf16 %v475_v26, %v474_v24  ;;  %v666_v36 = vpack.c.bf16 %v483_v27, %v482_v25 }
 0x10b   :  { %v460_v37 = vadd.f32 %v934_v41, %v437_v30  ;;  %v468_v38 = vadd.f32 %v934_v41, %v445_v31  ;;  %v438_v39 = vmul.f32 %v718_v32, %v929_v35  ;;  %v446_v40 = vmul.f32 %v742_v33, %v929_v35 }
 0x10c   :  { %678 = vst [vmem:[%s996_s4 + $0x8] sm:$0xff] %v646_v34   ;;  %682 = vst [vmem:[%s996_s4 + $0x28] sm:$0xff] %v666_v36  }
 0x10d   :  { %v461_v42 = vadd.f32 %v934_v41, %v438_v39  ;;  %v469_v43 = vadd.f32 %v934_v41, %v446_v40  ;;  %v719_v44 = vpop.f32.mrb[12].mxu0  ;;  %v743_v45 = vpop.f32.mrb[12].mxu1  ;;  %v476_v46 = vmax.f32 %v460_v37, 0.0  ;;  %v484_v47 = vmax.f32 %v468_v38, 0.0 }
 0x10e   :  { %v720_v48 = vpop.f32.mrb[13].mxu0  ;;  %v744_v49 = vpop.f32.mrb[13].mxu1 }
 0x10f   :  { %v477_v50 = vmax.f32 %v461_v42, 0.0  ;;  %v485_v51 = vmax.f32 %v469_v43, 0.0  ;;  %v721_v52 = vadd.f32 %v720_v48, %v719_v44  ;;  %v745_v53 = vadd.f32 %v744_v49, %v743_v45  ;;  %v722_v54 = vpop.f32.mrb[14].mxu0  ;;  %v746_v55 = vpop.f32.mrb[14].mxu1 }
 0x110   :  { %v723_v56 = vpop.f32.mrb[15].mxu0  ;;  %v747_v57 = vpop.f32.mrb[15].mxu1 }
 0x111   :  { %v651_v58 = vpack.c.bf16 %v477_v50, %v476_v46  ;;  %v671_v59 = vpack.c.bf16 %v485_v51, %v484_v47  ;;  %v439_v60 = vmul.f32 %v721_v52, %v929_v35  ;;  %v447_v61 = vmul.f32 %v745_v53, %v929_v35 }
 0x112   :  { %v724_v62 = vadd.f32 %v723_v56, %v722_v54  ;;  %v748_v63 = vadd.f32 %v747_v57, %v746_v55 }
 0x113   :  { %679 = vst [vmem:[%s996_s4 + $0x10] sm:$0xff] %v651_v58   ;;  %683 = vst [vmem:[%s996_s4 + $0x30] sm:$0xff] %v671_v59   ;;  %v462_v0 = vadd.f32 %v934_v41, %v439_v60  ;;  %v470_v1 = vadd.f32 %v934_v41, %v447_v61 }
 0x114   :  { %v440_v2 = vmul.f32 %v724_v62, %v929_v35  ;;  %v448_v3 = vmul.f32 %v748_v63, %v929_v35 }
 0x115   :  { %v478_v6 = vmax.f32 %v462_v0, 0.0  ;;  %v486_v7 = vmax.f32 %v470_v1, 0.0 }
 0x116   :  { %v463_v4 = vadd.f32 %v934_v41, %v440_v2  ;;  %v471_v5 = vadd.f32 %v934_v41, %v448_v3 }
 0x118   :  { %v479_v8 = vmax.f32 %v463_v4, 0.0  ;;  %v487_v9 = vmax.f32 %v471_v5, 0.0 }
 0x11a   :  { %v656_v10 = vpack.c.bf16 %v479_v8, %v478_v6  ;;  %v676_v11 = vpack.c.bf16 %v487_v9, %v486_v7 }
 0x11c   :  { %680 = vst [vmem:[%s996_s4 + $0x18] sm:$0xff] %v656_v10   ;;  %684 = vst [vmem:[%s996_s4 + $0x38] sm:$0xff] %v676_v11  }

// kernel: densenet121_forward.203
= control target key start
LH: loop header
LB: loop body
LE: loop exit
PB: predicated region body
PF: predicated region fallthrough
CT: control target
= control target key end

     0   :  { %s857_s1 = inlined_call_operand.vmem [shape: bf16[256,128], index: 1, kind: input, shape index: {}]   ;;  %s858_s0 = inlined_call_operand.vmem [shape: bf16[128,256], index: 0, kind: input, shape index: {}]   ;;  %s859_s2 = inlined_call_operand.vmem [shape: f32[1,128], index: 2, kind: input, shape index: {}]   ;;  %s860_s3 = inlined_call_operand.vmem [shape: f32[1,128], index: 3, kind: input, shape index: {}]   ;;  %s861_s4 = inlined_call_operand.vmem [shape: f32[128,128], index: 4, kind: output, shape index: {}]  }
   0x1   :  { %v606_v0 = vld [vmem:[%s857_s1 + $0x40] sm:$0xff]   ;;  %v608_v2 = vld [vmem:[%s857_s1 + $0x48] sm:$0xff]   ;;  %v610_v4 = vld [vmem:[%s857_s1 + $0x50] sm:$0xff]  }
   0x2   :  { %v607_v1 = vld [vmem:[%s857_s1] sm:$0xff]   ;;  %526 = vmatprep.subr.bf16.mxu0 %v606_v0  ;;  %590 = vmatprep.subr.bf16.mxu1 %v606_v0  ;;  %v609_v3 = vld [vmem:[%s857_s1 + $0x8] sm:$0xff]   ;;  %v611_v5 = vld [vmem:[%s857_s1 + $0x10] sm:$0xff]  }
   0x3   :  { %527 = vmatpush3.bf16.msra.mxu0 %v607_v1  ;;  %598 = vmatpush3.bf16.msra.mxu1 %v607_v1  ;;  %v612_v6 = vld [vmem:[%s857_s1 + $0x58] sm:$0xff]   ;;  %v614_v8 = vld [vmem:[%s857_s1 + $0x60] sm:$0xff]   ;;  %v616_v10 = vld [vmem:[%s857_s1 + $0x68] sm:$0xff]  }
   0x4   :  { %528 = vmatprep.subr.bf16.mxu0 %v608_v2  ;;  %591 = vmatprep.subr.bf16.mxu1 %v608_v2  ;;  %v613_v7 = vld [vmem:[%s857_s1 + $0x18] sm:$0xff]   ;;  %v615_v9 = vld [vmem:[%s857_s1 + $0x20] sm:$0xff]   ;;  %v617_v13 = vld [vmem:[%s857_s1 + $0x28] sm:$0xff]  }
   0x5   :  { %v624_v11 = vld [vmem:[%s858_s0 + $0x4] ss:$8 sps:$4 sm:$0xff]   ;;  %v618_v14 = vld [vmem:[%s857_s1 + $0x70] sm:$0xff]   ;;  %v620_v16 = vld [vmem:[%s857_s1 + $0x78] sm:$0xff]  }
   0x6   :  { %v627_v12 = vld [vmem:[%s858_s0 + $0x44] ss:$8 sps:$4 sm:$0xff]   ;;  %310 = vmatprep.mubr.bf16.mxu0 %v624_v11  ;;  %v619_v15 = vld [vmem:[%s857_s1 + $0x30] sm:$0xff]   ;;  %v621_v17 = vld [vmem:[%s857_s1 + $0x38] sm:$0xff]  }
   0x7   :  { %529 = vmatpush3.bf16.msra.mxu0 %v609_v3  ;;  %599 = vmatpush3.bf16.msra.mxu1 %v609_v3  ;;  %v622_v18 = vld [vmem:[%s858_s0] ss:$8 sps:$4 sm:$0xff]   ;;  %v628_v20 = vld [vmem:[%s858_s0 + $0x14] ss:$8 sps:$4 sm:$0xff]   ;;  %v632_v22 = vld [vmem:[%s858_s0 + $0x10] ss:$8 sps:$4 sm:$0xff]  }
   0x8   :  { %530 = vmatprep.subr.bf16.mxu0 %v610_v4  ;;  %592 = vmatprep.subr.bf16.mxu1 %v610_v4  ;;  %v625_v19 = vld [vmem:[%s858_s0 + $0x40] ss:$8 sps:$4 sm:$0xff]   ;;  %v630_v21 = vld [vmem:[%s858_s0 + $0x54] ss:$8 sps:$4 sm:$0xff]   ;;  %v633_v23 = vld [vmem:[%s858_s0 + $0x50] ss:$8 sps:$4 sm:$0xff]  }
   0x9   :  { %342 = vmatprep.mubr.bf16.mxu1 %v627_v12  ;;  %v634_v24 = vld [vmem:[%s858_s0 + $0x24] ss:$8 sps:$4 sm:$0xff]   ;;  %v638_v26 = vld [vmem:[%s858_s0 + $0x20] ss:$8 sps:$4 sm:$0xff]   ;;  %v640_v28 = vld [vmem:[%s858_s0 + $0x34] ss:$8 sps:$4 sm:$0xff]  }
   0xa   :  { %v636_v25 = vld [vmem:[%s858_s0 + $0x64] ss:$8 sps:$4 sm:$0xff]   ;;  %v639_v27 = vld [vmem:[%s858_s0 + $0x60] ss:$8 sps:$4 sm:$0xff]   ;;  %v642_v29 = vld [vmem:[%s858_s0 + $0x74] ss:$8 sps:$4 sm:$0xff]  }
   0xb   :  { %531 = vmatpush3.bf16.msra.mxu0 %v611_v5  ;;  %600 = vmatpush3.bf16.msra.mxu1 %v611_v5  ;;  %v644_v30 = vld [vmem:[%s858_s0 + $0x30] ss:$8 sps:$4 sm:$0xff]   ;;  %v770_v35 = vld [vmem:[%s859_s2] ss:$0 sm:$0xff] }
   0xc   :  { %532 = vmatprep.subr.bf16.mxu0 %v612_v6  ;;  %593 = vmatprep.subr.bf16.mxu1 %v612_v6  ;;  %v645_v31 = vld [vmem:[%s858_s0 + $0x70] ss:$8 sps:$4 sm:$0xff]   ;;  %v775_v41 = vld [vmem:[%s860_s3] ss:$0 sm:$0xff] }
   0xf   :  { %533 = vmatpush3.bf16.msra.mxu0 %v613_v7  ;;  %601 = vmatpush3.bf16.msra.mxu1 %v613_v7 }
  0x10   :  { %534 = vmatprep.subr.bf16.mxu0 %v614_v8  ;;  %594 = vmatprep.subr.bf16.mxu1 %v614_v8 }
  0x13   :  { %535 = vmatpush3.bf16.msra.mxu0 %v615_v9  ;;  %602 = vmatpush3.bf16.msra.mxu1 %v615_v9 }
  0x14   :  { %536 = vmatprep.subr.bf16.mxu0 %v616_v10  ;;  %595 = vmatprep.subr.bf16.mxu1 %v616_v10 }
  0x17   :  { %537 = vmatpush3.bf16.msra.mxu0 %v617_v13  ;;  %603 = vmatpush3.bf16.msra.mxu1 %v617_v13 }
  0x18   :  { %538 = vmatprep.subr.bf16.mxu0 %v618_v14  ;;  %596 = vmatprep.subr.bf16.mxu1 %v618_v14 }
  0x1b   :  { %539 = vmatpush3.bf16.msra.mxu0 %v619_v15  ;;  %604 = vmatpush3.bf16.msra.mxu1 %v619_v15 }
  0x1c   :  { %540 = vmatprep.subr.bf16.mxu0 %v620_v16  ;;  %597 = vmatprep.subr.bf16.mxu1 %v620_v16 }
  0x1f   :  { %541 = vmatpush3.bf16.msra.mxu0 %v621_v17  ;;  %605 = vmatpush3.bf16.msra.mxu1 %v621_v17 }
  0x22   :  { %311 = vmatmul.mubr.bf16.vlgmr.msra.gmra.mrb[0].mxu0 %v622_v18  ;;  %343 = vmatmul.mubr.bf16.vlgmr.msra.gmra.mrb[0].mxu1 %v625_v19 }
  0x23   :  { %318 = vmatprep.mubr.bf16.mxu0 %v628_v20  ;;  %350 = vmatprep.mubr.bf16.mxu1 %v630_v21 }
  0x2a   :  { %319 = vmatmul.mubr.bf16.gmra.mrb[4].mxu0 %v632_v22  ;;  %351 = vmatmul.mubr.bf16.gmra.mrb[4].mxu1 %v633_v23 }
  0x2b   :  { %326 = vmatprep.mubr.bf16.mxu0 %v634_v24  ;;  %358 = vmatprep.mubr.bf16.mxu1 %v636_v25 }
  0x32   :  { %327 = vmatmul.mubr.bf16.gmra.mrb[8].mxu0 %v638_v26  ;;  %359 = vmatmul.mubr.bf16.gmra.mrb[8].mxu1 %v639_v27 }
  0x33   :  { %334 = vmatprep.mubr.bf16.mxu0 %v640_v28  ;;  %366 = vmatprep.mubr.bf16.mxu1 %v642_v29 }
  0x3a   :  { %335 = vmatmul.mubr.bf16.gmra.mrb[12].mxu0 %v644_v30  ;;  %367 = vmatmul.mubr.bf16.gmra.mrb[12].mxu1 %v645_v31 }
  0xf5   :  { %v542_v32 = vpop.f32.mrb[0].mxu0  ;;  %v566_v33 = vpop.f32.mrb[0].mxu1 }
  0xf6   :  { %v543_v34 = vpop.f32.mrb[1].mxu0  ;;  %v567_v36 = vpop.f32.mrb[1].mxu1 }
  0xf7   :  { %v544_v37 = vadd.f32 %v543_v34, %v542_v32  ;;  %v568_v38 = vadd.f32 %v567_v36, %v566_v33  ;;  %v545_v39 = vpop.f32.mrb[2].mxu0  ;;  %v569_v40 = vpop.f32.mrb[2].mxu1 }
  0xf8   :  { %v546_v42 = vpop.f32.mrb[3].mxu0  ;;  %v570_v43 = vpop.f32.mrb[3].mxu1 }
  0xf9   :  { %v433_v44 = vmul.f32 %v544_v37, %v770_v35  ;;  %v441_v45 = vmul.f32 %v568_v38, %v770_v35  ;;  %v547_v46 = vadd.f32 %v546_v42, %v545_v39  ;;  %v571_v47 = vadd.f32 %v570_v43, %v569_v40 }
  0xfb   :  { %v456_v48 = vadd.f32 %v775_v41, %v433_v44  ;;  %v464_v49 = vadd.f32 %v775_v41, %v441_v45  ;;  %v434_v50 = vmul.f32 %v547_v46, %v770_v35  ;;  %v442_v51 = vmul.f32 %v571_v47, %v770_v35 }
  0xfd   :  { %472 = vst [vmem:[%s861_s4] sm:$0xff] %v456_v48  ;;  %480 = vst [vmem:[%s861_s4 + $0x40] sm:$0xff] %v464_v49  ;;  %v457_v52 = vadd.f32 %v775_v41, %v434_v50  ;;  %v465_v53 = vadd.f32 %v775_v41, %v442_v51  ;;  %v548_v54 = vpop.f32.mrb[4].mxu0  ;;  %v572_v55 = vpop.f32.mrb[4].mxu1 }
  0xfe   :  { %v549_v56 = vpop.f32.mrb[5].mxu0  ;;  %v573_v57 = vpop.f32.mrb[5].mxu1 }
  0xff   :  { %473 = vst [vmem:[%s861_s4 + $0x8] sm:$0xff] %v457_v52  ;;  %481 = vst [vmem:[%s861_s4 + $0x48] sm:$0xff] %v465_v53  ;;  %v550_v58 = vadd.f32 %v549_v56, %v548_v54  ;;  %v574_v59 = vadd.f32 %v573_v57, %v572_v55  ;;  %v551_v60 = vpop.f32.mrb[6].mxu0  ;;  %v575_v61 = vpop.f32.mrb[6].mxu1 }
 0x100   :  { %v552_v62 = vpop.f32.mrb[7].mxu0  ;;  %v576_v63 = vpop.f32.mrb[7].mxu1 }
 0x101   :  { %v435_v0 = vmul.f32 %v550_v58, %v770_v35  ;;  %v443_v1 = vmul.f32 %v574_v59, %v770_v35  ;;  %v553_v2 = vadd.f32 %v552_v62, %v551_v60  ;;  %v577_v3 = vadd.f32 %v576_v63, %v575_v61 }
 0x103   :  { %v458_v4 = vadd.f32 %v775_v41, %v435_v0  ;;  %v466_v5 = vadd.f32 %v775_v41, %v443_v1  ;;  %v436_v6 = vmul.f32 %v553_v2, %v770_v35  ;;  %v444_v7 = vmul.f32 %v577_v3, %v770_v35 }
 0x105   :  { %474 = vst [vmem:[%s861_s4 + $0x10] sm:$0xff] %v458_v4  ;;  %482 = vst [vmem:[%s861_s4 + $0x50] sm:$0xff] %v466_v5  ;;  %v459_v8 = vadd.f32 %v775_v41, %v436_v6  ;;  %v467_v9 = vadd.f32 %v775_v41, %v444_v7  ;;  %v554_v10 = vpop.f32.mrb[8].mxu0  ;;  %v578_v11 = vpop.f32.mrb[8].mxu1 }
 0x106   :  { %v555_v12 = vpop.f32.mrb[9].mxu0  ;;  %v579_v13 = vpop.f32.mrb[9].mxu1 }
 0x107   :  { %475 = vst [vmem:[%s861_s4 + $0x18] sm:$0xff] %v459_v8  ;;  %483 = vst [vmem:[%s861_s4 + $0x58] sm:$0xff] %v467_v9  ;;  %v556_v14 = vadd.f32 %v555_v12, %v554_v10  ;;  %v580_v15 = vadd.f32 %v579_v13, %v578_v11  ;;  %v557_v16 = vpop.f32.mrb[10].mxu0  ;;  %v581_v17 = vpop.f32.mrb[10].mxu1 }
 0x108   :  { %v558_v18 = vpop.f32.mrb[11].mxu0  ;;  %v582_v19 = vpop.f32.mrb[11].mxu1 }
 0x109   :  { %v437_v20 = vmul.f32 %v556_v14, %v770_v35  ;;  %v445_v21 = vmul.f32 %v580_v15, %v770_v35  ;;  %v559_v22 = vadd.f32 %v558_v18, %v557_v16  ;;  %v583_v23 = vadd.f32 %v582_v19, %v581_v17 }
 0x10b   :  { %v460_v24 = vadd.f32 %v775_v41, %v437_v20  ;;  %v468_v25 = vadd.f32 %v775_v41, %v445_v21  ;;  %v438_v26 = vmul.f32 %v559_v22, %v770_v35  ;;  %v446_v27 = vmul.f32 %v583_v23, %v770_v35 }
 0x10d   :  { %476 = vst [vmem:[%s861_s4 + $0x20] sm:$0xff] %v460_v24  ;;  %484 = vst [vmem:[%s861_s4 + $0x60] sm:$0xff] %v468_v25  ;;  %v461_v28 = vadd.f32 %v775_v41, %v438_v26  ;;  %v469_v29 = vadd.f32 %v775_v41, %v446_v27  ;;  %v560_v30 = vpop.f32.mrb[12].mxu0  ;;  %v584_v31 = vpop.f32.mrb[12].mxu1 }
 0x10e   :  { %v561_v32 = vpop.f32.mrb[13].mxu0  ;;  %v585_v33 = vpop.f32.mrb[13].mxu1 }
 0x10f   :  { %477 = vst [vmem:[%s861_s4 + $0x28] sm:$0xff] %v461_v28  ;;  %485 = vst [vmem:[%s861_s4 + $0x68] sm:$0xff] %v469_v29  ;;  %v562_v34 = vadd.f32 %v561_v32, %v560_v30  ;;  %v586_v36 = vadd.f32 %v585_v33, %v584_v31  ;;  %v563_v37 = vpop.f32.mrb[14].mxu0  ;;  %v587_v38 = vpop.f32.mrb[14].mxu1 }
 0x110   :  { %v564_v39 = vpop.f32.mrb[15].mxu0  ;;  %v588_v40 = vpop.f32.mrb[15].mxu1 }
 0x111   :  { %v439_v42 = vmul.f32 %v562_v34, %v770_v35  ;;  %v447_v43 = vmul.f32 %v586_v36, %v770_v35  ;;  %v565_v44 = vadd.f32 %v564_v39, %v563_v37  ;;  %v589_v45 = vadd.f32 %v588_v40, %v587_v38 }
 0x113   :  { %v462_v46 = vadd.f32 %v775_v41, %v439_v42  ;;  %v470_v47 = vadd.f32 %v775_v41, %v447_v43  ;;  %v440_v48 = vmul.f32 %v565_v44, %v770_v35  ;;  %v448_v49 = vmul.f32 %v589_v45, %v770_v35 }
 0x115   :  { %478 = vst [vmem:[%s861_s4 + $0x30] sm:$0xff] %v462_v46  ;;  %486 = vst [vmem:[%s861_s4 + $0x70] sm:$0xff] %v470_v47  ;;  %v463_v50 = vadd.f32 %v775_v41, %v440_v48  ;;  %v471_v51 = vadd.f32 %v775_v41, %v448_v49 }
 0x117   :  { %479 = vst [vmem:[%s861_s4 + $0x38] sm:$0xff] %v463_v50  ;;  %487 = vst [vmem:[%s861_s4 + $0x78] sm:$0xff] %v471_v51 }

// kernel: densenet121_forward.205
= control target key start
LH: loop header
LB: loop body
LE: loop exit
PB: predicated region body
PF: predicated region fallthrough
CT: control target
= control target key end

     0   :  { %s362_s1 = inlined_call_operand.vmem [shape: bf16[128,128], index: 1, kind: input, shape index: {}]   ;;  %s363_s0 = inlined_call_operand.vmem [shape: bf16[32,128], index: 0, kind: input, shape index: {}]   ;;  %s364_s2 = inlined_call_operand.vmem [shape: f32[1,128], index: 2, kind: input, shape index: {}]   ;;  %s365_s3 = inlined_call_operand.vmem [shape: f32[1,128], index: 3, kind: input, shape index: {}]   ;;  %s366_s4 = inlined_call_operand.vmem [shape: bf16[32,128], index: 4, kind: output, shape index: {}]  }
   0x1   :  { %v285_v0 = vld [vmem:[%s362_s1] sm:$0xff]   ;;  %v286_v1 = vld [vmem:[%s362_s1 + $0x8] sm:$0xff]   ;;  %v287_v2 = vld [vmem:[%s362_s1 + $0x10] sm:$0xff]  }
   0x2   :  { %265 = vmatprep.subr.bf16.mxu0 %v285_v0  ;;  %v288_v3 = vld [vmem:[%s362_s1 + $0x18] sm:$0xff]   ;;  %v293_v4 = vld [vmem:[%s363_s0] sm:$0xff]   ;;  %v290_v6 = vld [vmem:[%s362_s1 + $0x28] sm:$0xff]  }
   0x3   :  { %266 = vmatpush3.bf16.msra.mxu0 %v285_v0  ;;  %281 = vmatprep.mubr.bf16.mxu0 %v293_v4  ;;  %v289_v5 = vld [vmem:[%s362_s1 + $0x20] sm:$0xff]   ;;  %v291_v7 = vld [vmem:[%s362_s1 + $0x30] sm:$0xff]   ;;  %v292_v8 = vld [vmem:[%s362_s1 + $0x38] sm:$0xff]  }
   0x4   :  { %267 = vmatprep.subr.bf16.mxu0 %v286_v1  ;;  %v294_v9 = vld [vmem:[%s363_s0 + $0x8] sm:$0xff]   ;;  %v234_v10 = vld [vmem:[%s364_s2] ss:$0 sm:$0xff] }
   0x5   :  { %v235_v12 = vld [vmem:[%s365_s3] ss:$0 sm:$0xff] }
   0x7   :  { %268 = vmatpush3.bf16.msra.mxu0 %v286_v1 }
   0x8   :  { %269 = vmatprep.subr.bf16.mxu0 %v287_v2 }
   0xb   :  { %270 = vmatpush3.bf16.msra.mxu0 %v287_v2 }
   0xc   :  { %271 = vmatprep.subr.bf16.mxu0 %v288_v3 }
   0xf   :  { %272 = vmatpush3.bf16.msra.mxu0 %v288_v3 }
  0x10   :  { %273 = vmatprep.subr.bf16.mxu0 %v289_v5 }
  0x13   :  { %274 = vmatpush3.bf16.msra.mxu0 %v289_v5 }
  0x14   :  { %275 = vmatprep.subr.bf16.mxu0 %v290_v6 }
  0x17   :  { %276 = vmatpush3.bf16.msra.mxu0 %v290_v6 }
  0x18   :  { %277 = vmatprep.subr.bf16.mxu0 %v291_v7 }
  0x1b   :  { %278 = vmatpush3.bf16.msra.mxu0 %v291_v7 }
  0x1c   :  { %279 = vmatprep.subr.bf16.mxu0 %v292_v8 }
  0x1f   :  { %280 = vmatpush3.bf16.msra.mxu0 %v292_v8 }
  0x22   :  { %282 = vmatmul.mubr.bf16.vlgmr.msra.gmra.mrb[0].mxu0 %v294_v9 }
  0xf5   :  { %v283_v11 = vpop.f32.mrb[0].mxu0 }
  0xf6   :  { %v183_v13 = vmul.f32 %v283_v11, %v234_v10  ;;  %v144_v14 = vpop.f32.mrb[1].mxu0 }
  0xf7   :  { %v181_v15 = vmul.f32 %v234_v10, %v144_v14  ;;  %v284_v16 = vpop.f32.mrb[2].mxu0 }
  0xf8   :  { %v194_v17 = vadd.f32 %v235_v12, %v183_v13  ;;  %v184_v18 = vmul.f32 %v284_v16, %v234_v10  ;;  %v147_v19 = vpop.f32.mrb[3].mxu0 }
  0xf9   :  { %v192_v20 = vadd.f32 %v235_v12, %v181_v15  ;;  %v182_v21 = vmul.f32 %v234_v10, %v147_v19 }
  0xfa   :  { %v195_v22 = vadd.f32 %v235_v12, %v184_v18  ;;  %v198_v24 = vmax.f32 %v194_v17, 0.0 }
  0xfb   :  { %v193_v23 = vadd.f32 %v235_v12, %v182_v21  ;;  %v196_v26 = vmax.f32 %v192_v20, 0.0 }
  0xfc   :  { %v199_v25 = vmax.f32 %v195_v22, 0.0 }
  0xfd   :  { %v197_v27 = vmax.f32 %v193_v23, 0.0 }
  0xfe   :  { %v252_v28 = vpack.c.bf16 %v199_v25, %v198_v24 }
  0xff   :  { %v247_v29 = vpack.c.bf16 %v197_v27, %v196_v26 }
 0x100   :  { %254 = vst [vmem:[%s366_s4 + $0x8] sm:$0xff] %v252_v28  }
 0x101   :  { %248 = vst [vmem:[%s366_s4] sm:$0xff] %v247_v29  }

// kernel: densenet121_forward.204
= control target key start
LH: loop header
LB: loop body
LE: loop exit
PB: predicated region body
PF: predicated region fallthrough
CT: control target
= control target key end

     0   :  { %s183_s0 = inlined_call_operand.vmem [shape: f32[32,512], index: 0, kind: input, shape index: {}]   ;;  %s184_s1 = inlined_call_operand.vmem [shape: f32[1,128], index: 1, kind: input, shape index: {}]   ;;  %s185_s2 = inlined_call_operand.vmem [shape: f32[1,128], index: 2, kind: input, shape index: {}]   ;;  %s186_s3 = inlined_call_operand.vmem [shape: bf16[32,128], index: 3, kind: output, shape index: {}]  }
   0x1   :  { %v43_v0 = vld [vmem:[%s183_s0] sm:$0xff] }
   0x2   :  { %v45_v1 = vld [vmem:[%s183_s0 + $0x20] sm:$0xff] }
   0x3   :  { %v118_v2 = vld [vmem:[%s184_s1] ss:$0 sm:$0xff] }
   0x4   :  { %v71_v3 = vmul.f32 %v118_v2, %v43_v0  ;;  %v72_v4 = vmul.f32 %v118_v2, %v45_v1  ;;  %v119_v5 = vld [vmem:[%s185_s2] ss:$0 sm:$0xff] }
   0x5   :  { %v47_v6 = vld [vmem:[%s183_s0 + $0x40] sm:$0xff] }
   0x6   :  { %v49_v7 = vld [vmem:[%s183_s0 + $0x60] sm:$0xff]  ;;  %v73_v8 = vmul.f32 %v118_v2, %v47_v6  ;;  %v82_v10 = vadd.f32 %v119_v5, %v71_v3  ;;  %v83_v11 = vadd.f32 %v119_v5, %v72_v4 }
   0x7   :  { %v74_v9 = vmul.f32 %v118_v2, %v49_v7 }
   0x8   :  { %v84_v12 = vadd.f32 %v119_v5, %v73_v8  ;;  %v86_v14 = vmax.f32 %v82_v10, 0.0  ;;  %v87_v15 = vmax.f32 %v83_v11, 0.0 }
   0x9   :  { %v85_v13 = vadd.f32 %v119_v5, %v74_v9 }
   0xa   :  { %v88_v16 = vmax.f32 %v84_v12, 0.0  ;;  %v131_v18 = vpack.c.bf16 %v87_v15, %v86_v14 }
   0xb   :  { %v89_v17 = vmax.f32 %v85_v13, 0.0 }
   0xc   :  { %132 = vst [vmem:[%s186_s3] sm:$0xff] %v131_v18  }
   0xd   :  { %v136_v19 = vpack.c.bf16 %v89_v17, %v88_v16 }
   0xf   :  { %138 = vst [vmem:[%s186_s3 + $0x8] sm:$0xff] %v136_v19  }

// kernel: densenet121_forward.206
= control target key start
LH: loop header
LB: loop body
LE: loop exit
PB: predicated region body
PF: predicated region fallthrough
CT: control target
= control target key end

     0   :  { %s828_s15 = smov 0   ;;  %s830_s16 = smov 0   ;;  %s930_s0 = inlined_call_operand.vmem [shape: bf16[32,1152], index: 0, kind: input, shape index: {}]   ;;  %s931_s1 = inlined_call_operand.vmem [shape: bf16[1152,128], index: 1, kind: input, shape index: {}]   ;;  %s932_s2 = inlined_call_operand.vmem [shape: f32[1,128], index: 2, kind: input, shape index: {}]   ;;  %s933_s3 = inlined_call_operand.vmem [shape: f32[1,128], index: 3, kind: input, shape index: {}]   ;;  %s934_s4 = inlined_call_operand.vmem [shape: f32[32,128], index: 4, kind: output, shape index: {}]  }
   0x1   :  { %s832_s17 = smov 0   ;;  %s834_s18 = smov 0  }
   0x2   :  { %s836_s19 = smov 0  }
   0x3 LB: > { %s26_s20 = sadd.s32 1, %s796_s18  ;;  %p49_p1 = scmp.ne.s32.totalorder %s788_s16, %s784_s15  ;;  %s800_s19 = sphi %s836_s19, %s14_s19   ;;  %s796_s18 = sphi %s834_s18, %s938_s18   ;;  %s792_s17 = sphi %s832_s17, %s937_s17   ;;  %s788_s16 = sphi %s830_s16, %s936_s16   ;;  %s784_s15 = sphi %s828_s15, %s935_s15  }
   0x4   : > { %p27_p0 = scmp.ge.s32.totalorder %s26_s20, 9  ;;  %p50_p2 = scmp.eq.s32.totalorder %s800_s19, 0 }
   0x5   : > { %s42_s22 = sadd.s32 1, %s788_s16  ;;  %p656_p5 = scmp.ge.s32.totalorder %s800_s19, 9 }
   0x6   : > { %s940_s20 = smov (%p27_p0, %s26_s20), 0  ;;  %p51_p3 = por %p50_p2, %p49_p1 }
   0x7   : > { %s38_s21 = ssub.s32 %s796_s18, %s940_s20  ;;  %195 = sbr.rel (%p656_p5) target bundleno = 21 (0x15), region = 24 }
   0x8   : > { %p40_p4 = scmp.eq.s32.totalorder %s38_s21, 0 }
   0xa   : > { %s863_s23 = scalar_select %p40_p4, %s788_s16, %s42_s22  }
   0xe   : > { %198 = sbr.rel (!%p51_p3) target bundleno = 21 (0x15), region = 28  ;;  %s200_s24 = sand.u32 (%p51_p3), 1, %s788_s16  }
   0xf   : > { %s658_s25 = sshll.u32 (%p51_p3), %s796_s18, 2  ;;  %s657_s26 = sshll.u32 (%p51_p3), %s200_s24, 4 }
  0x10   : > { %s207_s29 = scalar_lea.vmem (%p51_p3), %s930_s0, %s658_s25  ;;  %s202_s30 = scalar_lea.vmem (%p51_p3), [#allocation3], %s657_s26 }
  0x11   : > { %v223_v0 = vld [vmem:[%s207_s29] sm:$0xf] (%p51_p3)  ;;  %v225_v1 = vld [vmem:[%s207_s29 + $0x24] sm:$0xf] (%p51_p3)  ;;  %v227_v2 = vld [vmem:[%s207_s29 + $0x48] sm:$0xf] (%p51_p3) }
  0x12   : > { %224 = vst [vmem:[%s202_s30] sm:$0xf] (%p51_p3), %v223_v0  ;;  %226 = vst [vmem:[%s202_s30 + $0x4] sm:$0xf] (%p51_p3), %v225_v1  ;;  %v229_v3 = vld [vmem:[%s207_s29 + $0x6c] sm:$0xf] (%p51_p3) }
  0x13   : > { %228 = vst [vmem:[%s202_s30 + $0x8] sm:$0xf] (%p51_p3), %v227_v2  ;;  %230 = vst [vmem:[%s202_s30 + $0xc] sm:$0xf] (%p51_p3), %v229_v3 }
  0x15 PF: > { %p659_p6 = scmp.ge.s32.totalorder %s800_s19, 1  ;;  %p272_p7 = scmp.lt.s32.totalorder %s800_s19, 10 }
  0x17   : > { %p273_p8 = pnand %p659_p6, %p272_p7 }
  0x18   : > { %s279_s5 = sand.u32 (!%p273_p8), 1, %s784_s15   ;;  %s661_s6 = sshll.u32 (!%p273_p8), %s792_s17, 4 }
  0x19   : > { %276 = sbr.rel (%p273_p8) target bundleno = 302 (0x12e), region = 73  ;;  %s875_s7 = sshll.u32 (!%p273_p8), %s279_s5, 4 }
  0x1a   : > { %p323_p9 = scmp.lt.s32.totalorder (!%p273_p8), %s661_s6, 143  ;;  %s281_s12 = scalar_lea.vmem (!%p273_p8), [#allocation3], %s875_s7 }
  0x1b   : > { %p663_p10 = scmp.ne.s32.totalorder (!%p273_p8), %s792_s17, 0 }
  0x20   : > { %s942_s6 = smov (!%p323_p9, %s661_s6), 143  ;;  %350 = sbr.rel (%p663_p10) target bundleno = 39 (0x27), region = 81 }
  0x21   : > { %s662_s8 = sshll.u32 %s942_s6, 2  ;;  %v802_v4 = vmov (!%p663_p10), 0.0  }
  0x22   : > { %s880_s11 = scalar_lea.vmem %s931_s1, %s662_s8  ;;  %351 = vst [vmem:[#allocation2] sm:$0xff] (!%p663_p10), %v802_v4  ;;  %352 = vst [vmem:[#allocation2 + $0x8] sm:$0xff] (!%p663_p10), %v802_v4 }
  0x23   : > { %353 = vst [vmem:[#allocation2 + $0x10] sm:$0xff] (!%p663_p10), %v802_v4  ;;  %354 = vst [vmem:[#allocation2 + $0x18] sm:$0xff] (!%p663_p10), %v802_v4 }
  0x27 PF: > { %v752_v5 = vld [vmem:[%s880_s11] sm:$0xff]   ;;  %v753_v6 = vld [vmem:[%s880_s11 + $0x8] sm:$0xff]   ;;  %v754_v7 = vld [vmem:[%s880_s11 + $0x10] sm:$0xff]   ;;  %p674_p11 = scmp.ne.s32.totalorder %s792_s17, 8 }
  0x28   : > { %691 = vmatprep.subr.bf16.mxu0 %v752_v5  ;;  %v755_v8 = vld [vmem:[%s880_s11 + $0x18] sm:$0xff]   ;;  %v760_v9 = vld [vmem:[%s281_s12] sm:$0xff]   ;;  %v757_v11 = vld [vmem:[%s880_s11 + $0x28] sm:$0xff]  }
  0x29   : > { %692 = vmatpush3.bf16.msra.mxu0 %v752_v5  ;;  %707 = vmatprep.mubr.bf16.mxu0 %v760_v9  ;;  %v756_v10 = vld [vmem:[%s880_s11 + $0x20] sm:$0xff]   ;;  %v758_v12 = vld [vmem:[%s880_s11 + $0x30] sm:$0xff]   ;;  %v759_v13 = vld [vmem:[%s880_s11 + $0x38] sm:$0xff]  }
  0x2a   : > { %693 = vmatprep.subr.bf16.mxu0 %v753_v6  ;;  %v761_v14 = vld [vmem:[%s281_s12 + $0x8] sm:$0xff]   ;;  %v357_v15 = vld [vmem:[#allocation2 + $0x10] sm:$0xff]  ;;  %v355_v16 = vld [vmem:[#allocation2] sm:$0xff] }
  0x2b   : > { %v358_v18 = vld [vmem:[#allocation2 + $0x18] sm:$0xff]  ;;  %v356_v21 = vld [vmem:[#allocation2 + $0x8] sm:$0xff]  ;;  %v675_v28 = vld [vmem:[%s932_s2] ss:$0 sm:$0xff] (!%p674_p11) }
  0x2c   : > { %v676_v29 = vld [vmem:[%s933_s3] ss:$0 sm:$0xff] (!%p674_p11) }
  0x2d   : > { %694 = vmatpush3.bf16.msra.mxu0 %v753_v6 }
  0x2e   : > { %695 = vmatprep.subr.bf16.mxu0 %v754_v7 }
  0x31   : > { %696 = vmatpush3.bf16.msra.mxu0 %v754_v7 }
  0x32   : > { %697 = vmatprep.subr.bf16.mxu0 %v755_v8 }
  0x35   : > { %698 = vmatpush3.bf16.msra.mxu0 %v755_v8 }
  0x36   : > { %699 = vmatprep.subr.bf16.mxu0 %v756_v10 }
  0x39   : > { %700 = vmatpush3.bf16.msra.mxu0 %v756_v10 }
  0x3a   : > { %701 = vmatprep.subr.bf16.mxu0 %v757_v11 }
  0x3d   : > { %702 = vmatpush3.bf16.msra.mxu0 %v757_v11 }
  0x3e   : > { %703 = vmatprep.subr.bf16.mxu0 %v758_v12 }
  0x41   : > { %704 = vmatpush3.bf16.msra.mxu0 %v758_v12 }
  0x42   : > { %705 = vmatprep.subr.bf16.mxu0 %v759_v13 }
  0x45   : > { %706 = vmatpush3.bf16.msra.mxu0 %v759_v13 }
  0x48   : > { %708 = vmatmul.mubr.bf16.vlgmr.msra.gmra.mrb[0].mxu0 %v761_v14 }
 0x11b   : > { %v709_v17 = vpop.f32.mrb[0].mxu0  ;;  %499 = sbr.rel (%p674_p11) target bundleno = 302 (0x12e), region = 85 }
 0x11c   : > { %v490_v19 = vadd.f32 %v709_v17, %v357_v15  ;;  %v473_v20 = vpop.f32.mrb[1].mxu0 }
 0x11d   : > { %v488_v22 = vadd.f32 %v473_v20, %v355_v16  ;;  %v710_v23 = vpop.f32.mrb[2].mxu0 }
 0x11e   : > { %494 = vst [vmem:[#allocation2 + $0x10] sm:$0xff] %v490_v19  ;;  %v491_v24 = vadd.f32 %v710_v23, %v358_v18  ;;  %v476_v25 = vpop.f32.mrb[3].mxu0 }
 0x11f   : > { %492 = vst [vmem:[#allocation2] sm:$0xff] %v488_v22  ;;  %v489_v26 = vadd.f32 %v476_v25, %v356_v21 }
 0x120   : > { %495 = vst [vmem:[#allocation2 + $0x18] sm:$0xff] %v491_v24 }
 0x121   : > { %493 = vst [vmem:[#allocation2 + $0x8] sm:$0xff] %v489_v26 }
 0x125   : > { %v502_v32 = vld [vmem:[#allocation2 + $0x10] sm:$0xff] }
 0x126   : > { %v500_v27 = vld [vmem:[#allocation2] sm:$0xff]  ;;  %v513_v35 = vmul.f32 %v675_v28, %v502_v32 }
 0x127   : > { %v511_v30 = vmul.f32 %v675_v28, %v500_v27  ;;  %v503_v33 = vld [vmem:[#allocation2 + $0x18] sm:$0xff] }
 0x128   : > { %v501_v31 = vld [vmem:[#allocation2 + $0x8] sm:$0xff]  ;;  %v514_v36 = vmul.f32 %v675_v28, %v503_v33  ;;  %v524_v39 = vadd.f32 %v676_v29, %v513_v35 }
 0x129   : > { %v512_v34 = vmul.f32 %v675_v28, %v501_v31  ;;  %v522_v37 = vadd.f32 %v676_v29, %v511_v30 }
 0x12a   : > { %v525_v40 = vadd.f32 %v676_v29, %v514_v36  ;;  %528 = vst [vmem:[%s934_s4 + $0x10] sm:$0xff] %v524_v39 }
 0x12b   : > { %v523_v38 = vadd.f32 %v676_v29, %v512_v34  ;;  %526 = vst [vmem:[%s934_s4] sm:$0xff] %v522_v37 }
 0x12c   : > { %529 = vst [vmem:[%s934_s4 + $0x18] sm:$0xff] %v525_v40 }
 0x12d   : > { %527 = vst [vmem:[%s934_s4 + $0x8] sm:$0xff] %v523_v38 }
 0x12e PF: > { %s14_s19 = sadd.s32 1, %s800_s19   ;;  %s935_s15 = smov %s788_s16 }
 0x12f   : > { %p11_p12 = scmp.ge.s32.totalorder %s14_s19, 11   ;;  %s936_s16 = smov %s863_s23 }
 0x130   : > { %s937_s17 = smov %s796_s18  ;;  %s938_s18 = smov %s940_s20 }
 0x131   :  { %13 = sbr.rel (!%p11_p12) target bundleno = 3 (0x3), region = 129 }

// kernel: densenet121_forward.207
= control target key start
LH: loop header
LB: loop body
LE: loop exit
PB: predicated region body
PF: predicated region fallthrough
CT: control target
= control target key end

     0   :  { %v57_v0 = vlaneseq  ;;  %s209_s0 = inlined_call_operand.vmem [shape: f32[32,512], index: 0, kind: input, shape index: {}]   ;;  %s210_s1 = inlined_call_operand.vmem [shape: f32[1,256], index: 1, kind: input, shape index: {}]   ;;  %s211_s2 = inlined_call_operand.vmem [shape: f32[1,256], index: 2, kind: input, shape index: {}]   ;;  %s212_s3 = inlined_call_operand.vmem [shape: bf16[32,256], index: 3, kind: output, shape index: {}]  }
   0x1   :  { %v55_v2 = vld [vmem:[%s210_s1] sm:$0x3]  ;;  %v24_v5 = vld [vmem:[%s209_s0 + $0x8] sm:$0xff] }
   0x2   :  { %v58_v1 = vshrl.u32 %v57_v0, 7  ;;  %v75_v3 = vld [vmem:[%s211_s2] sm:$0x3]  ;;  %v28_v9 = vld [vmem:[%s209_s0 + $0x28] sm:$0xff] }
   0x3   :  { %v22_v4 = vld [vmem:[%s209_s0] sm:$0xff]  ;;  %v32_v15 = vld [vmem:[%s209_s0 + $0x48] sm:$0xff] }
   0x4   :  { %v59_v6 = vsub.s32 0, %v58_v1  ;;  %v63_v7 = vsub.s32 1, %v58_v1  ;;  %v26_v8 = vld [vmem:[%s209_s0 + $0x20] sm:$0xff]  ;;  %v36_v17 = vld [vmem:[%s209_s0 + $0x68] sm:$0xff] }
   0x5   :  { %v30_v10 = vld [vmem:[%s209_s0 + $0x40] sm:$0xff] }
   0x6   :  { %v60_v11 = vrot.slane %v55_v2, %v59_v6  ;;  %v64_v12 = vrot.slane %v55_v2, %v63_v7  ;;  %v80_v13 = vrot.slane %v75_v3, %v59_v6  ;;  %v84_v14 = vrot.slane %v75_v3, %v63_v7  ;;  %v34_v16 = vld [vmem:[%s209_s0 + $0x60] sm:$0xff] }
   0x8   :  { %v67_v18 = vmul.f32 %v60_v11, %v22_v4  ;;  %v68_v19 = vmul.f32 %v64_v12, %v24_v5  ;;  %v69_v20 = vmul.f32 %v60_v11, %v26_v8  ;;  %v70_v21 = vmul.f32 %v64_v12, %v28_v9 }
   0x9   :  { %v71_v22 = vmul.f32 %v60_v11, %v30_v10  ;;  %v72_v23 = vmul.f32 %v64_v12, %v32_v15  ;;  %v73_v24 = vmul.f32 %v60_v11, %v34_v16  ;;  %v74_v25 = vmul.f32 %v64_v12, %v36_v17 }
   0xa   :  { %v87_v26 = vadd.f32 %v80_v13, %v67_v18  ;;  %v88_v27 = vadd.f32 %v84_v14, %v68_v19  ;;  %v89_v28 = vadd.f32 %v80_v13, %v69_v20  ;;  %v90_v29 = vadd.f32 %v84_v14, %v70_v21 }
   0xb   :  { %v91_v30 = vadd.f32 %v80_v13, %v71_v22  ;;  %v92_v31 = vadd.f32 %v84_v14, %v72_v23  ;;  %v93_v32 = vadd.f32 %v80_v13, %v73_v24  ;;  %v94_v33 = vadd.f32 %v84_v14, %v74_v25 }
   0xc   :  { %v95_v34 = vmax.f32 %v87_v26, 0.0  ;;  %v96_v35 = vmax.f32 %v88_v27, 0.0  ;;  %v97_v36 = vmax.f32 %v89_v28, 0.0  ;;  %v98_v37 = vmax.f32 %v90_v29, 0.0 }
   0xd   :  { %v99_v38 = vmax.f32 %v91_v30, 0.0  ;;  %v100_v39 = vmax.f32 %v92_v31, 0.0  ;;  %v101_v40 = vmax.f32 %v93_v32, 0.0  ;;  %v102_v41 = vmax.f32 %v94_v33, 0.0 }
   0xe   :  { %v143_v42 = vpack.c.bf16 %v96_v35, %v95_v34  ;;  %v144_v43 = vpack.c.bf16 %v98_v37, %v97_v36 }
   0xf   :  { %v145_v44 = vpack.c.bf16 %v100_v39, %v99_v38  ;;  %v146_v45 = vpack.c.bf16 %v102_v41, %v101_v40 }
  0x10   :  { %127 = vst [vmem:[%s212_s3] sm:$0xff] %v143_v42  ;;  %128 = vst [vmem:[%s212_s3 + $0x8] sm:$0xff] %v144_v43 }
  0x11   :  { %129 = vst [vmem:[%s212_s3 + $0x10] sm:$0xff] %v145_v44  ;;  %130 = vst [vmem:[%s212_s3 + $0x18] sm:$0xff] %v146_v45 }

// kernel: densenet121_forward.208
= control target key start
LH: loop header
LB: loop body
LE: loop exit
PB: predicated region body
PF: predicated region fallthrough
CT: control target
= control target key end

     0   :  { %s500_s1 = inlined_call_operand.vmem [shape: bf16[256,128], index: 1, kind: input, shape index: {}]   ;;  %s501_s0 = inlined_call_operand.vmem [shape: bf16[32,256], index: 0, kind: input, shape index: {}]   ;;  %s502_s2 = inlined_call_operand.vmem [shape: f32[1,128], index: 2, kind: input, shape index: {}]   ;;  %s503_s3 = inlined_call_operand.vmem [shape: f32[1,128], index: 3, kind: input, shape index: {}]   ;;  %s504_s4 = inlined_call_operand.vmem [shape: bf16[32,128], index: 4, kind: output, shape index: {}]  }
   0x1   :  { %v381_v0 = vld [vmem:[%s500_s1 + $0x40] sm:$0xff]   ;;  %v383_v2 = vld [vmem:[%s500_s1 + $0x48] sm:$0xff]   ;;  %v385_v4 = vld [vmem:[%s500_s1 + $0x50] sm:$0xff]  }
   0x2   :  { %v382_v1 = vld [vmem:[%s500_s1] sm:$0xff]   ;;  %337 = vmatprep.subr.bf16.mxu0 %v381_v0  ;;  %365 = vmatprep.subr.bf16.mxu1 %v381_v0  ;;  %v384_v3 = vld [vmem:[%s500_s1 + $0x8] sm:$0xff]   ;;  %v386_v5 = vld [vmem:[%s500_s1 + $0x10] sm:$0xff]  }
   0x3   :  { %338 = vmatpush3.bf16.msra.mxu0 %v382_v1  ;;  %373 = vmatpush3.bf16.msra.mxu1 %v382_v1  ;;  %v387_v6 = vld [vmem:[%s500_s1 + $0x58] sm:$0xff]   ;;  %v389_v8 = vld [vmem:[%s500_s1 + $0x60] sm:$0xff]   ;;  %v391_v10 = vld [vmem:[%s500_s1 + $0x68] sm:$0xff]  }
   0x4   :  { %339 = vmatprep.subr.bf16.mxu0 %v383_v2  ;;  %366 = vmatprep.subr.bf16.mxu1 %v383_v2  ;;  %v388_v7 = vld [vmem:[%s500_s1 + $0x18] sm:$0xff]   ;;  %v390_v9 = vld [vmem:[%s500_s1 + $0x20] sm:$0xff]   ;;  %v392_v13 = vld [vmem:[%s500_s1 + $0x28] sm:$0xff]  }
   0x5   :  { %v399_v11 = vld [vmem:[%s501_s0 + $0x4] ss:$8 sps:$4 sm:$0xff]   ;;  %v402_v12 = vld [vmem:[%s501_s0 + $0x14] ss:$8 sps:$4 sm:$0xff]   ;;  %v397_v18 = vld [vmem:[%s501_s0] ss:$8 sps:$4 sm:$0xff]  }
   0x6   :  { %v393_v14 = vld [vmem:[%s500_s1 + $0x70] sm:$0xff]   ;;  %214 = vmatprep.mubr.bf16.mxu0 %v399_v11  ;;  %222 = vmatprep.mubr.bf16.mxu1 %v402_v12  ;;  %v395_v16 = vld [vmem:[%s500_s1 + $0x78] sm:$0xff]   ;;  %v316_v23 = vld [vmem:[%s502_s2] ss:$0 sm:$0xff] }
   0x7   :  { %340 = vmatpush3.bf16.msra.mxu0 %v384_v3  ;;  %374 = vmatpush3.bf16.msra.mxu1 %v384_v3  ;;  %v394_v15 = vld [vmem:[%s500_s1 + $0x30] sm:$0xff]   ;;  %v396_v17 = vld [vmem:[%s500_s1 + $0x38] sm:$0xff]   ;;  %v317_v29 = vld [vmem:[%s503_s3] ss:$0 sm:$0xff] }
   0x8   :  { %341 = vmatprep.subr.bf16.mxu0 %v385_v4  ;;  %367 = vmatprep.subr.bf16.mxu1 %v385_v4  ;;  %v400_v19 = vld [vmem:[%s501_s0 + $0x10] ss:$8 sps:$4 sm:$0xff]  }
   0xb   :  { %342 = vmatpush3.bf16.msra.mxu0 %v386_v5  ;;  %375 = vmatpush3.bf16.msra.mxu1 %v386_v5 }
   0xc   :  { %343 = vmatprep.subr.bf16.mxu0 %v387_v6  ;;  %368 = vmatprep.subr.bf16.mxu1 %v387_v6 }
   0xf   :  { %344 = vmatpush3.bf16.msra.mxu0 %v388_v7  ;;  %376 = vmatpush3.bf16.msra.mxu1 %v388_v7 }
  0x10   :  { %345 = vmatprep.subr.bf16.mxu0 %v389_v8  ;;  %369 = vmatprep.subr.bf16.mxu1 %v389_v8 }
  0x13   :  { %346 = vmatpush3.bf16.msra.mxu0 %v390_v9  ;;  %377 = vmatpush3.bf16.msra.mxu1 %v390_v9 }
  0x14   :  { %347 = vmatprep.subr.bf16.mxu0 %v391_v10  ;;  %370 = vmatprep.subr.bf16.mxu1 %v391_v10 }
  0x17   :  { %348 = vmatpush3.bf16.msra.mxu0 %v392_v13  ;;  %378 = vmatpush3.bf16.msra.mxu1 %v392_v13 }
  0x18   :  { %349 = vmatprep.subr.bf16.mxu0 %v393_v14  ;;  %371 = vmatprep.subr.bf16.mxu1 %v393_v14 }
  0x1b   :  { %350 = vmatpush3.bf16.msra.mxu0 %v394_v15  ;;  %379 = vmatpush3.bf16.msra.mxu1 %v394_v15 }
  0x1c   :  { %351 = vmatprep.subr.bf16.mxu0 %v395_v16  ;;  %372 = vmatprep.subr.bf16.mxu1 %v395_v16 }
  0x1f   :  { %352 = vmatpush3.bf16.msra.mxu0 %v396_v17  ;;  %380 = vmatpush3.bf16.msra.mxu1 %v396_v17 }
  0x22   :  { %215 = vmatmul.mubr.bf16.vlgmr.msra.gmra.mrb[0].mxu0 %v397_v18  ;;  %223 = vmatmul.mubr.bf16.vlgmr.msra.gmra.mrb[0].mxu1 %v400_v19 }
  0xf5   :  { %v353_v20 = vpop.f32.mrb[0].mxu0  ;;  %v359_v21 = vpop.f32.mrb[0].mxu1 }
  0xf6   :  { %v354_v22 = vpop.f32.mrb[1].mxu0  ;;  %v360_v24 = vpop.f32.mrb[1].mxu1 }
  0xf7   :  { %v355_v25 = vadd.f32 %v354_v22, %v353_v20  ;;  %v361_v26 = vadd.f32 %v360_v24, %v359_v21  ;;  %v356_v27 = vpop.f32.mrb[2].mxu0  ;;  %v362_v28 = vpop.f32.mrb[2].mxu1 }
  0xf8   :  { %v357_v30 = vpop.f32.mrb[3].mxu0  ;;  %v363_v31 = vpop.f32.mrb[3].mxu1 }
  0xf9   :  { %v253_v32 = vmul.f32 %v355_v25, %v316_v23  ;;  %v255_v33 = vmul.f32 %v361_v26, %v316_v23  ;;  %v358_v34 = vadd.f32 %v357_v30, %v356_v27  ;;  %v364_v35 = vadd.f32 %v363_v31, %v362_v28 }
  0xfb   :  { %v264_v36 = vadd.f32 %v317_v29, %v253_v32  ;;  %v266_v37 = vadd.f32 %v317_v29, %v255_v33  ;;  %v254_v38 = vmul.f32 %v358_v34, %v316_v23  ;;  %v256_v39 = vmul.f32 %v364_v35, %v316_v23 }
  0xfd   :  { %v265_v40 = vadd.f32 %v317_v29, %v254_v38  ;;  %v267_v41 = vadd.f32 %v317_v29, %v256_v39  ;;  %v268_v42 = vmax.f32 %v264_v36, 0.0  ;;  %v270_v43 = vmax.f32 %v266_v37, 0.0 }
  0xff   :  { %v269_v44 = vmax.f32 %v265_v40, 0.0  ;;  %v271_v45 = vmax.f32 %v267_v41, 0.0 }
 0x101   :  { %v329_v46 = vpack.c.bf16 %v269_v44, %v268_v42  ;;  %v334_v47 = vpack.c.bf16 %v271_v45, %v270_v43 }
 0x103   :  { %330 = vst [vmem:[%s504_s4] sm:$0xff] %v329_v46   ;;  %336 = vst [vmem:[%s504_s4 + $0x8] sm:$0xff] %v334_v47  }

// kernel: densenet121_forward.219
= control target key start
LH: loop header
LB: loop body
LE: loop exit
PB: predicated region body
PF: predicated region fallthrough
CT: control target
= control target key end

     0   :  { %v69_v0 = vlaneseq  ;;  %s295_s0 = inlined_call_operand.vmem [shape: f32[32,512], index: 0, kind: input, shape index: {}]   ;;  %s296_s1 = inlined_call_operand.vmem [shape: f32[1,384], index: 1, kind: input, shape index: {}]   ;;  %s297_s2 = inlined_call_operand.vmem [shape: f32[1,384], index: 2, kind: input, shape index: {}]   ;;  %s298_s3 = inlined_call_operand.vmem [shape: bf16[32,384], index: 3, kind: output, shape index: {}]  }
   0x1   :  { %v67_v2 = vld [vmem:[%s296_s1] sm:$0x7]  ;;  %v24_v5 = vld [vmem:[%s295_s0 + $0x8] sm:$0xff]  ;;  %v26_v9 = vld [vmem:[%s295_s0 + $0x10] sm:$0xff] }
   0x2   :  { %v70_v1 = vshrl.u32 %v69_v0, 7  ;;  %v96_v3 = vld [vmem:[%s297_s2] sm:$0x7]  ;;  %v30_v11 = vld [vmem:[%s295_s0 + $0x28] sm:$0xff]  ;;  %v32_v16 = vld [vmem:[%s295_s0 + $0x30] sm:$0xff] }
   0x3   :  { %v22_v4 = vld [vmem:[%s295_s0] sm:$0xff]  ;;  %v36_v18 = vld [vmem:[%s295_s0 + $0x48] sm:$0xff]  ;;  %v38_v37 = vld [vmem:[%s295_s0 + $0x50] sm:$0xff] }
   0x4   :  { %v71_v6 = vsub.s32 0, %v70_v1  ;;  %v75_v7 = vsub.s32 1, %v70_v1  ;;  %v79_v8 = vsub.s32 2, %v70_v1  ;;  %v28_v10 = vld [vmem:[%s295_s0 + $0x20] sm:$0xff]  ;;  %v42_v43 = vld [vmem:[%s295_s0 + $0x68] sm:$0xff]  ;;  %v44_v48 = vld [vmem:[%s295_s0 + $0x70] sm:$0xff] }
   0x5   :  { %v34_v17 = vld [vmem:[%s295_s0 + $0x40] sm:$0xff] }
   0x6   :  { %v72_v12 = vrot.slane %v67_v2, %v71_v6  ;;  %v76_v13 = vrot.slane %v67_v2, %v75_v7  ;;  %v101_v14 = vrot.slane %v96_v3, %v71_v6  ;;  %v105_v15 = vrot.slane %v96_v3, %v75_v7  ;;  %v40_v38 = vld [vmem:[%s295_s0 + $0x60] sm:$0xff] }
   0x7   :  { %v80_v19 = vrot.slane %v67_v2, %v79_v8  ;;  %v109_v20 = vrot.slane %v96_v3, %v79_v8 }
   0x8   :  { %v84_v21 = vmul.f32 %v72_v12, %v22_v4  ;;  %v85_v22 = vmul.f32 %v76_v13, %v24_v5  ;;  %v87_v23 = vmul.f32 %v72_v12, %v28_v10  ;;  %v88_v24 = vmul.f32 %v76_v13, %v30_v11 }
   0x9   :  { %v86_v25 = vmul.f32 %v80_v19, %v26_v9  ;;  %v89_v26 = vmul.f32 %v80_v19, %v32_v16  ;;  %v90_v27 = vmul.f32 %v72_v12, %v34_v17  ;;  %v91_v28 = vmul.f32 %v76_v13, %v36_v18 }
   0xa   :  { %v113_v29 = vadd.f32 %v101_v14, %v84_v21  ;;  %v114_v30 = vadd.f32 %v105_v15, %v85_v22  ;;  %v116_v31 = vadd.f32 %v101_v14, %v87_v23  ;;  %v117_v32 = vadd.f32 %v105_v15, %v88_v24 }
   0xb   :  { %v115_v33 = vadd.f32 %v109_v20, %v86_v25  ;;  %v118_v34 = vadd.f32 %v109_v20, %v89_v26  ;;  %v119_v35 = vadd.f32 %v101_v14, %v90_v27  ;;  %v120_v36 = vadd.f32 %v105_v15, %v91_v28 }
   0xc   :  { %v125_v39 = vmax.f32 %v113_v29, 0.0  ;;  %v126_v40 = vmax.f32 %v114_v30, 0.0  ;;  %v128_v41 = vmax.f32 %v116_v31, 0.0  ;;  %v129_v42 = vmax.f32 %v117_v32, 0.0 }
   0xd   :  { %v127_v44 = vmax.f32 %v115_v33, 0.0  ;;  %v130_v45 = vmax.f32 %v118_v34, 0.0  ;;  %v131_v46 = vmax.f32 %v119_v35, 0.0  ;;  %v132_v47 = vmax.f32 %v120_v36, 0.0 }
   0xe   :  { %v201_v49 = vpack.c.bf16 %v126_v40, %v125_v39  ;;  %v203_v50 = vpack.c.bf16 %v129_v42, %v128_v41  ;;  %v92_v51 = vmul.f32 %v80_v19, %v38_v37  ;;  %v93_v52 = vmul.f32 %v72_v12, %v40_v38 }
   0xf   :  { %v202_v53 = vpack.c.bf16 %v127_v44, %v127_v44  ;;  %v204_v54 = vpack.c.bf16 %v130_v45, %v130_v45  ;;  %v205_v55 = vpack.c.bf16 %v132_v47, %v131_v46  ;;  %v94_v56 = vmul.f32 %v76_v13, %v42_v43 }
  0x10   :  { %177 = vst [vmem:[%s298_s3] sm:$0xff] %v201_v49  ;;  %179 = vst [vmem:[%s298_s3 + $0xc] sm:$0xff] %v203_v50  ;;  %v121_v57 = vadd.f32 %v109_v20, %v92_v51  ;;  %v122_v58 = vadd.f32 %v101_v14, %v93_v52  ;;  %v95_v59 = vmul.f32 %v80_v19, %v44_v48 }
  0x11   :  { %178 = vst [vmem:[%s298_s3 + $0x8] sm:$0xf] %v202_v53  ;;  %180 = vst [vmem:[%s298_s3 + $0x14] sm:$0xf] %v204_v54  ;;  %v123_v60 = vadd.f32 %v105_v15, %v94_v56 }
  0x12   :  { %181 = vst [vmem:[%s298_s3 + $0x18] sm:$0xff] %v205_v55  ;;  %v133_v61 = vmax.f32 %v121_v57, 0.0  ;;  %v134_v62 = vmax.f32 %v122_v58, 0.0  ;;  %v124_v63 = vadd.f32 %v109_v20, %v95_v59 }
  0x13   :  { %v135_v0 = vmax.f32 %v123_v60, 0.0 }
  0x14   :  { %v206_v1 = vpack.c.bf16 %v133_v61, %v133_v61  ;;  %v136_v2 = vmax.f32 %v124_v63, 0.0 }
  0x15   :  { %v207_v3 = vpack.c.bf16 %v135_v0, %v134_v62 }
  0x16   :  { %182 = vst [vmem:[%s298_s3 + $0x20] sm:$0xf] %v206_v1  ;;  %v208_v4 = vpack.c.bf16 %v136_v2, %v136_v2 }
  0x17   :  { %183 = vst [vmem:[%s298_s3 + $0x24] sm:$0xff] %v207_v3 }
  0x18   :  { %184 = vst [vmem:[%s298_s3 + $0x2c] sm:$0xf] %v208_v4 }

// kernel: densenet121_forward.220
= control target key start
LH: loop header
LB: loop body
LE: loop exit
PB: predicated region body
PF: predicated region fallthrough
CT: control target
= control target key end

     0   :  { %s867_s15 = smov 0   ;;  %s869_s16 = smov 0   ;;  %s963_s0 = inlined_call_operand.vmem [shape: bf16[32,384], index: 0, kind: input, shape index: {}]   ;;  %s964_s1 = inlined_call_operand.vmem [shape: bf16[384,128], index: 1, kind: input, shape index: {}]   ;;  %s965_s2 = inlined_call_operand.vmem [shape: f32[1,128], index: 2, kind: input, shape index: {}]   ;;  %s966_s3 = inlined_call_operand.vmem [shape: f32[1,128], index: 3, kind: input, shape index: {}]   ;;  %s967_s4 = inlined_call_operand.vmem [shape: bf16[32,128], index: 4, kind: output, shape index: {}]  }
   0x1   :  { %s871_s17 = smov 0   ;;  %s873_s18 = smov 0  }
   0x2   :  { %s875_s19 = smov 0  }
   0x3 LB: > { %s26_s20 = sadd.s32 1, %s835_s18  ;;  %p49_p1 = scmp.ne.s32.totalorder %s827_s16, %s823_s15  ;;  %s839_s19 = sphi %s875_s19, %s14_s19   ;;  %s835_s18 = sphi %s873_s18, %s971_s18   ;;  %s831_s17 = sphi %s871_s17, %s970_s17   ;;  %s827_s16 = sphi %s869_s16, %s969_s16   ;;  %s823_s15 = sphi %s867_s15, %s968_s15  }
   0x4   : > { %p27_p0 = scmp.ge.s32.totalorder %s26_s20, 3  ;;  %p50_p2 = scmp.eq.s32.totalorder %s839_s19, 0 }
   0x5   : > { %s42_s22 = sadd.s32 1, %s827_s16  ;;  %p676_p5 = scmp.ge.s32.totalorder %s839_s19, 3 }
   0x6   : > { %s973_s20 = smov (%p27_p0, %s26_s20), 0  ;;  %p51_p3 = por %p50_p2, %p49_p1 }
   0x7   : > { %s38_s21 = ssub.s32 %s835_s18, %s973_s20  ;;  %195 = sbr.rel (%p676_p5) target bundleno = 21 (0x15), region = 24 }
   0x8   : > { %p40_p4 = scmp.eq.s32.totalorder %s38_s21, 0 }
   0xa   : > { %s902_s23 = scalar_select %p40_p4, %s827_s16, %s42_s22  }
   0xe   : > { %198 = sbr.rel (!%p51_p3) target bundleno = 21 (0x15), region = 28  ;;  %s200_s24 = sand.u32 (%p51_p3), 1, %s827_s16  }
   0xf   : > { %s678_s25 = sshll.u32 (%p51_p3), %s835_s18, 2  ;;  %s677_s26 = sshll.u32 (%p51_p3), %s200_s24, 4 }
  0x10   : > { %s207_s29 = scalar_lea.vmem (%p51_p3), %s963_s0, %s678_s25  ;;  %s202_s30 = scalar_lea.vmem (%p51_p3), [#allocation3], %s677_s26 }
  0x11   : > { %v223_v0 = vld [vmem:[%s207_s29] sm:$0xf] (%p51_p3)  ;;  %v225_v1 = vld [vmem:[%s207_s29 + $0xc] sm:$0xf] (%p51_p3)  ;;  %v227_v2 = vld [vmem:[%s207_s29 + $0x18] sm:$0xf] (%p51_p3) }
  0x12   : > { %224 = vst [vmem:[%s202_s30] sm:$0xf] (%p51_p3), %v223_v0  ;;  %226 = vst [vmem:[%s202_s30 + $0x4] sm:$0xf] (%p51_p3), %v225_v1  ;;  %v229_v3 = vld [vmem:[%s207_s29 + $0x24] sm:$0xf] (%p51_p3) }
  0x13   : > { %228 = vst [vmem:[%s202_s30 + $0x8] sm:$0xf] (%p51_p3), %v227_v2  ;;  %230 = vst [vmem:[%s202_s30 + $0xc] sm:$0xf] (%p51_p3), %v229_v3 }
  0x15 PF: > { %p679_p6 = scmp.ge.s32.totalorder %s839_s19, 1  ;;  %p272_p7 = scmp.lt.s32.totalorder %s839_s19, 4 }
  0x17   : > { %p273_p8 = pnand %p679_p6, %p272_p7 }
  0x18   : > { %s279_s5 = sand.u32 (!%p273_p8), 1, %s823_s15   ;;  %s681_s6 = sshll.u32 (!%p273_p8), %s831_s17, 4 }
  0x19   : > { %276 = sbr.rel (%p273_p8) target bundleno = 306 (0x132), region = 73  ;;  %s914_s7 = sshll.u32 (!%p273_p8), %s279_s5, 4 }
  0x1a   : > { %p323_p9 = scmp.lt.s32.totalorder (!%p273_p8), %s681_s6, 47  ;;  %s281_s12 = scalar_lea.vmem (!%p273_p8), [#allocation3], %s914_s7 }
  0x1b   : > { %p683_p10 = scmp.ne.s32.totalorder (!%p273_p8), %s831_s17, 0 }
  0x20   : > { %s975_s6 = smov (!%p323_p9, %s681_s6), 47  ;;  %350 = sbr.rel (%p683_p10) target bundleno = 39 (0x27), region = 81 }
  0x21   : > { %s682_s8 = sshll.u32 %s975_s6, 2  ;;  %v841_v4 = vmov (!%p683_p10), 0.0  }
  0x22   : > { %s919_s11 = scalar_lea.vmem %s964_s1, %s682_s8  ;;  %351 = vst [vmem:[#allocation2] sm:$0xff] (!%p683_p10), %v841_v4  ;;  %352 = vst [vmem:[#allocation2 + $0x8] sm:$0xff] (!%p683_p10), %v841_v4 }
  0x23   : > { %353 = vst [vmem:[#allocation2 + $0x10] sm:$0xff] (!%p683_p10), %v841_v4  ;;  %354 = vst [vmem:[#allocation2 + $0x18] sm:$0xff] (!%p683_p10), %v841_v4 }
  0x27 PF: > { %v791_v5 = vld [vmem:[%s919_s11] sm:$0xff]   ;;  %v792_v6 = vld [vmem:[%s919_s11 + $0x8] sm:$0xff]   ;;  %v793_v7 = vld [vmem:[%s919_s11 + $0x10] sm:$0xff]   ;;  %p694_p11 = scmp.ne.s32.totalorder %s831_s17, 2 }
  0x28   : > { %730 = vmatprep.subr.bf16.mxu0 %v791_v5  ;;  %v794_v8 = vld [vmem:[%s919_s11 + $0x18] sm:$0xff]   ;;  %v799_v9 = vld [vmem:[%s281_s12] sm:$0xff]   ;;  %v796_v11 = vld [vmem:[%s919_s11 + $0x28] sm:$0xff]  }
  0x29   : > { %731 = vmatpush3.bf16.msra.mxu0 %v791_v5  ;;  %746 = vmatprep.mubr.bf16.mxu0 %v799_v9  ;;  %v795_v10 = vld [vmem:[%s919_s11 + $0x20] sm:$0xff]   ;;  %v797_v12 = vld [vmem:[%s919_s11 + $0x30] sm:$0xff]   ;;  %v798_v13 = vld [vmem:[%s919_s11 + $0x38] sm:$0xff]  }
  0x2a   : > { %732 = vmatprep.subr.bf16.mxu0 %v792_v6  ;;  %v800_v14 = vld [vmem:[%s281_s12 + $0x8] sm:$0xff]   ;;  %v357_v15 = vld [vmem:[#allocation2 + $0x10] sm:$0xff]  ;;  %v355_v16 = vld [vmem:[#allocation2] sm:$0xff] }
  0x2b   : > { %v358_v18 = vld [vmem:[#allocation2 + $0x18] sm:$0xff]  ;;  %v356_v21 = vld [vmem:[#allocation2 + $0x8] sm:$0xff]  ;;  %v695_v29 = vld [vmem:[%s965_s2] ss:$0 sm:$0xff] (!%p694_p11) }
  0x2c   : > { %v696_v32 = vld [vmem:[%s966_s3] ss:$0 sm:$0xff] (!%p694_p11) }
  0x2d   : > { %733 = vmatpush3.bf16.msra.mxu0 %v792_v6 }
  0x2e   : > { %734 = vmatprep.subr.bf16.mxu0 %v793_v7 }
  0x31   : > { %735 = vmatpush3.bf16.msra.mxu0 %v793_v7 }
  0x32   : > { %736 = vmatprep.subr.bf16.mxu0 %v794_v8 }
  0x35   : > { %737 = vmatpush3.bf16.msra.mxu0 %v794_v8 }
  0x36   : > { %738 = vmatprep.subr.bf16.mxu0 %v795_v10 }
  0x39   : > { %739 = vmatpush3.bf16.msra.mxu0 %v795_v10 }
  0x3a   : > { %740 = vmatprep.subr.bf16.mxu0 %v796_v11 }
  0x3d   : > { %741 = vmatpush3.bf16.msra.mxu0 %v796_v11 }
  0x3e   : > { %742 = vmatprep.subr.bf16.mxu0 %v797_v12 }
  0x41   : > { %743 = vmatpush3.bf16.msra.mxu0 %v797_v12 }
  0x42   : > { %744 = vmatprep.subr.bf16.mxu0 %v798_v13 }
  0x45   : > { %745 = vmatpush3.bf16.msra.mxu0 %v798_v13 }
  0x48   : > { %747 = vmatmul.mubr.bf16.vlgmr.msra.gmra.mrb[0].mxu0 %v800_v14 }
 0x11b   : > { %v748_v17 = vpop.f32.mrb[0].mxu0  ;;  %499 = sbr.rel (%p694_p11) target bundleno = 306 (0x132), region = 85 }
 0x11c   : > { %v490_v19 = vadd.f32 %v748_v17, %v357_v15  ;;  %v473_v20 = vpop.f32.mrb[1].mxu0 }
 0x11d   : > { %v488_v22 = vadd.f32 %v473_v20, %v355_v16  ;;  %v749_v23 = vpop.f32.mrb[2].mxu0 }
 0x11e   : > { %494 = vst [vmem:[#allocation2 + $0x10] sm:$0xff] %v490_v19  ;;  %v491_v24 = vadd.f32 %v749_v23, %v358_v18  ;;  %v476_v25 = vpop.f32.mrb[3].mxu0 }
 0x11f   : > { %492 = vst [vmem:[#allocation2] sm:$0xff] %v488_v22  ;;  %v489_v26 = vadd.f32 %v476_v25, %v356_v21 }
 0x120   : > { %495 = vst [vmem:[#allocation2 + $0x18] sm:$0xff] %v491_v24 }
 0x121   : > { %493 = vst [vmem:[#allocation2 + $0x8] sm:$0xff] %v489_v26 }
 0x125   : > { %v502_v33 = vld [vmem:[#allocation2 + $0x10] sm:$0xff] }
 0x126   : > { %v500_v27 = vld [vmem:[#allocation2] sm:$0xff]  ;;  %v513_v35 = vmul.f32 %v695_v29, %v502_v33 }
 0x127   : > { %v511_v30 = vmul.f32 %v695_v29, %v500_v27  ;;  %v503_v34 = vld [vmem:[#allocation2 + $0x18] sm:$0xff] }
 0x128   : > { %v501_v28 = vld [vmem:[#allocation2 + $0x8] sm:$0xff]  ;;  %v514_v36 = vmul.f32 %v695_v29, %v503_v34  ;;  %v524_v39 = vadd.f32 %v696_v32, %v513_v35 }
 0x129   : > { %v512_v31 = vmul.f32 %v695_v29, %v501_v28  ;;  %v522_v37 = vadd.f32 %v696_v32, %v511_v30 }
 0x12a   : > { %v525_v40 = vadd.f32 %v696_v32, %v514_v36  ;;  %v528_v43 = vmax.f32 %v524_v39, 0.0 }
 0x12b   : > { %v523_v38 = vadd.f32 %v696_v32, %v512_v31  ;;  %v526_v41 = vmax.f32 %v522_v37, 0.0 }
 0x12c   : > { %v529_v44 = vmax.f32 %v525_v40, 0.0 }
 0x12d   : > { %v527_v42 = vmax.f32 %v523_v38, 0.0 }
 0x12e   : > { %v717_v46 = vpack.c.bf16 %v529_v44, %v528_v43 }
 0x12f   : > { %v712_v45 = vpack.c.bf16 %v527_v42, %v526_v41 }
 0x130   : > { %719 = vst [vmem:[%s967_s4 + $0x8] sm:$0xff] %v717_v46  }
 0x131   : > { %713 = vst [vmem:[%s967_s4] sm:$0xff] %v712_v45  }
 0x132 PF: > { %s14_s19 = sadd.s32 1, %s839_s19   ;;  %s968_s15 = smov %s827_s16 }
 0x133   : > { %p11_p12 = scmp.ge.s32.totalorder %s14_s19, 5   ;;  %s969_s16 = smov %s902_s23 }
 0x134   : > { %s970_s17 = smov %s835_s18  ;;  %s971_s18 = smov %s973_s20 }
 0x135   :  { %13 = sbr.rel (!%p11_p12) target bundleno = 3 (0x3), region = 129 }

// kernel: densenet121_forward.231
= control target key start
LH: loop header
LB: loop body
LE: loop exit
PB: predicated region body
PF: predicated region fallthrough
CT: control target
= control target key end

     0   :  { %v32_v0 = vlaneseq  ;;  %s308_s1 = inlined_call_operand.vmem [shape: f32[1,512], index: 1, kind: input, shape index: {}]   ;;  %s309_s2 = inlined_call_operand.vmem [shape: f32[1,512], index: 2, kind: input, shape index: {}]   ;;  %s310_s0 = inlined_call_operand.vmem [shape: f32[32,512], index: 0, kind: input, shape index: {}]   ;;  %s311_s3 = inlined_call_operand.vmem [shape: bf16[32,512], index: 3, kind: output, shape index: {}]  }
   0x1   :  { %v30_v2 = vld [vmem:[%s308_s1] sm:$0xf]  ;;  %v15_v5 = vld [vmem:[%s310_s0 + $0x8] sm:$0xff]  ;;  %v16_v10 = vld [vmem:[%s310_s0 + $0x10] sm:$0xff] }
   0x2   :  { %v33_v1 = vshrl.u32 %v32_v0, 7  ;;  %v68_v3 = vld [vmem:[%s309_s2] sm:$0xf]  ;;  %v19_v12 = vld [vmem:[%s310_s0 + $0x28] sm:$0xff]  ;;  %v17_v17 = vld [vmem:[%s310_s0 + $0x18] sm:$0xff] }
   0x3   :  { %v14_v4 = vld [vmem:[%s310_s0] sm:$0xff]  ;;  %v20_v18 = vld [vmem:[%s310_s0 + $0x30] sm:$0xff]  ;;  %v21_v19 = vld [vmem:[%s310_s0 + $0x38] sm:$0xff] }
   0x4   :  { %v34_v6 = vsub.s32 0, %v33_v1  ;;  %v38_v7 = vsub.s32 1, %v33_v1  ;;  %v42_v8 = vsub.s32 2, %v33_v1  ;;  %v46_v9 = vsub.s32 3, %v33_v1  ;;  %v18_v11 = vld [vmem:[%s310_s0 + $0x20] sm:$0xff]  ;;  %v23_v41 = vld [vmem:[%s310_s0 + $0x48] sm:$0xff] }
   0x5   :  { %v22_v40 = vld [vmem:[%s310_s0 + $0x40] sm:$0xff]  ;;  %v24_v46 = vld [vmem:[%s310_s0 + $0x50] sm:$0xff]  ;;  %v25_v47 = vld [vmem:[%s310_s0 + $0x58] sm:$0xff] }
   0x6   :  { %v35_v13 = vrot.slane %v30_v2, %v34_v6  ;;  %v39_v14 = vrot.slane %v30_v2, %v38_v7  ;;  %v239_v15 = vrot.slane %v68_v3, %v34_v6  ;;  %v241_v16 = vrot.slane %v68_v3, %v38_v7  ;;  %v26_v52 = vld [vmem:[%s310_s0 + $0x60] sm:$0xff]  ;;  %v27_v53 = vld [vmem:[%s310_s0 + $0x68] sm:$0xff]  ;;  %v28_v58 = vld [vmem:[%s310_s0 + $0x70] sm:$0xff] }
   0x7   :  { %v43_v20 = vrot.slane %v30_v2, %v42_v8  ;;  %v47_v21 = vrot.slane %v30_v2, %v46_v9  ;;  %v81_v22 = vrot.slane %v68_v3, %v42_v8  ;;  %v85_v23 = vrot.slane %v68_v3, %v46_v9  ;;  %v29_v59 = vld [vmem:[%s310_s0 + $0x78] sm:$0xff] }
   0x8   :  { %v52_v24 = vmul.f32 %v35_v13, %v14_v4  ;;  %v53_v25 = vmul.f32 %v39_v14, %v15_v5  ;;  %v56_v26 = vmul.f32 %v35_v13, %v18_v11  ;;  %v57_v27 = vmul.f32 %v39_v14, %v19_v12 }
   0x9   :  { %v54_v28 = vmul.f32 %v43_v20, %v16_v10  ;;  %v55_v29 = vmul.f32 %v47_v21, %v17_v17  ;;  %v58_v30 = vmul.f32 %v43_v20, %v20_v18  ;;  %v59_v31 = vmul.f32 %v47_v21, %v21_v19 }
   0xa   :  { %v90_v32 = vadd.f32 %v239_v15, %v52_v24  ;;  %v91_v33 = vadd.f32 %v241_v16, %v53_v25  ;;  %v94_v34 = vadd.f32 %v239_v15, %v56_v26  ;;  %v95_v35 = vadd.f32 %v241_v16, %v57_v27 }
   0xb   :  { %v92_v36 = vadd.f32 %v81_v22, %v54_v28  ;;  %v93_v37 = vadd.f32 %v85_v23, %v55_v29  ;;  %v96_v38 = vadd.f32 %v81_v22, %v58_v30  ;;  %v97_v39 = vadd.f32 %v85_v23, %v59_v31 }
   0xc   :  { %v106_v42 = vmax.f32 %v90_v32, 0.0  ;;  %v107_v43 = vmax.f32 %v91_v33, 0.0  ;;  %v110_v44 = vmax.f32 %v94_v34, 0.0  ;;  %v111_v45 = vmax.f32 %v95_v35, 0.0 }
   0xd   :  { %v108_v48 = vmax.f32 %v92_v36, 0.0  ;;  %v109_v49 = vmax.f32 %v93_v37, 0.0  ;;  %v112_v50 = vmax.f32 %v96_v38, 0.0  ;;  %v113_v51 = vmax.f32 %v97_v39, 0.0 }
   0xe   :  { %v190_v54 = vpack.c.bf16 %v107_v43, %v106_v42  ;;  %v192_v55 = vpack.c.bf16 %v111_v45, %v110_v44  ;;  %v60_v56 = vmul.f32 %v35_v13, %v22_v40  ;;  %v61_v57 = vmul.f32 %v39_v14, %v23_v41 }
   0xf   :  { %v191_v60 = vpack.c.bf16 %v109_v49, %v108_v48  ;;  %v193_v61 = vpack.c.bf16 %v113_v51, %v112_v50  ;;  %v62_v62 = vmul.f32 %v43_v20, %v24_v46  ;;  %v63_v63 = vmul.f32 %v47_v21, %v25_v47 }
  0x10   :  { %170 = vst [vmem:[%s311_s3] sm:$0xff] %v190_v54  ;;  %172 = vst [vmem:[%s311_s3 + $0x10] sm:$0xff] %v192_v55  ;;  %v98_v0 = vadd.f32 %v239_v15, %v60_v56  ;;  %v99_v1 = vadd.f32 %v241_v16, %v61_v57  ;;  %v64_v2 = vmul.f32 %v35_v13, %v26_v52 }
  0x11   :  { %v65_v3 = vmul.f32 %v39_v14, %v27_v53  ;;  %171 = vst [vmem:[%s311_s3 + $0x8] sm:$0xff] %v191_v60  ;;  %173 = vst [vmem:[%s311_s3 + $0x18] sm:$0xff] %v193_v61  ;;  %v100_v4 = vadd.f32 %v81_v22, %v62_v62  ;;  %v101_v5 = vadd.f32 %v85_v23, %v63_v63 }
  0x12   :  { %v66_v6 = vmul.f32 %v43_v20, %v28_v58  ;;  %v67_v7 = vmul.f32 %v47_v21, %v29_v59  ;;  %v114_v8 = vmax.f32 %v98_v0, 0.0  ;;  %v115_v9 = vmax.f32 %v99_v1, 0.0 }
  0x13   :  { %v102_v10 = vadd.f32 %v239_v15, %v64_v2  ;;  %v103_v11 = vadd.f32 %v241_v16, %v65_v3  ;;  %v116_v12 = vmax.f32 %v100_v4, 0.0  ;;  %v117_v13 = vmax.f32 %v101_v5, 0.0 }
  0x14   :  { %v104_v14 = vadd.f32 %v81_v22, %v66_v6  ;;  %v105_v17 = vadd.f32 %v85_v23, %v67_v7  ;;  %v194_v18 = vpack.c.bf16 %v115_v9, %v114_v8 }
  0x15   :  { %v118_v19 = vmax.f32 %v102_v10, 0.0  ;;  %v119_v24 = vmax.f32 %v103_v11, 0.0  ;;  %v195_v25 = vpack.c.bf16 %v117_v13, %v116_v12 }
  0x16   :  { %v120_v26 = vmax.f32 %v104_v14, 0.0  ;;  %v121_v27 = vmax.f32 %v105_v17, 0.0  ;;  %174 = vst [vmem:[%s311_s3 + $0x20] sm:$0xff] %v194_v18 }
  0x17   :  { %v196_v20 = vpack.c.bf16 %v119_v24, %v118_v19  ;;  %175 = vst [vmem:[%s311_s3 + $0x28] sm:$0xff] %v195_v25 }
  0x18   :  { %v197_v15 = vpack.c.bf16 %v121_v27, %v120_v26 }
  0x19   :  { %176 = vst [vmem:[%s311_s3 + $0x30] sm:$0xff] %v196_v20 }
  0x1a   :  { %177 = vst [vmem:[%s311_s3 + $0x38] sm:$0xff] %v197_v15 }

// kernel: densenet121_forward.232
= control target key start
LH: loop header
LB: loop body
LE: loop exit
PB: predicated region body
PF: predicated region fallthrough
CT: control target
= control target key end

     0   :  { %s973_s15 = smov 0   ;;  %s975_s16 = smov 0   ;;  %s1076_s0 = inlined_call_operand.vmem [shape: bf16[32,512], index: 0, kind: input, shape index: {}]   ;;  %s1077_s1 = inlined_call_operand.vmem [shape: bf16[512,128], index: 1, kind: input, shape index: {}]   ;;  %s1078_s2 = inlined_call_operand.vmem [shape: f32[1,128], index: 2, kind: input, shape index: {}]   ;;  %s1079_s3 = inlined_call_operand.vmem [shape: f32[1,128], index: 3, kind: input, shape index: {}]   ;;  %s1080_s4 = inlined_call_operand.vmem [shape: bf16[32,128], index: 4, kind: output, shape index: {}]  }
   0x1   :  { %s977_s17 = smov 0   ;;  %s979_s18 = smov 0  }
   0x2   :  { %s981_s19 = smov 0  }
   0x3 LB: > { %s26_s20 = sadd.s32 1, %s941_s18  ;;  %p49_p1 = scmp.ne.s32.totalorder %s933_s16, %s929_s15  ;;  %s945_s19 = sphi %s981_s19, %s14_s19   ;;  %s941_s18 = sphi %s979_s18, %s1084_s18   ;;  %s937_s17 = sphi %s977_s17, %s1083_s17   ;;  %s933_s16 = sphi %s975_s16, %s1082_s16   ;;  %s929_s15 = sphi %s973_s15, %s1081_s15  }
   0x4   : > { %p27_p0 = scmp.ge.s32.totalorder %s26_s20, 2  ;;  %p50_p2 = scmp.eq.s32.totalorder %s945_s19, 0 }
   0x5   : > { %s42_s22 = sadd.s32 1, %s933_s16  ;;  %p744_p5 = scmp.ge.s32.totalorder %s945_s19, 2 }
   0x6   : > { %s1086_s20 = smov (%p27_p0, %s26_s20), 0  ;;  %p51_p3 = por %p50_p2, %p49_p1 }
   0x7   : > { %s38_s21 = ssub.s32 %s941_s18, %s1086_s20  ;;  %195 = sbr.rel (%p744_p5) target bundleno = 21 (0x15), region = 24 }
   0x8   : > { %p40_p4 = scmp.eq.s32.totalorder %s38_s21, 0 }
   0xa   : > { %s1008_s23 = scalar_select %p40_p4, %s933_s16, %s42_s22  }
   0xe   : > { %198 = sbr.rel (!%p51_p3) target bundleno = 21 (0x15), region = 28  ;;  %s200_s24 = sand.u32 (%p51_p3), 1, %s933_s16  }
   0xf   : > { %s784_s25 = sshll.u32 (%p51_p3), %s941_s18, 3  ;;  %s745_s26 = sshll.u32 (%p51_p3), %s200_s24, 5 }
  0x10   : > { %s208_s29 = scalar_lea.vmem (%p51_p3), %s1076_s0, %s784_s25  ;;  %s202_s30 = scalar_lea.vmem (%p51_p3), [#allocation3], %s745_s26 }
  0x11   : > { %v242_v0 = vld [vmem:[%s208_s29] sm:$0xff] (%p51_p3)  ;;  %v244_v1 = vld [vmem:[%s208_s29 + $0x10] sm:$0xff] (%p51_p3) }
  0x12   : > { %v246_v2 = vld [vmem:[%s208_s29 + $0x20] sm:$0xff] (%p51_p3)  ;;  %243 = vst [vmem:[%s202_s30] sm:$0xff] (%p51_p3), %v242_v0  ;;  %245 = vst [vmem:[%s202_s30 + $0x8] sm:$0xff] (%p51_p3), %v244_v1  ;;  %v248_v3 = vld [vmem:[%s208_s29 + $0x30] sm:$0xff] (%p51_p3) }
  0x13   : > { %247 = vst [vmem:[%s202_s30 + $0x10] sm:$0xff] (%p51_p3), %v246_v2  ;;  %249 = vst [vmem:[%s202_s30 + $0x18] sm:$0xff] (%p51_p3), %v248_v3 }
  0x15 PF: > { %p748_p6 = scmp.ge.s32.totalorder %s945_s19, 1  ;;  %p266_p7 = scmp.lt.s32.totalorder %s945_s19, 3 }
  0x17   : > { %p267_p8 = pnand %p748_p6, %p266_p7 }
  0x18   : > { %s273_s5 = sand.u32 (!%p267_p8), 1, %s929_s15   ;;  %s750_s6 = sshll.u32 (!%p267_p8), %s937_s17, 5 }
  0x19   : > { %270 = sbr.rel (%p267_p8) target bundleno = 308 (0x134), region = 70  ;;  %s749_s7 = sshll.u32 (!%p267_p8), %s273_s5, 5 }
  0x1a   : > { %p318_p9 = scmp.lt.s32.totalorder (!%p267_p8), %s750_s6, 63  ;;  %s1025_s12 = scalar_lea.vmem (!%p267_p8), [#allocation3], %s749_s7 }
  0x1b   : > { %p752_p10 = scmp.ne.s32.totalorder (!%p267_p8), %s937_s17, 0 }
  0x20   : > { %s1088_s6 = smov (!%p318_p9, %s750_s6), 63  ;;  %345 = sbr.rel (%p752_p10) target bundleno = 39 (0x27), region = 78 }
  0x21   : > { %s751_s8 = sshll.u32 %s1088_s6, 2  ;;  %v947_v4 = vmov (!%p752_p10), 0.0  }
  0x22   : > { %s1023_s11 = scalar_lea.vmem %s1077_s1, %s751_s8  ;;  %346 = vst [vmem:[#allocation2] sm:$0xff] (!%p752_p10), %v947_v4  ;;  %347 = vst [vmem:[#allocation2 + $0x8] sm:$0xff] (!%p752_p10), %v947_v4 }
  0x23   : > { %348 = vst [vmem:[#allocation2 + $0x10] sm:$0xff] (!%p752_p10), %v947_v4  ;;  %349 = vst [vmem:[#allocation2 + $0x18] sm:$0xff] (!%p752_p10), %v947_v4 }
  0x27 PF: > { %v885_v5 = vld [vmem:[%s1023_s11 + $0x40] sm:$0xff]   ;;  %v887_v7 = vld [vmem:[%s1023_s11 + $0x48] sm:$0xff]   ;;  %v889_v9 = vld [vmem:[%s1023_s11 + $0x50] sm:$0xff]   ;;  %p773_p11 = scmp.ne.s32.totalorder %s937_s17, 1 }
  0x28   : > { %v886_v6 = vld [vmem:[%s1023_s11] sm:$0xff]   ;;  %800 = vmatprep.subr.bf16.mxu0 %v885_v5  ;;  %828 = vmatprep.subr.bf16.mxu1 %v885_v5  ;;  %v888_v8 = vld [vmem:[%s1023_s11 + $0x8] sm:$0xff]   ;;  %v890_v10 = vld [vmem:[%s1023_s11 + $0x10] sm:$0xff]  }
  0x29   : > { %801 = vmatpush3.bf16.msra.mxu0 %v886_v6  ;;  %836 = vmatpush3.bf16.msra.mxu1 %v886_v6  ;;  %v891_v11 = vld [vmem:[%s1023_s11 + $0x58] sm:$0xff]   ;;  %v893_v13 = vld [vmem:[%s1023_s11 + $0x60] sm:$0xff]   ;;  %v895_v15 = vld [vmem:[%s1023_s11 + $0x68] sm:$0xff]  }
  0x2a   : > { %802 = vmatprep.subr.bf16.mxu0 %v887_v7  ;;  %829 = vmatprep.subr.bf16.mxu1 %v887_v7  ;;  %v892_v12 = vld [vmem:[%s1023_s11 + $0x18] sm:$0xff]   ;;  %v894_v14 = vld [vmem:[%s1023_s11 + $0x20] sm:$0xff]   ;;  %v896_v18 = vld [vmem:[%s1023_s11 + $0x28] sm:$0xff]  }
  0x2b   : > { %v903_v16 = vld [vmem:[%s1025_s12 + $0x4] ss:$8 sps:$4 sm:$0xff]   ;;  %v906_v17 = vld [vmem:[%s1025_s12 + $0x14] ss:$8 sps:$4 sm:$0xff]   ;;  %v901_v23 = vld [vmem:[%s1025_s12] ss:$8 sps:$4 sm:$0xff]  }
  0x2c   : > { %v897_v19 = vld [vmem:[%s1023_s11 + $0x70] sm:$0xff]   ;;  %538 = vmatprep.mubr.bf16.mxu0 %v903_v16  ;;  %546 = vmatprep.mubr.bf16.mxu1 %v906_v17  ;;  %v899_v21 = vld [vmem:[%s1023_s11 + $0x78] sm:$0xff]   ;;  %v350_v27 = vld [vmem:[#allocation2] sm:$0xff] }
  0x2d   : > { %803 = vmatpush3.bf16.msra.mxu0 %v888_v8  ;;  %837 = vmatpush3.bf16.msra.mxu1 %v888_v8  ;;  %v898_v20 = vld [vmem:[%s1023_s11 + $0x30] sm:$0xff]   ;;  %v900_v22 = vld [vmem:[%s1023_s11 + $0x38] sm:$0xff]   ;;  %v351_v35 = vld [vmem:[#allocation2 + $0x8] sm:$0xff] }
  0x2e   : > { %804 = vmatprep.subr.bf16.mxu0 %v889_v9  ;;  %830 = vmatprep.subr.bf16.mxu1 %v889_v9  ;;  %v904_v24 = vld [vmem:[%s1025_s12 + $0x10] ss:$8 sps:$4 sm:$0xff]   ;;  %v774_v47 = vld [vmem:[%s1078_s2] ss:$0 sm:$0xff] (!%p773_p11) }
  0x2f   : > { %v352_v29 = vld [vmem:[#allocation2 + $0x10] sm:$0xff]  ;;  %v353_v37 = vld [vmem:[#allocation2 + $0x18] sm:$0xff]  ;;  %v775_v50 = vld [vmem:[%s1079_s3] ss:$0 sm:$0xff] (!%p773_p11) }
  0x31   : > { %805 = vmatpush3.bf16.msra.mxu0 %v890_v10  ;;  %838 = vmatpush3.bf16.msra.mxu1 %v890_v10 }
  0x32   : > { %806 = vmatprep.subr.bf16.mxu0 %v891_v11  ;;  %831 = vmatprep.subr.bf16.mxu1 %v891_v11 }
  0x35   : > { %807 = vmatpush3.bf16.msra.mxu0 %v892_v12  ;;  %839 = vmatpush3.bf16.msra.mxu1 %v892_v12 }
  0x36   : > { %808 = vmatprep.subr.bf16.mxu0 %v893_v13  ;;  %832 = vmatprep.subr.bf16.mxu1 %v893_v13 }
  0x39   : > { %809 = vmatpush3.bf16.msra.mxu0 %v894_v14  ;;  %840 = vmatpush3.bf16.msra.mxu1 %v894_v14 }
  0x3a   : > { %810 = vmatprep.subr.bf16.mxu0 %v895_v15  ;;  %833 = vmatprep.subr.bf16.mxu1 %v895_v15 }
  0x3d   : > { %811 = vmatpush3.bf16.msra.mxu0 %v896_v18  ;;  %841 = vmatpush3.bf16.msra.mxu1 %v896_v18 }
  0x3e   : > { %812 = vmatprep.subr.bf16.mxu0 %v897_v19  ;;  %834 = vmatprep.subr.bf16.mxu1 %v897_v19 }
  0x41   : > { %813 = vmatpush3.bf16.msra.mxu0 %v898_v20  ;;  %842 = vmatpush3.bf16.msra.mxu1 %v898_v20 }
  0x42   : > { %814 = vmatprep.subr.bf16.mxu0 %v899_v21  ;;  %835 = vmatprep.subr.bf16.mxu1 %v899_v21 }
  0x45   : > { %815 = vmatpush3.bf16.msra.mxu0 %v900_v22  ;;  %843 = vmatpush3.bf16.msra.mxu1 %v900_v22 }
  0x48   : > { %539 = vmatmul.mubr.bf16.vlgmr.msra.gmra.mrb[0].mxu0 %v901_v23  ;;  %547 = vmatmul.mubr.bf16.vlgmr.msra.gmra.mrb[0].mxu1 %v904_v24 }
 0x11b   : > { %v816_v25 = vpop.f32.mrb[0].mxu0  ;;  %v822_v26 = vpop.f32.mrb[0].mxu1 }
 0x11c   : > { %v817_v28 = vpop.f32.mrb[1].mxu0  ;;  %v823_v30 = vpop.f32.mrb[1].mxu1 }
 0x11d   : > { %v818_v31 = vadd.f32 %v817_v28, %v816_v25  ;;  %v824_v32 = vadd.f32 %v823_v30, %v822_v26  ;;  %v819_v33 = vpop.f32.mrb[2].mxu0  ;;  %v825_v34 = vpop.f32.mrb[2].mxu1  ;;  %566 = sbr.rel (%p773_p11) target bundleno = 308 (0x134), region = 82 }
 0x11e   : > { %v820_v36 = vpop.f32.mrb[3].mxu0  ;;  %v826_v38 = vpop.f32.mrb[3].mxu1 }
 0x11f   : > { %v555_v39 = vadd.f32 %v818_v31, %v350_v27  ;;  %v557_v40 = vadd.f32 %v824_v32, %v352_v29  ;;  %v821_v41 = vadd.f32 %v820_v36, %v819_v33  ;;  %v827_v42 = vadd.f32 %v826_v38, %v825_v34 }
 0x121   : > { %559 = vst [vmem:[#allocation2] sm:$0xff] %v555_v39  ;;  %561 = vst [vmem:[#allocation2 + $0x10] sm:$0xff] %v557_v40  ;;  %v556_v43 = vadd.f32 %v821_v41, %v351_v35  ;;  %v558_v44 = vadd.f32 %v827_v42, %v353_v37 }
 0x123   : > { %560 = vst [vmem:[#allocation2 + $0x8] sm:$0xff] %v556_v43  ;;  %562 = vst [vmem:[#allocation2 + $0x18] sm:$0xff] %v558_v44 }
 0x128   : > { %v567_v45 = vld [vmem:[#allocation2] sm:$0xff]  ;;  %v569_v51 = vld [vmem:[#allocation2 + $0x10] sm:$0xff] }
 0x129   : > { %v578_v48 = vmul.f32 %v774_v47, %v567_v45  ;;  %v580_v53 = vmul.f32 %v774_v47, %v569_v51 }
 0x12a   : > { %v568_v46 = vld [vmem:[#allocation2 + $0x8] sm:$0xff]  ;;  %v570_v52 = vld [vmem:[#allocation2 + $0x18] sm:$0xff] }
 0x12b   : > { %v579_v49 = vmul.f32 %v774_v47, %v568_v46  ;;  %v581_v54 = vmul.f32 %v774_v47, %v570_v52  ;;  %v589_v55 = vadd.f32 %v775_v50, %v578_v48  ;;  %v591_v57 = vadd.f32 %v775_v50, %v580_v53 }
 0x12d   : > { %v590_v56 = vadd.f32 %v775_v50, %v579_v49  ;;  %v592_v58 = vadd.f32 %v775_v50, %v581_v54  ;;  %v593_v59 = vmax.f32 %v589_v55, 0.0  ;;  %v595_v61 = vmax.f32 %v591_v57, 0.0 }
 0x12f   : > { %v594_v60 = vmax.f32 %v590_v56, 0.0  ;;  %v596_v62 = vmax.f32 %v592_v58, 0.0 }
 0x131   : > { %v792_v63 = vpack.c.bf16 %v594_v60, %v593_v59  ;;  %v797_v0 = vpack.c.bf16 %v596_v62, %v595_v61 }
 0x133   : > { %793 = vst [vmem:[%s1080_s4] sm:$0xff] %v792_v63   ;;  %799 = vst [vmem:[%s1080_s4 + $0x8] sm:$0xff] %v797_v0  }
 0x134 PF: > { %s14_s19 = sadd.s32 1, %s945_s19   ;;  %s1081_s15 = smov %s933_s16 }
 0x135   : > { %p11_p12 = scmp.ge.s32.totalorder %s14_s19, 4   ;;  %s1082_s16 = smov %s1008_s23 }
 0x136   : > { %s1083_s17 = smov %s941_s18  ;;  %s1084_s18 = smov %s1086_s20 }
 0x137   :  { %13 = sbr.rel (!%p11_p12) target bundleno = 3 (0x3), region = 126 }

// kernel: densenet121_forward.241
= control target key start
LH: loop header
LB: loop body
LE: loop exit
PB: predicated region body
PF: predicated region fallthrough
CT: control target
= control target key end

     0   :  { %s1114_s15 = smov 0   ;;  %s1116_s16 = smov 0   ;;  %s1251_s0 = inlined_call_operand.vmem [shape: bf16[32,512], index: 0, kind: input, shape index: {}]   ;;  %s1252_s1 = inlined_call_operand.vmem [shape: bf16[512,256], index: 1, kind: input, shape index: {}]   ;;  %s1253_s2 = inlined_call_operand.vmem [shape: f32[1,256], index: 2, kind: input, shape index: {}]   ;;  %s1254_s3 = inlined_call_operand.vmem [shape: f32[1,256], index: 3, kind: input, shape index: {}]   ;;  %s1255_s4 = inlined_call_operand.vmem [shape: f32[32,256], index: 4, kind: output, shape index: {}]  }
   0x1   :  { %s1118_s17 = smov 0   ;;  %s1120_s18 = smov 0  }
   0x2   :  { %s1122_s19 = smov 0  }
   0x3 LB: > { %s26_s20 = sadd.s32 1, %s1082_s18  ;;  %p49_p1 = scmp.ne.s32.totalorder %s1074_s16, %s1070_s15  ;;  %s1086_s19 = sphi %s1122_s19, %s14_s19   ;;  %s1082_s18 = sphi %s1120_s18, %s1259_s18   ;;  %s1078_s17 = sphi %s1118_s17, %s1258_s17   ;;  %s1074_s16 = sphi %s1116_s16, %s1257_s16   ;;  %s1070_s15 = sphi %s1114_s15, %s1256_s15  }
   0x4   : > { %p27_p0 = scmp.ge.s32.totalorder %s26_s20, 2  ;;  %p50_p2 = scmp.eq.s32.totalorder %s1086_s19, 0 }
   0x5   : > { %s42_s22 = sadd.s32 1, %s1074_s16  ;;  %p868_p5 = scmp.ge.s32.totalorder %s1086_s19, 2 }
   0x6   : > { %s1261_s20 = smov (%p27_p0, %s26_s20), 0  ;;  %p51_p3 = por %p50_p2, %p49_p1 }
   0x7   : > { %s38_s21 = ssub.s32 %s1082_s18, %s1261_s20  ;;  %199 = sbr.rel (%p868_p5) target bundleno = 21 (0x15), region = 24 }
   0x8   : > { %p40_p4 = scmp.eq.s32.totalorder %s38_s21, 0 }
   0xa   : > { %s1149_s23 = scalar_select %p40_p4, %s1074_s16, %s42_s22  }
   0xe   : > { %202 = sbr.rel (!%p51_p3) target bundleno = 21 (0x15), region = 28  ;;  %s204_s24 = sand.u32 (%p51_p3), 1, %s1074_s16  }
   0xf   : > { %s919_s25 = sshll.u32 (%p51_p3), %s1082_s18, 3  ;;  %s869_s26 = sshll.u32 (%p51_p3), %s204_s24, 5 }
  0x10   : > { %s212_s29 = scalar_lea.vmem (%p51_p3), %s1251_s0, %s919_s25  ;;  %s206_s30 = scalar_lea.vmem (%p51_p3), [#allocation3], %s869_s26 }
  0x11   : > { %v246_v0 = vld [vmem:[%s212_s29] sm:$0xff] (%p51_p3)  ;;  %v248_v1 = vld [vmem:[%s212_s29 + $0x10] sm:$0xff] (%p51_p3) }
  0x12   : > { %v250_v2 = vld [vmem:[%s212_s29 + $0x20] sm:$0xff] (%p51_p3)  ;;  %247 = vst [vmem:[%s206_s30] sm:$0xff] (%p51_p3), %v246_v0  ;;  %249 = vst [vmem:[%s206_s30 + $0x8] sm:$0xff] (%p51_p3), %v248_v1  ;;  %v252_v3 = vld [vmem:[%s212_s29 + $0x30] sm:$0xff] (%p51_p3) }
  0x13   : > { %251 = vst [vmem:[%s206_s30 + $0x10] sm:$0xff] (%p51_p3), %v250_v2  ;;  %253 = vst [vmem:[%s206_s30 + $0x18] sm:$0xff] (%p51_p3), %v252_v3 }
  0x15 PF: > { %p872_p6 = scmp.ge.s32.totalorder %s1086_s19, 1  ;;  %p273_p7 = scmp.lt.s32.totalorder %s1086_s19, 3 }
  0x17   : > { %p274_p8 = pnand %p872_p6, %p273_p7 }
  0x18   : > { %s280_s5 = sand.u32 (!%p274_p8), 1, %s1070_s15   ;;  %s874_s6 = sshll.u32 (!%p274_p8), %s1078_s17, 5 }
  0x19   : > { %277 = sbr.rel (%p274_p8) target bundleno = 335 (0x14f), region = 70  ;;  %s873_s7 = sshll.u32 (!%p274_p8), %s280_s5, 5 }
  0x1a   : > { %p332_p9 = scmp.lt.s32.totalorder (!%p274_p8), %s874_s6, 63  ;;  %s1166_s12 = scalar_lea.vmem (!%p274_p8), [#allocation3], %s873_s7 }
  0x1b   : > { %p877_p10 = scmp.ne.s32.totalorder (!%p274_p8), %s1078_s17, 0 }
  0x20   : > { %s1263_s6 = smov (!%p332_p9, %s874_s6), 63  ;;  %367 = sbr.rel (%p877_p10) target bundleno = 39 (0x27), region = 78 }
  0x21   : > { %s920_s8 = sshll.u32 %s1263_s6, 3  ;;  %v1088_v4 = vmov (!%p877_p10), 0.0  }
  0x22   : > { %s1164_s11 = scalar_lea.vmem %s1252_s1, %s920_s8  ;;  %368 = vst [vmem:[#allocation2] sm:$0xff] (!%p877_p10), %v1088_v4  ;;  %369 = vst [vmem:[#allocation2 + $0x8] sm:$0xff] (!%p877_p10), %v1088_v4 }
  0x23   : > { %370 = vst [vmem:[#allocation2 + $0x10] sm:$0xff] (!%p877_p10), %v1088_v4  ;;  %371 = vst [vmem:[#allocation2 + $0x18] sm:$0xff] (!%p877_p10), %v1088_v4 }
  0x24   : > { %372 = vst [vmem:[#allocation2 + $0x20] sm:$0xff] (!%p877_p10), %v1088_v4  ;;  %373 = vst [vmem:[#allocation2 + $0x28] sm:$0xff] (!%p877_p10), %v1088_v4 }
  0x25   : > { %374 = vst [vmem:[#allocation2 + $0x30] sm:$0xff] (!%p877_p10), %v1088_v4  ;;  %375 = vst [vmem:[#allocation2 + $0x38] sm:$0xff] (!%p877_p10), %v1088_v4 }
  0x27 PF: > { %v994_v5 = vld [vmem:[%s1164_s11 + $0x4] ss:$8 sps:$4 sm:$0xff]   ;;  %v996_v6 = vld [vmem:[%s1164_s11] ss:$8 sps:$4 sm:$0xff]   ;;  %v997_v7 = vld [vmem:[%s1164_s11 + $0x14] ss:$8 sps:$4 sm:$0xff]  }
  0x28   : > { %600 = vmatprep.subr.bf16.mxu0 %v994_v5  ;;  %921 = vmatprep.subr.bf16.mxu1 %v994_v5  ;;  %v999_v8 = vld [vmem:[%s1164_s11 + $0x10] ss:$8 sps:$4 sm:$0xff]   ;;  %v1000_v9 = vld [vmem:[%s1164_s11 + $0x24] ss:$8 sps:$4 sm:$0xff]   ;;  %v1002_v10 = vld [vmem:[%s1164_s11 + $0x20] ss:$8 sps:$4 sm:$0xff]  }
  0x29   : > { %601 = vmatpush1.bf16.msra.mxu0 %v996_v6  ;;  %937 = vmatpush1.bf16.msra.mxu1 %v996_v6  ;;  %v1003_v11 = vld [vmem:[%s1164_s11 + $0x34] ss:$8 sps:$4 sm:$0xff]   ;;  %v1005_v12 = vld [vmem:[%s1164_s11 + $0x30] ss:$8 sps:$4 sm:$0xff]   ;;  %v1006_v13 = vld [vmem:[%s1164_s11 + $0x44] ss:$8 sps:$4 sm:$0xff]  }
  0x2a   : > { %602 = vmatprep.subr.bf16.mxu0 %v997_v7  ;;  %922 = vmatprep.subr.bf16.mxu1 %v997_v7  ;;  %v1008_v14 = vld [vmem:[%s1164_s11 + $0x40] ss:$8 sps:$4 sm:$0xff]   ;;  %v1009_v15 = vld [vmem:[%s1164_s11 + $0x54] ss:$8 sps:$4 sm:$0xff]   ;;  %v1011_v16 = vld [vmem:[%s1164_s11 + $0x50] ss:$8 sps:$4 sm:$0xff]  }
  0x2b   : > { %v1012_v17 = vld [vmem:[%s1164_s11 + $0x64] ss:$8 sps:$4 sm:$0xff]   ;;  %v1014_v19 = vld [vmem:[%s1164_s11 + $0x60] ss:$8 sps:$4 sm:$0xff]   ;;  %v1047_v20 = vld [vmem:[%s1166_s12 + $0x14] ss:$8 sps:$4 sm:$0xff]  }
  0x2c   : > { %v1044_v18 = vld [vmem:[%s1166_s12 + $0x4] ss:$8 sps:$4 sm:$0xff]   ;;  %v1015_v21 = vld [vmem:[%s1164_s11 + $0x74] ss:$8 sps:$4 sm:$0xff]   ;;  %642 = vmatprep.mubr.bf16.mxu1 %v1047_v20  ;;  %v1017_v22 = vld [vmem:[%s1164_s11 + $0x70] ss:$8 sps:$4 sm:$0xff]  }
  0x2d   : > { %603 = vmatpush1.bf16.msra.mxu0 %v999_v8  ;;  %938 = vmatpush1.bf16.msra.mxu1 %v999_v8  ;;  %v1018_v23 = vld [vmem:[%s1164_s11 + $0x84] ss:$8 sps:$4 sm:$0xff]   ;;  %v1020_v24 = vld [vmem:[%s1164_s11 + $0x80] ss:$8 sps:$4 sm:$0xff]   ;;  %v1021_v25 = vld [vmem:[%s1164_s11 + $0x94] ss:$8 sps:$4 sm:$0xff]  }
  0x2e   : > { %604 = vmatprep.subr.bf16.mxu0 %v1000_v9  ;;  %923 = vmatprep.subr.bf16.mxu1 %v1000_v9  ;;  %v1023_v26 = vld [vmem:[%s1164_s11 + $0x90] ss:$8 sps:$4 sm:$0xff]   ;;  %v1024_v27 = vld [vmem:[%s1164_s11 + $0xa4] ss:$8 sps:$4 sm:$0xff]   ;;  %v1026_v28 = vld [vmem:[%s1164_s11 + $0xa0] ss:$8 sps:$4 sm:$0xff]  }
  0x2f   : > { %632 = vmatprep.mubr.bf16.mxu0 %v1044_v18  ;;  %v1027_v29 = vld [vmem:[%s1164_s11 + $0xb4] ss:$8 sps:$4 sm:$0xff]   ;;  %v1029_v30 = vld [vmem:[%s1164_s11 + $0xb0] ss:$8 sps:$4 sm:$0xff]   ;;  %v1030_v31 = vld [vmem:[%s1164_s11 + $0xc4] ss:$8 sps:$4 sm:$0xff]  }
  0x30   : > { %v1032_v32 = vld [vmem:[%s1164_s11 + $0xc0] ss:$8 sps:$4 sm:$0xff]   ;;  %v1033_v33 = vld [vmem:[%s1164_s11 + $0xd4] ss:$8 sps:$4 sm:$0xff]   ;;  %v1035_v34 = vld [vmem:[%s1164_s11 + $0xd0] ss:$8 sps:$4 sm:$0xff]  }
  0x31   : > { %605 = vmatpush1.bf16.msra.mxu0 %v1002_v10  ;;  %939 = vmatpush1.bf16.msra.mxu1 %v1002_v10  ;;  %v1036_v35 = vld [vmem:[%s1164_s11 + $0xe4] ss:$8 sps:$4 sm:$0xff]   ;;  %v1038_v36 = vld [vmem:[%s1164_s11 + $0xe0] ss:$8 sps:$4 sm:$0xff]   ;;  %v1039_v37 = vld [vmem:[%s1164_s11 + $0xf4] ss:$8 sps:$4 sm:$0xff]  }
  0x32   : > { %606 = vmatprep.subr.bf16.mxu0 %v1003_v11  ;;  %924 = vmatprep.subr.bf16.mxu1 %v1003_v11  ;;  %v1041_v38 = vld [vmem:[%s1164_s11 + $0xf0] ss:$8 sps:$4 sm:$0xff]   ;;  %v1042_v39 = vld [vmem:[%s1166_s12] ss:$8 sps:$4 sm:$0xff]   ;;  %p914_p11 = scmp.ne.s32.totalorder %s1078_s17, 1 }
  0x33   : > { %v1045_v40 = vld [vmem:[%s1166_s12 + $0x10] ss:$8 sps:$4 sm:$0xff]   ;;  %v376_v41 = vld [vmem:[#allocation2] sm:$0xff]  ;;  %v377_v43 = vld [vmem:[#allocation2 + $0x8] sm:$0xff]  ;;  %v683_v1 = vlaneseq (!%p914_p11) }
  0x34   : > { %v380_v42 = vld [vmem:[#allocation2 + $0x20] sm:$0xff]  ;;  %v381_v44 = vld [vmem:[#allocation2 + $0x28] sm:$0xff]  ;;  %v378_v47 = vld [vmem:[#allocation2 + $0x10] sm:$0xff] }
  0x35   : > { %607 = vmatpush1.bf16.msra.mxu0 %v1005_v12  ;;  %940 = vmatpush1.bf16.msra.mxu1 %v1005_v12  ;;  %v382_v48 = vld [vmem:[#allocation2 + $0x30] sm:$0xff]  ;;  %v379_v53 = vld [vmem:[#allocation2 + $0x18] sm:$0xff]  ;;  %v684_v2 = vshrl.u32 (!%p914_p11), %v683_v1, 7  ;;  %v681_v3 = vld [vmem:[%s1253_s2] sm:$0x3] (!%p914_p11) }
  0x36   : > { %608 = vmatprep.subr.bf16.mxu0 %v1006_v13  ;;  %925 = vmatprep.subr.bf16.mxu1 %v1006_v13  ;;  %v383_v54 = vld [vmem:[#allocation2 + $0x38] sm:$0xff]  ;;  %v701_v4 = vld [vmem:[%s1254_s3] sm:$0x3] (!%p914_p11) }
  0x37   : > { %v685_v6 = vsub.s32 (!%p914_p11), 0, %v684_v2  ;;  %v689_v8 = vsub.s32 (!%p914_p11), 1, %v684_v2 }
  0x39   : > { %609 = vmatpush1.bf16.msra.mxu0 %v1008_v14  ;;  %941 = vmatpush1.bf16.msra.mxu1 %v1008_v14  ;;  %v686_v12 = vrot.slane (!%p914_p11), %v681_v3, %v685_v6  ;;  %v706_v13 = vrot.slane (!%p914_p11), %v701_v4, %v685_v6  ;;  %v690_v14 = vrot.slane (!%p914_p11), %v681_v3, %v689_v8 }
  0x3a   : > { %610 = vmatprep.subr.bf16.mxu0 %v1009_v15  ;;  %926 = vmatprep.subr.bf16.mxu1 %v1009_v15  ;;  %v710_v15 = vrot.slane (!%p914_p11), %v701_v4, %v689_v8 }
  0x3d   : > { %611 = vmatpush1.bf16.msra.mxu0 %v1011_v16  ;;  %942 = vmatpush1.bf16.msra.mxu1 %v1011_v16 }
  0x3e   : > { %612 = vmatprep.subr.bf16.mxu0 %v1012_v17  ;;  %927 = vmatprep.subr.bf16.mxu1 %v1012_v17 }
  0x41   : > { %613 = vmatpush1.bf16.msra.mxu0 %v1014_v19  ;;  %943 = vmatpush1.bf16.msra.mxu1 %v1014_v19 }
  0x42   : > { %614 = vmatprep.subr.bf16.mxu0 %v1015_v21  ;;  %928 = vmatprep.subr.bf16.mxu1 %v1015_v21 }
  0x45   : > { %615 = vmatpush1.bf16.msra.mxu0 %v1017_v22  ;;  %944 = vmatpush1.bf16.msra.mxu1 %v1017_v22 }
  0x46   : > { %616 = vmatprep.subr.bf16.mxu0 %v1018_v23  ;;  %929 = vmatprep.subr.bf16.mxu1 %v1018_v23 }
  0x49   : > { %617 = vmatpush1.bf16.msra.mxu0 %v1020_v24  ;;  %945 = vmatpush1.bf16.msra.mxu1 %v1020_v24 }
  0x4a   : > { %618 = vmatprep.subr.bf16.mxu0 %v1021_v25  ;;  %930 = vmatprep.subr.bf16.mxu1 %v1021_v25 }
  0x4d   : > { %619 = vmatpush1.bf16.msra.mxu0 %v1023_v26  ;;  %946 = vmatpush1.bf16.msra.mxu1 %v1023_v26 }
  0x4e   : > { %620 = vmatprep.subr.bf16.mxu0 %v1024_v27  ;;  %931 = vmatprep.subr.bf16.mxu1 %v1024_v27 }
  0x51   : > { %621 = vmatpush1.bf16.msra.mxu0 %v1026_v28  ;;  %947 = vmatpush1.bf16.msra.mxu1 %v1026_v28 }
  0x52   : > { %622 = vmatprep.subr.bf16.mxu0 %v1027_v29  ;;  %932 = vmatprep.subr.bf16.mxu1 %v1027_v29 }
  0x55   : > { %623 = vmatpush1.bf16.msra.mxu0 %v1029_v30  ;;  %948 = vmatpush1.bf16.msra.mxu1 %v1029_v30 }
  0x56   : > { %624 = vmatprep.subr.bf16.mxu0 %v1030_v31  ;;  %933 = vmatprep.subr.bf16.mxu1 %v1030_v31 }
  0x59   : > { %625 = vmatpush1.bf16.msra.mxu0 %v1032_v32  ;;  %949 = vmatpush1.bf16.msra.mxu1 %v1032_v32 }
  0x5a   : > { %626 = vmatprep.subr.bf16.mxu0 %v1033_v33  ;;  %934 = vmatprep.subr.bf16.mxu1 %v1033_v33 }
  0x5d   : > { %627 = vmatpush1.bf16.msra.mxu0 %v1035_v34  ;;  %950 = vmatpush1.bf16.msra.mxu1 %v1035_v34 }
  0x5e   : > { %628 = vmatprep.subr.bf16.mxu0 %v1036_v35  ;;  %935 = vmatprep.subr.bf16.mxu1 %v1036_v35 }
  0x61   : > { %629 = vmatpush1.bf16.msra.mxu0 %v1038_v36  ;;  %951 = vmatpush1.bf16.msra.mxu1 %v1038_v36 }
  0x62   : > { %630 = vmatprep.subr.bf16.mxu0 %v1039_v37  ;;  %936 = vmatprep.subr.bf16.mxu1 %v1039_v37 }
  0x65   : > { %631 = vmatpush1.bf16.msra.mxu0 %v1041_v38  ;;  %952 = vmatpush1.bf16.msra.mxu1 %v1041_v38 }
  0x68   : > { %633 = vmatmul.mubr.bf16.vlgmr.msra.gmra.mrb[0].mxu0 %v1042_v39  ;;  %643 = vmatmul.mubr.bf16.vlgmr.msra.gmra.mrb[0].mxu1 %v1045_v40 }
 0x13b   : > { %v634_v45 = vpop.f32.mrb[0].mxu0  ;;  %v644_v46 = vpop.f32.mrb[0].mxu1  ;;  %672 = sbr.rel (%p914_p11) target bundleno = 335 (0x14f), region = 82 }
 0x13c   : > { %v653_v49 = vadd.f32 %v634_v45, %v376_v41  ;;  %v657_v50 = vadd.f32 %v644_v46, %v380_v42  ;;  %v636_v51 = vpop.f32.mrb[1].mxu0  ;;  %v646_v52 = vpop.f32.mrb[1].mxu1 }
 0x13d   : > { %v654_v55 = vadd.f32 %v636_v51, %v377_v43  ;;  %v658_v56 = vadd.f32 %v646_v52, %v381_v44  ;;  %v638_v57 = vpop.f32.mrb[2].mxu0  ;;  %v648_v58 = vpop.f32.mrb[2].mxu1 }
 0x13e   : > { %661 = vst [vmem:[#allocation2] sm:$0xff] %v653_v49  ;;  %665 = vst [vmem:[#allocation2 + $0x20] sm:$0xff] %v657_v50  ;;  %v655_v59 = vadd.f32 %v638_v57, %v378_v47  ;;  %v659_v60 = vadd.f32 %v648_v58, %v382_v48  ;;  %v640_v61 = vpop.f32.mrb[3].mxu0  ;;  %v650_v62 = vpop.f32.mrb[3].mxu1 }
 0x13f   : > { %662 = vst [vmem:[#allocation2 + $0x8] sm:$0xff] %v654_v55  ;;  %666 = vst [vmem:[#allocation2 + $0x28] sm:$0xff] %v658_v56  ;;  %v656_v63 = vadd.f32 %v640_v61, %v379_v53  ;;  %v660_v0 = vadd.f32 %v650_v62, %v383_v54 }
 0x140   : > { %663 = vst [vmem:[#allocation2 + $0x10] sm:$0xff] %v655_v59  ;;  %667 = vst [vmem:[#allocation2 + $0x30] sm:$0xff] %v659_v60 }
 0x141   : > { %664 = vst [vmem:[#allocation2 + $0x18] sm:$0xff] %v656_v63  ;;  %668 = vst [vmem:[#allocation2 + $0x38] sm:$0xff] %v660_v0 }
 0x145   : > { %v673_v5 = vld [vmem:[#allocation2] sm:$0xff] }
 0x146   : > { %v674_v7 = vld [vmem:[#allocation2 + $0x8] sm:$0xff]  ;;  %v677_v11 = vld [vmem:[#allocation2 + $0x20] sm:$0xff]  ;;  %v693_v19 = vmul.f32 %v686_v12, %v673_v5 }
 0x147   : > { %v675_v9 = vld [vmem:[#allocation2 + $0x10] sm:$0xff]  ;;  %v678_v16 = vld [vmem:[#allocation2 + $0x28] sm:$0xff]  ;;  %v694_v20 = vmul.f32 %v690_v14, %v674_v7  ;;  %v697_v23 = vmul.f32 %v686_v12, %v677_v11 }
 0x148   : > { %v676_v10 = vld [vmem:[#allocation2 + $0x18] sm:$0xff]  ;;  %v679_v17 = vld [vmem:[#allocation2 + $0x30] sm:$0xff]  ;;  %v695_v21 = vmul.f32 %v686_v12, %v675_v9  ;;  %v698_v24 = vmul.f32 %v690_v14, %v678_v16  ;;  %v713_v27 = vadd.f32 %v706_v13, %v693_v19 }
 0x149   : > { %v680_v18 = vld [vmem:[#allocation2 + $0x38] sm:$0xff]  ;;  %v696_v22 = vmul.f32 %v690_v14, %v676_v10  ;;  %v699_v25 = vmul.f32 %v686_v12, %v679_v17  ;;  %v714_v28 = vadd.f32 %v710_v15, %v694_v20  ;;  %v717_v31 = vadd.f32 %v706_v13, %v697_v23 }
 0x14a   : > { %v700_v26 = vmul.f32 %v690_v14, %v680_v18  ;;  %v715_v29 = vadd.f32 %v706_v13, %v695_v21  ;;  %v718_v32 = vadd.f32 %v710_v15, %v698_v24  ;;  %721 = vst [vmem:[%s1255_s4] sm:$0xff] %v713_v27 }
 0x14b   : > { %v716_v30 = vadd.f32 %v710_v15, %v696_v22  ;;  %v719_v33 = vadd.f32 %v706_v13, %v699_v25  ;;  %722 = vst [vmem:[%s1255_s4 + $0x8] sm:$0xff] %v714_v28  ;;  %725 = vst [vmem:[%s1255_s4 + $0x20] sm:$0xff] %v717_v31 }
 0x14c   : > { %v720_v34 = vadd.f32 %v710_v15, %v700_v26  ;;  %723 = vst [vmem:[%s1255_s4 + $0x10] sm:$0xff] %v715_v29  ;;  %726 = vst [vmem:[%s1255_s4 + $0x28] sm:$0xff] %v718_v32 }
 0x14d   : > { %724 = vst [vmem:[%s1255_s4 + $0x18] sm:$0xff] %v716_v30  ;;  %727 = vst [vmem:[%s1255_s4 + $0x30] sm:$0xff] %v719_v33 }
 0x14e   : > { %728 = vst [vmem:[%s1255_s4 + $0x38] sm:$0xff] %v720_v34 }
 0x14f PF: > { %s14_s19 = sadd.s32 1, %s1086_s19   ;;  %s1256_s15 = smov %s1074_s16 }
 0x150   : > { %p11_p12 = scmp.ge.s32.totalorder %s14_s19, 4   ;;  %s1257_s16 = smov %s1149_s23 }
 0x151   : > { %s1258_s17 = smov %s1082_s18  ;;  %s1259_s18 = smov %s1261_s20 }
 0x152   :  { %13 = sbr.rel (!%p11_p12) target bundleno = 3 (0x3), region = 126 }

// kernel: densenet121_forward.242
= control target key start
LH: loop header
LB: loop body
LE: loop exit
PB: predicated region body
PF: predicated region fallthrough
CT: control target
= control target key end

     0   :  { %v18_v0 = vlaneseq  ;;  %s96_s1 = inlined_call_operand.vmem [shape: f32[1,256], index: 1, kind: input, shape index: {}]   ;;  %s97_s2 = inlined_call_operand.vmem [shape: f32[1,256], index: 2, kind: input, shape index: {}]   ;;  %s98_s0 = inlined_call_operand.vmem [shape: f32[8,1024], index: 0, kind: input, shape index: {}]   ;;  %s99_s3 = inlined_call_operand.vmem [shape: bf16[8,256], index: 3, kind: output, shape index: {}]  }
   0x1   :  { %v16_v2 = vld [vmem:[%s96_s1] sm:$0x3]  ;;  %v15_v7 = vld [vmem:[%s98_s0 + $0x8] sm:$0xff] }
   0x2   :  { %v19_v1 = vshrl.u32 %v18_v0, 7  ;;  %v30_v3 = vld [vmem:[%s97_s2] sm:$0x3] }
   0x3   :  { %v14_v6 = vld [vmem:[%s98_s0] sm:$0xff] }
   0x4   :  { %v20_v4 = vsub.s32 0, %v19_v1  ;;  %v24_v5 = vsub.s32 1, %v19_v1 }
   0x6   :  { %v21_v8 = vrot.slane %v16_v2, %v20_v4  ;;  %v25_v9 = vrot.slane %v16_v2, %v24_v5  ;;  %v35_v10 = vrot.slane %v30_v3, %v20_v4  ;;  %v39_v11 = vrot.slane %v30_v3, %v24_v5 }
   0x8   :  { %v28_v12 = vmul.f32 %v21_v8, %v14_v6  ;;  %v29_v13 = vmul.f32 %v25_v9, %v15_v7 }
   0xa   :  { %v42_v14 = vadd.f32 %v35_v10, %v28_v12  ;;  %v43_v15 = vadd.f32 %v39_v11, %v29_v13 }
   0xc   :  { %v44_v16 = vmax.f32 %v42_v14, 0.0  ;;  %v45_v17 = vmax.f32 %v43_v15, 0.0 }
   0xe   :  { %v60_v18 = vpack.c.bf16 %v45_v17, %v44_v16 }
  0x10   :  { %54 = vst [vmem:[%s99_s3] sm:$0xff] %v60_v18 }

// kernel: densenet121_forward.243
= control target key start
LH: loop header
LB: loop body
LE: loop exit
PB: predicated region body
PF: predicated region fallthrough
CT: control target
= control target key end

     0   :  { %s374_s1 = inlined_call_operand.vmem [shape: bf16[256,128], index: 1, kind: input, shape index: {}]   ;;  %s375_s0 = inlined_call_operand.vmem [shape: bf16[8,256], index: 0, kind: input, shape index: {}]   ;;  %s376_s2 = inlined_call_operand.vmem [shape: f32[1,128], index: 2, kind: input, shape index: {}]   ;;  %s377_s3 = inlined_call_operand.vmem [shape: f32[1,128], index: 3, kind: input, shape index: {}]   ;;  %s378_s4 = inlined_call_operand.vmem [shape: bf16[8,128], index: 4, kind: output, shape index: {}]  }
   0x1   :  { %v271_v0 = vld [vmem:[%s374_s1 + $0x40] sm:$0xff]   ;;  %v273_v2 = vld [vmem:[%s374_s1 + $0x48] sm:$0xff]   ;;  %v275_v4 = vld [vmem:[%s374_s1 + $0x50] sm:$0xff]  }
   0x2   :  { %v272_v1 = vld [vmem:[%s374_s1] sm:$0xff]   ;;  %249 = vmatprep.subr.bf16.mxu0 %v271_v0  ;;  %v274_v3 = vld [vmem:[%s374_s1 + $0x8] sm:$0xff]   ;;  %v276_v5 = vld [vmem:[%s374_s1 + $0x10] sm:$0xff]  }
   0x3   :  { %250 = vmatpush3.bf16.msra.mxu0 %v272_v1  ;;  %v277_v6 = vld [vmem:[%s374_s1 + $0x58] sm:$0xff]   ;;  %v279_v8 = vld [vmem:[%s374_s1 + $0x60] sm:$0xff]   ;;  %v281_v10 = vld [vmem:[%s374_s1 + $0x68] sm:$0xff]  }
   0x4   :  { %251 = vmatprep.subr.bf16.mxu0 %v273_v2  ;;  %v278_v7 = vld [vmem:[%s374_s1 + $0x18] sm:$0xff]   ;;  %v280_v9 = vld [vmem:[%s374_s1 + $0x20] sm:$0xff]   ;;  %v282_v13 = vld [vmem:[%s374_s1 + $0x28] sm:$0xff]  }
   0x5   :  { %v24_v11 = vld [vmem:[%s375_s0] sm:$0xff]  ;;  %v283_v14 = vld [vmem:[%s374_s1 + $0x70] sm:$0xff]   ;;  %v285_v16 = vld [vmem:[%s374_s1 + $0x78] sm:$0xff]  }
   0x6   :  { %v230_v12 = vcombine.high %v24_v11, %v24_v11  ;;  %v284_v15 = vld [vmem:[%s374_s1 + $0x30] sm:$0xff]   ;;  %v286_v17 = vld [vmem:[%s374_s1 + $0x38] sm:$0xff]   ;;  %v229_v18 = vcombine.low %v24_v11, %v24_v11  ;;  %v247_v21 = vld [vmem:[%s376_s2] ss:$0 sm:$0xff] }
   0x7   :  { %252 = vmatpush3.bf16.msra.mxu0 %v274_v3  ;;  %v248_v24 = vld [vmem:[%s377_s3] ss:$0 sm:$0xff] }
   0x8   :  { %253 = vmatprep.subr.bf16.mxu0 %v275_v4  ;;  %192 = vmatprep.mubr.bf16.mxu0 %v230_v12 }
   0xb   :  { %254 = vmatpush3.bf16.msra.mxu0 %v276_v5 }
   0xc   :  { %255 = vmatprep.subr.bf16.mxu0 %v277_v6 }
   0xf   :  { %256 = vmatpush3.bf16.msra.mxu0 %v278_v7 }
  0x10   :  { %257 = vmatprep.subr.bf16.mxu0 %v279_v8 }
  0x13   :  { %258 = vmatpush3.bf16.msra.mxu0 %v280_v9 }
  0x14   :  { %259 = vmatprep.subr.bf16.mxu0 %v281_v10 }
  0x17   :  { %260 = vmatpush3.bf16.msra.mxu0 %v282_v13 }
  0x18   :  { %261 = vmatprep.subr.bf16.mxu0 %v283_v14 }
  0x1b   :  { %262 = vmatpush3.bf16.msra.mxu0 %v284_v15 }
  0x1c   :  { %263 = vmatprep.subr.bf16.mxu0 %v285_v16 }
  0x1f   :  { %264 = vmatpush3.bf16.msra.mxu0 %v286_v17 }
  0x22   :  { %193 = vmatmul.mubr.bf16.vlgmr.msra.gmra.mrb[0].mxu0 %v229_v18 }
  0xf5   :  { %v265_v19 = vpop.f32.mrb[0].mxu0 }
  0xf6   :  { %v266_v20 = vpop.f32.mrb[1].mxu0 }
  0xf7   :  { %v267_v22 = vadd.f32 %v266_v20, %v265_v19  ;;  %v268_v23 = vpop.f32.mrb[2].mxu0 }
  0xf8   :  { %v269_v25 = vpop.f32.mrb[3].mxu0 }
  0xf9   :  { %v213_v26 = vmul.f32 %v267_v22, %v247_v21 }
  0xfb   :  { %v221_v27 = vadd.f32 %v248_v24, %v213_v26 }
  0xfd   :  { %v222_v28 = vmax.f32 %v221_v27, 0.0 }
  0xff   :  { %v223_v29 = vpack.c.bf16 %v222_v28, %v222_v28 }
 0x101   :  { %224 = vst [vmem:[%s378_s4] sm:$0xf] %v223_v29 }

// kernel: densenet121_forward.244
= control target key start
LH: loop header
LB: loop body
LE: loop exit
PB: predicated region body
PF: predicated region fallthrough
CT: control target
= control target key end

     0   :  { %s688_s15 = smov 0   ;;  %s690_s16 = smov 0   ;;  %s740_s0 = inlined_call_operand.vmem [shape: bf16[8,1152], index: 0, kind: input, shape index: {}]   ;;  %s741_s1 = inlined_call_operand.vmem [shape: bf16[1152,128], index: 1, kind: input, shape index: {}]   ;;  %s742_s2 = inlined_call_operand.vmem [shape: f32[1,128], index: 2, kind: input, shape index: {}]   ;;  %s743_s3 = inlined_call_operand.vmem [shape: f32[1,128], index: 3, kind: input, shape index: {}]   ;;  %s744_s4 = inlined_call_operand.vmem [shape: f32[8,128], index: 4, kind: output, shape index: {}]  }
   0x1   :  { %s692_s17 = smov 0  }
   0x2 LB: > { %s26_s18 = sadd.s32 1, %s654_s16  ;;  %p553_p0 = scmp.ge.s32.totalorder %s658_s17, 1  ;;  %s658_s17 = sphi %s692_s17, %s14_s17   ;;  %s654_s16 = sphi %s690_s16, %s746_s16   ;;  %s650_s15 = sphi %s688_s15, %s745_s15  }
   0x3   : > { %p27_p1 = scmp.ge.s32.totalorder %s26_s18, 9  ;;  %p220_p2 = scmp.lt.s32.totalorder %s658_s17, 10 }
   0x5   : > { %s748_s18 = smov (%p27_p1, %s26_s18), 0  ;;  %p221_p3 = pnand %p553_p0, %p220_p2 }
   0x6   : > { %p267_p4 = scmp.lt.s32.totalorder (!%p221_p3), %s650_s15, 8  ;;  %s555_s19 = sshll.u32 (!%p221_p3), %s650_s15, 4 }
   0x7   : > { %224 = sbr.rel (%p221_p3) target bundleno = 282 (0x11a), region = 36  ;;  %p274_p5 = scmp.lt.s32.totalorder (!%p221_p3), %s555_s19, 143 }
   0x8   : > { %p557_p6 = scmp.ne.s32.totalorder (!%p221_p3), %s650_s15, 0 }
   0xe   : > { %s268_s20 = scalar_select %p267_p4, %s650_s15, 8 }
   0xf   : > { %s750_s19 = smov (!%p274_p5, %s555_s19), 143  ;;  %299 = sbr.rel (%p557_p6) target bundleno = 22 (0x16), region = 40 }
  0x10   : > { %s554_s21 = sshll.u32 %s268_s20, 2  ;;  %s556_s25 = sshll.u32 %s750_s19, 2  ;;  %v660_v0 = vmov (!%p557_p6), 0.0  }
  0x11   : > { %s714_s24 = scalar_lea.vmem %s740_s0, %s554_s21  ;;  %s280_s28 = scalar_lea.vmem %s741_s1, %s556_s25  ;;  %300 = vst [vmem:[#allocation2] sm:$0xff] (!%p557_p6), %v660_v0 }
  0x16 PF: > { %v628_v1 = vld [vmem:[%s280_s28] sm:$0xff]   ;;  %v661_v2 = vmov 0.0   ;;  %v629_v3 = vld [vmem:[%s280_s28 + $0x8] sm:$0xff]   ;;  %vm662_vm0 = vmmov 0   ;;  %v630_v4 = vld [vmem:[%s280_s28 + $0x10] sm:$0xff]   ;;  %p566_p7 = scmp.ne.s32.totalorder %s650_s15, 8 }
  0x17   : > { %581 = vmatprep.subr.bf16.mxu0 %v661_v2  ;;  %597 = vmatprep.mubr.msk.bf16.mxu0 %vm662_vm0, %v661_v2  ;;  %v631_v5 = vld [vmem:[%s280_s28 + $0x18] sm:$0xff]   ;;  %v632_v6 = vld [vmem:[%s280_s28 + $0x20] sm:$0xff]   ;;  %v633_v7 = vld [vmem:[%s280_s28 + $0x28] sm:$0xff]  }
  0x18   : > { %582 = vmatpush3.bf16.msra.mxu0 %v628_v1  ;;  %v634_v8 = vld [vmem:[%s280_s28 + $0x30] sm:$0xff]   ;;  %v635_v9 = vld [vmem:[%s280_s28 + $0x38] sm:$0xff]   ;;  %v302_v10 = vld [vmem:[%s714_s24] sm:$0xf] }
  0x19   : > { %583 = vmatprep.subr.bf16.mxu0 %v661_v2  ;;  %v301_v11 = vld [vmem:[#allocation2] sm:$0xff] }
  0x1a   : > { %v567_v18 = vld [vmem:[%s742_s2] ss:$0 sm:$0xff] (!%p566_p7) }
  0x1b   : > { %v568_v19 = vld [vmem:[%s743_s3] ss:$0 sm:$0xff] (!%p566_p7) }
  0x1c   : > { %584 = vmatpush3.bf16.msra.mxu0 %v629_v3 }
  0x1d   : > { %585 = vmatprep.subr.bf16.mxu0 %v661_v2 }
  0x20   : > { %586 = vmatpush3.bf16.msra.mxu0 %v630_v4 }
  0x21   : > { %587 = vmatprep.subr.bf16.mxu0 %v661_v2 }
  0x24   : > { %588 = vmatpush3.bf16.msra.mxu0 %v631_v5 }
  0x25   : > { %589 = vmatprep.subr.bf16.mxu0 %v661_v2 }
  0x28   : > { %590 = vmatpush3.bf16.msra.mxu0 %v632_v6 }
  0x29   : > { %591 = vmatprep.subr.bf16.mxu0 %v661_v2 }
  0x2c   : > { %592 = vmatpush3.bf16.msra.mxu0 %v633_v7 }
  0x2d   : > { %593 = vmatprep.subr.bf16.mxu0 %v661_v2 }
  0x30   : > { %594 = vmatpush3.bf16.msra.mxu0 %v634_v8 }
  0x31   : > { %595 = vmatprep.subr.bf16.mxu0 %v661_v2 }
  0x34   : > { %596 = vmatpush3.bf16.msra.mxu0 %v635_v9 }
  0x37   : > { %598 = vmatmul.mubr.bf16.vlgmr.msra.gmra.mrb[0].mxu0 %v302_v10 }
 0x107   : > { %412 = sbr.rel (%p566_p7) target bundleno = 282 (0x11a), region = 44 }
 0x10a   : > { %v401_v12 = vpop.f32.mrb[0].mxu0 }
 0x10b   : > { %v407_v13 = vadd.f32 %v401_v12, %v301_v11  ;;  %v599_v14 = vpop.f32.mrb[1].mxu0 }
 0x10c   : > { %v404_v15 = vpop.f32.mrb[2].mxu0 }
 0x10d   : > { %408 = vst [vmem:[#allocation2] sm:$0xff] %v407_v13  ;;  %v600_v16 = vpop.f32.mrb[3].mxu0 }
 0x114   : > { %v413_v17 = vld [vmem:[#allocation2] sm:$0xff] }
 0x115   : > { %v421_v20 = vmul.f32 %v567_v18, %v413_v17 }
 0x117   : > { %v429_v21 = vadd.f32 %v568_v19, %v421_v20 }
 0x119   : > { %430 = vst [vmem:[%s744_s4] sm:$0xff] %v429_v21 }
 0x11a PF: > { %s14_s17 = sadd.s32 1, %s658_s17   ;;  %s745_s15 = smov %s654_s16 }
 0x11b   : > { %p11_p8 = scmp.ge.s32.totalorder %s14_s17, 11   ;;  %s746_s16 = smov %s748_s18 }
 0x11d   :  { %13 = sbr.rel (!%p11_p8) target bundleno = 2 (0x2), region = 83 }

// kernel: densenet121_forward.245
= control target key start
LH: loop header
LB: loop body
LE: loop exit
PB: predicated region body
PF: predicated region fallthrough
CT: control target
= control target key end

     0   :  { %v19_v0 = vlaneseq  ;;  %s124_s1 = inlined_call_operand.vmem [shape: f32[1,384], index: 1, kind: input, shape index: {}]   ;;  %s125_s2 = inlined_call_operand.vmem [shape: f32[1,384], index: 2, kind: input, shape index: {}]   ;;  %s126_s0 = inlined_call_operand.vmem [shape: f32[8,1024], index: 0, kind: input, shape index: {}]   ;;  %s127_s3 = inlined_call_operand.vmem [shape: bf16[8,384], index: 3, kind: output, shape index: {}]  }
   0x1   :  { %v17_v2 = vld [vmem:[%s124_s1] sm:$0x7]  ;;  %v15_v8 = vld [vmem:[%s126_s0 + $0x8] sm:$0xff]  ;;  %v16_v13 = vld [vmem:[%s126_s0 + $0x10] sm:$0xff] }
   0x2   :  { %v20_v1 = vshrl.u32 %v19_v0, 7  ;;  %v37_v3 = vld [vmem:[%s125_s2] sm:$0x7] }
   0x3   :  { %v14_v7 = vld [vmem:[%s126_s0] sm:$0xff] }
   0x4   :  { %v21_v4 = vsub.s32 0, %v20_v1  ;;  %v25_v5 = vsub.s32 1, %v20_v1  ;;  %v29_v6 = vsub.s32 2, %v20_v1 }
   0x6   :  { %v22_v9 = vrot.slane %v17_v2, %v21_v4  ;;  %v26_v10 = vrot.slane %v17_v2, %v25_v5  ;;  %v42_v11 = vrot.slane %v37_v3, %v21_v4  ;;  %v46_v12 = vrot.slane %v37_v3, %v25_v5 }
   0x7   :  { %v30_v14 = vrot.slane %v17_v2, %v29_v6  ;;  %v50_v15 = vrot.slane %v37_v3, %v29_v6 }
   0x8   :  { %v34_v16 = vmul.f32 %v22_v9, %v14_v7  ;;  %v35_v17 = vmul.f32 %v26_v10, %v15_v8 }
   0x9   :  { %v36_v18 = vmul.f32 %v30_v14, %v16_v13 }
   0xa   :  { %v54_v19 = vadd.f32 %v42_v11, %v34_v16  ;;  %v55_v20 = vadd.f32 %v46_v12, %v35_v17 }
   0xb   :  { %v56_v21 = vadd.f32 %v50_v15, %v36_v18 }
   0xc   :  { %v57_v22 = vmax.f32 %v54_v19, 0.0  ;;  %v58_v23 = vmax.f32 %v55_v20, 0.0 }
   0xd   :  { %v59_v24 = vmax.f32 %v56_v21, 0.0 }
   0xe   :  { %v81_v25 = vpack.c.bf16 %v58_v23, %v57_v22 }
   0xf   :  { %v82_v26 = vpack.c.bf16 %v59_v24, %v59_v24 }
  0x10   :  { %73 = vst [vmem:[%s127_s3] sm:$0xff] %v81_v25 }
  0x11   :  { %74 = vst [vmem:[%s127_s3 + $0x8] sm:$0xf] %v82_v26 }

// kernel: densenet121_forward.246
= control target key start
LH: loop header
LB: loop body
LE: loop exit
PB: predicated region body
PF: predicated region fallthrough
CT: control target
= control target key end

     0   :  { %s690_s15 = smov 0   ;;  %s692_s16 = smov 0   ;;  %s742_s0 = inlined_call_operand.vmem [shape: bf16[8,384], index: 0, kind: input, shape index: {}]   ;;  %s743_s1 = inlined_call_operand.vmem [shape: bf16[384,128], index: 1, kind: input, shape index: {}]   ;;  %s744_s2 = inlined_call_operand.vmem [shape: f32[1,128], index: 2, kind: input, shape index: {}]   ;;  %s745_s3 = inlined_call_operand.vmem [shape: f32[1,128], index: 3, kind: input, shape index: {}]   ;;  %s746_s4 = inlined_call_operand.vmem [shape: bf16[8,128], index: 4, kind: output, shape index: {}]  }
   0x1   :  { %s694_s17 = smov 0  }
   0x2 LB: > { %s26_s18 = sadd.s32 1, %s656_s16  ;;  %p555_p0 = scmp.ge.s32.totalorder %s660_s17, 1  ;;  %s660_s17 = sphi %s694_s17, %s14_s17   ;;  %s656_s16 = sphi %s692_s16, %s748_s16   ;;  %s652_s15 = sphi %s690_s15, %s747_s15  }
   0x3   : > { %p27_p1 = scmp.ge.s32.totalorder %s26_s18, 3  ;;  %p220_p2 = scmp.lt.s32.totalorder %s660_s17, 4 }
   0x5   : > { %s750_s18 = smov (%p27_p1, %s26_s18), 0  ;;  %p221_p3 = pnand %p555_p0, %p220_p2 }
   0x6   : > { %p267_p4 = scmp.lt.s32.totalorder (!%p221_p3), %s652_s15, 2  ;;  %s557_s19 = sshll.u32 (!%p221_p3), %s652_s15, 4 }
   0x7   : > { %224 = sbr.rel (%p221_p3) target bundleno = 286 (0x11e), region = 36  ;;  %p274_p5 = scmp.lt.s32.totalorder (!%p221_p3), %s557_s19, 47 }
   0x8   : > { %p559_p6 = scmp.ne.s32.totalorder (!%p221_p3), %s652_s15, 0 }
   0xe   : > { %s268_s20 = scalar_select %p267_p4, %s652_s15, 2 }
   0xf   : > { %s752_s19 = smov (!%p274_p5, %s557_s19), 47  ;;  %299 = sbr.rel (%p559_p6) target bundleno = 22 (0x16), region = 40 }
  0x10   : > { %s556_s21 = sshll.u32 %s268_s20, 2  ;;  %s558_s25 = sshll.u32 %s752_s19, 2  ;;  %v662_v0 = vmov (!%p559_p6), 0.0  }
  0x11   : > { %s716_s24 = scalar_lea.vmem %s742_s0, %s556_s21  ;;  %s280_s28 = scalar_lea.vmem %s743_s1, %s558_s25  ;;  %300 = vst [vmem:[#allocation2] sm:$0xff] (!%p559_p6), %v662_v0 }
  0x16 PF: > { %v630_v1 = vld [vmem:[%s280_s28] sm:$0xff]   ;;  %v663_v2 = vmov 0.0   ;;  %v631_v3 = vld [vmem:[%s280_s28 + $0x8] sm:$0xff]   ;;  %vm664_vm0 = vmmov 0   ;;  %v632_v4 = vld [vmem:[%s280_s28 + $0x10] sm:$0xff]   ;;  %p568_p7 = scmp.ne.s32.totalorder %s652_s15, 2 }
  0x17   : > { %583 = vmatprep.subr.bf16.mxu0 %v663_v2  ;;  %599 = vmatprep.mubr.msk.bf16.mxu0 %vm664_vm0, %v663_v2  ;;  %v633_v5 = vld [vmem:[%s280_s28 + $0x18] sm:$0xff]   ;;  %v634_v6 = vld [vmem:[%s280_s28 + $0x20] sm:$0xff]   ;;  %v635_v7 = vld [vmem:[%s280_s28 + $0x28] sm:$0xff]  }
  0x18   : > { %584 = vmatpush3.bf16.msra.mxu0 %v630_v1  ;;  %v636_v8 = vld [vmem:[%s280_s28 + $0x30] sm:$0xff]   ;;  %v637_v9 = vld [vmem:[%s280_s28 + $0x38] sm:$0xff]   ;;  %v302_v10 = vld [vmem:[%s716_s24] sm:$0xf] }
  0x19   : > { %585 = vmatprep.subr.bf16.mxu0 %v663_v2  ;;  %v301_v11 = vld [vmem:[#allocation2] sm:$0xff] }
  0x1a   : > { %v569_v18 = vld [vmem:[%s744_s2] ss:$0 sm:$0xff] (!%p568_p7) }
  0x1b   : > { %v570_v19 = vld [vmem:[%s745_s3] ss:$0 sm:$0xff] (!%p568_p7) }
  0x1c   : > { %586 = vmatpush3.bf16.msra.mxu0 %v631_v3 }
  0x1d   : > { %587 = vmatprep.subr.bf16.mxu0 %v663_v2 }
  0x20   : > { %588 = vmatpush3.bf16.msra.mxu0 %v632_v4 }
  0x21   : > { %589 = vmatprep.subr.bf16.mxu0 %v663_v2 }
  0x24   : > { %590 = vmatpush3.bf16.msra.mxu0 %v633_v5 }
  0x25   : > { %591 = vmatprep.subr.bf16.mxu0 %v663_v2 }
  0x28   : > { %592 = vmatpush3.bf16.msra.mxu0 %v634_v6 }
  0x29   : > { %593 = vmatprep.subr.bf16.mxu0 %v663_v2 }
  0x2c   : > { %594 = vmatpush3.bf16.msra.mxu0 %v635_v7 }
  0x2d   : > { %595 = vmatprep.subr.bf16.mxu0 %v663_v2 }
  0x30   : > { %596 = vmatpush3.bf16.msra.mxu0 %v636_v8 }
  0x31   : > { %597 = vmatprep.subr.bf16.mxu0 %v663_v2 }
  0x34   : > { %598 = vmatpush3.bf16.msra.mxu0 %v637_v9 }
  0x37   : > { %600 = vmatmul.mubr.bf16.vlgmr.msra.gmra.mrb[0].mxu0 %v302_v10 }
 0x107   : > { %412 = sbr.rel (%p568_p7) target bundleno = 286 (0x11e), region = 44 }
 0x10a   : > { %v401_v12 = vpop.f32.mrb[0].mxu0 }
 0x10b   : > { %v407_v13 = vadd.f32 %v401_v12, %v301_v11  ;;  %v601_v14 = vpop.f32.mrb[1].mxu0 }
 0x10c   : > { %v404_v15 = vpop.f32.mrb[2].mxu0 }
 0x10d   : > { %408 = vst [vmem:[#allocation2] sm:$0xff] %v407_v13  ;;  %v602_v16 = vpop.f32.mrb[3].mxu0 }
 0x114   : > { %v413_v17 = vld [vmem:[#allocation2] sm:$0xff] }
 0x115   : > { %v421_v20 = vmul.f32 %v569_v18, %v413_v17 }
 0x117   : > { %v429_v21 = vadd.f32 %v570_v19, %v421_v20 }
 0x119   : > { %v430_v22 = vmax.f32 %v429_v21, 0.0 }
 0x11b   : > { %v431_v23 = vpack.c.bf16 %v430_v22, %v430_v22 }
 0x11d   : > { %432 = vst [vmem:[%s746_s4] sm:$0xf] %v431_v23 }
 0x11e PF: > { %s14_s17 = sadd.s32 1, %s660_s17   ;;  %s747_s15 = smov %s656_s16 }
 0x11f   : > { %p11_p8 = scmp.ge.s32.totalorder %s14_s17, 5   ;;  %s748_s16 = smov %s750_s18 }
 0x121   :  { %13 = sbr.rel (!%p11_p8) target bundleno = 2 (0x2), region = 83 }

// kernel: densenet121_forward.257
= control target key start
LH: loop header
LB: loop body
LE: loop exit
PB: predicated region body
PF: predicated region fallthrough
CT: control target
= control target key end

     0   :  { %v20_v0 = vlaneseq  ;;  %s144_s1 = inlined_call_operand.vmem [shape: f32[1,512], index: 1, kind: input, shape index: {}]   ;;  %s145_s2 = inlined_call_operand.vmem [shape: f32[1,512], index: 2, kind: input, shape index: {}]   ;;  %s146_s0 = inlined_call_operand.vmem [shape: f32[8,1024], index: 0, kind: input, shape index: {}]   ;;  %s147_s3 = inlined_call_operand.vmem [shape: bf16[8,512], index: 3, kind: output, shape index: {}]  }
   0x1   :  { %v18_v2 = vld [vmem:[%s144_s1] sm:$0xf]  ;;  %v15_v9 = vld [vmem:[%s146_s0 + $0x8] sm:$0xff]  ;;  %v16_v14 = vld [vmem:[%s146_s0 + $0x10] sm:$0xff] }
   0x2   :  { %v21_v1 = vshrl.u32 %v20_v0, 7  ;;  %v44_v3 = vld [vmem:[%s145_s2] sm:$0xf]  ;;  %v17_v15 = vld [vmem:[%s146_s0 + $0x18] sm:$0xff] }
   0x3   :  { %v14_v8 = vld [vmem:[%s146_s0] sm:$0xff] }
   0x4   :  { %v22_v4 = vsub.s32 0, %v21_v1  ;;  %v26_v5 = vsub.s32 1, %v21_v1  ;;  %v30_v6 = vsub.s32 2, %v21_v1  ;;  %v34_v7 = vsub.s32 3, %v21_v1 }
   0x6   :  { %v23_v10 = vrot.slane %v18_v2, %v22_v4  ;;  %v27_v11 = vrot.slane %v18_v2, %v26_v5  ;;  %v49_v12 = vrot.slane %v44_v3, %v22_v4  ;;  %v53_v13 = vrot.slane %v44_v3, %v26_v5 }
   0x7   :  { %v31_v16 = vrot.slane %v18_v2, %v30_v6  ;;  %v35_v17 = vrot.slane %v18_v2, %v34_v7  ;;  %v57_v18 = vrot.slane %v44_v3, %v30_v6  ;;  %v61_v19 = vrot.slane %v44_v3, %v34_v7 }
   0x8   :  { %v40_v20 = vmul.f32 %v23_v10, %v14_v8  ;;  %v41_v21 = vmul.f32 %v27_v11, %v15_v9 }
   0x9   :  { %v42_v22 = vmul.f32 %v31_v16, %v16_v14  ;;  %v43_v23 = vmul.f32 %v35_v17, %v17_v15 }
   0xa   :  { %v66_v24 = vadd.f32 %v49_v12, %v40_v20  ;;  %v67_v25 = vadd.f32 %v53_v13, %v41_v21 }
   0xb   :  { %v68_v26 = vadd.f32 %v57_v18, %v42_v22  ;;  %v69_v27 = vadd.f32 %v61_v19, %v43_v23 }
   0xc   :  { %v70_v28 = vmax.f32 %v66_v24, 0.0  ;;  %v71_v29 = vmax.f32 %v67_v25, 0.0 }
   0xd   :  { %v72_v30 = vmax.f32 %v68_v26, 0.0  ;;  %v73_v31 = vmax.f32 %v69_v27, 0.0 }
   0xe   :  { %v98_v32 = vpack.c.bf16 %v71_v29, %v70_v28 }
   0xf   :  { %v99_v33 = vpack.c.bf16 %v73_v31, %v72_v30 }
  0x10   :  { %90 = vst [vmem:[%s147_s3] sm:$0xff] %v98_v32 }
  0x11   :  { %91 = vst [vmem:[%s147_s3 + $0x8] sm:$0xff] %v99_v33 }

// kernel: densenet121_forward.258
= control target key start
LH: loop header
LB: loop body
LE: loop exit
PB: predicated region body
PF: predicated region fallthrough
CT: control target
= control target key end

     0   :  { %s776_s15 = smov 0   ;;  %s778_s16 = smov 0   ;;  %s842_s0 = inlined_call_operand.vmem [shape: bf16[8,512], index: 0, kind: input, shape index: {}]   ;;  %s843_s1 = inlined_call_operand.vmem [shape: bf16[512,128], index: 1, kind: input, shape index: {}]   ;;  %s844_s2 = inlined_call_operand.vmem [shape: f32[1,128], index: 2, kind: input, shape index: {}]   ;;  %s845_s3 = inlined_call_operand.vmem [shape: f32[1,128], index: 3, kind: input, shape index: {}]   ;;  %s846_s4 = inlined_call_operand.vmem [shape: bf16[8,128], index: 4, kind: output, shape index: {}]  }
   0x1   :  { %s780_s17 = smov 0  }
   0x2 LB: > { %s26_s18 = sadd.s32 1, %s744_s16  ;;  %p631_p0 = scmp.ge.s32.totalorder %s748_s17, 1  ;;  %s748_s17 = sphi %s780_s17, %s14_s17   ;;  %s744_s16 = sphi %s778_s16, %s848_s16   ;;  %s740_s15 = sphi %s776_s15, %s847_s15  }
   0x3   : > { %p27_p1 = scmp.ge.s32.totalorder %s26_s18, 2  ;;  %p222_p2 = scmp.lt.s32.totalorder %s748_s17, 3 }
   0x5   : > { %s850_s18 = smov (%p27_p1, %s26_s18), 0  ;;  %p223_p3 = pnand %p631_p0, %p222_p2 }
   0x6   : > { %s632_s19 = sshll.u32 (!%p223_p3), %s740_s15, 1  ;;  %s634_s20 = sshll.u32 (!%p223_p3), %s740_s15, 5 }
   0x7   : > { %226 = sbr.rel (%p223_p3) target bundleno = 291 (0x123), region = 36  ;;  %p271_p4 = scmp.lt.s32.totalorder (!%p223_p3), %s632_s19, 3 }
   0x8   : > { %p279_p5 = scmp.lt.s32.totalorder (!%p223_p3), %s634_s20, 63  ;;  %p636_p6 = scmp.ne.s32.totalorder (!%p223_p3), %s740_s15, 0 }
   0xe   : > { %s852_s19 = smov (!%p271_p4, %s632_s19), 3  ;;  %s854_s20 = smov (!%p279_p5, %s634_s20), 63 }
   0xf   : > { %s633_s21 = sshll.u32 %s852_s19, 2  ;;  %s635_s25 = sshll.u32 %s854_s20, 2  ;;  %v750_v0 = vmov (!%p636_p6), 0.0  }
  0x10   : > { %s276_s24 = scalar_lea.vmem %s842_s0, %s633_s21  ;;  %s804_s28 = scalar_lea.vmem %s843_s1, %s635_s25  ;;  %305 = vst [vmem:[#allocation2] sm:$0xff] (!%p636_p6), %v750_v0 }
  0x11   : > { %304 = sbr.rel (%p636_p6) target bundleno = 24 (0x18), region = 40 }
  0x18 PF: > { %v708_v1 = vld [vmem:[%s804_s28 + $0x40] sm:$0xff]   ;;  %v710_v3 = vld [vmem:[%s804_s28 + $0x48] sm:$0xff]   ;;  %v712_v5 = vld [vmem:[%s804_s28 + $0x50] sm:$0xff]   ;;  %p655_p7 = scmp.ne.s32.totalorder %s740_s15, 1 }
  0x19   : > { %v709_v2 = vld [vmem:[%s804_s28] sm:$0xff]   ;;  %661 = vmatprep.subr.bf16.mxu0 %v708_v1  ;;  %v711_v4 = vld [vmem:[%s804_s28 + $0x8] sm:$0xff]   ;;  %v713_v6 = vld [vmem:[%s804_s28 + $0x10] sm:$0xff]  }
  0x1a   : > { %662 = vmatpush3.bf16.msra.mxu0 %v709_v2  ;;  %v714_v7 = vld [vmem:[%s804_s28 + $0x58] sm:$0xff]   ;;  %v716_v9 = vld [vmem:[%s804_s28 + $0x60] sm:$0xff]   ;;  %v718_v11 = vld [vmem:[%s804_s28 + $0x68] sm:$0xff]  }
  0x1b   : > { %663 = vmatprep.subr.bf16.mxu0 %v710_v3  ;;  %v715_v8 = vld [vmem:[%s804_s28 + $0x18] sm:$0xff]   ;;  %v717_v10 = vld [vmem:[%s804_s28 + $0x20] sm:$0xff]   ;;  %v719_v14 = vld [vmem:[%s804_s28 + $0x28] sm:$0xff]  }
  0x1c   : > { %v307_v12 = vld [vmem:[%s276_s24] sm:$0xff]  ;;  %v720_v15 = vld [vmem:[%s804_s28 + $0x70] sm:$0xff]   ;;  %v722_v17 = vld [vmem:[%s804_s28 + $0x78] sm:$0xff]  }
  0x1d   : > { %v638_v13 = vcombine.high %v307_v12, %v307_v12  ;;  %v721_v16 = vld [vmem:[%s804_s28 + $0x30] sm:$0xff]   ;;  %v723_v18 = vld [vmem:[%s804_s28 + $0x38] sm:$0xff]   ;;  %v637_v19 = vcombine.low %v307_v12, %v307_v12  ;;  %v306_v21 = vld [vmem:[#allocation2] sm:$0xff] }
  0x1e   : > { %664 = vmatpush3.bf16.msra.mxu0 %v711_v4  ;;  %v656_v28 = vld [vmem:[%s844_s2] ss:$0 sm:$0xff] (!%p655_p7) }
  0x1f   : > { %665 = vmatprep.subr.bf16.mxu0 %v712_v5  ;;  %475 = vmatprep.mubr.bf16.mxu0 %v638_v13  ;;  %v657_v29 = vld [vmem:[%s845_s3] ss:$0 sm:$0xff] (!%p655_p7) }
  0x22   : > { %666 = vmatpush3.bf16.msra.mxu0 %v713_v6 }
  0x23   : > { %667 = vmatprep.subr.bf16.mxu0 %v714_v7 }
  0x26   : > { %668 = vmatpush3.bf16.msra.mxu0 %v715_v8 }
  0x27   : > { %669 = vmatprep.subr.bf16.mxu0 %v716_v9 }
  0x2a   : > { %670 = vmatpush3.bf16.msra.mxu0 %v717_v10 }
  0x2b   : > { %671 = vmatprep.subr.bf16.mxu0 %v718_v11 }
  0x2e   : > { %672 = vmatpush3.bf16.msra.mxu0 %v719_v14 }
  0x2f   : > { %673 = vmatprep.subr.bf16.mxu0 %v720_v15 }
  0x32   : > { %674 = vmatpush3.bf16.msra.mxu0 %v721_v16 }
  0x33   : > { %675 = vmatprep.subr.bf16.mxu0 %v722_v17 }
  0x36   : > { %676 = vmatpush3.bf16.msra.mxu0 %v723_v18 }
  0x39   : > { %476 = vmatmul.mubr.bf16.vlgmr.msra.gmra.mrb[0].mxu0 %v637_v19 }
 0x10c   : > { %v677_v20 = vpop.f32.mrb[0].mxu0  ;;  %488 = sbr.rel (%p655_p7) target bundleno = 291 (0x123), region = 44 }
 0x10d   : > { %v678_v22 = vpop.f32.mrb[1].mxu0 }
 0x10e   : > { %v679_v23 = vadd.f32 %v678_v22, %v677_v20  ;;  %v680_v24 = vpop.f32.mrb[2].mxu0 }
 0x10f   : > { %v681_v25 = vpop.f32.mrb[3].mxu0 }
 0x110   : > { %v483_v26 = vadd.f32 %v679_v23, %v306_v21 }
 0x112   : > { %484 = vst [vmem:[#allocation2] sm:$0xff] %v483_v26 }
 0x119   : > { %v489_v27 = vld [vmem:[#allocation2] sm:$0xff] }
 0x11a   : > { %v497_v30 = vmul.f32 %v656_v28, %v489_v27 }
 0x11c   : > { %v505_v31 = vadd.f32 %v657_v29, %v497_v30 }
 0x11e   : > { %v506_v32 = vmax.f32 %v505_v31, 0.0 }
 0x120   : > { %v507_v33 = vpack.c.bf16 %v506_v32, %v506_v32 }
 0x122   : > { %508 = vst [vmem:[%s846_s4] sm:$0xf] %v507_v33 }
 0x123 PF: > { %s14_s17 = sadd.s32 1, %s748_s17   ;;  %s847_s15 = smov %s744_s16 }
 0x124   : > { %p11_p8 = scmp.ge.s32.totalorder %s14_s17, 4   ;;  %s848_s16 = smov %s850_s18 }
 0x126   :  { %13 = sbr.rel (!%p11_p8) target bundleno = 2 (0x2), region = 83 }

// kernel: densenet121_forward.270
= control target key start
LH: loop header
LB: loop body
LE: loop exit
PB: predicated region body
PF: predicated region fallthrough
CT: control target
= control target key end

     0   :  { %s690_s15 = smov 0   ;;  %s692_s16 = smov 0   ;;  %s742_s0 = inlined_call_operand.vmem [shape: bf16[8,640], index: 0, kind: input, shape index: {}]   ;;  %s743_s1 = inlined_call_operand.vmem [shape: bf16[640,128], index: 1, kind: input, shape index: {}]   ;;  %s744_s2 = inlined_call_operand.vmem [shape: f32[1,128], index: 2, kind: input, shape index: {}]   ;;  %s745_s3 = inlined_call_operand.vmem [shape: f32[1,128], index: 3, kind: input, shape index: {}]   ;;  %s746_s4 = inlined_call_operand.vmem [shape: bf16[8,128], index: 4, kind: output, shape index: {}]  }
   0x1   :  { %s694_s17 = smov 0  }
   0x2 LB: > { %s26_s18 = sadd.s32 1, %s656_s16  ;;  %p555_p0 = scmp.ge.s32.totalorder %s660_s17, 1  ;;  %s660_s17 = sphi %s694_s17, %s14_s17   ;;  %s656_s16 = sphi %s692_s16, %s748_s16   ;;  %s652_s15 = sphi %s690_s15, %s747_s15  }
   0x3   : > { %p27_p1 = scmp.ge.s32.totalorder %s26_s18, 5  ;;  %p220_p2 = scmp.lt.s32.totalorder %s660_s17, 6 }
   0x5   : > { %s750_s18 = smov (%p27_p1, %s26_s18), 0  ;;  %p221_p3 = pnand %p555_p0, %p220_p2 }
   0x6   : > { %p267_p4 = scmp.lt.s32.totalorder (!%p221_p3), %s652_s15, 4  ;;  %s557_s19 = sshll.u32 (!%p221_p3), %s652_s15, 4 }
   0x7   : > { %224 = sbr.rel (%p221_p3) target bundleno = 286 (0x11e), region = 36  ;;  %p274_p5 = scmp.lt.s32.totalorder (!%p221_p3), %s557_s19, 79 }
   0x8   : > { %p559_p6 = scmp.ne.s32.totalorder (!%p221_p3), %s652_s15, 0 }
   0xe   : > { %s268_s20 = scalar_select %p267_p4, %s652_s15, 4 }
   0xf   : > { %s752_s19 = smov (!%p274_p5, %s557_s19), 79  ;;  %299 = sbr.rel (%p559_p6) target bundleno = 22 (0x16), region = 40 }
  0x10   : > { %s556_s21 = sshll.u32 %s268_s20, 2  ;;  %s558_s25 = sshll.u32 %s752_s19, 2  ;;  %v662_v0 = vmov (!%p559_p6), 0.0  }
  0x11   : > { %s716_s24 = scalar_lea.vmem %s742_s0, %s556_s21  ;;  %s280_s28 = scalar_lea.vmem %s743_s1, %s558_s25  ;;  %300 = vst [vmem:[#allocation2] sm:$0xff] (!%p559_p6), %v662_v0 }
  0x16 PF: > { %v630_v1 = vld [vmem:[%s280_s28] sm:$0xff]   ;;  %v663_v2 = vmov 0.0   ;;  %v631_v3 = vld [vmem:[%s280_s28 + $0x8] sm:$0xff]   ;;  %vm664_vm0 = vmmov 0   ;;  %v632_v4 = vld [vmem:[%s280_s28 + $0x10] sm:$0xff]   ;;  %p568_p7 = scmp.ne.s32.totalorder %s652_s15, 4 }
  0x17   : > { %583 = vmatprep.subr.bf16.mxu0 %v663_v2  ;;  %599 = vmatprep.mubr.msk.bf16.mxu0 %vm664_vm0, %v663_v2  ;;  %v633_v5 = vld [vmem:[%s280_s28 + $0x18] sm:$0xff]   ;;  %v634_v6 = vld [vmem:[%s280_s28 + $0x20] sm:$0xff]   ;;  %v635_v7 = vld [vmem:[%s280_s28 + $0x28] sm:$0xff]  }
  0x18   : > { %584 = vmatpush3.bf16.msra.mxu0 %v630_v1  ;;  %v636_v8 = vld [vmem:[%s280_s28 + $0x30] sm:$0xff]   ;;  %v637_v9 = vld [vmem:[%s280_s28 + $0x38] sm:$0xff]   ;;  %v302_v10 = vld [vmem:[%s716_s24] sm:$0xf] }
  0x19   : > { %585 = vmatprep.subr.bf16.mxu0 %v663_v2  ;;  %v301_v11 = vld [vmem:[#allocation2] sm:$0xff] }
  0x1a   : > { %v569_v18 = vld [vmem:[%s744_s2] ss:$0 sm:$0xff] (!%p568_p7) }
  0x1b   : > { %v570_v19 = vld [vmem:[%s745_s3] ss:$0 sm:$0xff] (!%p568_p7) }
  0x1c   : > { %586 = vmatpush3.bf16.msra.mxu0 %v631_v3 }
  0x1d   : > { %587 = vmatprep.subr.bf16.mxu0 %v663_v2 }
  0x20   : > { %588 = vmatpush3.bf16.msra.mxu0 %v632_v4 }
  0x21   : > { %589 = vmatprep.subr.bf16.mxu0 %v663_v2 }
  0x24   : > { %590 = vmatpush3.bf16.msra.mxu0 %v633_v5 }
  0x25   : > { %591 = vmatprep.subr.bf16.mxu0 %v663_v2 }
  0x28   : > { %592 = vmatpush3.bf16.msra.mxu0 %v634_v6 }
  0x29   : > { %593 = vmatprep.subr.bf16.mxu0 %v663_v2 }
  0x2c   : > { %594 = vmatpush3.bf16.msra.mxu0 %v635_v7 }
  0x2d   : > { %595 = vmatprep.subr.bf16.mxu0 %v663_v2 }
  0x30   : > { %596 = vmatpush3.bf16.msra.mxu0 %v636_v8 }
  0x31   : > { %597 = vmatprep.subr.bf16.mxu0 %v663_v2 }
  0x34   : > { %598 = vmatpush3.bf16.msra.mxu0 %v637_v9 }
  0x37   : > { %600 = vmatmul.mubr.bf16.vlgmr.msra.gmra.mrb[0].mxu0 %v302_v10 }
 0x107   : > { %412 = sbr.rel (%p568_p7) target bundleno = 286 (0x11e), region = 44 }
 0x10a   : > { %v401_v12 = vpop.f32.mrb[0].mxu0 }
 0x10b   : > { %v407_v13 = vadd.f32 %v401_v12, %v301_v11  ;;  %v601_v14 = vpop.f32.mrb[1].mxu0 }
 0x10c   : > { %v404_v15 = vpop.f32.mrb[2].mxu0 }
 0x10d   : > { %408 = vst [vmem:[#allocation2] sm:$0xff] %v407_v13  ;;  %v602_v16 = vpop.f32.mrb[3].mxu0 }
 0x114   : > { %v413_v17 = vld [vmem:[#allocation2] sm:$0xff] }
 0x115   : > { %v421_v20 = vmul.f32 %v569_v18, %v413_v17 }
 0x117   : > { %v429_v21 = vadd.f32 %v570_v19, %v421_v20 }
 0x119   : > { %v430_v22 = vmax.f32 %v429_v21, 0.0 }
 0x11b   : > { %v431_v23 = vpack.c.bf16 %v430_v22, %v430_v22 }
 0x11d   : > { %432 = vst [vmem:[%s746_s4] sm:$0xf] %v431_v23 }
 0x11e PF: > { %s14_s17 = sadd.s32 1, %s660_s17   ;;  %s747_s15 = smov %s656_s16 }
 0x11f   : > { %p11_p8 = scmp.ge.s32.totalorder %s14_s17, 7   ;;  %s748_s16 = smov %s750_s18 }
 0x121   :  { %13 = sbr.rel (!%p11_p8) target bundleno = 2 (0x2), region = 83 }

// kernel: densenet121_forward.269
= control target key start
LH: loop header
LB: loop body
LE: loop exit
PB: predicated region body
PF: predicated region fallthrough
CT: control target
= control target key end

     0   :  { %v21_v0 = vlaneseq  ;;  %s172_s1 = inlined_call_operand.vmem [shape: f32[1,640], index: 1, kind: input, shape index: {}]   ;;  %s173_s2 = inlined_call_operand.vmem [shape: f32[1,640], index: 2, kind: input, shape index: {}]   ;;  %s174_s0 = inlined_call_operand.vmem [shape: f32[8,1024], index: 0, kind: input, shape index: {}]   ;;  %s175_s3 = inlined_call_operand.vmem [shape: bf16[8,640], index: 3, kind: output, shape index: {}]  }
   0x1   :  { %v19_v2 = vld [vmem:[%s172_s1] sm:$0x1f]  ;;  %v15_v9 = vld [vmem:[%s174_s0 + $0x8] sm:$0xff]  ;;  %v16_v15 = vld [vmem:[%s174_s0 + $0x10] sm:$0xff] }
   0x2   :  { %v22_v1 = vshrl.u32 %v21_v0, 7  ;;  %v51_v3 = vld [vmem:[%s173_s2] sm:$0x1f]  ;;  %v17_v16 = vld [vmem:[%s174_s0 + $0x18] sm:$0xff] }
   0x3   :  { %v14_v8 = vld [vmem:[%s174_s0] sm:$0xff] }
   0x4   :  { %v23_v4 = vsub.s32 0, %v22_v1  ;;  %v27_v5 = vsub.s32 1, %v22_v1  ;;  %v31_v6 = vsub.s32 2, %v22_v1  ;;  %v35_v7 = vsub.s32 3, %v22_v1  ;;  %v18_v21 = vld [vmem:[%s174_s0 + $0x20] sm:$0xff] }
   0x5   :  { %v39_v10 = vsub.s32 4, %v22_v1 }
   0x6   :  { %v24_v11 = vrot.slane %v19_v2, %v23_v4  ;;  %v28_v12 = vrot.slane %v19_v2, %v27_v5  ;;  %v56_v13 = vrot.slane %v51_v3, %v23_v4  ;;  %v60_v14 = vrot.slane %v51_v3, %v27_v5 }
   0x7   :  { %v32_v17 = vrot.slane %v19_v2, %v31_v6  ;;  %v36_v18 = vrot.slane %v19_v2, %v35_v7  ;;  %v64_v19 = vrot.slane %v51_v3, %v31_v6  ;;  %v68_v20 = vrot.slane %v51_v3, %v35_v7 }
   0x8   :  { %v46_v22 = vmul.f32 %v24_v11, %v14_v8  ;;  %v47_v23 = vmul.f32 %v28_v12, %v15_v9  ;;  %v40_v24 = vrot.slane %v19_v2, %v39_v10  ;;  %v72_v25 = vrot.slane %v51_v3, %v39_v10 }
   0x9   :  { %v48_v26 = vmul.f32 %v32_v17, %v16_v15  ;;  %v49_v27 = vmul.f32 %v36_v18, %v17_v16 }
   0xa   :  { %v78_v28 = vadd.f32 %v56_v13, %v46_v22  ;;  %v79_v29 = vadd.f32 %v60_v14, %v47_v23  ;;  %v50_v30 = vmul.f32 %v40_v24, %v18_v21 }
   0xb   :  { %v80_v31 = vadd.f32 %v64_v19, %v48_v26  ;;  %v81_v32 = vadd.f32 %v68_v20, %v49_v27 }
   0xc   :  { %v83_v33 = vmax.f32 %v78_v28, 0.0  ;;  %v84_v34 = vmax.f32 %v79_v29, 0.0  ;;  %v82_v35 = vadd.f32 %v72_v25, %v50_v30 }
   0xd   :  { %v85_v36 = vmax.f32 %v80_v31, 0.0  ;;  %v86_v37 = vmax.f32 %v81_v32, 0.0 }
   0xe   :  { %v119_v38 = vpack.c.bf16 %v84_v34, %v83_v33  ;;  %v87_v39 = vmax.f32 %v82_v35, 0.0 }
   0xf   :  { %v120_v40 = vpack.c.bf16 %v86_v37, %v85_v36 }
  0x10   :  { %109 = vst [vmem:[%s175_s3] sm:$0xff] %v119_v38  ;;  %v121_v41 = vpack.c.bf16 %v87_v39, %v87_v39 }
  0x11   :  { %110 = vst [vmem:[%s175_s3 + $0x8] sm:$0xff] %v120_v40 }
  0x12   :  { %111 = vst [vmem:[%s175_s3 + $0x10] sm:$0xf] %v121_v41 }

// kernel: densenet121_forward.281
= control target key start
LH: loop header
LB: loop body
LE: loop exit
PB: predicated region body
PF: predicated region fallthrough
CT: control target
= control target key end

     0   :  { %v22_v0 = vlaneseq  ;;  %s192_s1 = inlined_call_operand.vmem [shape: f32[1,768], index: 1, kind: input, shape index: {}]   ;;  %s193_s2 = inlined_call_operand.vmem [shape: f32[1,768], index: 2, kind: input, shape index: {}]   ;;  %s194_s0 = inlined_call_operand.vmem [shape: f32[8,1024], index: 0, kind: input, shape index: {}]   ;;  %s195_s3 = inlined_call_operand.vmem [shape: bf16[8,768], index: 3, kind: output, shape index: {}]  }
   0x1   :  { %v20_v2 = vld [vmem:[%s192_s1] sm:$0x3f]  ;;  %v15_v9 = vld [vmem:[%s194_s0 + $0x8] sm:$0xff]  ;;  %v16_v16 = vld [vmem:[%s194_s0 + $0x10] sm:$0xff] }
   0x2   :  { %v23_v1 = vshrl.u32 %v22_v0, 7  ;;  %v58_v3 = vld [vmem:[%s193_s2] sm:$0x3f]  ;;  %v17_v17 = vld [vmem:[%s194_s0 + $0x18] sm:$0xff]  ;;  %v19_v23 = vld [vmem:[%s194_s0 + $0x28] sm:$0xff] }
   0x3   :  { %v14_v8 = vld [vmem:[%s194_s0] sm:$0xff] }
   0x4   :  { %v24_v4 = vsub.s32 0, %v23_v1  ;;  %v28_v5 = vsub.s32 1, %v23_v1  ;;  %v32_v6 = vsub.s32 2, %v23_v1  ;;  %v36_v7 = vsub.s32 3, %v23_v1  ;;  %v18_v22 = vld [vmem:[%s194_s0 + $0x20] sm:$0xff] }
   0x5   :  { %v40_v10 = vsub.s32 4, %v23_v1  ;;  %v44_v11 = vsub.s32 5, %v23_v1 }
   0x6   :  { %v25_v12 = vrot.slane %v20_v2, %v24_v4  ;;  %v29_v13 = vrot.slane %v20_v2, %v28_v5  ;;  %v63_v14 = vrot.slane %v58_v3, %v24_v4  ;;  %v67_v15 = vrot.slane %v58_v3, %v28_v5 }
   0x7   :  { %v33_v18 = vrot.slane %v20_v2, %v32_v6  ;;  %v37_v19 = vrot.slane %v20_v2, %v36_v7  ;;  %v71_v20 = vrot.slane %v58_v3, %v32_v6  ;;  %v75_v21 = vrot.slane %v58_v3, %v36_v7 }
   0x8   :  { %v52_v24 = vmul.f32 %v25_v12, %v14_v8  ;;  %v53_v25 = vmul.f32 %v29_v13, %v15_v9  ;;  %v41_v26 = vrot.slane %v20_v2, %v40_v10  ;;  %v45_v27 = vrot.slane %v20_v2, %v44_v11 }
   0x9   :  { %v54_v28 = vmul.f32 %v33_v18, %v16_v16  ;;  %v55_v29 = vmul.f32 %v37_v19, %v17_v17  ;;  %v79_v30 = vrot.slane %v58_v3, %v40_v10  ;;  %v83_v31 = vrot.slane %v58_v3, %v44_v11 }
   0xa   :  { %v90_v32 = vadd.f32 %v63_v14, %v52_v24  ;;  %v91_v33 = vadd.f32 %v67_v15, %v53_v25  ;;  %v56_v34 = vmul.f32 %v41_v26, %v18_v22  ;;  %v57_v35 = vmul.f32 %v45_v27, %v19_v23 }
   0xb   :  { %v92_v36 = vadd.f32 %v71_v20, %v54_v28  ;;  %v93_v37 = vadd.f32 %v75_v21, %v55_v29 }
   0xc   :  { %v96_v38 = vmax.f32 %v90_v32, 0.0  ;;  %v97_v39 = vmax.f32 %v91_v33, 0.0  ;;  %v94_v40 = vadd.f32 %v79_v30, %v56_v34  ;;  %v95_v41 = vadd.f32 %v83_v31, %v57_v35 }
   0xd   :  { %v98_v42 = vmax.f32 %v92_v36, 0.0  ;;  %v99_v43 = vmax.f32 %v93_v37, 0.0 }
   0xe   :  { %v136_v44 = vpack.c.bf16 %v97_v39, %v96_v38  ;;  %v100_v45 = vmax.f32 %v94_v40, 0.0  ;;  %v101_v46 = vmax.f32 %v95_v41, 0.0 }
   0xf   :  { %v137_v47 = vpack.c.bf16 %v99_v43, %v98_v42 }
  0x10   :  { %126 = vst [vmem:[%s195_s3] sm:$0xff] %v136_v44  ;;  %v138_v48 = vpack.c.bf16 %v101_v46, %v100_v45 }
  0x11   :  { %127 = vst [vmem:[%s195_s3 + $0x8] sm:$0xff] %v137_v47 }
  0x12   :  { %128 = vst [vmem:[%s195_s3 + $0x10] sm:$0xff] %v138_v48 }

// kernel: densenet121_forward.282
= control target key start
LH: loop header
LB: loop body
LE: loop exit
PB: predicated region body
PF: predicated region fallthrough
CT: control target
= control target key end

     0   :  { %s776_s15 = smov 0   ;;  %s778_s16 = smov 0   ;;  %s842_s0 = inlined_call_operand.vmem [shape: bf16[8,768], index: 0, kind: input, shape index: {}]   ;;  %s843_s1 = inlined_call_operand.vmem [shape: bf16[768,128], index: 1, kind: input, shape index: {}]   ;;  %s844_s2 = inlined_call_operand.vmem [shape: f32[1,128], index: 2, kind: input, shape index: {}]   ;;  %s845_s3 = inlined_call_operand.vmem [shape: f32[1,128], index: 3, kind: input, shape index: {}]   ;;  %s846_s4 = inlined_call_operand.vmem [shape: bf16[8,128], index: 4, kind: output, shape index: {}]  }
   0x1   :  { %s780_s17 = smov 0  }
   0x2 LB: > { %s26_s18 = sadd.s32 1, %s744_s16  ;;  %p631_p0 = scmp.ge.s32.totalorder %s748_s17, 1  ;;  %s748_s17 = sphi %s780_s17, %s14_s17   ;;  %s744_s16 = sphi %s778_s16, %s848_s16   ;;  %s740_s15 = sphi %s776_s15, %s847_s15  }
   0x3   : > { %p27_p1 = scmp.ge.s32.totalorder %s26_s18, 3  ;;  %p222_p2 = scmp.lt.s32.totalorder %s748_s17, 4 }
   0x5   : > { %s850_s18 = smov (%p27_p1, %s26_s18), 0  ;;  %p223_p3 = pnand %p631_p0, %p222_p2 }
   0x6   : > { %s632_s19 = sshll.u32 (!%p223_p3), %s740_s15, 1  ;;  %s634_s20 = sshll.u32 (!%p223_p3), %s740_s15, 5 }
   0x7   : > { %226 = sbr.rel (%p223_p3) target bundleno = 291 (0x123), region = 36  ;;  %p271_p4 = scmp.lt.s32.totalorder (!%p223_p3), %s632_s19, 5 }
   0x8   : > { %p279_p5 = scmp.lt.s32.totalorder (!%p223_p3), %s634_s20, 95  ;;  %p636_p6 = scmp.ne.s32.totalorder (!%p223_p3), %s740_s15, 0 }
   0xe   : > { %s852_s19 = smov (!%p271_p4, %s632_s19), 5  ;;  %s854_s20 = smov (!%p279_p5, %s634_s20), 95 }
   0xf   : > { %s633_s21 = sshll.u32 %s852_s19, 2  ;;  %s635_s25 = sshll.u32 %s854_s20, 2  ;;  %v750_v0 = vmov (!%p636_p6), 0.0  }
  0x10   : > { %s276_s24 = scalar_lea.vmem %s842_s0, %s633_s21  ;;  %s804_s28 = scalar_lea.vmem %s843_s1, %s635_s25  ;;  %305 = vst [vmem:[#allocation2] sm:$0xff] (!%p636_p6), %v750_v0 }
  0x11   : > { %304 = sbr.rel (%p636_p6) target bundleno = 24 (0x18), region = 40 }
  0x18 PF: > { %v708_v1 = vld [vmem:[%s804_s28 + $0x40] sm:$0xff]   ;;  %v710_v3 = vld [vmem:[%s804_s28 + $0x48] sm:$0xff]   ;;  %v712_v5 = vld [vmem:[%s804_s28 + $0x50] sm:$0xff]   ;;  %p655_p7 = scmp.ne.s32.totalorder %s740_s15, 2 }
  0x19   : > { %v709_v2 = vld [vmem:[%s804_s28] sm:$0xff]   ;;  %661 = vmatprep.subr.bf16.mxu0 %v708_v1  ;;  %v711_v4 = vld [vmem:[%s804_s28 + $0x8] sm:$0xff]   ;;  %v713_v6 = vld [vmem:[%s804_s28 + $0x10] sm:$0xff]  }
  0x1a   : > { %662 = vmatpush3.bf16.msra.mxu0 %v709_v2  ;;  %v714_v7 = vld [vmem:[%s804_s28 + $0x58] sm:$0xff]   ;;  %v716_v9 = vld [vmem:[%s804_s28 + $0x60] sm:$0xff]   ;;  %v718_v11 = vld [vmem:[%s804_s28 + $0x68] sm:$0xff]  }
  0x1b   : > { %663 = vmatprep.subr.bf16.mxu0 %v710_v3  ;;  %v715_v8 = vld [vmem:[%s804_s28 + $0x18] sm:$0xff]   ;;  %v717_v10 = vld [vmem:[%s804_s28 + $0x20] sm:$0xff]   ;;  %v719_v14 = vld [vmem:[%s804_s28 + $0x28] sm:$0xff]  }
  0x1c   : > { %v307_v12 = vld [vmem:[%s276_s24] sm:$0xff]  ;;  %v720_v15 = vld [vmem:[%s804_s28 + $0x70] sm:$0xff]   ;;  %v722_v17 = vld [vmem:[%s804_s28 + $0x78] sm:$0xff]  }
  0x1d   : > { %v638_v13 = vcombine.high %v307_v12, %v307_v12  ;;  %v721_v16 = vld [vmem:[%s804_s28 + $0x30] sm:$0xff]   ;;  %v723_v18 = vld [vmem:[%s804_s28 + $0x38] sm:$0xff]   ;;  %v637_v19 = vcombine.low %v307_v12, %v307_v12  ;;  %v306_v21 = vld [vmem:[#allocation2] sm:$0xff] }
  0x1e   : > { %664 = vmatpush3.bf16.msra.mxu0 %v711_v4  ;;  %v656_v28 = vld [vmem:[%s844_s2] ss:$0 sm:$0xff] (!%p655_p7) }
  0x1f   : > { %665 = vmatprep.subr.bf16.mxu0 %v712_v5  ;;  %475 = vmatprep.mubr.bf16.mxu0 %v638_v13  ;;  %v657_v29 = vld [vmem:[%s845_s3] ss:$0 sm:$0xff] (!%p655_p7) }
  0x22   : > { %666 = vmatpush3.bf16.msra.mxu0 %v713_v6 }
  0x23   : > { %667 = vmatprep.subr.bf16.mxu0 %v714_v7 }
  0x26   : > { %668 = vmatpush3.bf16.msra.mxu0 %v715_v8 }
  0x27   : > { %669 = vmatprep.subr.bf16.mxu0 %v716_v9 }
  0x2a   : > { %670 = vmatpush3.bf16.msra.mxu0 %v717_v10 }
  0x2b   : > { %671 = vmatprep.subr.bf16.mxu0 %v718_v11 }
  0x2e   : > { %672 = vmatpush3.bf16.msra.mxu0 %v719_v14 }
  0x2f   : > { %673 = vmatprep.subr.bf16.mxu0 %v720_v15 }
  0x32   : > { %674 = vmatpush3.bf16.msra.mxu0 %v721_v16 }
  0x33   : > { %675 = vmatprep.subr.bf16.mxu0 %v722_v17 }
  0x36   : > { %676 = vmatpush3.bf16.msra.mxu0 %v723_v18 }
  0x39   : > { %476 = vmatmul.mubr.bf16.vlgmr.msra.gmra.mrb[0].mxu0 %v637_v19 }
 0x10c   : > { %v677_v20 = vpop.f32.mrb[0].mxu0  ;;  %488 = sbr.rel (%p655_p7) target bundleno = 291 (0x123), region = 44 }
 0x10d   : > { %v678_v22 = vpop.f32.mrb[1].mxu0 }
 0x10e   : > { %v679_v23 = vadd.f32 %v678_v22, %v677_v20  ;;  %v680_v24 = vpop.f32.mrb[2].mxu0 }
 0x10f   : > { %v681_v25 = vpop.f32.mrb[3].mxu0 }
 0x110   : > { %v483_v26 = vadd.f32 %v679_v23, %v306_v21 }
 0x112   : > { %484 = vst [vmem:[#allocation2] sm:$0xff] %v483_v26 }
 0x119   : > { %v489_v27 = vld [vmem:[#allocation2] sm:$0xff] }
 0x11a   : > { %v497_v30 = vmul.f32 %v656_v28, %v489_v27 }
 0x11c   : > { %v505_v31 = vadd.f32 %v657_v29, %v497_v30 }
 0x11e   : > { %v506_v32 = vmax.f32 %v505_v31, 0.0 }
 0x120   : > { %v507_v33 = vpack.c.bf16 %v506_v32, %v506_v32 }
 0x122   : > { %508 = vst [vmem:[%s846_s4] sm:$0xf] %v507_v33 }
 0x123 PF: > { %s14_s17 = sadd.s32 1, %s748_s17   ;;  %s847_s15 = smov %s744_s16 }
 0x124   : > { %p11_p8 = scmp.ge.s32.totalorder %s14_s17, 5   ;;  %s848_s16 = smov %s850_s18 }
 0x126   :  { %13 = sbr.rel (!%p11_p8) target bundleno = 2 (0x2), region = 83 }

// kernel: densenet121_forward.294
= control target key start
LH: loop header
LB: loop body
LE: loop exit
PB: predicated region body
PF: predicated region fallthrough
CT: control target
= control target key end

     0   :  { %s690_s15 = smov 0   ;;  %s692_s16 = smov 0   ;;  %s742_s0 = inlined_call_operand.vmem [shape: bf16[8,896], index: 0, kind: input, shape index: {}]   ;;  %s743_s1 = inlined_call_operand.vmem [shape: bf16[896,128], index: 1, kind: input, shape index: {}]   ;;  %s744_s2 = inlined_call_operand.vmem [shape: f32[1,128], index: 2, kind: input, shape index: {}]   ;;  %s745_s3 = inlined_call_operand.vmem [shape: f32[1,128], index: 3, kind: input, shape index: {}]   ;;  %s746_s4 = inlined_call_operand.vmem [shape: bf16[8,128], index: 4, kind: output, shape index: {}]  }
   0x1   :  { %s694_s17 = smov 0  }
   0x2 LB: > { %s26_s18 = sadd.s32 1, %s656_s16  ;;  %p555_p0 = scmp.ge.s32.totalorder %s660_s17, 1  ;;  %s660_s17 = sphi %s694_s17, %s14_s17   ;;  %s656_s16 = sphi %s692_s16, %s748_s16   ;;  %s652_s15 = sphi %s690_s15, %s747_s15  }
   0x3   : > { %p27_p1 = scmp.ge.s32.totalorder %s26_s18, 7  ;;  %p220_p2 = scmp.lt.s32.totalorder %s660_s17, 8 }
   0x5   : > { %s750_s18 = smov (%p27_p1, %s26_s18), 0  ;;  %p221_p3 = pnand %p555_p0, %p220_p2 }
   0x6   : > { %p267_p4 = scmp.lt.s32.totalorder (!%p221_p3), %s652_s15, 6  ;;  %s557_s19 = sshll.u32 (!%p221_p3), %s652_s15, 4 }
   0x7   : > { %224 = sbr.rel (%p221_p3) target bundleno = 286 (0x11e), region = 36  ;;  %p274_p5 = scmp.lt.s32.totalorder (!%p221_p3), %s557_s19, 111 }
   0x8   : > { %p559_p6 = scmp.ne.s32.totalorder (!%p221_p3), %s652_s15, 0 }
   0xe   : > { %s268_s20 = scalar_select %p267_p4, %s652_s15, 6 }
   0xf   : > { %s752_s19 = smov (!%p274_p5, %s557_s19), 111  ;;  %299 = sbr.rel (%p559_p6) target bundleno = 22 (0x16), region = 40 }
  0x10   : > { %s556_s21 = sshll.u32 %s268_s20, 2  ;;  %s558_s25 = sshll.u32 %s752_s19, 2  ;;  %v662_v0 = vmov (!%p559_p6), 0.0  }
  0x11   : > { %s716_s24 = scalar_lea.vmem %s742_s0, %s556_s21  ;;  %s280_s28 = scalar_lea.vmem %s743_s1, %s558_s25  ;;  %300 = vst [vmem:[#allocation2] sm:$0xff] (!%p559_p6), %v662_v0 }
  0x16 PF: > { %v630_v1 = vld [vmem:[%s280_s28] sm:$0xff]   ;;  %v663_v2 = vmov 0.0   ;;  %v631_v3 = vld [vmem:[%s280_s28 + $0x8] sm:$0xff]   ;;  %vm664_vm0 = vmmov 0   ;;  %v632_v4 = vld [vmem:[%s280_s28 + $0x10] sm:$0xff]   ;;  %p568_p7 = scmp.ne.s32.totalorder %s652_s15, 6 }
  0x17   : > { %583 = vmatprep.subr.bf16.mxu0 %v663_v2  ;;  %599 = vmatprep.mubr.msk.bf16.mxu0 %vm664_vm0, %v663_v2  ;;  %v633_v5 = vld [vmem:[%s280_s28 + $0x18] sm:$0xff]   ;;  %v634_v6 = vld [vmem:[%s280_s28 + $0x20] sm:$0xff]   ;;  %v635_v7 = vld [vmem:[%s280_s28 + $0x28] sm:$0xff]  }
  0x18   : > { %584 = vmatpush3.bf16.msra.mxu0 %v630_v1  ;;  %v636_v8 = vld [vmem:[%s280_s28 + $0x30] sm:$0xff]   ;;  %v637_v9 = vld [vmem:[%s280_s28 + $0x38] sm:$0xff]   ;;  %v302_v10 = vld [vmem:[%s716_s24] sm:$0xf] }
  0x19   : > { %585 = vmatprep.subr.bf16.mxu0 %v663_v2  ;;  %v301_v11 = vld [vmem:[#allocation2] sm:$0xff] }
  0x1a   : > { %v569_v18 = vld [vmem:[%s744_s2] ss:$0 sm:$0xff] (!%p568_p7) }
  0x1b   : > { %v570_v19 = vld [vmem:[%s745_s3] ss:$0 sm:$0xff] (!%p568_p7) }
  0x1c   : > { %586 = vmatpush3.bf16.msra.mxu0 %v631_v3 }
  0x1d   : > { %587 = vmatprep.subr.bf16.mxu0 %v663_v2 }
  0x20   : > { %588 = vmatpush3.bf16.msra.mxu0 %v632_v4 }
  0x21   : > { %589 = vmatprep.subr.bf16.mxu0 %v663_v2 }
  0x24   : > { %590 = vmatpush3.bf16.msra.mxu0 %v633_v5 }
  0x25   : > { %591 = vmatprep.subr.bf16.mxu0 %v663_v2 }
  0x28   : > { %592 = vmatpush3.bf16.msra.mxu0 %v634_v6 }
  0x29   : > { %593 = vmatprep.subr.bf16.mxu0 %v663_v2 }
  0x2c   : > { %594 = vmatpush3.bf16.msra.mxu0 %v635_v7 }
  0x2d   : > { %595 = vmatprep.subr.bf16.mxu0 %v663_v2 }
  0x30   : > { %596 = vmatpush3.bf16.msra.mxu0 %v636_v8 }
  0x31   : > { %597 = vmatprep.subr.bf16.mxu0 %v663_v2 }
  0x34   : > { %598 = vmatpush3.bf16.msra.mxu0 %v637_v9 }
  0x37   : > { %600 = vmatmul.mubr.bf16.vlgmr.msra.gmra.mrb[0].mxu0 %v302_v10 }
 0x107   : > { %412 = sbr.rel (%p568_p7) target bundleno = 286 (0x11e), region = 44 }
 0x10a   : > { %v401_v12 = vpop.f32.mrb[0].mxu0 }
 0x10b   : > { %v407_v13 = vadd.f32 %v401_v12, %v301_v11  ;;  %v601_v14 = vpop.f32.mrb[1].mxu0 }
 0x10c   : > { %v404_v15 = vpop.f32.mrb[2].mxu0 }
 0x10d   : > { %408 = vst [vmem:[#allocation2] sm:$0xff] %v407_v13  ;;  %v602_v16 = vpop.f32.mrb[3].mxu0 }
 0x114   : > { %v413_v17 = vld [vmem:[#allocation2] sm:$0xff] }
 0x115   : > { %v421_v20 = vmul.f32 %v569_v18, %v413_v17 }
 0x117   : > { %v429_v21 = vadd.f32 %v570_v19, %v421_v20 }
 0x119   : > { %v430_v22 = vmax.f32 %v429_v21, 0.0 }
 0x11b   : > { %v431_v23 = vpack.c.bf16 %v430_v22, %v430_v22 }
 0x11d   : > { %432 = vst [vmem:[%s746_s4] sm:$0xf] %v431_v23 }
 0x11e PF: > { %s14_s17 = sadd.s32 1, %s660_s17   ;;  %s747_s15 = smov %s656_s16 }
 0x11f   : > { %p11_p8 = scmp.ge.s32.totalorder %s14_s17, 9   ;;  %s748_s16 = smov %s750_s18 }
 0x121   :  { %13 = sbr.rel (!%p11_p8) target bundleno = 2 (0x2), region = 83 }

// kernel: densenet121_forward.293
= control target key start
LH: loop header
LB: loop body
LE: loop exit
PB: predicated region body
PF: predicated region fallthrough
CT: control target
= control target key end

     0   :  { %v23_v0 = vlaneseq  ;;  %s220_s1 = inlined_call_operand.vmem [shape: f32[1,896], index: 1, kind: input, shape index: {}]   ;;  %s221_s2 = inlined_call_operand.vmem [shape: f32[1,896], index: 2, kind: input, shape index: {}]   ;;  %s222_s0 = inlined_call_operand.vmem [shape: f32[8,1024], index: 0, kind: input, shape index: {}]   ;;  %s223_s3 = inlined_call_operand.vmem [shape: bf16[8,896], index: 3, kind: output, shape index: {}]  }
   0x1   :  { %v21_v2 = vld [vmem:[%s220_s1] sm:$0xff]  ;;  %v15_v9 = vld [vmem:[%s222_s0 + $0x8] sm:$0xff]  ;;  %v16_v17 = vld [vmem:[%s222_s0 + $0x10] sm:$0xff] }
   0x2   :  { %v24_v1 = vshrl.u32 %v23_v0, 7  ;;  %v65_v3 = vld [vmem:[%s221_s2] sm:$0xff]  ;;  %v17_v18 = vld [vmem:[%s222_s0 + $0x18] sm:$0xff]  ;;  %v19_v24 = vld [vmem:[%s222_s0 + $0x28] sm:$0xff] }
   0x3   :  { %v14_v8 = vld [vmem:[%s222_s0] sm:$0xff]  ;;  %v20_v37 = vld [vmem:[%s222_s0 + $0x30] sm:$0xff] }
   0x4   :  { %v25_v4 = vsub.s32 0, %v24_v1  ;;  %v29_v5 = vsub.s32 1, %v24_v1  ;;  %v33_v6 = vsub.s32 2, %v24_v1  ;;  %v37_v7 = vsub.s32 3, %v24_v1  ;;  %v18_v23 = vld [vmem:[%s222_s0 + $0x20] sm:$0xff] }
   0x5   :  { %v41_v10 = vsub.s32 4, %v24_v1  ;;  %v45_v11 = vsub.s32 5, %v24_v1  ;;  %v49_v12 = vsub.s32 6, %v24_v1 }
   0x6   :  { %v26_v13 = vrot.slane %v21_v2, %v25_v4  ;;  %v30_v14 = vrot.slane %v21_v2, %v29_v5  ;;  %v70_v15 = vrot.slane %v65_v3, %v25_v4  ;;  %v74_v16 = vrot.slane %v65_v3, %v29_v5 }
   0x7   :  { %v34_v19 = vrot.slane %v21_v2, %v33_v6  ;;  %v38_v20 = vrot.slane %v21_v2, %v37_v7  ;;  %v78_v21 = vrot.slane %v65_v3, %v33_v6  ;;  %v82_v22 = vrot.slane %v65_v3, %v37_v7 }
   0x8   :  { %v58_v25 = vmul.f32 %v26_v13, %v14_v8  ;;  %v59_v26 = vmul.f32 %v30_v14, %v15_v9  ;;  %v42_v27 = vrot.slane %v21_v2, %v41_v10  ;;  %v46_v28 = vrot.slane %v21_v2, %v45_v11 }
   0x9   :  { %v60_v29 = vmul.f32 %v34_v19, %v16_v17  ;;  %v61_v30 = vmul.f32 %v38_v20, %v17_v18  ;;  %v86_v31 = vrot.slane %v65_v3, %v41_v10  ;;  %v90_v32 = vrot.slane %v65_v3, %v45_v11 }
   0xa   :  { %v102_v33 = vadd.f32 %v70_v15, %v58_v25  ;;  %v103_v34 = vadd.f32 %v74_v16, %v59_v26  ;;  %v62_v35 = vmul.f32 %v42_v27, %v18_v23  ;;  %v63_v36 = vmul.f32 %v46_v28, %v19_v24 }
   0xb   :  { %v104_v38 = vadd.f32 %v78_v21, %v60_v29  ;;  %v105_v39 = vadd.f32 %v82_v22, %v61_v30  ;;  %v50_v40 = vrot.slane %v21_v2, %v49_v12  ;;  %v94_v41 = vrot.slane %v65_v3, %v49_v12 }
   0xc   :  { %v109_v42 = vmax.f32 %v102_v33, 0.0  ;;  %v110_v43 = vmax.f32 %v103_v34, 0.0  ;;  %v106_v44 = vadd.f32 %v86_v31, %v62_v35  ;;  %v107_v45 = vadd.f32 %v90_v32, %v63_v36 }
   0xd   :  { %v111_v46 = vmax.f32 %v104_v38, 0.0  ;;  %v112_v47 = vmax.f32 %v105_v39, 0.0  ;;  %v64_v48 = vmul.f32 %v50_v40, %v20_v37 }
   0xe   :  { %v157_v49 = vpack.c.bf16 %v110_v43, %v109_v42  ;;  %v113_v50 = vmax.f32 %v106_v44, 0.0  ;;  %v114_v51 = vmax.f32 %v107_v45, 0.0 }
   0xf   :  { %v158_v52 = vpack.c.bf16 %v112_v47, %v111_v46  ;;  %v108_v53 = vadd.f32 %v94_v41, %v64_v48 }
  0x10   :  { %145 = vst [vmem:[%s223_s3] sm:$0xff] %v157_v49  ;;  %v159_v54 = vpack.c.bf16 %v114_v51, %v113_v50 }
  0x11   :  { %146 = vst [vmem:[%s223_s3 + $0x8] sm:$0xff] %v158_v52  ;;  %v115_v55 = vmax.f32 %v108_v53, 0.0 }
  0x12   :  { %147 = vst [vmem:[%s223_s3 + $0x10] sm:$0xff] %v159_v54 }
  0x13   :  { %v160_v56 = vpack.c.bf16 %v115_v55, %v115_v55 }
  0x15   :  { %148 = vst [vmem:[%s223_s3 + $0x18] sm:$0xf] %v160_v56 }

// kernel: densenet121_forward.305
= control target key start
LH: loop header
LB: loop body
LE: loop exit
PB: predicated region body
PF: predicated region fallthrough
CT: control target
= control target key end

     0   :  { %v24_v0 = vlaneseq  ;;  %s240_s1 = inlined_call_operand.vmem [shape: f32[1,1024], index: 1, kind: input, shape index: {}]   ;;  %s241_s2 = inlined_call_operand.vmem [shape: f32[1,1024], index: 2, kind: input, shape index: {}]   ;;  %s242_s0 = inlined_call_operand.vmem [shape: f32[8,1024], index: 0, kind: input, shape index: {}]   ;;  %s243_s3 = inlined_call_operand.vmem [shape: bf16[8,1024], index: 3, kind: output, shape index: {}]  }
   0x1   :  { %v22_v2 = vld [vmem:[%s240_s1] sm:$0xff]  ;;  %v15_v9 = vld [vmem:[%s242_s0 + $0x8] sm:$0xff]  ;;  %v16_v18 = vld [vmem:[%s242_s0 + $0x10] sm:$0xff] }
   0x2   :  { %v25_v1 = vshrl.u32 %v24_v0, 7  ;;  %v72_v3 = vld [vmem:[%s241_s2] sm:$0xff]  ;;  %v17_v19 = vld [vmem:[%s242_s0 + $0x18] sm:$0xff]  ;;  %v19_v25 = vld [vmem:[%s242_s0 + $0x28] sm:$0xff] }
   0x3   :  { %v14_v8 = vld [vmem:[%s242_s0] sm:$0xff]  ;;  %v20_v38 = vld [vmem:[%s242_s0 + $0x30] sm:$0xff]  ;;  %v21_v39 = vld [vmem:[%s242_s0 + $0x38] sm:$0xff] }
   0x4   :  { %v26_v4 = vsub.s32 0, %v25_v1  ;;  %v30_v5 = vsub.s32 1, %v25_v1  ;;  %v34_v6 = vsub.s32 2, %v25_v1  ;;  %v38_v7 = vsub.s32 3, %v25_v1  ;;  %v18_v24 = vld [vmem:[%s242_s0 + $0x20] sm:$0xff] }
   0x5   :  { %v42_v10 = vsub.s32 4, %v25_v1  ;;  %v46_v11 = vsub.s32 5, %v25_v1  ;;  %v50_v12 = vsub.s32 6, %v25_v1  ;;  %v54_v13 = vsub.s32 7, %v25_v1 }
   0x6   :  { %v27_v14 = vrot.slane %v22_v2, %v26_v4  ;;  %v31_v15 = vrot.slane %v22_v2, %v30_v5  ;;  %v77_v16 = vrot.slane %v72_v3, %v26_v4  ;;  %v81_v17 = vrot.slane %v72_v3, %v30_v5 }
   0x7   :  { %v35_v20 = vrot.slane %v22_v2, %v34_v6  ;;  %v39_v21 = vrot.slane %v22_v2, %v38_v7  ;;  %v85_v22 = vrot.slane %v72_v3, %v34_v6  ;;  %v89_v23 = vrot.slane %v72_v3, %v38_v7 }
   0x8   :  { %v64_v26 = vmul.f32 %v27_v14, %v14_v8  ;;  %v65_v27 = vmul.f32 %v31_v15, %v15_v9  ;;  %v43_v28 = vrot.slane %v22_v2, %v42_v10  ;;  %v47_v29 = vrot.slane %v22_v2, %v46_v11 }
   0x9   :  { %v66_v30 = vmul.f32 %v35_v20, %v16_v18  ;;  %v67_v31 = vmul.f32 %v39_v21, %v17_v19  ;;  %v93_v32 = vrot.slane %v72_v3, %v42_v10  ;;  %v97_v33 = vrot.slane %v72_v3, %v46_v11 }
   0xa   :  { %v114_v34 = vadd.f32 %v77_v16, %v64_v26  ;;  %v115_v35 = vadd.f32 %v81_v17, %v65_v27  ;;  %v68_v36 = vmul.f32 %v43_v28, %v18_v24  ;;  %v69_v37 = vmul.f32 %v47_v29, %v19_v25 }
   0xb   :  { %v116_v40 = vadd.f32 %v85_v22, %v66_v30  ;;  %v117_v41 = vadd.f32 %v89_v23, %v67_v31  ;;  %v51_v42 = vrot.slane %v22_v2, %v50_v12  ;;  %v55_v43 = vrot.slane %v22_v2, %v54_v13 }
   0xc   :  { %v122_v44 = vmax.f32 %v114_v34, 0.0  ;;  %v123_v45 = vmax.f32 %v115_v35, 0.0  ;;  %v118_v46 = vadd.f32 %v93_v32, %v68_v36  ;;  %v119_v47 = vadd.f32 %v97_v33, %v69_v37 }
   0xd   :  { %v124_v48 = vmax.f32 %v116_v40, 0.0  ;;  %v125_v49 = vmax.f32 %v117_v41, 0.0  ;;  %v70_v50 = vmul.f32 %v51_v42, %v20_v38  ;;  %v71_v51 = vmul.f32 %v55_v43, %v21_v39 }
   0xe   :  { %v174_v52 = vpack.c.bf16 %v123_v45, %v122_v44  ;;  %v126_v53 = vmax.f32 %v118_v46, 0.0  ;;  %v127_v54 = vmax.f32 %v119_v47, 0.0  ;;  %v101_v55 = vrot.slane %v72_v3, %v50_v12 }
   0xf   :  { %v175_v56 = vpack.c.bf16 %v125_v49, %v124_v48  ;;  %v105_v57 = vrot.slane %v72_v3, %v54_v13 }
  0x10   :  { %162 = vst [vmem:[%s243_s3] sm:$0xff] %v174_v52  ;;  %v176_v58 = vpack.c.bf16 %v127_v54, %v126_v53  ;;  %v120_v59 = vadd.f32 %v101_v55, %v70_v50 }
  0x11   :  { %163 = vst [vmem:[%s243_s3 + $0x8] sm:$0xff] %v175_v56  ;;  %v121_v60 = vadd.f32 %v105_v57, %v71_v51 }
  0x12   :  { %164 = vst [vmem:[%s243_s3 + $0x10] sm:$0xff] %v176_v58  ;;  %v128_v61 = vmax.f32 %v120_v59, 0.0 }
  0x13   :  { %v129_v62 = vmax.f32 %v121_v60, 0.0 }
  0x15   :  { %v177_v63 = vpack.c.bf16 %v129_v62, %v128_v61 }
  0x17   :  { %165 = vst [vmem:[%s243_s3 + $0x18] sm:$0xff] %v177_v63 }

// kernel: densenet121_forward.306
= control target key start
LH: loop header
LB: loop body
LE: loop exit
PB: predicated region body
PF: predicated region fallthrough
CT: control target
= control target key end

     0   :  { %s776_s15 = smov 0   ;;  %s778_s16 = smov 0   ;;  %s842_s0 = inlined_call_operand.vmem [shape: bf16[8,1024], index: 0, kind: input, shape index: {}]   ;;  %s843_s1 = inlined_call_operand.vmem [shape: bf16[1024,128], index: 1, kind: input, shape index: {}]   ;;  %s844_s2 = inlined_call_operand.vmem [shape: f32[1,128], index: 2, kind: input, shape index: {}]   ;;  %s845_s3 = inlined_call_operand.vmem [shape: f32[1,128], index: 3, kind: input, shape index: {}]   ;;  %s846_s4 = inlined_call_operand.vmem [shape: bf16[8,128], index: 4, kind: output, shape index: {}]  }
   0x1   :  { %s780_s17 = smov 0  }
   0x2 LB: > { %s26_s18 = sadd.s32 1, %s744_s16  ;;  %p631_p0 = scmp.ge.s32.totalorder %s748_s17, 1  ;;  %s748_s17 = sphi %s780_s17, %s14_s17   ;;  %s744_s16 = sphi %s778_s16, %s848_s16   ;;  %s740_s15 = sphi %s776_s15, %s847_s15  }
   0x3   : > { %p27_p1 = scmp.ge.s32.totalorder %s26_s18, 4  ;;  %p222_p2 = scmp.lt.s32.totalorder %s748_s17, 5 }
   0x5   : > { %s850_s18 = smov (%p27_p1, %s26_s18), 0  ;;  %p223_p3 = pnand %p631_p0, %p222_p2 }
   0x6   : > { %s632_s19 = sshll.u32 (!%p223_p3), %s740_s15, 1  ;;  %s634_s20 = sshll.u32 (!%p223_p3), %s740_s15, 5 }
   0x7   : > { %226 = sbr.rel (%p223_p3) target bundleno = 291 (0x123), region = 36  ;;  %p271_p4 = scmp.lt.s32.totalorder (!%p223_p3), %s632_s19, 7 }
   0x8   : > { %p279_p5 = scmp.lt.s32.totalorder (!%p223_p3), %s634_s20, 127  ;;  %p636_p6 = scmp.ne.s32.totalorder (!%p223_p3), %s740_s15, 0 }
   0xe   : > { %s852_s19 = smov (!%p271_p4, %s632_s19), 7  ;;  %s854_s20 = smov (!%p279_p5, %s634_s20), 127 }
   0xf   : > { %s633_s21 = sshll.u32 %s852_s19, 2  ;;  %s635_s25 = sshll.u32 %s854_s20, 2  ;;  %v750_v0 = vmov (!%p636_p6), 0.0  }
  0x10   : > { %s276_s24 = scalar_lea.vmem %s842_s0, %s633_s21  ;;  %s804_s28 = scalar_lea.vmem %s843_s1, %s635_s25  ;;  %305 = vst [vmem:[#allocation2] sm:$0xff] (!%p636_p6), %v750_v0 }
  0x11   : > { %304 = sbr.rel (%p636_p6) target bundleno = 24 (0x18), region = 40 }
  0x18 PF: > { %v708_v1 = vld [vmem:[%s804_s28 + $0x40] sm:$0xff]   ;;  %v710_v3 = vld [vmem:[%s804_s28 + $0x48] sm:$0xff]   ;;  %v712_v5 = vld [vmem:[%s804_s28 + $0x50] sm:$0xff]   ;;  %p655_p7 = scmp.ne.s32.totalorder %s740_s15, 3 }
  0x19   : > { %v709_v2 = vld [vmem:[%s804_s28] sm:$0xff]   ;;  %661 = vmatprep.subr.bf16.mxu0 %v708_v1  ;;  %v711_v4 = vld [vmem:[%s804_s28 + $0x8] sm:$0xff]   ;;  %v713_v6 = vld [vmem:[%s804_s28 + $0x10] sm:$0xff]  }
  0x1a   : > { %662 = vmatpush3.bf16.msra.mxu0 %v709_v2  ;;  %v714_v7 = vld [vmem:[%s804_s28 + $0x58] sm:$0xff]   ;;  %v716_v9 = vld [vmem:[%s804_s28 + $0x60] sm:$0xff]   ;;  %v718_v11 = vld [vmem:[%s804_s28 + $0x68] sm:$0xff]  }
  0x1b   : > { %663 = vmatprep.subr.bf16.mxu0 %v710_v3  ;;  %v715_v8 = vld [vmem:[%s804_s28 + $0x18] sm:$0xff]   ;;  %v717_v10 = vld [vmem:[%s804_s28 + $0x20] sm:$0xff]   ;;  %v719_v14 = vld [vmem:[%s804_s28 + $0x28] sm:$0xff]  }
  0x1c   : > { %v307_v12 = vld [vmem:[%s276_s24] sm:$0xff]  ;;  %v720_v15 = vld [vmem:[%s804_s28 + $0x70] sm:$0xff]   ;;  %v722_v17 = vld [vmem:[%s804_s28 + $0x78] sm:$0xff]  }
  0x1d   : > { %v638_v13 = vcombine.high %v307_v12, %v307_v12  ;;  %v721_v16 = vld [vmem:[%s804_s28 + $0x30] sm:$0xff]   ;;  %v723_v18 = vld [vmem:[%s804_s28 + $0x38] sm:$0xff]   ;;  %v637_v19 = vcombine.low %v307_v12, %v307_v12  ;;  %v306_v21 = vld [vmem:[#allocation2] sm:$0xff] }
  0x1e   : > { %664 = vmatpush3.bf16.msra.mxu0 %v711_v4  ;;  %v656_v28 = vld [vmem:[%s844_s2] ss:$0 sm:$0xff] (!%p655_p7) }
  0x1f   : > { %665 = vmatprep.subr.bf16.mxu0 %v712_v5  ;;  %475 = vmatprep.mubr.bf16.mxu0 %v638_v13  ;;  %v657_v29 = vld [vmem:[%s845_s3] ss:$0 sm:$0xff] (!%p655_p7) }
  0x22   : > { %666 = vmatpush3.bf16.msra.mxu0 %v713_v6 }
  0x23   : > { %667 = vmatprep.subr.bf16.mxu0 %v714_v7 }
  0x26   : > { %668 = vmatpush3.bf16.msra.mxu0 %v715_v8 }
  0x27   : > { %669 = vmatprep.subr.bf16.mxu0 %v716_v9 }
  0x2a   : > { %670 = vmatpush3.bf16.msra.mxu0 %v717_v10 }
  0x2b   : > { %671 = vmatprep.subr.bf16.mxu0 %v718_v11 }
  0x2e   : > { %672 = vmatpush3.bf16.msra.mxu0 %v719_v14 }
  0x2f   : > { %673 = vmatprep.subr.bf16.mxu0 %v720_v15 }
  0x32   : > { %674 = vmatpush3.bf16.msra.mxu0 %v721_v16 }
  0x33   : > { %675 = vmatprep.subr.bf16.mxu0 %v722_v17 }
  0x36   : > { %676 = vmatpush3.bf16.msra.mxu0 %v723_v18 }
  0x39   : > { %476 = vmatmul.mubr.bf16.vlgmr.msra.gmra.mrb[0].mxu0 %v637_v19 }
 0x10c   : > { %v677_v20 = vpop.f32.mrb[0].mxu0  ;;  %488 = sbr.rel (%p655_p7) target bundleno = 291 (0x123), region = 44 }
 0x10d   : > { %v678_v22 = vpop.f32.mrb[1].mxu0 }
 0x10e   : > { %v679_v23 = vadd.f32 %v678_v22, %v677_v20  ;;  %v680_v24 = vpop.f32.mrb[2].mxu0 }
 0x10f   : > { %v681_v25 = vpop.f32.mrb[3].mxu0 }
 0x110   : > { %v483_v26 = vadd.f32 %v679_v23, %v306_v21 }
 0x112   : > { %484 = vst [vmem:[#allocation2] sm:$0xff] %v483_v26 }
 0x119   : > { %v489_v27 = vld [vmem:[#allocation2] sm:$0xff] }
 0x11a   : > { %v497_v30 = vmul.f32 %v656_v28, %v489_v27 }
 0x11c   : > { %v505_v31 = vadd.f32 %v657_v29, %v497_v30 }
 0x11e   : > { %v506_v32 = vmax.f32 %v505_v31, 0.0 }
 0x120   : > { %v507_v33 = vpack.c.bf16 %v506_v32, %v506_v32 }
 0x122   : > { %508 = vst [vmem:[%s846_s4] sm:$0xf] %v507_v33 }
 0x123 PF: > { %s14_s17 = sadd.s32 1, %s748_s17   ;;  %s847_s15 = smov %s744_s16 }
 0x124   : > { %p11_p8 = scmp.ge.s32.totalorder %s14_s17, 6   ;;  %s848_s16 = smov %s850_s18 }
 0x126   :  { %13 = sbr.rel (!%p11_p8) target bundleno = 2 (0x2), region = 83 }

// kernel: densenet121_forward.315
= control target key start
LH: loop header
LB: loop body
LE: loop exit
PB: predicated region body
PF: predicated region fallthrough
CT: control target
= control target key end

     0   :  { %s1134_s15 = smov 0   ;;  %s1136_s16 = smov 0   ;;  %s1358_s0 = inlined_call_operand.vmem [shape: bf16[8,1024], index: 0, kind: input, shape index: {}]   ;;  %s1359_s1 = inlined_call_operand.vmem [shape: bf16[1024,512], index: 1, kind: input, shape index: {}]   ;;  %s1360_s2 = inlined_call_operand.vmem [shape: f32[1,512], index: 2, kind: input, shape index: {}]   ;;  %s1361_s3 = inlined_call_operand.vmem [shape: f32[1,512], index: 3, kind: input, shape index: {}]   ;;  %s1362_s4 = inlined_call_operand.vmem [shape: f32[8,512], index: 4, kind: output, shape index: {}]  }
   0x1   :  { %s1138_s17 = smov 0   ;;  %s1140_s18 = smov 0  }
   0x2   :  { %s1142_s19 = smov 0   ;;  %s1144_s20 = smov 0  }
   0x3   :  { %s1146_s21 = smov 0  }
   0x4 LB: > { %s26_s22 = sadd.s32 1, %s1098_s19  ;;  %s29_s23 = sadd.s32 1, %s1102_s20  ;;  %s1106_s21 = sphi %s1146_s21, %s14_s21   ;;  %s1102_s20 = sphi %s1144_s20, %s1368_s20   ;;  %s1098_s19 = sphi %s1142_s19, %s1367_s19   ;;  %s1094_s18 = sphi %s1140_s18, %s1366_s18   ;;  %s1090_s17 = sphi %s1138_s17, %s1365_s17   ;;  %s1086_s16 = sphi %s1136_s16, %s1364_s16   ;;  %s1082_s15 = sphi %s1134_s15, %s1363_s15  }
   0x5   : > { %p27_p0 = scmp.ge.s32.totalorder %s26_s22, 4  ;;  %p77_p1 = scmp.ne.s32.totalorder %s1086_s16, %s1082_s15 }
   0x6   : > { %p78_p2 = scmp.eq.s32.totalorder %s1106_s21, 0  ;;  %s70_s27 = sadd.s32 1, %s1086_s16 }
   0x7   : > { %s1370_s22 = smov (%p27_p0, %s26_s22), 0  ;;  %s1372_s23 = smov (!%p27_p0, %s29_s23), %s1102_s20 }
   0x8   : > { %p79_p3 = por %p78_p2, %p77_p1  ;;  %p31_p4 = scmp.ge.s32.totalorder %s1372_s23, 2 }
   0x9   : > { %s65_s24 = ssub.s32 %s1098_s19, %s1370_s22  ;;  %p892_p6 = scmp.ge.s32.totalorder %s1106_s21, 8 }
   0xa   : > { %s1374_s23 = smov (%p31_p4, %s1372_s23), 0 }
   0xb   : > { %s66_s25 = ssub.s32 %s1102_s20, %s1374_s23  ;;  %183 = sbr.rel (%p892_p6) target bundleno = 41 (0x29), region = 16 }
   0xc   : > { %s67_s26 = sor.u32 %s66_s25, %s65_s24 }
   0xd   : > { %p68_p5 = scmp.eq.s32.totalorder %s67_s26, 0 }
   0xf   : > { %s1185_s28 = scalar_select %p68_p5, %s1086_s16, %s70_s27  }
  0x12   : > { %199 = sbr.rel (!%p79_p3) target bundleno = 41 (0x29), region = 24  ;;  %s201_s29 = sand.u32 (%p79_p3), 1, %s1086_s16  }
  0x13   : > { %s895_s30 = sshll.u32 (%p79_p3), %s1102_s20, 1  ;;  %s893_s5 = sshll.u32 (%p79_p3), %s201_s29, 8 }
  0x14   : > { %s944_s6 = sshll.u32 (%p79_p3), %s1098_s19, 7  ;;  %s1199_s12 = scalar_lea.vmem (%p79_p3), [#allocation3], %s893_s5 }
  0x15   : > { %s207_s7 = sadd.s32 (%p79_p3), %s944_s6, %s895_s30 }
  0x16   : > { %s897_s8 = sshll.u32 (%p79_p3), %s207_s7, 2 }
  0x17   : > { %s1194_s11 = scalar_lea.vmem (%p79_p3), %s1359_s1, %s897_s8 }
  0x18   : > { %v299_v0 = vld [vmem:[%s1194_s11] sm:$0xff] (%p79_p3)  ;;  %v301_v1 = vld [vmem:[%s1194_s11 + $0x10] sm:$0xff] (%p79_p3) }
  0x19   : > { %v303_v2 = vld [vmem:[%s1194_s11 + $0x20] sm:$0xff]  ;;  %300 = vst [vmem:[%s1199_s12] sm:$0xff] %v299_v0  ;;  %302 = vst [vmem:[%s1199_s12 + $0x8] sm:$0xff] %v301_v1  ;;  %v305_v3 = vld [vmem:[%s1194_s11 + $0x30] sm:$0xff] }
  0x1a   : > { %304 = vst [vmem:[%s1199_s12 + $0x10] sm:$0xff] %v303_v2  ;;  %v307_v4 = vld [vmem:[%s1194_s11 + $0x40] sm:$0xff]  ;;  %v309_v5 = vld [vmem:[%s1194_s11 + $0x50] sm:$0xff]  ;;  %306 = vst [vmem:[%s1199_s12 + $0x18] sm:$0xff] %v305_v3 }
  0x1b   : > { %308 = vst [vmem:[%s1199_s12 + $0x20] sm:$0xff] %v307_v4  ;;  %310 = vst [vmem:[%s1199_s12 + $0x28] sm:$0xff] %v309_v5  ;;  %v311_v6 = vld [vmem:[%s1194_s11 + $0x60] sm:$0xff]  ;;  %v313_v7 = vld [vmem:[%s1194_s11 + $0x70] sm:$0xff] }
  0x1c   : > { %v315_v8 = vld [vmem:[%s1194_s11 + $0x80] sm:$0xff]  ;;  %312 = vst [vmem:[%s1199_s12 + $0x30] sm:$0xff] %v311_v6  ;;  %314 = vst [vmem:[%s1199_s12 + $0x38] sm:$0xff] %v313_v7  ;;  %v317_v9 = vld [vmem:[%s1194_s11 + $0x90] sm:$0xff] }
  0x1d   : > { %316 = vst [vmem:[%s1199_s12 + $0x40] sm:$0xff] %v315_v8  ;;  %v319_v10 = vld [vmem:[%s1194_s11 + $0xa0] sm:$0xff]  ;;  %v321_v11 = vld [vmem:[%s1194_s11 + $0xb0] sm:$0xff]  ;;  %318 = vst [vmem:[%s1199_s12 + $0x48] sm:$0xff] %v317_v9 }
  0x1e   : > { %320 = vst [vmem:[%s1199_s12 + $0x50] sm:$0xff] %v319_v10  ;;  %322 = vst [vmem:[%s1199_s12 + $0x58] sm:$0xff] %v321_v11  ;;  %v323_v12 = vld [vmem:[%s1194_s11 + $0xc0] sm:$0xff]  ;;  %v325_v13 = vld [vmem:[%s1194_s11 + $0xd0] sm:$0xff] }
  0x1f   : > { %v327_v14 = vld [vmem:[%s1194_s11 + $0xe0] sm:$0xff]  ;;  %324 = vst [vmem:[%s1199_s12 + $0x60] sm:$0xff] %v323_v12  ;;  %326 = vst [vmem:[%s1199_s12 + $0x68] sm:$0xff] %v325_v13  ;;  %v329_v15 = vld [vmem:[%s1194_s11 + $0xf0] sm:$0xff] }
  0x20   : > { %328 = vst [vmem:[%s1199_s12 + $0x70] sm:$0xff] %v327_v14  ;;  %v331_v16 = vld [vmem:[%s1194_s11 + $0x100] sm:$0xff]  ;;  %v333_v17 = vld [vmem:[%s1194_s11 + $0x110] sm:$0xff]  ;;  %330 = vst [vmem:[%s1199_s12 + $0x78] sm:$0xff] %v329_v15 }
  0x21   : > { %332 = vst [vmem:[%s1199_s12 + $0x80] sm:$0xff] %v331_v16  ;;  %334 = vst [vmem:[%s1199_s12 + $0x88] sm:$0xff] %v333_v17  ;;  %v335_v18 = vld [vmem:[%s1194_s11 + $0x120] sm:$0xff]  ;;  %v337_v19 = vld [vmem:[%s1194_s11 + $0x130] sm:$0xff] }
  0x22   : > { %v339_v20 = vld [vmem:[%s1194_s11 + $0x140] sm:$0xff]  ;;  %336 = vst [vmem:[%s1199_s12 + $0x90] sm:$0xff] %v335_v18  ;;  %338 = vst [vmem:[%s1199_s12 + $0x98] sm:$0xff] %v337_v19  ;;  %v341_v21 = vld [vmem:[%s1194_s11 + $0x150] sm:$0xff] }
  0x23   : > { %340 = vst [vmem:[%s1199_s12 + $0xa0] sm:$0xff] %v339_v20  ;;  %v343_v22 = vld [vmem:[%s1194_s11 + $0x160] sm:$0xff]  ;;  %v345_v23 = vld [vmem:[%s1194_s11 + $0x170] sm:$0xff]  ;;  %342 = vst [vmem:[%s1199_s12 + $0xa8] sm:$0xff] %v341_v21 }
  0x24   : > { %344 = vst [vmem:[%s1199_s12 + $0xb0] sm:$0xff] %v343_v22  ;;  %346 = vst [vmem:[%s1199_s12 + $0xb8] sm:$0xff] %v345_v23  ;;  %v347_v24 = vld [vmem:[%s1194_s11 + $0x180] sm:$0xff]  ;;  %v349_v25 = vld [vmem:[%s1194_s11 + $0x190] sm:$0xff] }
  0x25   : > { %v351_v26 = vld [vmem:[%s1194_s11 + $0x1a0] sm:$0xff]  ;;  %348 = vst [vmem:[%s1199_s12 + $0xc0] sm:$0xff] %v347_v24  ;;  %350 = vst [vmem:[%s1199_s12 + $0xc8] sm:$0xff] %v349_v25  ;;  %v353_v27 = vld [vmem:[%s1194_s11 + $0x1b0] sm:$0xff] }
  0x26   : > { %352 = vst [vmem:[%s1199_s12 + $0xd0] sm:$0xff] %v351_v26  ;;  %v355_v28 = vld [vmem:[%s1194_s11 + $0x1c0] sm:$0xff]  ;;  %v357_v29 = vld [vmem:[%s1194_s11 + $0x1d0] sm:$0xff]  ;;  %354 = vst [vmem:[%s1199_s12 + $0xd8] sm:$0xff] %v353_v27 }
  0x27   : > { %356 = vst [vmem:[%s1199_s12 + $0xe0] sm:$0xff] %v355_v28  ;;  %358 = vst [vmem:[%s1199_s12 + $0xe8] sm:$0xff] %v357_v29  ;;  %v359_v30 = vld [vmem:[%s1194_s11 + $0x1e0] sm:$0xff]  ;;  %v361_v31 = vld [vmem:[%s1194_s11 + $0x1f0] sm:$0xff] }
  0x28   : > { %360 = vst [vmem:[%s1199_s12 + $0xf0] sm:$0xff] %v359_v30  ;;  %362 = vst [vmem:[%s1199_s12 + $0xf8] sm:$0xff] %v361_v31 }
  0x29 PF: > { %p898_p7 = scmp.ge.s32.totalorder %s1106_s21, 1  ;;  %p383_p8 = scmp.lt.s32.totalorder %s1106_s21, 9 }
  0x2b   : > { %p384_p9 = pnand %p898_p7, %p383_p8 }
  0x2c   : > { %s390_s13 = sand.u32 (!%p384_p9), 1, %s1082_s15   ;;  %s900_s14 = sshll.u32 (!%p384_p9), %s1090_s17, 1 }
  0x2d   : > { %387 = sbr.rel (%p384_p9) target bundleno = 355 (0x163), region = 70  ;;  %s899_s24 = sshll.u32 (!%p384_p9), %s390_s13, 8 }
  0x2e   : > { %p439_p10 = scmp.lt.s32.totalorder (!%p384_p9), %s900_s14, 7  ;;  %s902_s25 = sshll.u32 (!%p384_p9), %s1094_s18, 1 }
  0x2f   : > { %p449_p11 = scmp.lt.s32.totalorder (!%p384_p9), %s902_s25, 3  ;;  %s1288_s13 = scalar_lea.vmem (!%p384_p9), [#allocation3], %s899_s24 }
  0x30   : > { %p906_p12 = scmp.ne.s32.totalorder (!%p384_p9), %s1090_s17, 0 }
  0x34   : > { %s1376_s14 = smov (!%p439_p10, %s900_s14), 7  ;;  %s1378_s25 = smov (!%p449_p11, %s902_s25), 3 }
  0x35   : > { %s901_s26 = sshll.u32 %s1376_s14, 2  ;;  %s451_s15 = scalar_lea.vmem %s1360_s2, %s1378_s25  ;;  %v1108_v32 = vmov (!%p906_p12), 0.0  }
  0x36   : > { %s1270_s30 = scalar_lea.vmem %s1358_s0, %s901_s26  ;;  %s456_s18 = scalar_lea.vmem %s1361_s3, %s1378_s25  ;;  %472 = vst [vmem:[#allocation2] sm:$0xff] (!%p906_p12), %v1108_v32  ;;  %473 = vst [vmem:[#allocation2 + $0x8] sm:$0xff] (!%p906_p12), %v1108_v32 }
  0x37   : > { %s905_s9 = sshll.u32 %s1378_s25, 3  ;;  %471 = sbr.rel (%p906_p12) target bundleno = 62 (0x3e), region = 78 }
  0x38   : > { %s1286_s12 = scalar_lea.vmem %s1362_s4, %s905_s9 }
  0x3e PF: > { %v1002_v33 = vld [vmem:[%s1288_s13 + $0x4] ss:$8 sps:$4 sm:$0xff]   ;;  %v1004_v34 = vld [vmem:[%s1288_s13] ss:$8 sps:$4 sm:$0xff]   ;;  %v1005_v35 = vld [vmem:[%s1288_s13 + $0x14] ss:$8 sps:$4 sm:$0xff]  }
  0x3f   : > { %676 = vmatprep.subr.bf16.mxu0 %v1002_v33  ;;  %v1007_v36 = vld [vmem:[%s1288_s13 + $0x10] ss:$8 sps:$4 sm:$0xff]   ;;  %v1008_v37 = vld [vmem:[%s1288_s13 + $0x24] ss:$8 sps:$4 sm:$0xff]   ;;  %v1010_v38 = vld [vmem:[%s1288_s13 + $0x20] ss:$8 sps:$4 sm:$0xff]  }
  0x40   : > { %677 = vmatpush1.bf16.msra.mxu0 %v1004_v34  ;;  %v1011_v39 = vld [vmem:[%s1288_s13 + $0x34] ss:$8 sps:$4 sm:$0xff]   ;;  %v1013_v40 = vld [vmem:[%s1288_s13 + $0x30] ss:$8 sps:$4 sm:$0xff]   ;;  %v1014_v41 = vld [vmem:[%s1288_s13 + $0x44] ss:$8 sps:$4 sm:$0xff]  }
  0x41   : > { %678 = vmatprep.subr.bf16.mxu0 %v1005_v35  ;;  %v1016_v42 = vld [vmem:[%s1288_s13 + $0x40] ss:$8 sps:$4 sm:$0xff]   ;;  %v1017_v43 = vld [vmem:[%s1288_s13 + $0x54] ss:$8 sps:$4 sm:$0xff]   ;;  %v1019_v44 = vld [vmem:[%s1288_s13 + $0x50] ss:$8 sps:$4 sm:$0xff]  }
  0x42   : > { %v1020_v45 = vld [vmem:[%s1288_s13 + $0x64] ss:$8 sps:$4 sm:$0xff]   ;;  %v476_v46 = vld [vmem:[%s1270_s30] sm:$0xff]  ;;  %v1022_v48 = vld [vmem:[%s1288_s13 + $0x60] ss:$8 sps:$4 sm:$0xff]   ;;  %p941_p13 = scmp.ne.s32.totalorder %s1090_s17, 3 }
  0x43   : > { %v908_v47 = vcombine.high %v476_v46, %v476_v46  ;;  %v1023_v49 = vld [vmem:[%s1288_s13 + $0x74] ss:$8 sps:$4 sm:$0xff]   ;;  %v1025_v50 = vld [vmem:[%s1288_s13 + $0x70] ss:$8 sps:$4 sm:$0xff]   ;;  %v1026_v51 = vld [vmem:[%s1288_s13 + $0x84] ss:$8 sps:$4 sm:$0xff]   ;;  %v907_v3 = vcombine.low %v476_v46, %v476_v46  ;;  %v729_v12 = vlaneseq (!%p941_p13) }
  0x44   : > { %679 = vmatpush1.bf16.msra.mxu0 %v1007_v36  ;;  %v1028_v52 = vld [vmem:[%s1288_s13 + $0x80] ss:$8 sps:$4 sm:$0xff]   ;;  %v1029_v53 = vld [vmem:[%s1288_s13 + $0x94] ss:$8 sps:$4 sm:$0xff]   ;;  %v1031_v54 = vld [vmem:[%s1288_s13 + $0x90] ss:$8 sps:$4 sm:$0xff]  }
  0x45   : > { %680 = vmatprep.subr.bf16.mxu0 %v1008_v37  ;;  %708 = vmatprep.mubr.bf16.mxu0 %v908_v47  ;;  %v1032_v55 = vld [vmem:[%s1288_s13 + $0xa4] ss:$8 sps:$4 sm:$0xff]   ;;  %v1034_v56 = vld [vmem:[%s1288_s13 + $0xa0] ss:$8 sps:$4 sm:$0xff]   ;;  %v1035_v57 = vld [vmem:[%s1288_s13 + $0xb4] ss:$8 sps:$4 sm:$0xff]  }
  0x46   : > { %v1037_v58 = vld [vmem:[%s1288_s13 + $0xb0] ss:$8 sps:$4 sm:$0xff]   ;;  %v1038_v59 = vld [vmem:[%s1288_s13 + $0xc4] ss:$8 sps:$4 sm:$0xff]   ;;  %v1040_v60 = vld [vmem:[%s1288_s13 + $0xc0] ss:$8 sps:$4 sm:$0xff]  }
  0x47   : > { %v1041_v61 = vld [vmem:[%s1288_s13 + $0xd4] ss:$8 sps:$4 sm:$0xff]   ;;  %v1043_v62 = vld [vmem:[%s1288_s13 + $0xd0] ss:$8 sps:$4 sm:$0xff]   ;;  %v1044_v63 = vld [vmem:[%s1288_s13 + $0xe4] ss:$8 sps:$4 sm:$0xff]  }
  0x48   : > { %681 = vmatpush1.bf16.msra.mxu0 %v1010_v38  ;;  %v1046_v0 = vld [vmem:[%s1288_s13 + $0xe0] ss:$8 sps:$4 sm:$0xff]   ;;  %v1047_v1 = vld [vmem:[%s1288_s13 + $0xf4] ss:$8 sps:$4 sm:$0xff]   ;;  %v1049_v2 = vld [vmem:[%s1288_s13 + $0xf0] ss:$8 sps:$4 sm:$0xff]  }
  0x49   : > { %682 = vmatprep.subr.bf16.mxu0 %v1011_v39  ;;  %v474_v4 = vld [vmem:[#allocation2] sm:$0xff]  ;;  %v475_v5 = vld [vmem:[#allocation2 + $0x8] sm:$0xff]  ;;  %v730_v13 = vshrl.u32 (!%p941_p13), %v729_v12, 7 }
  0x4a   : > { %v727_v14 = vld [vmem:[%s451_s15] sm:$0x3] (!%p941_p13) }
  0x4b   : > { %v741_v15 = vld [vmem:[%s456_s18] sm:$0x3] (!%p941_p13)  ;;  %v731_v16 = vsub.s32 (!%p941_p13), 0, %v730_v13  ;;  %v735_v17 = vsub.s32 (!%p941_p13), 1, %v730_v13 }
  0x4c   : > { %683 = vmatpush1.bf16.msra.mxu0 %v1013_v40 }
  0x4d   : > { %684 = vmatprep.subr.bf16.mxu0 %v1014_v41  ;;  %v732_v20 = vrot.slane (!%p941_p13), %v727_v14, %v731_v16  ;;  %v746_v21 = vrot.slane (!%p941_p13), %v741_v15, %v731_v16  ;;  %v736_v22 = vrot.slane (!%p941_p13), %v727_v14, %v735_v17  ;;  %v750_v23 = vrot.slane (!%p941_p13), %v741_v15, %v735_v17 }
  0x50   : > { %685 = vmatpush1.bf16.msra.mxu0 %v1016_v42 }
  0x51   : > { %686 = vmatprep.subr.bf16.mxu0 %v1017_v43 }
  0x54   : > { %687 = vmatpush1.bf16.msra.mxu0 %v1019_v44 }
  0x55   : > { %688 = vmatprep.subr.bf16.mxu0 %v1020_v45 }
  0x58   : > { %689 = vmatpush1.bf16.msra.mxu0 %v1022_v48 }
  0x59   : > { %690 = vmatprep.subr.bf16.mxu0 %v1023_v49 }
  0x5c   : > { %691 = vmatpush1.bf16.msra.mxu0 %v1025_v50 }
  0x5d   : > { %692 = vmatprep.subr.bf16.mxu0 %v1026_v51 }
  0x60   : > { %693 = vmatpush1.bf16.msra.mxu0 %v1028_v52 }
  0x61   : > { %694 = vmatprep.subr.bf16.mxu0 %v1029_v53 }
  0x64   : > { %695 = vmatpush1.bf16.msra.mxu0 %v1031_v54 }
  0x65   : > { %696 = vmatprep.subr.bf16.mxu0 %v1032_v55 }
  0x68   : > { %697 = vmatpush1.bf16.msra.mxu0 %v1034_v56 }
  0x69   : > { %698 = vmatprep.subr.bf16.mxu0 %v1035_v57 }
  0x6c   : > { %699 = vmatpush1.bf16.msra.mxu0 %v1037_v58 }
  0x6d   : > { %700 = vmatprep.subr.bf16.mxu0 %v1038_v59 }
  0x70   : > { %701 = vmatpush1.bf16.msra.mxu0 %v1040_v60 }
  0x71   : > { %702 = vmatprep.subr.bf16.mxu0 %v1041_v61 }
  0x74   : > { %703 = vmatpush1.bf16.msra.mxu0 %v1043_v62 }
  0x75   : > { %704 = vmatprep.subr.bf16.mxu0 %v1044_v63 }
  0x78   : > { %705 = vmatpush1.bf16.msra.mxu0 %v1046_v0 }
  0x79   : > { %706 = vmatprep.subr.bf16.mxu0 %v1047_v1 }
  0x7c   : > { %707 = vmatpush1.bf16.msra.mxu0 %v1049_v2 }
  0x7f   : > { %709 = vmatmul.mubr.bf16.vlgmr.msra.gmra.mrb[0].mxu0 %v907_v3 }
 0x150   : > { %724 = sbr.rel (%p941_p13) target bundleno = 355 (0x163), region = 82 }
 0x152   : > { %v710_v6 = vpop.f32.mrb[0].mxu0 }
 0x153   : > { %v717_v7 = vadd.f32 %v710_v6, %v474_v4  ;;  %v712_v8 = vpop.f32.mrb[1].mxu0 }
 0x154   : > { %v718_v9 = vadd.f32 %v712_v8, %v475_v5  ;;  %v714_v10 = vpop.f32.mrb[2].mxu0 }
 0x155   : > { %719 = vst [vmem:[#allocation2] sm:$0xff] %v717_v7  ;;  %v715_v11 = vpop.f32.mrb[3].mxu0 }
 0x156   : > { %720 = vst [vmem:[#allocation2 + $0x8] sm:$0xff] %v718_v9 }
 0x15c   : > { %v725_v18 = vld [vmem:[#allocation2] sm:$0xff] }
 0x15d   : > { %v726_v19 = vld [vmem:[#allocation2 + $0x8] sm:$0xff]  ;;  %v739_v24 = vmul.f32 %v732_v20, %v725_v18 }
 0x15e   : > { %v740_v25 = vmul.f32 %v736_v22, %v726_v19 }
 0x15f   : > { %v753_v26 = vadd.f32 %v746_v21, %v739_v24 }
 0x160   : > { %v754_v27 = vadd.f32 %v750_v23, %v740_v25 }
 0x161   : > { %755 = vst [vmem:[%s1286_s12] sm:$0xff] %v753_v26 }
 0x162   : > { %756 = vst [vmem:[%s1286_s12 + $0x8] sm:$0xff] %v754_v27 }
 0x163 PF: > { %s14_s21 = sadd.s32 1, %s1106_s21   ;;  %s1363_s15 = smov %s1086_s16 }
 0x164   : > { %p11_p0 = scmp.ge.s32.totalorder %s14_s21, 10   ;;  %s1364_s16 = smov %s1185_s28 }
 0x165   : > { %s1365_s17 = smov %s1098_s19  ;;  %s1366_s18 = smov %s1102_s20 }
 0x166   : > { %s1367_s19 = smov %s1370_s22  ;;  %s1368_s20 = smov %s1374_s23 }
 0x167   :  { %13 = sbr.rel (!%p11_p0) target bundleno = 4 (0x4), region = 126 }

// kernel: densenet121_forward.364
= control target key start
LH: loop header
LB: loop body
LE: loop exit
PB: predicated region body
PF: predicated region fallthrough
CT: control target
= control target key end

     0   :  { %v24_v0 = vlaneseq  ;;  %s216_s1 = inlined_call_operand.vmem [shape: f32[1,1024], index: 1, kind: input, shape index: {}]   ;;  %s217_s2 = inlined_call_operand.vmem [shape: f32[1,1024], index: 2, kind: input, shape index: {}]   ;;  %s218_s0 = inlined_call_operand.vmem [shape: f32[8,1024], index: 0, kind: input, shape index: {}]   ;;  %s219_s3 = inlined_call_operand.vmem [shape: f32[8,1024], index: 3, kind: output, shape index: {}]  }
   0x1   :  { %v22_v2 = vld [vmem:[%s216_s1] sm:$0xff]  ;;  %v15_v9 = vld [vmem:[%s218_s0 + $0x8] sm:$0xff]  ;;  %v16_v18 = vld [vmem:[%s218_s0 + $0x10] sm:$0xff] }
   0x2   :  { %v25_v1 = vshrl.u32 %v24_v0, 7  ;;  %v72_v3 = vld [vmem:[%s217_s2] sm:$0xff]  ;;  %v17_v19 = vld [vmem:[%s218_s0 + $0x18] sm:$0xff]  ;;  %v19_v29 = vld [vmem:[%s218_s0 + $0x28] sm:$0xff] }
   0x3   :  { %v14_v8 = vld [vmem:[%s218_s0] sm:$0xff]  ;;  %v20_v34 = vld [vmem:[%s218_s0 + $0x30] sm:$0xff]  ;;  %v21_v47 = vld [vmem:[%s218_s0 + $0x38] sm:$0xff] }
   0x4   :  { %v26_v4 = vsub.s32 0, %v25_v1  ;;  %v30_v5 = vsub.s32 1, %v25_v1  ;;  %v34_v6 = vsub.s32 2, %v25_v1  ;;  %v38_v7 = vsub.s32 3, %v25_v1  ;;  %v18_v24 = vld [vmem:[%s218_s0 + $0x20] sm:$0xff] }
   0x5   :  { %v42_v10 = vsub.s32 4, %v25_v1  ;;  %v46_v11 = vsub.s32 5, %v25_v1  ;;  %v50_v12 = vsub.s32 6, %v25_v1  ;;  %v54_v13 = vsub.s32 7, %v25_v1 }
   0x6   :  { %v27_v14 = vrot.slane %v22_v2, %v26_v4  ;;  %v77_v15 = vrot.slane %v72_v3, %v26_v4  ;;  %v31_v16 = vrot.slane %v22_v2, %v30_v5  ;;  %v81_v17 = vrot.slane %v72_v3, %v30_v5 }
   0x7   :  { %v35_v20 = vrot.slane %v22_v2, %v34_v6  ;;  %v85_v21 = vrot.slane %v72_v3, %v34_v6  ;;  %v39_v22 = vrot.slane %v22_v2, %v38_v7  ;;  %v89_v23 = vrot.slane %v72_v3, %v38_v7 }
   0x8   :  { %v64_v25 = vmul.f32 %v27_v14, %v14_v8  ;;  %v65_v26 = vmul.f32 %v31_v16, %v15_v9  ;;  %v43_v27 = vrot.slane %v22_v2, %v42_v10  ;;  %v93_v28 = vrot.slane %v72_v3, %v42_v10 }
   0x9   :  { %v66_v30 = vmul.f32 %v35_v20, %v16_v18  ;;  %v67_v31 = vmul.f32 %v39_v22, %v17_v19  ;;  %v47_v32 = vrot.slane %v22_v2, %v46_v11  ;;  %v97_v33 = vrot.slane %v72_v3, %v46_v11 }
   0xa   :  { %v114_v35 = vadd.f32 %v77_v15, %v64_v25  ;;  %v115_v36 = vadd.f32 %v81_v17, %v65_v26  ;;  %v68_v37 = vmul.f32 %v43_v27, %v18_v24  ;;  %v51_v38 = vrot.slane %v22_v2, %v50_v12 }
   0xb   :  { %v116_v39 = vadd.f32 %v85_v21, %v66_v30  ;;  %v117_v40 = vadd.f32 %v89_v23, %v67_v31  ;;  %v69_v41 = vmul.f32 %v47_v32, %v19_v29  ;;  %v101_v42 = vrot.slane %v72_v3, %v50_v12 }
   0xc   :  { %v122_v43 = vmax.f32 %v114_v35, 0.0  ;;  %v123_v44 = vmax.f32 %v115_v36, 0.0  ;;  %v118_v45 = vadd.f32 %v93_v28, %v68_v37  ;;  %v70_v46 = vmul.f32 %v51_v38, %v20_v34 }
   0xd   :  { %v124_v48 = vmax.f32 %v116_v39, 0.0  ;;  %v125_v49 = vmax.f32 %v117_v40, 0.0  ;;  %v119_v50 = vadd.f32 %v97_v33, %v69_v41  ;;  %v55_v51 = vrot.slane %v22_v2, %v54_v13 }
   0xe   :  { %130 = vst [vmem:[%s219_s3] sm:$0xff] %v122_v43  ;;  %131 = vst [vmem:[%s219_s3 + $0x8] sm:$0xff] %v123_v44  ;;  %v126_v52 = vmax.f32 %v118_v45, 0.0  ;;  %v120_v53 = vadd.f32 %v101_v42, %v70_v46  ;;  %v105_v54 = vrot.slane %v72_v3, %v54_v13 }
   0xf   :  { %132 = vst [vmem:[%s219_s3 + $0x10] sm:$0xff] %v124_v48  ;;  %133 = vst [vmem:[%s219_s3 + $0x18] sm:$0xff] %v125_v49  ;;  %v127_v55 = vmax.f32 %v119_v50, 0.0  ;;  %v71_v56 = vmul.f32 %v55_v51, %v21_v47 }
  0x10   :  { %134 = vst [vmem:[%s219_s3 + $0x20] sm:$0xff] %v126_v52  ;;  %v128_v57 = vmax.f32 %v120_v53, 0.0 }
  0x11   :  { %135 = vst [vmem:[%s219_s3 + $0x28] sm:$0xff] %v127_v55  ;;  %v121_v58 = vadd.f32 %v105_v54, %v71_v56 }
  0x12   :  { %136 = vst [vmem:[%s219_s3 + $0x30] sm:$0xff] %v128_v57 }
  0x13   :  { %v129_v59 = vmax.f32 %v121_v58, 0.0 }
  0x15   :  { %137 = vst [vmem:[%s219_s3 + $0x38] sm:$0xff] %v129_v59 }

// kernel: densenet121_forward.365
= control target key start
LH: loop header
LB: loop body
LE: loop exit
PB: predicated region body
PF: predicated region fallthrough
CT: control target
= control target key end

     0   :  { %v884_v60 = vmov 1966171168   ;;  %v184_v62 = vlaneseq  ;;  %s1353_s1 = inlined_call_operand.vmem [shape: f32[1024,128], index: 1, kind: input, shape index: {}]   ;;  %s1354_s0 = inlined_call_operand.vmem [shape: f32[8,1,1024], index: 0, kind: input, shape index: {}]   ;;  %s1355_s2 = inlined_call_operand.vmem [shape: f32[1,128], index: 2, kind: input, shape index: {}]   ;;  %s1356_s3 = inlined_call_operand.vmem [shape: f32[8,128], index: 3, kind: output, shape index: {}]  }
   0x1   :  { %v46_v0 = vld [vmem:[%s1353_s1 + $0x80] sm:$0xff]  ;;  %v47_v1 = vld [vmem:[%s1353_s1 + $0x88] sm:$0xff]  ;;  %v48_v11 = vld [vmem:[%s1353_s1 + $0x90] sm:$0xff]  ;;  %v182_v61 = vunpack.c.l.s4 %v884_v60 }
   0x2   :  { %v30_v2 = vld [vmem:[%s1353_s1] sm:$0xff]  ;;  %v743_v3 = vpack.c.bf16 %v47_v1, %v46_v0  ;;  %v31_v4 = vld [vmem:[%s1353_s1 + $0x8] sm:$0xff]  ;;  %v49_v13 = vld [vmem:[%s1353_s1 + $0x98] sm:$0xff] }
   0x3   :  { %v78_v5 = vld [vmem:[%s1353_s1 + $0x180] sm:$0xff]  ;;  %v79_v6 = vld [vmem:[%s1353_s1 + $0x188] sm:$0xff]  ;;  %v745_v7 = vpack.c.bf16 %v31_v4, %v30_v2  ;;  %v32_v14 = vld [vmem:[%s1353_s1 + $0x10] sm:$0xff]  ;;  %v747_v16 = vpack.c.bf16 %v49_v13, %v48_v11  ;;  %v183_v11 = vunpack.c.0.s8 %v182_v61 }
   0x4   :  { %v775_v8 = vpack.c.bf16 %v79_v6, %v78_v5  ;;  %v62_v9 = vld [vmem:[%s1353_s1 + $0x100] sm:$0xff]  ;;  %v63_v10 = vld [vmem:[%s1353_s1 + $0x108] sm:$0xff]  ;;  %744 = vmatprep.subr.bf16.mxu0 %v743_v3  ;;  %v33_v15 = vld [vmem:[%s1353_s1 + $0x18] sm:$0xff] }
   0x5   :  { %v777_v12 = vpack.c.bf16 %v63_v10, %v62_v9  ;;  %746 = vmatpush3.bf16.msra.mxu0 %v745_v7  ;;  %v749_v17 = vpack.c.bf16 %v33_v15, %v32_v14  ;;  %v80_v18 = vld [vmem:[%s1353_s1 + $0x190] sm:$0xff]  ;;  %v81_v19 = vld [vmem:[%s1353_s1 + $0x198] sm:$0xff]  ;;  %v50_v23 = vld [vmem:[%s1353_s1 + $0xa0] sm:$0xff] }
   0x6   :  { %776 = vmatprep.subr.bf16.mxu1 %v775_v8  ;;  %v64_v20 = vld [vmem:[%s1353_s1 + $0x110] sm:$0xff]  ;;  %v779_v21 = vpack.c.bf16 %v81_v19, %v80_v18  ;;  %v65_v22 = vld [vmem:[%s1353_s1 + $0x118] sm:$0xff]  ;;  %v51_v24 = vld [vmem:[%s1353_s1 + $0xa8] sm:$0xff]  ;;  %748 = vmatprep.subr.bf16.mxu0 %v747_v16 }
   0x7   :  { %778 = vmatpush3.bf16.msra.mxu1 %v777_v12  ;;  %v781_v25 = vpack.c.bf16 %v65_v22, %v64_v20  ;;  %v751_v26 = vpack.c.bf16 %v51_v24, %v50_v23  ;;  %v34_v27 = vld [vmem:[%s1353_s1 + $0x20] sm:$0xff]  ;;  %v35_v28 = vld [vmem:[%s1353_s1 + $0x28] sm:$0xff]  ;;  %v52_v35 = vld [vmem:[%s1353_s1 + $0xb0] sm:$0xff]  ;;  %v185_v12 = vshrl.u32 %v184_v62, 7 }
   0x8   :  { %v82_v29 = vld [vmem:[%s1353_s1 + $0x1a0] sm:$0xff]  ;;  %780 = vmatprep.subr.bf16.mxu1 %v779_v21  ;;  %v83_v30 = vld [vmem:[%s1353_s1 + $0x1a8] sm:$0xff]  ;;  %v753_v33 = vpack.c.bf16 %v35_v28, %v34_v27  ;;  %v53_v36 = vld [vmem:[%s1353_s1 + $0xb8] sm:$0xff] }
   0x9   :  { %v66_v31 = vld [vmem:[%s1353_s1 + $0x120] sm:$0xff]  ;;  %v67_v32 = vld [vmem:[%s1353_s1 + $0x128] sm:$0xff]  ;;  %750 = vmatpush3.bf16.msra.mxu0 %v749_v17  ;;  %v783_v34 = vpack.c.bf16 %v83_v30, %v82_v29  ;;  %v36_v37 = vld [vmem:[%s1353_s1 + $0x30] sm:$0xff]  ;;  %v755_v39 = vpack.c.bf16 %v53_v36, %v52_v35 }
   0xa   :  { %752 = vmatprep.subr.bf16.mxu0 %v751_v26  ;;  %v785_v38 = vpack.c.bf16 %v67_v32, %v66_v31  ;;  %v37_v40 = vld [vmem:[%s1353_s1 + $0x38] sm:$0xff]  ;;  %v84_v41 = vld [vmem:[%s1353_s1 + $0x1b0] sm:$0xff]  ;;  %v54_v46 = vld [vmem:[%s1353_s1 + $0xc0] sm:$0xff]  ;;  %v1097_v31 = vsub.s32 %v183_v11, %v185_v12 }
   0xb   :  { %782 = vmatpush3.bf16.msra.mxu1 %v781_v25  ;;  %v85_v42 = vld [vmem:[%s1353_s1 + $0x1b8] sm:$0xff]  ;;  %v68_v44 = vld [vmem:[%s1353_s1 + $0x130] sm:$0xff]  ;;  %v55_v47 = vld [vmem:[%s1353_s1 + $0xc8] sm:$0xff]  ;;  %v757_v48 = vpack.c.bf16 %v37_v40, %v36_v37 }
   0xc   :  { %784 = vmatprep.subr.bf16.mxu1 %v783_v34  ;;  %v787_v43 = vpack.c.bf16 %v85_v42, %v84_v41  ;;  %v69_v45 = vld [vmem:[%s1353_s1 + $0x138] sm:$0xff]  ;;  %v86_v49 = vld [vmem:[%s1353_s1 + $0x1c0] sm:$0xff]  ;;  %v87_v50 = vld [vmem:[%s1353_s1 + $0x1c8] sm:$0xff]  ;;  %v759_v52 = vpack.c.bf16 %v55_v47, %v54_v46 }
   0xd   :  { %754 = vmatpush3.bf16.msra.mxu0 %v753_v33  ;;  %v789_v51 = vpack.c.bf16 %v69_v45, %v68_v44  ;;  %v38_v53 = vld [vmem:[%s1353_s1 + $0x40] sm:$0xff]  ;;  %v39_v54 = vld [vmem:[%s1353_s1 + $0x48] sm:$0xff]  ;;  %v791_v56 = vpack.c.bf16 %v87_v50, %v86_v49  ;;  %v56_v58 = vld [vmem:[%s1353_s1 + $0xd0] sm:$0xff] }
   0xe   :  { %756 = vmatprep.subr.bf16.mxu0 %v755_v39  ;;  %v70_v55 = vld [vmem:[%s1353_s1 + $0x140] sm:$0xff]  ;;  %v71_v57 = vld [vmem:[%s1353_s1 + $0x148] sm:$0xff]  ;;  %v57_v59 = vld [vmem:[%s1353_s1 + $0xd8] sm:$0xff]  ;;  %v761_v1 = vpack.c.bf16 %v39_v54, %v38_v53 }
   0xf   :  { %786 = vmatpush3.bf16.msra.mxu1 %v785_v38  ;;  %v88_v63 = vld [vmem:[%s1353_s1 + $0x1d0] sm:$0xff]  ;;  %v89_v0 = vld [vmem:[%s1353_s1 + $0x1d8] sm:$0xff]  ;;  %v793_v2 = vpack.c.bf16 %v71_v57, %v70_v55  ;;  %v763_v3 = vpack.c.bf16 %v57_v59, %v56_v58  ;;  %v58_v9 = vld [vmem:[%s1353_s1 + $0xe0] sm:$0xff] }
  0x10   :  { %788 = vmatprep.subr.bf16.mxu1 %v787_v43  ;;  %v40_v4 = vld [vmem:[%s1353_s1 + $0x50] sm:$0xff]  ;;  %v41_v5 = vld [vmem:[%s1353_s1 + $0x58] sm:$0xff]  ;;  %v795_v7 = vpack.c.bf16 %v89_v0, %v88_v63  ;;  %v59_v10 = vld [vmem:[%s1353_s1 + $0xe8] sm:$0xff] }
  0x11   :  { %758 = vmatpush3.bf16.msra.mxu0 %v757_v48  ;;  %v72_v6 = vld [vmem:[%s1353_s1 + $0x150] sm:$0xff]  ;;  %v73_v8 = vld [vmem:[%s1353_s1 + $0x158] sm:$0xff]  ;;  %v42_v13 = vld [vmem:[%s1353_s1 + $0x60] sm:$0xff]  ;;  %v765_v17 = vpack.c.bf16 %v41_v5, %v40_v4  ;;  %v767_v23 = vpack.c.bf16 %v59_v10, %v58_v9 }
  0x12   :  { %760 = vmatprep.subr.bf16.mxu0 %v759_v52  ;;  %v43_v14 = vld [vmem:[%s1353_s1 + $0x68] sm:$0xff]  ;;  %v90_v15 = vld [vmem:[%s1353_s1 + $0x1e0] sm:$0xff]  ;;  %v60_v20 = vld [vmem:[%s1353_s1 + $0xf0] sm:$0xff]  ;;  %v797_v22 = vpack.c.bf16 %v73_v8, %v72_v6 }
  0x13   :  { %790 = vmatpush3.bf16.msra.mxu1 %v789_v51  ;;  %v91_v16 = vld [vmem:[%s1353_s1 + $0x1e8] sm:$0xff]  ;;  %v74_v18 = vld [vmem:[%s1353_s1 + $0x160] sm:$0xff]  ;;  %v61_v21 = vld [vmem:[%s1353_s1 + $0xf8] sm:$0xff]  ;;  %v769_v32 = vpack.c.bf16 %v43_v14, %v42_v13 }
  0x14   :  { %792 = vmatprep.subr.bf16.mxu1 %v791_v56  ;;  %v75_v19 = vld [vmem:[%s1353_s1 + $0x168] sm:$0xff]  ;;  %v44_v24 = vld [vmem:[%s1353_s1 + $0x70] sm:$0xff]  ;;  %v45_v25 = vld [vmem:[%s1353_s1 + $0x78] sm:$0xff]  ;;  %v799_v28 = vpack.c.bf16 %v91_v16, %v90_v15  ;;  %v771_v37 = vpack.c.bf16 %v61_v21, %v60_v20 }
  0x15   :  { %762 = vmatpush3.bf16.msra.mxu0 %v761_v1  ;;  %v92_v26 = vld [vmem:[%s1353_s1 + $0x1f0] sm:$0xff]  ;;  %v93_v27 = vld [vmem:[%s1353_s1 + $0x1f8] sm:$0xff]  ;;  %v872_v33 = vld [vmem:[%s1354_s0] ss:$8 sps:$4 sm:$0xff]   ;;  %v801_v36 = vpack.c.bf16 %v75_v19, %v74_v18  ;;  %v773_v41 = vpack.c.bf16 %v45_v25, %v44_v24 }
  0x16   :  { %764 = vmatprep.subr.bf16.mxu0 %v763_v3  ;;  %v76_v29 = vld [vmem:[%s1353_s1 + $0x170] sm:$0xff]  ;;  %v77_v30 = vld [vmem:[%s1353_s1 + $0x178] sm:$0xff]  ;;  %v874_v34 = vld [vmem:[%s1354_s0 + $0x4] ss:$8 sps:$4 sm:$0xff]   ;;  %v803_v42 = vpack.c.bf16 %v93_v27, %v92_v26  ;;  %v187_v45 = vrot.slane %v872_v33, %v1097_v31 }
  0x17   :  { %794 = vmatpush3.bf16.msra.mxu1 %v793_v2  ;;  %v875_v35 = vld [vmem:[%s1354_s0 + $0x10] ss:$8 sps:$4 sm:$0xff]   ;;  %v877_v38 = vld [vmem:[%s1354_s0 + $0x14] ss:$8 sps:$4 sm:$0xff]   ;;  %v878_v39 = vld [vmem:[%s1354_s0 + $0x20] ss:$8 sps:$4 sm:$0xff]   ;;  %v805_v48 = vpack.c.bf16 %v77_v30, %v76_v29  ;;  %v1133_v51 = vrot.slane %v874_v34, %v1097_v31 }
  0x18   :  { %796 = vmatprep.subr.bf16.mxu1 %v795_v7  ;;  %v880_v40 = vld [vmem:[%s1354_s0 + $0x24] ss:$8 sps:$4 sm:$0xff]   ;;  %v881_v43 = vld [vmem:[%s1354_s0 + $0x30] ss:$8 sps:$4 sm:$0xff]   ;;  %v883_v44 = vld [vmem:[%s1354_s0 + $0x34] ss:$8 sps:$4 sm:$0xff]   ;;  %v201_v46 = vrot.slane %v875_v35, %v1097_v31  ;;  %v215_v49 = vrot.slane %v878_v39, %v1097_v31  ;;  %v1136_v52 = vrot.slane %v877_v38, %v1097_v31 }
  0x19   :  { %766 = vmatpush3.bf16.msra.mxu0 %v765_v17  ;;  %v110_v47 = vld [vmem:[%s1353_s1 + $0x280] sm:$0xff]  ;;  %v111_v50 = vld [vmem:[%s1353_s1 + $0x288] sm:$0xff]  ;;  %v229_v53 = vrot.slane %v881_v43, %v1097_v31  ;;  %v1146_v58 = vrot.slane %v880_v40, %v1097_v31  ;;  %v1155_v63 = vrot.slane %v883_v44, %v1097_v31  ;;  %v112_v6 = vld [vmem:[%s1353_s1 + $0x290] sm:$0xff] }
  0x1a   :  { %768 = vmatprep.subr.bf16.mxu0 %v767_v23  ;;  %v238_v54 = vcombine.high %v187_v45, %v201_v46  ;;  %v237_v55 = vcombine.low %v187_v45, %v201_v46  ;;  %v142_v56 = vld [vmem:[%s1353_s1 + $0x380] sm:$0xff]  ;;  %v143_v57 = vld [vmem:[%s1353_s1 + $0x388] sm:$0xff]  ;;  %v807_v59 = vpack.c.bf16 %v111_v50, %v110_v47  ;;  %v240_v7 = vcombine.high %v1133_v51, %v1136_v52  ;;  %v113_v11 = vld [vmem:[%s1353_s1 + $0x298] sm:$0xff] }
  0x1b   :  { %798 = vmatpush3.bf16.msra.mxu1 %v797_v22  ;;  %v94_v60 = vld [vmem:[%s1353_s1 + $0x200] sm:$0xff]  ;;  %v95_v61 = vld [vmem:[%s1353_s1 + $0x208] sm:$0xff]  ;;  %v839_v62 = vpack.c.bf16 %v143_v57, %v142_v56  ;;  %v242_v0 = vcombine.high %v215_v49, %v229_v53  ;;  %v241_v2 = vcombine.low %v215_v49, %v229_v53  ;;  %v144_v12 = vld [vmem:[%s1353_s1 + $0x390] sm:$0xff]  ;;  %v244_v15 = vcombine.high %v1146_v58, %v1155_v63 }
  0x1c   :  { %800 = vmatprep.subr.bf16.mxu1 %v799_v28  ;;  %v265_v1 = vrot.slane %v238_v54, %v1097_v31  ;;  %v251_v3 = vrot.slane %v237_v55, %v1097_v31  ;;  %v126_v4 = vld [vmem:[%s1353_s1 + $0x300] sm:$0xff]  ;;  %v127_v5 = vld [vmem:[%s1353_s1 + $0x308] sm:$0xff]  ;;  %v809_v10 = vpack.c.bf16 %v95_v61, %v94_v60  ;;  %v145_v13 = vld [vmem:[%s1353_s1 + $0x398] sm:$0xff]  ;;  %v272_v16 = vrot.slane %v240_v7, %v1097_v31 }
  0x1d   :  { %770 = vmatpush3.bf16.msra.mxu0 %v769_v32  ;;  %v293_v8 = vrot.slane %v242_v0, %v1097_v31  ;;  %v279_v9 = vrot.slane %v241_v2, %v1097_v31  ;;  %v841_v14 = vpack.c.bf16 %v127_v5, %v126_v4  ;;  %v96_v21 = vld [vmem:[%s1353_s1 + $0x210] sm:$0xff]  ;;  %v97_v22 = vld [vmem:[%s1353_s1 + $0x218] sm:$0xff]  ;;  %v811_v23 = vpack.c.bf16 %v113_v11, %v112_v6  ;;  %v114_v27 = vld [vmem:[%s1353_s1 + $0x2a0] sm:$0xff] }
  0x1e   :  { %772 = vmatprep.subr.bf16.mxu0 %v771_v37  ;;  %v843_v24 = vpack.c.bf16 %v145_v13, %v144_v12  ;;  %v128_v25 = vld [vmem:[%s1353_s1 + $0x310] sm:$0xff]  ;;  %v129_v26 = vld [vmem:[%s1353_s1 + $0x318] sm:$0xff]  ;;  %v300_v28 = vrot.slane %v244_v15, %v1097_v31  ;;  %v115_v29 = vld [vmem:[%s1353_s1 + $0x2a8] sm:$0xff]  ;;  %v813_v34 = vpack.c.bf16 %v97_v22, %v96_v21 }
  0x1f   :  { %802 = vmatpush3.bf16.msra.mxu1 %v801_v36  ;;  %v305_v17 = vcombine.low %v265_v1, %v293_v8  ;;  %v301_v18 = vcombine.low %v251_v3, %v279_v9  ;;  %v306_v19 = vcombine.high %v265_v1, %v293_v8  ;;  %v302_v20 = vcombine.high %v251_v3, %v279_v9  ;;  %v146_v30 = vld [vmem:[%s1353_s1 + $0x3a0] sm:$0xff]  ;;  %v147_v32 = vld [vmem:[%s1353_s1 + $0x3a8] sm:$0xff]  ;;  %v117_v44 = vld [vmem:[%s1353_s1 + $0x2b8] sm:$0xff] }
  0x20   :  { %804 = vmatprep.subr.bf16.mxu1 %v803_v42  ;;  %v307_v33 = vcombine.low %v272_v16, %v300_v28  ;;  %v845_v35 = vpack.c.bf16 %v129_v26, %v128_v25  ;;  %v98_v36 = vld [vmem:[%s1353_s1 + $0x220] sm:$0xff]  ;;  %v99_v37 = vld [vmem:[%s1353_s1 + $0x228] sm:$0xff]  ;;  %v815_v38 = vpack.c.bf16 %v115_v29, %v114_v27  ;;  %v847_v39 = vpack.c.bf16 %v147_v32, %v146_v30  ;;  %v116_v42 = vld [vmem:[%s1353_s1 + $0x2b0] sm:$0xff] }
  0x21   :  { %774 = vmatpush3.bf16.msra.mxu0 %v773_v41  ;;  %381 = vmatprep.mubr.f32.mxu0 %v305_v17  ;;  %v130_v40 = vld [vmem:[%s1353_s1 + $0x320] sm:$0xff]  ;;  %v131_v41 = vld [vmem:[%s1353_s1 + $0x328] sm:$0xff]  ;;  %v308_v43 = vcombine.high %v272_v16, %v300_v28  ;;  %v148_v45 = vld [vmem:[%s1353_s1 + $0x3b0] sm:$0xff]  ;;  %v817_v47 = vpack.c.bf16 %v99_v37, %v98_v36  ;;  %v819_v53 = vpack.c.bf16 %v117_v44, %v116_v42 }
  0x22   :  { %808 = vmatprep.subr.bf16.mxu0 %v807_v59  ;;  %451 = vmatprep.mubr.f32.mxu1 %v306_v19  ;;  %v149_v46 = vld [vmem:[%s1353_s1 + $0x3b8] sm:$0xff]  ;;  %v100_v49 = vld [vmem:[%s1353_s1 + $0x230] sm:$0xff]  ;;  %v118_v57 = vld [vmem:[%s1353_s1 + $0x2c0] sm:$0xff]  ;;  %v239_v36 = vcombine.low %v1133_v51, %v1136_v52  ;;  %v243_v37 = vcombine.low %v1146_v58, %v1155_v63 }
  0x23   :  { %806 = vmatpush3.bf16.msra.mxu1 %v805_v48  ;;  %v849_v48 = vpack.c.bf16 %v131_v41, %v130_v40  ;;  %v101_v50 = vld [vmem:[%s1353_s1 + $0x238] sm:$0xff]  ;;  %v851_v54 = vpack.c.bf16 %v149_v46, %v148_v45  ;;  %v132_v55 = vld [vmem:[%s1353_s1 + $0x330] sm:$0xff]  ;;  %v119_v59 = vld [vmem:[%s1353_s1 + $0x2c8] sm:$0xff] }
  0x24   :  { %840 = vmatprep.subr.bf16.mxu1 %v839_v62  ;;  %382 = vmatmul.mubr.f32.vlgmr.msra.gmra.mrb[0].mxu0 %v301_v18  ;;  %v133_v56 = vld [vmem:[%s1353_s1 + $0x338] sm:$0xff]  ;;  %v150_v60 = vld [vmem:[%s1353_s1 + $0x3c0] sm:$0xff]  ;;  %v151_v61 = vld [vmem:[%s1353_s1 + $0x3c8] sm:$0xff]  ;;  %v821_v62 = vpack.c.bf16 %v101_v50, %v100_v49  ;;  %v823_v3 = vpack.c.bf16 %v119_v59, %v118_v57  ;;  %v258_v58 = vrot.slane %v239_v36, %v1097_v31 }
  0x25   :  { %810 = vmatpush3.bf16.msra.mxu0 %v809_v10  ;;  %521 = vmatprep.mubr.f32.mxu0 %v307_v33  ;;  %v853_v0 = vpack.c.bf16 %v133_v56, %v132_v55  ;;  %v102_v1 = vld [vmem:[%s1353_s1 + $0x240] sm:$0xff]  ;;  %v103_v2 = vld [vmem:[%s1353_s1 + $0x248] sm:$0xff]  ;;  %v855_v4 = vpack.c.bf16 %v151_v61, %v150_v60  ;;  %v120_v7 = vld [vmem:[%s1353_s1 + $0x2d0] sm:$0xff]  ;;  %v286_v63 = vrot.slane %v243_v37, %v1097_v31 }
  0x26   :  { %452 = vmatmul.mubr.f32.vlgmr.msra.gmra.mrb[0].mxu1 %v302_v20  ;;  %812 = vmatprep.subr.bf16.mxu0 %v811_v23  ;;  %v134_v5 = vld [vmem:[%s1353_s1 + $0x340] sm:$0xff]  ;;  %v135_v6 = vld [vmem:[%s1353_s1 + $0x348] sm:$0xff]  ;;  %v121_v8 = vld [vmem:[%s1353_s1 + $0x2d8] sm:$0xff]  ;;  %v825_v11 = vpack.c.bf16 %v103_v2, %v102_v1 }
  0x27   :  { %842 = vmatpush3.bf16.msra.mxu1 %v841_v14  ;;  %591 = vmatprep.mubr.f32.mxu1 %v308_v43  ;;  %v152_v9 = vld [vmem:[%s1353_s1 + $0x3d0] sm:$0xff]  ;;  %v153_v10 = vld [vmem:[%s1353_s1 + $0x3d8] sm:$0xff]  ;;  %v857_v12 = vpack.c.bf16 %v135_v6, %v134_v5  ;;  %v827_v15 = vpack.c.bf16 %v121_v8, %v120_v7  ;;  %v122_v19 = vld [vmem:[%s1353_s1 + $0x2e0] sm:$0xff]  ;;  %v303_v46 = vcombine.low %v258_v58, %v286_v63 }
  0x28   :  { %844 = vmatprep.subr.bf16.mxu1 %v843_v24  ;;  %v104_v13 = vld [vmem:[%s1353_s1 + $0x250] sm:$0xff]  ;;  %v105_v14 = vld [vmem:[%s1353_s1 + $0x258] sm:$0xff]  ;;  %v859_v16 = vpack.c.bf16 %v153_v10, %v152_v9  ;;  %v123_v20 = vld [vmem:[%s1353_s1 + $0x2e8] sm:$0xff] }
  0x29   :  { %814 = vmatpush3.bf16.msra.mxu0 %v813_v34  ;;  %v136_v17 = vld [vmem:[%s1353_s1 + $0x350] sm:$0xff]  ;;  %v137_v18 = vld [vmem:[%s1353_s1 + $0x358] sm:$0xff]  ;;  %v154_v21 = vld [vmem:[%s1353_s1 + $0x3e0] sm:$0xff]  ;;  %v829_v23 = vpack.c.bf16 %v105_v14, %v104_v13  ;;  %v831_v27 = vpack.c.bf16 %v123_v20, %v122_v19 }
  0x2a   :  { %816 = vmatprep.subr.bf16.mxu0 %v815_v38  ;;  %v155_v22 = vld [vmem:[%s1353_s1 + $0x3e8] sm:$0xff]  ;;  %v861_v24 = vpack.c.bf16 %v137_v18, %v136_v17  ;;  %v106_v25 = vld [vmem:[%s1353_s1 + $0x260] sm:$0xff]  ;;  %v124_v32 = vld [vmem:[%s1353_s1 + $0x2f0] sm:$0xff] }
  0x2b   :  { %846 = vmatpush3.bf16.msra.mxu1 %v845_v35  ;;  %v107_v26 = vld [vmem:[%s1353_s1 + $0x268] sm:$0xff]  ;;  %v863_v28 = vpack.c.bf16 %v155_v22, %v154_v21  ;;  %v138_v29 = vld [vmem:[%s1353_s1 + $0x360] sm:$0xff]  ;;  %v125_v33 = vld [vmem:[%s1353_s1 + $0x2f8] sm:$0xff] }
  0x2c   :  { %848 = vmatprep.subr.bf16.mxu1 %v847_v39  ;;  %v139_v30 = vld [vmem:[%s1353_s1 + $0x368] sm:$0xff]  ;;  %v156_v34 = vld [vmem:[%s1353_s1 + $0x3f0] sm:$0xff]  ;;  %v157_v35 = vld [vmem:[%s1353_s1 + $0x3f8] sm:$0xff]  ;;  %v833_v38 = vpack.c.bf16 %v107_v26, %v106_v25  ;;  %v835_v41 = vpack.c.bf16 %v125_v33, %v124_v32 }
  0x2d   :  { %818 = vmatpush3.bf16.msra.mxu0 %v817_v47  ;;  %v865_v39 = vpack.c.bf16 %v139_v30, %v138_v29  ;;  %v108_v40 = vld [vmem:[%s1353_s1 + $0x270] sm:$0xff]  ;;  %v109_v42 = vld [vmem:[%s1353_s1 + $0x278] sm:$0xff]  ;;  %v867_v43 = vpack.c.bf16 %v157_v35, %v156_v34  ;;  %v304_v47 = vcombine.high %v258_v58, %v286_v63  ;;  %v602_v50 = vld [vmem:[%s1355_s2] ss:$0 sm:$0xff] }
  0x2e   :  { %820 = vmatprep.subr.bf16.mxu0 %v819_v53  ;;  %v140_v51 = vld [vmem:[%s1353_s1 + $0x370] sm:$0xff]  ;;  %v141_v52 = vld [vmem:[%s1353_s1 + $0x378] sm:$0xff]  ;;  %v837_v44 = vpack.c.bf16 %v109_v42, %v108_v40 }
  0x2f   :  { %850 = vmatpush3.bf16.msra.mxu1 %v849_v48  ;;  %v869_v45 = vpack.c.bf16 %v141_v52, %v140_v51 }
  0x30   :  { %852 = vmatprep.subr.bf16.mxu1 %v851_v54 }
  0x31   :  { %822 = vmatpush3.bf16.msra.mxu0 %v821_v62 }
  0x32   :  { %824 = vmatprep.subr.bf16.mxu0 %v823_v3 }
  0x33   :  { %854 = vmatpush3.bf16.msra.mxu1 %v853_v0 }
  0x34   :  { %856 = vmatprep.subr.bf16.mxu1 %v855_v4 }
  0x35   :  { %826 = vmatpush3.bf16.msra.mxu0 %v825_v11 }
  0x36   :  { %828 = vmatprep.subr.bf16.mxu0 %v827_v15 }
  0x37   :  { %858 = vmatpush3.bf16.msra.mxu1 %v857_v12 }
  0x38   :  { %860 = vmatprep.subr.bf16.mxu1 %v859_v16 }
  0x39   :  { %830 = vmatpush3.bf16.msra.mxu0 %v829_v23 }
  0x3a   :  { %832 = vmatprep.subr.bf16.mxu0 %v831_v27 }
  0x3b   :  { %862 = vmatpush3.bf16.msra.mxu1 %v861_v24 }
  0x3c   :  { %864 = vmatprep.subr.bf16.mxu1 %v863_v28 }
  0x3d   :  { %834 = vmatpush3.bf16.msra.mxu0 %v833_v38 }
  0x3e   :  { %836 = vmatprep.subr.bf16.mxu0 %v835_v41 }
  0x3f   :  { %866 = vmatpush3.bf16.msra.mxu1 %v865_v39 }
  0x40   :  { %868 = vmatprep.subr.bf16.mxu1 %v867_v43 }
  0x41   :  { %838 = vmatpush3.bf16.msra.mxu0 %v837_v44 }
  0x43   :  { %870 = vmatpush3.bf16.msra.mxu1 %v869_v45 }
  0x44   :  { %522 = vmatmul.mubr.f32.vlgmr.msra.gmra.mrb[2].mxu0 %v303_v46 }
  0x46   :  { %592 = vmatmul.mubr.f32.vlgmr.msra.gmra.mrb[2].mxu1 %v304_v47 }
  0xf7   :  { %v635_v48 = vpop.f32.mrb[0].mxu0 }
  0xf8   :  { %v636_v53 = vpop.f32.mrb[1].mxu0 }
  0xf9   :  { %v670_v49 = vpop.f32.mrb[0].mxu1  ;;  %v637_v54 = vadd.f32 %v636_v53, %v635_v48 }
  0xfa   :  { %v671_v31 = vpop.f32.mrb[1].mxu1 }
  0xfb   :  { %v672_v55 = vadd.f32 %v671_v31, %v670_v49  ;;  %v384_v56 = vadd.f32 %v637_v54, %v602_v50 }
  0xfd   :  { %v454_v57 = vadd.f32 %v672_v55, %v384_v56 }
 0x117   :  { %v705_v59 = vpop.f32.mrb[2].mxu0 }
 0x118   :  { %v706_v61 = vpop.f32.mrb[3].mxu0 }
 0x119   :  { %v740_v60 = vpop.f32.mrb[2].mxu1  ;;  %v707_v0 = vadd.f32 %v706_v61, %v705_v59 }
 0x11a   :  { %v741_v62 = vpop.f32.mrb[3].mxu1 }
 0x11b   :  { %v742_v1 = vadd.f32 %v741_v62, %v740_v60  ;;  %v524_v2 = vadd.f32 %v707_v0, %v454_v57 }
 0x11d   :  { %v594_v3 = vadd.f32 %v742_v1, %v524_v2 }
 0x11f   :  { %597 = vst [vmem:[%s1356_s3] sm:$0xff] %v594_v3 }

</bundles_post_ra>
